<compile_context>
chip_gen: v5e
topology: v5e:2x2
jax: 0.10.0
libtpu: 0.0.40
codegen_flags: <defaults>
</compile_context>

<pallas_src>
import functools
import math

import jax
import jax.numpy as jnp
import numpy as np
from jax.experimental import pallas as pl
from jax.experimental.pallas import tpu as pltpu

_SQRT_HALF = 0.7071067811865476
_TAPS5 = [(dh, dw) for dh in range(-2, 3) for dw in range(-2, 3)]   # 5x5 offsets
_TAPS3 = [(dh, dw) for dh in range(-1, 2) for dw in range(-1, 2)]   # 3x3 offsets
_LHS_ROWS = 8   # pad every matmul LHS (Cout dim) up to the 8-sublane granule


def _erf(x):
    # erf has no guaranteed Mosaic lowering; A&S 7.1.26 polynomial
    # (|err| < 1.5e-7) built from EUP exp; the divide uses the approximate EUP
    # reciprocal (adds ~1e-4 relative error).
    p = 0.3275911
    a1, a2, a3, a4, a5 = (0.254829592, -0.284496736, 1.421413741,
                          -1.453152027, 1.061405429)
    s = jnp.where(x >= 0.0, 1.0, -1.0)
    ax = jnp.abs(x)
    t = pl.reciprocal(1.0 + p * ax, approx=True)
    poly = ((((a5 * t + a4) * t + a3) * t + a2) * t + a1) * t
    return s * (1.0 - poly * jnp.exp(-ax * ax))


def _gelu(x):
    # 0.5 * x * (1 + erf(x / sqrt(2)))  == torch.nn.GELU()
    return 0.5 * x * (1.0 + _erf(x * _SQRT_HALF))


def _tap_masks(H, W):
    """(25, H*W) f32: masks[(dh+2)*5+(dw+2), h*W+w] = 1 iff (h+dh, w+dw) in-image."""
    hh, ww = np.meshgrid(np.arange(H), np.arange(W), indexing="ij")
    hh = hh.reshape(-1)
    ww = ww.reshape(-1)
    masks = np.zeros((len(_TAPS5), H * W), np.float32)
    for t, (dh, dw) in enumerate(_TAPS5):
        valid = ((hh + dh >= 0) & (hh + dh < H) &
                 (ww + dw >= 0) & (ww + dw < W))
        masks[t] = valid.astype(np.float32)
    return masks


def _pack_taps(w_oihw, ktaps):
    """OIHW conv weight -> (Cout, ktaps*ktaps*Cin) LHS, tap-major / channel-minor."""
    cout, cin, kh, kw = w_oihw.shape
    ph, pw = (ktaps - kh) // 2, (ktaps - kw) // 2
    w = jnp.pad(w_oihw, ((0, 0), (0, 0), (ph, ph), (pw, pw)))
    w = jnp.transpose(w, (0, 2, 3, 1))                 # (Cout, kt, kt, Cin)
    return w.reshape(cout, ktaps * ktaps * cin)


def _pack_blocks(w_oihw, blocks):
    """3x3 OIHW weight -> LHS whose K order matches the block-contiguous pg layout:
    column = off*9 + tap*nc + c_local for each feature block (off, nc)."""
    cout = w_oihw.shape[0]
    cols = []
    for off, nc in blocks:
        blk = jnp.transpose(w_oihw[:, off:off + nc], (0, 2, 3, 1))   # (Cout,3,3,nc)
        cols.append(blk.reshape(cout, 9 * nc))
    return jnp.concatenate(cols, axis=1)


def _pad_rows(a, rows):
    r = max(rows, a.shape[0])
    return jnp.pad(a, ((0, r - a.shape[0]),) + ((0, 0),) * (a.ndim - 1))


def _pick_lane_batch(n, hw, lane_budget):
    """Images folded onto the lane axis per grid step (must divide n)."""
    divs = [d for d in range(1, n + 1) if n % d == 0 and d * hw <= lane_budget]
    if not divs:
        return 1
    multi_step = [d for d in divs if n // d >= 2]      # keep both v7x TCs busy
    return max(multi_step) if (multi_step and n >= 4) else max(divs)


def _msdb_kernel(*refs, C, IC, W, HW, nb, block_num):
    (x_ref, mask_ref, w35_ref, b35_ref, wf_ref, bf_ref) = refs[:6]
    wg_refs = refs[6:6 + block_num]
    bg_refs = refs[6 + block_num:6 + 2 * block_num]
    (wfu_ref, bfu_ref, o_ref, xb_ref, p5_ref, pf_ref, pg_ref) = refs[6 + 2 * block_num:]

    L = nb * HW
    C2 = 2 * C
    bf16 = jnp.bfloat16

    def tap(src, dh, dw):
        """out[:, g] = src[:, g + dh*W + dw] for valid taps; off-image taps (which
        include every lane that wraps across an image boundary) are masked to 0."""
        if dh == 0 and dw == 0:
            return src
        shift = (-(dh * W + dw)) % L
        m = mask_ref[pl.ds((dh + 2) * 5 + (dw + 2), 1), :]          # (1, L)
        return pltpu.roll(src, shift, 1) * m

    # ---- repack the (nb, C, HW) input block into a lane-batched (2C, L) buffer
    # with x duplicated over both C-halves, so the stage-1 residual add is one
    # full-granule 8-row add (C=4 < 8 sublanes).
    for k in range(nb):
        v = x_ref[k].astype(jnp.float32)                            # (C, HW)
        xb_ref[pl.ds(0, C), pl.ds(k * HW, HW)] = v
        xb_ref[pl.ds(C, C), pl.ds(k * HW, HW)] = v
    xsrc = xb_ref[...]                                              # (2C, L) f32

    # ---- stage 1: conv_3_1 & conv_5_1 fused into ONE matmul on a shared 25-tap
    # im2col of x (bf16 operands, f32 accumulate).
    for t, (dh, dw) in enumerate(_TAPS5):
        p5_ref[pl.ds(t * C, C), :] = tap(xsrc, dh, dw)[:C].astype(bf16)
    pre = jnp.dot(w35_ref[...], p5_ref[...],
                  preferred_element_type=jnp.float32) + b35_ref[...]
    # rows [0,C): gelu(conv3(x)) + x = x_3 ; rows [C,2C): gelu(conv5(x)) + x = x_5
    x35 = _gelu(pre)[:C2, :] + xsrc          # == torch.cat([x_3, x_5], dim=1)

    # ---- stage 2: conv_f (3x3 over the 2C concatenated channels), one matmul.
    for t, (dh, dw) in enumerate(_TAPS3):
        pf_ref[pl.ds(t * C2, C2), :] = tap(x35, dh, dw).astype(bf16)
    pre = jnp.dot(wf_ref[...], pf_ref[...],
                  preferred_element_type=jnp.float32) + bf_ref[...]
    x_f = _gelu(pre)                                                # rows [0,C) valid

    # ---- stage 3: dense group convs on a growing block-contiguous 9-tap im2col.
    # Rows [0, 9*valid) are always fully written before they are read, so no
    # memset of pg is needed and each matmul contracts only over valid K.
    def add_feature(val, off, nc):
        for t, (dh, dw) in enumerate(_TAPS3):
            pg_ref[pl.ds(off * 9 + t * nc, nc), :] = tap(val, dh, dw)[:nc].astype(bf16)

    add_feature(x_f, 0, C)
    cv = C                                                          # valid channels
    for i in range(block_num):
        K = 9 * cv
        pre = jnp.dot(wg_refs[i][...], pg_ref[pl.ds(0, K), :],
                      preferred_element_type=jnp.float32) + bg_refs[i][...]
        add_feature(_gelu(pre), cv, IC)
        cv += IC

    # ---- stage 4: 1x1 fusion (weights scattered onto the centre-tap columns of
    # pg, so pg doubles as the dense feature buffer) + residual.
    pre = jnp.dot(wfu_ref[...], pg_ref[...],
                  preferred_element_type=jnp.float32) + bfu_ref[...]
    res = _gelu(pre)[:C, :] + xsrc[:C, :]
    for k in range(nb):
        o_ref[k] = res[:, k * HW:(k + 1) * HW].astype(o_ref.dtype)


def msdb_forward(x_nchw, params, block_num, lane_budget=2048):
    """Fused MSDB forward.  x_nchw: (N, C, H, W) NCHW, params in OIHW (torch) layout."""
    N, C, H, W = x_nchw.shape
    HW = H * W
    IC = params["group_0"][0].shape[0]          # inter_channel
    CC = C + block_num * IC                     # concat_channels
    C2 = 2 * C

    nb = _pick_lane_batch(N, HW, lane_budget)   # images per grid step (lane axis)
    L = nb * HW
    x_flat = x_nchw.reshape(N, C, HW)
    wdt = jnp.bfloat16

    # feature-buffer blocks: (channel offset, width)
    blocks = [(0, C)] + [(C + j * IC, IC) for j in range(block_num)]

    # --- pack weights into matmul-ready layouts (tiny, one-off, bf16) ---
    w3, b3 = params["conv_3_1"]
    w5, b5 = params["conv_5_1"]
    w35 = jnp.concatenate([_pack_taps(w3, 5), _pack_taps(w5, 5)], axis=0)
    w35 = _pad_rows(w35, _LHS_ROWS).astype(wdt)                      # (8, 25*C)
    b35 = _pad_rows(jnp.concatenate([b3, b5])[:, None].astype(jnp.float32), _LHS_ROWS)

    wf, bfb = params["conv_f"]
    wf_p = _pad_rows(_pack_taps(wf, 3), _LHS_ROWS).astype(wdt)       # (8, 9*2C)
    bf_p = _pad_rows(bfb[:, None].astype(jnp.float32), _LHS_ROWS)

    wg_list, bg_list = [], []
    for i in range(block_num):
        wgi, bgi = params[f"group_{i}"]
        wg_list.append(_pad_rows(_pack_blocks(wgi, blocks[:i + 1]),
                                 _LHS_ROWS).astype(wdt))             # (8, 9*cin_i)
        bg_list.append(_pad_rows(bgi[:, None].astype(jnp.float32), _LHS_ROWS))

    wfu, bfu = params["fusion"]
    centre_cols = np.concatenate(
        [off * 9 + 4 * nc + np.arange(nc) for off, nc in blocks])    # static ints
    wfu_p = jnp.zeros((C, 9 * CC), jnp.float32).at[:, centre_cols].set(wfu[:, :, 0, 0])
    wfu_p = _pad_rows(wfu_p, _LHS_ROWS).astype(wdt)                  # (8, 9*CC)
    bfu_p = _pad_rows(bfu[:, None].astype(jnp.float32), _LHS_ROWS)

    masks = jnp.asarray(np.tile(_tap_masks(H, W), (1, nb)))          # (25, L) f32

    # VMEM budget: scratch + (double-buffered) blocks, headroom, capped at v7x's
    # 64 MiB physical VMEM.
    scratch_bytes = C2 * L * 4 + (25 * C * L + 9 * C2 * L + 9 * CC * L) * 2
    block_bytes = 2 * 2 * (nb * C * HW * 4) + 2 * (25 * L * 4)
    vmem_limit = int(min(64 << 20, max(32 << 20, 2 * (scratch_bytes + block_bytes))))

    in_specs = [
        pl.BlockSpec((nb, C, HW), lambda n: (n, 0, 0)),              # x
        pl.BlockSpec(masks.shape, lambda n: (0, 0)),                 # tiled masks
        pl.BlockSpec(w35.shape, lambda n: (0, 0)),
        pl.BlockSpec(b35.shape, lambda n: (0, 0)),
        pl.BlockSpec(wf_p.shape, lambda n: (0, 0)),
        pl.BlockSpec(bf_p.shape, lambda n: (0, 0)),
    ]
    in_specs += [pl.BlockSpec(w.shape, lambda n: (0, 0)) for w in wg_list]
    in_specs += [pl.BlockSpec(b.shape, lambda n: (0, 0)) for b in bg_list]
    in_specs += [pl.BlockSpec(wfu_p.shape, lambda n: (0, 0)),
                 pl.BlockSpec(bfu_p.shape, lambda n: (0, 0))]

    kernel = functools.partial(_msdb_kernel, C=C, IC=IC, W=W, HW=HW, nb=nb,
                               block_num=block_num)
    out = pl.pallas_call(
        kernel,
        out_shape=jax.ShapeDtypeStruct((N, C, HW), x_nchw.dtype),
        grid=(N // nb,),
        in_specs=in_specs,
        out_specs=pl.BlockSpec((nb, C, HW), lambda n: (n, 0, 0)),
        scratch_shapes=[
            pltpu.VMEM((C2, L), jnp.float32),        # lane-batched x (duplicated)
            pltpu.VMEM((25 * C, L), jnp.bfloat16),   # stage-1 im2col
            pltpu.VMEM((9 * C2, L), jnp.bfloat16),   # stage-2 im2col
            pltpu.VMEM((9 * CC, L), jnp.bfloat16),   # growing dense-feature im2col
        ],
        compiler_params=pltpu.CompilerParams(
            dimension_semantics=("parallel",),       # batch across TCs (v7x)
            vmem_limit_bytes=vmem_limit),
    )(x_flat, masks, w35, b35, wf_p, bf_p, *wg_list, *bg_list, wfu_p, bfu_p)
    return out.reshape(N, C, H, W)


def init_msdb_params(key, block_num, inter_channel, channel, dtype=jnp.float32):
    """Deterministic synthetic init (PyTorch-Conv2d-style uniform bounds), OIHW."""
    def conv_init(k, cout, cin, kh, kw):
        kw_key, kb_key = jax.random.split(k)
        bound = 1.0 / math.sqrt(cin * kh * kw)
        w = jax.random.uniform(kw_key, (cout, cin, kh, kw), dtype, -bound, bound)
        b = jax.random.uniform(kb_key, (cout,), dtype, -bound, bound)
        return w, b

    keys = jax.random.split(key, 4 + block_num)
    params = {
        "conv_3_1": conv_init(keys[0], channel, channel, 3, 3),
        "conv_5_1": conv_init(keys[1], channel, channel, 5, 5),
        "conv_f": conv_init(keys[2], channel, 2 * channel, 3, 3),
    }
    ch_now = channel
    for i in range(block_num):
        params[f"group_{i}"] = conv_init(keys[3 + i], inter_channel, ch_now, 3, 3)
        ch_now += inter_channel
    params["fusion"] = conv_init(keys[3 + block_num], channel, ch_now, 1, 1)
    return params


def _msdb_reference(x, params, block_num):
    """Pure-JAX (XLA) reference of the PyTorch MSDB forward, NCHW."""
    gelu = lambda v: jax.nn.gelu(v, approximate=False)

    def conv(v, wb, pad):
        w, b = wb
        y = jax.lax.conv_general_dilated(
            v, w, window_strides=(1, 1), padding=((pad, pad), (pad, pad)),
            dimension_numbers=("NCHW", "OIHW", "NCHW"),
            precision=jax.lax.Precision.HIGHEST)
        return y + b[None, :, None, None]

    x3 = gelu(conv(x, params["conv_3_1"], 1)) + x
    x5 = gelu(conv(x, params["conv_5_1"], 2)) + x
    xf = gelu(conv(jnp.concatenate([x3, x5], 1), params["conv_f"], 1))
    feats = [xf]
    for i in range(block_num):
        feats.append(gelu(conv(jnp.concatenate(feats, 1),
                               params[f"group_{i}"], 1)))
    return gelu(conv(jnp.concatenate(feats, 1), params["fusion"], 0)) + x


if __name__ == "__main__":
    block_num, inter_channel, channel = 3, 4, 4
    N, H, W = 2, 16, 16

    key = jax.random.PRNGKey(0)
    kx, kp = jax.random.split(key)
    x = jax.random.normal(kx, (N, channel, H, W), jnp.float32)   # NCHW like torch
    params = init_msdb_params(kp, block_num, inter_channel, channel)

    fwd = jax.jit(functools.partial(msdb_forward, block_num=block_num))
    y = fwd(x, params)
    jax.block_until_ready(y)

    assert y.shape == (N, channel, H, W)
    assert bool(jnp.isfinite(y).all())

    # Loose-tolerance check against a pure-JAX f32 reference: bf16 matmul
    # operands (~4e-3 relative per layer) plus the approximate EUP reciprocal
    # inside GELU cost ~1e-2-2e-2 max abs; structural bugs are O(0.1-1).
    y_ref = _msdb_reference(x, params, block_num)
    err = float(jnp.max(jnp.abs(y - y_ref)))
    assert err < 1e-1, f"kernel mismatch vs reference: max|err|={err}"
    print("KERNEL_OK")
</pallas_src>

<mosaic_0001>
module attributes {stable_mosaic.version = 11 : i64} {
  func.func @_msdb_kernel(%arg0: i32, %arg1: memref<2x4x256xf32, #tpu.memory_space<vmem>>, %arg2: memref<25x512xf32, #tpu.memory_space<vmem>>, %arg3: memref<8x100xbf16, #tpu.memory_space<vmem>>, %arg4: memref<8x1xf32, #tpu.memory_space<vmem>>, %arg5: memref<8x72xbf16, #tpu.memory_space<vmem>>, %arg6: memref<8x1xf32, #tpu.memory_space<vmem>>, %arg7: memref<8x36xbf16, #tpu.memory_space<vmem>>, %arg8: memref<8x72xbf16, #tpu.memory_space<vmem>>, %arg9: memref<8x108xbf16, #tpu.memory_space<vmem>>, %arg10: memref<8x1xf32, #tpu.memory_space<vmem>>, %arg11: memref<8x1xf32, #tpu.memory_space<vmem>>, %arg12: memref<8x1xf32, #tpu.memory_space<vmem>>, %arg13: memref<8x144xbf16, #tpu.memory_space<vmem>>, %arg14: memref<8x1xf32, #tpu.memory_space<vmem>>, %arg15: memref<2x4x256xf32, #tpu.memory_space<vmem>>, %arg16: memref<8x512xf32, #tpu.memory_space<vmem>>, %arg17: memref<100x512xbf16, #tpu.memory_space<vmem>>, %arg18: memref<72x512xbf16, #tpu.memory_space<vmem>>, %arg19: memref<144x512xbf16, #tpu.memory_space<vmem>>) attributes {dimension_semantics = [#tpu.dimension_semantics<parallel>], iteration_bounds = array<i64: 1>, scalar_prefetch = 0 : i64, scratch_operands = 4 : i64, tpu.core_type = #tpu.core_type<tc>, window_params = [{transform_indices = @transform_0, window_bounds = array<i64: 2, 4, 256>}, {pipeline_mode = #tpu.pipeline_mode<synchronous>, transform_indices = @transform_1, window_bounds = array<i64: 25, 512>}, {pipeline_mode = #tpu.pipeline_mode<synchronous>, transform_indices = @transform_2, window_bounds = array<i64: 8, 100>}, {pipeline_mode = #tpu.pipeline_mode<synchronous>, transform_indices = @transform_3, window_bounds = array<i64: 8, 1>}, {pipeline_mode = #tpu.pipeline_mode<synchronous>, transform_indices = @transform_4, window_bounds = array<i64: 8, 72>}, {pipeline_mode = #tpu.pipeline_mode<synchronous>, transform_indices = @transform_5, window_bounds = array<i64: 8, 1>}, {pipeline_mode = #tpu.pipeline_mode<synchronous>, transform_indices = @transform_6, window_bounds = array<i64: 8, 36>}, {pipeline_mode = #tpu.pipeline_mode<synchronous>, transform_indices = @transform_7, window_bounds = array<i64: 8, 72>}, {pipeline_mode = #tpu.pipeline_mode<synchronous>, transform_indices = @transform_8, window_bounds = array<i64: 8, 108>}, {pipeline_mode = #tpu.pipeline_mode<synchronous>, transform_indices = @transform_9, window_bounds = array<i64: 8, 1>}, {pipeline_mode = #tpu.pipeline_mode<synchronous>, transform_indices = @transform_10, window_bounds = array<i64: 8, 1>}, {pipeline_mode = #tpu.pipeline_mode<synchronous>, transform_indices = @transform_11, window_bounds = array<i64: 8, 1>}, {pipeline_mode = #tpu.pipeline_mode<synchronous>, transform_indices = @transform_12, window_bounds = array<i64: 8, 144>}, {pipeline_mode = #tpu.pipeline_mode<synchronous>, transform_indices = @transform_13, window_bounds = array<i64: 8, 1>}, {transform_indices = @transform_14, window_bounds = array<i64: 2, 4, 256>}]} {
    %c0 = arith.constant 0 : index
    %c0_0 = arith.constant 0 : index
    %c0_1 = arith.constant 0 : index
    %0 = vector.load %arg1[%c0, %c0_0, %c0_1] : memref<2x4x256xf32, #tpu.memory_space<vmem>>, vector<1x4x256xf32>
    %1 = vector.shape_cast %0 : vector<1x4x256xf32> to vector<4x256xf32>
    %c0_2 = arith.constant 0 : index
    %c0_3 = arith.constant 0 : index
    %2 = vector.load %arg16[%c0_2, %c0_3] : memref<8x512xf32, #tpu.memory_space<vmem>>, vector<4x256xf32>
    tpu.vector_store %arg16[%c0_2, %c0_3], %1 {strides = array<i32>} : memref<8x512xf32, #tpu.memory_space<vmem>>, vector<4x256xf32>,
    %c4 = arith.constant 4 : index
    %c0_4 = arith.constant 0 : index
    %3 = vector.load %arg16[%c4, %c0_4] : memref<8x512xf32, #tpu.memory_space<vmem>>, vector<4x256xf32>
    tpu.vector_store %arg16[%c4, %c0_4], %1 {strides = array<i32>} : memref<8x512xf32, #tpu.memory_space<vmem>>, vector<4x256xf32>,
    %c1 = arith.constant 1 : index
    %c0_5 = arith.constant 0 : index
    %c0_6 = arith.constant 0 : index
    %4 = vector.load %arg1[%c1, %c0_5, %c0_6] : memref<2x4x256xf32, #tpu.memory_space<vmem>>, vector<1x4x256xf32>
    %5 = vector.shape_cast %4 : vector<1x4x256xf32> to vector<4x256xf32>
    %c0_7 = arith.constant 0 : index
    %c256 = arith.constant 256 : index
    %6 = vector.load %arg16[%c0_7, %c256] : memref<8x512xf32, #tpu.memory_space<vmem>>, vector<4x256xf32>
    tpu.vector_store %arg16[%c0_7, %c256], %5 {strides = array<i32>} : memref<8x512xf32, #tpu.memory_space<vmem>>, vector<4x256xf32>,
    %c4_8 = arith.constant 4 : index
    %c256_9 = arith.constant 256 : index
    %7 = vector.load %arg16[%c4_8, %c256_9] : memref<8x512xf32, #tpu.memory_space<vmem>>, vector<4x256xf32>
    tpu.vector_store %arg16[%c4_8, %c256_9], %5 {strides = array<i32>} : memref<8x512xf32, #tpu.memory_space<vmem>>, vector<4x256xf32>,
    %c0_10 = arith.constant 0 : index
    %c0_11 = arith.constant 0 : index
    %8 = vector.load %arg16[%c0_10, %c0_11] : memref<8x512xf32, #tpu.memory_space<vmem>>, vector<8x512xf32>
    %c0_12 = arith.constant 0 : index
    %c0_13 = arith.constant 0 : index
    %9 = vector.load %arg2[%c0_12, %c0_13] : memref<25x512xf32, #tpu.memory_space<vmem>>, vector<1x512xf32>
    %c34_i32 = arith.constant 34 : i32
    %10 = tpu.dynamic_rotate %8 by %c34_i32 dim 1 : vector<8x512xf32>, i32 -> vector<8x512xf32>
    %11 = vector.broadcast %9 : vector<1x512xf32> to vector<8x512xf32>
    %12 = arith.mulf %10, %11 : vector<8x512xf32>
    %13 = vector.extract_strided_slice %12 {offsets = [0, 0], sizes = [4, 512], strides = [1, 1]} : vector<8x512xf32> to vector<4x512xf32>
    %14 = arith.truncf %13 : vector<4x512xf32> to vector<4x512xbf16>
    %c0_14 = arith.constant 0 : index
    %c0_15 = arith.constant 0 : index
    %15 = vector.load %arg17[%c0_14, %c0_15] : memref<100x512xbf16, #tpu.memory_space<vmem>>, vector<4x512xbf16>
    tpu.vector_store %arg17[%c0_14, %c0_15], %14 {strides = array<i32>} : memref<100x512xbf16, #tpu.memory_space<vmem>>, vector<4x512xbf16>,
    %c1_16 = arith.constant 1 : index
    %c0_17 = arith.constant 0 : index
    %16 = vector.load %arg2[%c1_16, %c0_17] : memref<25x512xf32, #tpu.memory_space<vmem>>, vector<1x512xf32>
    %c33_i32 = arith.constant 33 : i32
    %17 = tpu.dynamic_rotate %8 by %c33_i32 dim 1 : vector<8x512xf32>, i32 -> vector<8x512xf32>
    %18 = vector.broadcast %16 : vector<1x512xf32> to vector<8x512xf32>
    %19 = arith.mulf %17, %18 : vector<8x512xf32>
    %20 = vector.extract_strided_slice %19 {offsets = [0, 0], sizes = [4, 512], strides = [1, 1]} : vector<8x512xf32> to vector<4x512xf32>
    %21 = arith.truncf %20 : vector<4x512xf32> to vector<4x512xbf16>
    %c4_18 = arith.constant 4 : index
    %c0_19 = arith.constant 0 : index
    %22 = vector.load %arg17[%c4_18, %c0_19] : memref<100x512xbf16, #tpu.memory_space<vmem>>, vector<4x512xbf16>
    tpu.vector_store %arg17[%c4_18, %c0_19], %21 {strides = array<i32>} : memref<100x512xbf16, #tpu.memory_space<vmem>>, vector<4x512xbf16>,
    %c2 = arith.constant 2 : index
    %c0_20 = arith.constant 0 : index
    %23 = vector.load %arg2[%c2, %c0_20] : memref<25x512xf32, #tpu.memory_space<vmem>>, vector<1x512xf32>
    %c32_i32 = arith.constant 32 : i32
    %24 = tpu.dynamic_rotate %8 by %c32_i32 dim 1 : vector<8x512xf32>, i32 -> vector<8x512xf32>
    %25 = vector.broadcast %23 : vector<1x512xf32> to vector<8x512xf32>
    %26 = arith.mulf %24, %25 : vector<8x512xf32>
    %27 = vector.extract_strided_slice %26 {offsets = [0, 0], sizes = [4, 512], strides = [1, 1]} : vector<8x512xf32> to vector<4x512xf32>
    %28 = arith.truncf %27 : vector<4x512xf32> to vector<4x512xbf16>
    %c8 = arith.constant 8 : index
    %c0_21 = arith.constant 0 : index
    %29 = vector.load %arg17[%c8, %c0_21] : memref<100x512xbf16, #tpu.memory_space<vmem>>, vector<4x512xbf16>
    tpu.vector_store %arg17[%c8, %c0_21], %28 {strides = array<i32>} : memref<100x512xbf16, #tpu.memory_space<vmem>>, vector<4x512xbf16>,
    %c3 = arith.constant 3 : index
    %c0_22 = arith.constant 0 : index
    %30 = vector.load %arg2[%c3, %c0_22] : memref<25x512xf32, #tpu.memory_space<vmem>>, vector<1x512xf32>
    %c31_i32 = arith.constant 31 : i32
    %31 = tpu.dynamic_rotate %8 by %c31_i32 dim 1 : vector<8x512xf32>, i32 -> vector<8x512xf32>
    %32 = vector.broadcast %30 : vector<1x512xf32> to vector<8x512xf32>
    %33 = arith.mulf %31, %32 : vector<8x512xf32>
    %34 = vector.extract_strided_slice %33 {offsets = [0, 0], sizes = [4, 512], strides = [1, 1]} : vector<8x512xf32> to vector<4x512xf32>
    %35 = arith.truncf %34 : vector<4x512xf32> to vector<4x512xbf16>
    %c12 = arith.constant 12 : index
    %c0_23 = arith.constant 0 : index
    %36 = vector.load %arg17[%c12, %c0_23] : memref<100x512xbf16, #tpu.memory_space<vmem>>, vector<4x512xbf16>
    tpu.vector_store %arg17[%c12, %c0_23], %35 {strides = array<i32>} : memref<100x512xbf16, #tpu.memory_space<vmem>>, vector<4x512xbf16>,
    %c4_24 = arith.constant 4 : index
    %c0_25 = arith.constant 0 : index
    %37 = vector.load %arg2[%c4_24, %c0_25] : memref<25x512xf32, #tpu.memory_space<vmem>>, vector<1x512xf32>
    %c30_i32 = arith.constant 30 : i32
    %38 = tpu.dynamic_rotate %8 by %c30_i32 dim 1 : vector<8x512xf32>, i32 -> vector<8x512xf32>
    %39 = vector.broadcast %37 : vector<1x512xf32> to vector<8x512xf32>
    %40 = arith.mulf %38, %39 : vector<8x512xf32>
    %41 = vector.extract_strided_slice %40 {offsets = [0, 0], sizes = [4, 512], strides = [1, 1]} : vector<8x512xf32> to vector<4x512xf32>
    %42 = arith.truncf %41 : vector<4x512xf32> to vector<4x512xbf16>
    %c16 = arith.constant 16 : index
    %c0_26 = arith.constant 0 : index
    %43 = vector.load %arg17[%c16, %c0_26] : memref<100x512xbf16, #tpu.memory_space<vmem>>, vector<4x512xbf16>
    tpu.vector_store %arg17[%c16, %c0_26], %42 {strides = array<i32>} : memref<100x512xbf16, #tpu.memory_space<vmem>>, vector<4x512xbf16>,
    %c5 = arith.constant 5 : index
    %c0_27 = arith.constant 0 : index
    %44 = vector.load %arg2[%c5, %c0_27] : memref<25x512xf32, #tpu.memory_space<vmem>>, vector<1x512xf32>
    %c18_i32 = arith.constant 18 : i32
    %45 = tpu.dynamic_rotate %8 by %c18_i32 dim 1 : vector<8x512xf32>, i32 -> vector<8x512xf32>
    %46 = vector.broadcast %44 : vector<1x512xf32> to vector<8x512xf32>
    %47 = arith.mulf %45, %46 : vector<8x512xf32>
    %48 = vector.extract_strided_slice %47 {offsets = [0, 0], sizes = [4, 512], strides = [1, 1]} : vector<8x512xf32> to vector<4x512xf32>
    %49 = arith.truncf %48 : vector<4x512xf32> to vector<4x512xbf16>
    %c20 = arith.constant 20 : index
    %c0_28 = arith.constant 0 : index
    %50 = vector.load %arg17[%c20, %c0_28] : memref<100x512xbf16, #tpu.memory_space<vmem>>, vector<4x512xbf16>
    tpu.vector_store %arg17[%c20, %c0_28], %49 {strides = array<i32>} : memref<100x512xbf16, #tpu.memory_space<vmem>>, vector<4x512xbf16>,
    %c6 = arith.constant 6 : index
    %c0_29 = arith.constant 0 : index
    %51 = vector.load %arg2[%c6, %c0_29] : memref<25x512xf32, #tpu.memory_space<vmem>>, vector<1x512xf32>
    %c17_i32 = arith.constant 17 : i32
    %52 = tpu.dynamic_rotate %8 by %c17_i32 dim 1 : vector<8x512xf32>, i32 -> vector<8x512xf32>
    %53 = vector.broadcast %51 : vector<1x512xf32> to vector<8x512xf32>
    %54 = arith.mulf %52, %53 : vector<8x512xf32>
    %55 = vector.extract_strided_slice %54 {offsets = [0, 0], sizes = [4, 512], strides = [1, 1]} : vector<8x512xf32> to vector<4x512xf32>
    %56 = arith.truncf %55 : vector<4x512xf32> to vector<4x512xbf16>
    %c24 = arith.constant 24 : index
    %c0_30 = arith.constant 0 : index
    %57 = vector.load %arg17[%c24, %c0_30] : memref<100x512xbf16, #tpu.memory_space<vmem>>, vector<4x512xbf16>
    tpu.vector_store %arg17[%c24, %c0_30], %56 {strides = array<i32>} : memref<100x512xbf16, #tpu.memory_space<vmem>>, vector<4x512xbf16>,
    %c7 = arith.constant 7 : index
    %c0_31 = arith.constant 0 : index
    %58 = vector.load %arg2[%c7, %c0_31] : memref<25x512xf32, #tpu.memory_space<vmem>>, vector<1x512xf32>
    %c16_i32 = arith.constant 16 : i32
    %59 = tpu.dynamic_rotate %8 by %c16_i32 dim 1 : vector<8x512xf32>, i32 -> vector<8x512xf32>
    %60 = vector.broadcast %58 : vector<1x512xf32> to vector<8x512xf32>
    %61 = arith.mulf %59, %60 : vector<8x512xf32>
    %62 = vector.extract_strided_slice %61 {offsets = [0, 0], sizes = [4, 512], strides = [1, 1]} : vector<8x512xf32> to vector<4x512xf32>
    %63 = arith.truncf %62 : vector<4x512xf32> to vector<4x512xbf16>
    %c28 = arith.constant 28 : index
    %c0_32 = arith.constant 0 : index
    %64 = vector.load %arg17[%c28, %c0_32] : memref<100x512xbf16, #tpu.memory_space<vmem>>, vector<4x512xbf16>
    tpu.vector_store %arg17[%c28, %c0_32], %63 {strides = array<i32>} : memref<100x512xbf16, #tpu.memory_space<vmem>>, vector<4x512xbf16>,
    %c8_33 = arith.constant 8 : index
    %c0_34 = arith.constant 0 : index
    %65 = vector.load %arg2[%c8_33, %c0_34] : memref<25x512xf32, #tpu.memory_space<vmem>>, vector<1x512xf32>
    %c15_i32 = arith.constant 15 : i32
    %66 = tpu.dynamic_rotate %8 by %c15_i32 dim 1 : vector<8x512xf32>, i32 -> vector<8x512xf32>
    %67 = vector.broadcast %65 : vector<1x512xf32> to vector<8x512xf32>
    %68 = arith.mulf %66, %67 : vector<8x512xf32>
    %69 = vector.extract_strided_slice %68 {offsets = [0, 0], sizes = [4, 512], strides = [1, 1]} : vector<8x512xf32> to vector<4x512xf32>
    %70 = arith.truncf %69 : vector<4x512xf32> to vector<4x512xbf16>
    %c32 = arith.constant 32 : index
    %c0_35 = arith.constant 0 : index
    %71 = vector.load %arg17[%c32, %c0_35] : memref<100x512xbf16, #tpu.memory_space<vmem>>, vector<4x512xbf16>
    tpu.vector_store %arg17[%c32, %c0_35], %70 {strides = array<i32>} : memref<100x512xbf16, #tpu.memory_space<vmem>>, vector<4x512xbf16>,
    %c9 = arith.constant 9 : index
    %c0_36 = arith.constant 0 : index
    %72 = vector.load %arg2[%c9, %c0_36] : memref<25x512xf32, #tpu.memory_space<vmem>>, vector<1x512xf32>
    %c14_i32 = arith.constant 14 : i32
    %73 = tpu.dynamic_rotate %8 by %c14_i32 dim 1 : vector<8x512xf32>, i32 -> vector<8x512xf32>
    %74 = vector.broadcast %72 : vector<1x512xf32> to vector<8x512xf32>
    %75 = arith.mulf %73, %74 : vector<8x512xf32>
    %76 = vector.extract_strided_slice %75 {offsets = [0, 0], sizes = [4, 512], strides = [1, 1]} : vector<8x512xf32> to vector<4x512xf32>
    %77 = arith.truncf %76 : vector<4x512xf32> to vector<4x512xbf16>
    %c36 = arith.constant 36 : index
    %c0_37 = arith.constant 0 : index
    %78 = vector.load %arg17[%c36, %c0_37] : memref<100x512xbf16, #tpu.memory_space<vmem>>, vector<4x512xbf16>
    tpu.vector_store %arg17[%c36, %c0_37], %77 {strides = array<i32>} : memref<100x512xbf16, #tpu.memory_space<vmem>>, vector<4x512xbf16>,
    %c10 = arith.constant 10 : index
    %c0_38 = arith.constant 0 : index
    %79 = vector.load %arg2[%c10, %c0_38] : memref<25x512xf32, #tpu.memory_space<vmem>>, vector<1x512xf32>
    %c2_i32 = arith.constant 2 : i32
    %80 = tpu.dynamic_rotate %8 by %c2_i32 dim 1 : vector<8x512xf32>, i32 -> vector<8x512xf32>
    %81 = vector.broadcast %79 : vector<1x512xf32> to vector<8x512xf32>
    %82 = arith.mulf %80, %81 : vector<8x512xf32>
    %83 = vector.extract_strided_slice %82 {offsets = [0, 0], sizes = [4, 512], strides = [1, 1]} : vector<8x512xf32> to vector<4x512xf32>
    %84 = arith.truncf %83 : vector<4x512xf32> to vector<4x512xbf16>
    %c40 = arith.constant 40 : index
    %c0_39 = arith.constant 0 : index
    %85 = vector.load %arg17[%c40, %c0_39] : memref<100x512xbf16, #tpu.memory_space<vmem>>, vector<4x512xbf16>
    tpu.vector_store %arg17[%c40, %c0_39], %84 {strides = array<i32>} : memref<100x512xbf16, #tpu.memory_space<vmem>>, vector<4x512xbf16>,
    %c11 = arith.constant 11 : index
    %c0_40 = arith.constant 0 : index
    %86 = vector.load %arg2[%c11, %c0_40] : memref<25x512xf32, #tpu.memory_space<vmem>>, vector<1x512xf32>
    %c1_i32 = arith.constant 1 : i32
    %87 = tpu.dynamic_rotate %8 by %c1_i32 dim 1 : vector<8x512xf32>, i32 -> vector<8x512xf32>
    %88 = vector.broadcast %86 : vector<1x512xf32> to vector<8x512xf32>
    %89 = arith.mulf %87, %88 : vector<8x512xf32>
    %90 = vector.extract_strided_slice %89 {offsets = [0, 0], sizes = [4, 512], strides = [1, 1]} : vector<8x512xf32> to vector<4x512xf32>
    %91 = arith.truncf %90 : vector<4x512xf32> to vector<4x512xbf16>
    %c44 = arith.constant 44 : index
    %c0_41 = arith.constant 0 : index
    %92 = vector.load %arg17[%c44, %c0_41] : memref<100x512xbf16, #tpu.memory_space<vmem>>, vector<4x512xbf16>
    tpu.vector_store %arg17[%c44, %c0_41], %91 {strides = array<i32>} : memref<100x512xbf16, #tpu.memory_space<vmem>>, vector<4x512xbf16>,
    %93 = vector.extract_strided_slice %8 {offsets = [0, 0], sizes = [4, 512], strides = [1, 1]} : vector<8x512xf32> to vector<4x512xf32>
    %94 = arith.truncf %93 : vector<4x512xf32> to vector<4x512xbf16>
    %c48 = arith.constant 48 : index
    %c0_42 = arith.constant 0 : index
    %95 = vector.load %arg17[%c48, %c0_42] : memref<100x512xbf16, #tpu.memory_space<vmem>>, vector<4x512xbf16>
    tpu.vector_store %arg17[%c48, %c0_42], %94 {strides = array<i32>} : memref<100x512xbf16, #tpu.memory_space<vmem>>, vector<4x512xbf16>,
    %c13 = arith.constant 13 : index
    %c0_43 = arith.constant 0 : index
    %96 = vector.load %arg2[%c13, %c0_43] : memref<25x512xf32, #tpu.memory_space<vmem>>, vector<1x512xf32>
    %c511_i32 = arith.constant 511 : i32
    %97 = tpu.dynamic_rotate %8 by %c511_i32 dim 1 : vector<8x512xf32>, i32 -> vector<8x512xf32>
    %98 = vector.broadcast %96 : vector<1x512xf32> to vector<8x512xf32>
    %99 = arith.mulf %97, %98 : vector<8x512xf32>
    %100 = vector.extract_strided_slice %99 {offsets = [0, 0], sizes = [4, 512], strides = [1, 1]} : vector<8x512xf32> to vector<4x512xf32>
    %101 = arith.truncf %100 : vector<4x512xf32> to vector<4x512xbf16>
    %c52 = arith.constant 52 : index
    %c0_44 = arith.constant 0 : index
    %102 = vector.load %arg17[%c52, %c0_44] : memref<100x512xbf16, #tpu.memory_space<vmem>>, vector<4x512xbf16>
    tpu.vector_store %arg17[%c52, %c0_44], %101 {strides = array<i32>} : memref<100x512xbf16, #tpu.memory_space<vmem>>, vector<4x512xbf16>,
    %c14 = arith.constant 14 : index
    %c0_45 = arith.constant 0 : index
    %103 = vector.load %arg2[%c14, %c0_45] : memref<25x512xf32, #tpu.memory_space<vmem>>, vector<1x512xf32>
    %c510_i32 = arith.constant 510 : i32
    %104 = tpu.dynamic_rotate %8 by %c510_i32 dim 1 : vector<8x512xf32>, i32 -> vector<8x512xf32>
    %105 = vector.broadcast %103 : vector<1x512xf32> to vector<8x512xf32>
    %106 = arith.mulf %104, %105 : vector<8x512xf32>
    %107 = vector.extract_strided_slice %106 {offsets = [0, 0], sizes = [4, 512], strides = [1, 1]} : vector<8x512xf32> to vector<4x512xf32>
    %108 = arith.truncf %107 : vector<4x512xf32> to vector<4x512xbf16>
    %c56 = arith.constant 56 : index
    %c0_46 = arith.constant 0 : index
    %109 = vector.load %arg17[%c56, %c0_46] : memref<100x512xbf16, #tpu.memory_space<vmem>>, vector<4x512xbf16>
    tpu.vector_store %arg17[%c56, %c0_46], %108 {strides = array<i32>} : memref<100x512xbf16, #tpu.memory_space<vmem>>, vector<4x512xbf16>,
    %c15 = arith.constant 15 : index
    %c0_47 = arith.constant 0 : index
    %110 = vector.load %arg2[%c15, %c0_47] : memref<25x512xf32, #tpu.memory_space<vmem>>, vector<1x512xf32>
    %c498_i32 = arith.constant 498 : i32
    %111 = tpu.dynamic_rotate %8 by %c498_i32 dim 1 : vector<8x512xf32>, i32 -> vector<8x512xf32>
    %112 = vector.broadcast %110 : vector<1x512xf32> to vector<8x512xf32>
    %113 = arith.mulf %111, %112 : vector<8x512xf32>
    %114 = vector.extract_strided_slice %113 {offsets = [0, 0], sizes = [4, 512], strides = [1, 1]} : vector<8x512xf32> to vector<4x512xf32>
    %115 = arith.truncf %114 : vector<4x512xf32> to vector<4x512xbf16>
    %c60 = arith.constant 60 : index
    %c0_48 = arith.constant 0 : index
    %116 = vector.load %arg17[%c60, %c0_48] : memref<100x512xbf16, #tpu.memory_space<vmem>>, vector<4x512xbf16>
    tpu.vector_store %arg17[%c60, %c0_48], %115 {strides = array<i32>} : memref<100x512xbf16, #tpu.memory_space<vmem>>, vector<4x512xbf16>,
    %c16_49 = arith.constant 16 : index
    %c0_50 = arith.constant 0 : index
    %117 = vector.load %arg2[%c16_49, %c0_50] : memref<25x512xf32, #tpu.memory_space<vmem>>, vector<1x512xf32>
    %c497_i32 = arith.constant 497 : i32
    %118 = tpu.dynamic_rotate %8 by %c497_i32 dim 1 : vector<8x512xf32>, i32 -> vector<8x512xf32>
    %119 = vector.broadcast %117 : vector<1x512xf32> to vector<8x512xf32>
    %120 = arith.mulf %118, %119 : vector<8x512xf32>
    %121 = vector.extract_strided_slice %120 {offsets = [0, 0], sizes = [4, 512], strides = [1, 1]} : vector<8x512xf32> to vector<4x512xf32>
    %122 = arith.truncf %121 : vector<4x512xf32> to vector<4x512xbf16>
    %c64 = arith.constant 64 : index
    %c0_51 = arith.constant 0 : index
    %123 = vector.load %arg17[%c64, %c0_51] : memref<100x512xbf16, #tpu.memory_space<vmem>>, vector<4x512xbf16>
    tpu.vector_store %arg17[%c64, %c0_51], %122 {strides = array<i32>} : memref<100x512xbf16, #tpu.memory_space<vmem>>, vector<4x512xbf16>,
    %c17 = arith.constant 17 : index
    %c0_52 = arith.constant 0 : index
    %124 = vector.load %arg2[%c17, %c0_52] : memref<25x512xf32, #tpu.memory_space<vmem>>, vector<1x512xf32>
    %c496_i32 = arith.constant 496 : i32
    %125 = tpu.dynamic_rotate %8 by %c496_i32 dim 1 : vector<8x512xf32>, i32 -> vector<8x512xf32>
    %126 = vector.broadcast %124 : vector<1x512xf32> to vector<8x512xf32>
    %127 = arith.mulf %125, %126 : vector<8x512xf32>
    %128 = vector.extract_strided_slice %127 {offsets = [0, 0], sizes = [4, 512], strides = [1, 1]} : vector<8x512xf32> to vector<4x512xf32>
    %129 = arith.truncf %128 : vector<4x512xf32> to vector<4x512xbf16>
    %c68 = arith.constant 68 : index
    %c0_53 = arith.constant 0 : index
    %130 = vector.load %arg17[%c68, %c0_53] : memref<100x512xbf16, #tpu.memory_space<vmem>>, vector<4x512xbf16>
    tpu.vector_store %arg17[%c68, %c0_53], %129 {strides = array<i32>} : memref<100x512xbf16, #tpu.memory_space<vmem>>, vector<4x512xbf16>,
    %c18 = arith.constant 18 : index
    %c0_54 = arith.constant 0 : index
    %131 = vector.load %arg2[%c18, %c0_54] : memref<25x512xf32, #tpu.memory_space<vmem>>, vector<1x512xf32>
    %c495_i32 = arith.constant 495 : i32
    %132 = tpu.dynamic_rotate %8 by %c495_i32 dim 1 : vector<8x512xf32>, i32 -> vector<8x512xf32>
    %133 = vector.broadcast %131 : vector<1x512xf32> to vector<8x512xf32>
    %134 = arith.mulf %132, %133 : vector<8x512xf32>
    %135 = vector.extract_strided_slice %134 {offsets = [0, 0], sizes = [4, 512], strides = [1, 1]} : vector<8x512xf32> to vector<4x512xf32>
    %136 = arith.truncf %135 : vector<4x512xf32> to vector<4x512xbf16>
    %c72 = arith.constant 72 : index
    %c0_55 = arith.constant 0 : index
    %137 = vector.load %arg17[%c72, %c0_55] : memref<100x512xbf16, #tpu.memory_space<vmem>>, vector<4x512xbf16>
    tpu.vector_store %arg17[%c72, %c0_55], %136 {strides = array<i32>} : memref<100x512xbf16, #tpu.memory_space<vmem>>, vector<4x512xbf16>,
    %c19 = arith.constant 19 : index
    %c0_56 = arith.constant 0 : index
    %138 = vector.load %arg2[%c19, %c0_56] : memref<25x512xf32, #tpu.memory_space<vmem>>, vector<1x512xf32>
    %c494_i32 = arith.constant 494 : i32
    %139 = tpu.dynamic_rotate %8 by %c494_i32 dim 1 : vector<8x512xf32>, i32 -> vector<8x512xf32>
    %140 = vector.broadcast %138 : vector<1x512xf32> to vector<8x512xf32>
    %141 = arith.mulf %139, %140 : vector<8x512xf32>
    %142 = vector.extract_strided_slice %141 {offsets = [0, 0], sizes = [4, 512], strides = [1, 1]} : vector<8x512xf32> to vector<4x512xf32>
    %143 = arith.truncf %142 : vector<4x512xf32> to vector<4x512xbf16>
    %c76 = arith.constant 76 : index
    %c0_57 = arith.constant 0 : index
    %144 = vector.load %arg17[%c76, %c0_57] : memref<100x512xbf16, #tpu.memory_space<vmem>>, vector<4x512xbf16>
    tpu.vector_store %arg17[%c76, %c0_57], %143 {strides = array<i32>} : memref<100x512xbf16, #tpu.memory_space<vmem>>, vector<4x512xbf16>,
    %c20_58 = arith.constant 20 : index
    %c0_59 = arith.constant 0 : index
    %145 = vector.load %arg2[%c20_58, %c0_59] : memref<25x512xf32, #tpu.memory_space<vmem>>, vector<1x512xf32>
    %c482_i32 = arith.constant 482 : i32
    %146 = tpu.dynamic_rotate %8 by %c482_i32 dim 1 : vector<8x512xf32>, i32 -> vector<8x512xf32>
    %147 = vector.broadcast %145 : vector<1x512xf32> to vector<8x512xf32>
    %148 = arith.mulf %146, %147 : vector<8x512xf32>
    %149 = vector.extract_strided_slice %148 {offsets = [0, 0], sizes = [4, 512], strides = [1, 1]} : vector<8x512xf32> to vector<4x512xf32>
    %150 = arith.truncf %149 : vector<4x512xf32> to vector<4x512xbf16>
    %c80 = arith.constant 80 : index
    %c0_60 = arith.constant 0 : index
    %151 = vector.load %arg17[%c80, %c0_60] : memref<100x512xbf16, #tpu.memory_space<vmem>>, vector<4x512xbf16>
    tpu.vector_store %arg17[%c80, %c0_60], %150 {strides = array<i32>} : memref<100x512xbf16, #tpu.memory_space<vmem>>, vector<4x512xbf16>,
    %c21 = arith.constant 21 : index
    %c0_61 = arith.constant 0 : index
    %152 = vector.load %arg2[%c21, %c0_61] : memref<25x512xf32, #tpu.memory_space<vmem>>, vector<1x512xf32>
    %c481_i32 = arith.constant 481 : i32
    %153 = tpu.dynamic_rotate %8 by %c481_i32 dim 1 : vector<8x512xf32>, i32 -> vector<8x512xf32>
    %154 = vector.broadcast %152 : vector<1x512xf32> to vector<8x512xf32>
    %155 = arith.mulf %153, %154 : vector<8x512xf32>
    %156 = vector.extract_strided_slice %155 {offsets = [0, 0], sizes = [4, 512], strides = [1, 1]} : vector<8x512xf32> to vector<4x512xf32>
    %157 = arith.truncf %156 : vector<4x512xf32> to vector<4x512xbf16>
    %c84 = arith.constant 84 : index
    %c0_62 = arith.constant 0 : index
    %158 = vector.load %arg17[%c84, %c0_62] : memref<100x512xbf16, #tpu.memory_space<vmem>>, vector<4x512xbf16>
    tpu.vector_store %arg17[%c84, %c0_62], %157 {strides = array<i32>} : memref<100x512xbf16, #tpu.memory_space<vmem>>, vector<4x512xbf16>,
    %c22 = arith.constant 22 : index
    %c0_63 = arith.constant 0 : index
    %159 = vector.load %arg2[%c22, %c0_63] : memref<25x512xf32, #tpu.memory_space<vmem>>, vector<1x512xf32>
    %c480_i32 = arith.constant 480 : i32
    %160 = tpu.dynamic_rotate %8 by %c480_i32 dim 1 : vector<8x512xf32>, i32 -> vector<8x512xf32>
    %161 = vector.broadcast %159 : vector<1x512xf32> to vector<8x512xf32>
    %162 = arith.mulf %160, %161 : vector<8x512xf32>
    %163 = vector.extract_strided_slice %162 {offsets = [0, 0], sizes = [4, 512], strides = [1, 1]} : vector<8x512xf32> to vector<4x512xf32>
    %164 = arith.truncf %163 : vector<4x512xf32> to vector<4x512xbf16>
    %c88 = arith.constant 88 : index
    %c0_64 = arith.constant 0 : index
    %165 = vector.load %arg17[%c88, %c0_64] : memref<100x512xbf16, #tpu.memory_space<vmem>>, vector<4x512xbf16>
    tpu.vector_store %arg17[%c88, %c0_64], %164 {strides = array<i32>} : memref<100x512xbf16, #tpu.memory_space<vmem>>, vector<4x512xbf16>,
    %c23 = arith.constant 23 : index
    %c0_65 = arith.constant 0 : index
    %166 = vector.load %arg2[%c23, %c0_65] : memref<25x512xf32, #tpu.memory_space<vmem>>, vector<1x512xf32>
    %c479_i32 = arith.constant 479 : i32
    %167 = tpu.dynamic_rotate %8 by %c479_i32 dim 1 : vector<8x512xf32>, i32 -> vector<8x512xf32>
    %168 = vector.broadcast %166 : vector<1x512xf32> to vector<8x512xf32>
    %169 = arith.mulf %167, %168 : vector<8x512xf32>
    %170 = vector.extract_strided_slice %169 {offsets = [0, 0], sizes = [4, 512], strides = [1, 1]} : vector<8x512xf32> to vector<4x512xf32>
    %171 = arith.truncf %170 : vector<4x512xf32> to vector<4x512xbf16>
    %c92 = arith.constant 92 : index
    %c0_66 = arith.constant 0 : index
    %172 = vector.load %arg17[%c92, %c0_66] : memref<100x512xbf16, #tpu.memory_space<vmem>>, vector<4x512xbf16>
    tpu.vector_store %arg17[%c92, %c0_66], %171 {strides = array<i32>} : memref<100x512xbf16, #tpu.memory_space<vmem>>, vector<4x512xbf16>,
    %c24_67 = arith.constant 24 : index
    %c0_68 = arith.constant 0 : index
    %173 = vector.load %arg2[%c24_67, %c0_68] : memref<25x512xf32, #tpu.memory_space<vmem>>, vector<1x512xf32>
    %c478_i32 = arith.constant 478 : i32
    %174 = tpu.dynamic_rotate %8 by %c478_i32 dim 1 : vector<8x512xf32>, i32 -> vector<8x512xf32>
    %175 = vector.broadcast %173 : vector<1x512xf32> to vector<8x512xf32>
    %176 = arith.mulf %174, %175 : vector<8x512xf32>
    %177 = vector.extract_strided_slice %176 {offsets = [0, 0], sizes = [4, 512], strides = [1, 1]} : vector<8x512xf32> to vector<4x512xf32>
    %178 = arith.truncf %177 : vector<4x512xf32> to vector<4x512xbf16>
    %c96 = arith.constant 96 : index
    %c0_69 = arith.constant 0 : index
    %179 = vector.load %arg17[%c96, %c0_69] : memref<100x512xbf16, #tpu.memory_space<vmem>>, vector<4x512xbf16>
    tpu.vector_store %arg17[%c96, %c0_69], %178 {strides = array<i32>} : memref<100x512xbf16, #tpu.memory_space<vmem>>, vector<4x512xbf16>,
    %c0_70 = arith.constant 0 : index
    %c0_71 = arith.constant 0 : index
    %180 = vector.load %arg3[%c0_70, %c0_71] : memref<8x100xbf16, #tpu.memory_space<vmem>>, vector<8x100xbf16>
    %c0_72 = arith.constant 0 : index
    %c0_73 = arith.constant 0 : index
    %181 = vector.load %arg17[%c0_72, %c0_73] : memref<100x512xbf16, #tpu.memory_space<vmem>>, vector<100x512xbf16>
    %cst = arith.constant dense<0.000000e+00> : vector<8x512xf32>
    %182 = tpu.matmul %180, %181, %cst {dimension_numbers = #tpu.dot_dimension_numbers<[1], [0], [0], [1], [0, 0, 1, 1], [], []>} : vector<8x100xbf16>, vector<100x512xbf16>, vector<8x512xf32> -> vector<8x512xf32>
    %c0_74 = arith.constant 0 : index
    %c0_75 = arith.constant 0 : index
    %183 = vector.load %arg4[%c0_74, %c0_75] : memref<8x1xf32, #tpu.memory_space<vmem>>, vector<8x1xf32>
    %184 = vector.broadcast %183 : vector<8x1xf32> to vector<8x512xf32>
    %185 = arith.addf %182, %184 : vector<8x512xf32>
    %cst_76 = arith.constant 5.000000e-01 : f32
    %186 = vector.broadcast %cst_76 : f32 to vector<8x512xf32>
    %187 = arith.mulf %186, %185 : vector<8x512xf32>
    %cst_77 = arith.constant 0.707106769 : f32
    %188 = vector.broadcast %cst_77 : f32 to vector<8x512xf32>
    %189 = arith.mulf %185, %188 : vector<8x512xf32>
    %cst_78 = arith.constant 0.000000e+00 : f32
    %190 = vector.broadcast %cst_78 : f32 to vector<8x512xf32>
    %191 = arith.cmpf oge, %189, %190 : vector<8x512xf32>
    %cst_79 = arith.constant 1.000000e+00 : f32
    %cst_80 = arith.constant -1.000000e+00 : f32
    %192 = vector.broadcast %cst_79 : f32 to vector<8x512xf32>
    %193 = vector.broadcast %cst_80 : f32 to vector<8x512xf32>
    %194 = arith.select %191, %192, %193 : vector<8x512xi1>, vector<8x512xf32>
    %195 = math.absf %189 : vector<8x512xf32>
    %cst_81 = arith.constant 0.327591091 : f32
    %196 = vector.broadcast %cst_81 : f32 to vector<8x512xf32>
    %197 = arith.mulf %196, %195 : vector<8x512xf32>
    %cst_82 = arith.constant 1.000000e+00 : f32
    %198 = vector.broadcast %cst_82 : f32 to vector<8x512xf32>
    %199 = arith.addf %198, %197 : vector<8x512xf32>
    %200 = tpu.reciprocal %199 {approx = true} : vector<8x512xf32> -> vector<8x512xf32>
    %cst_83 = arith.constant 1.06140542 : f32
    %201 = vector.broadcast %cst_83 : f32 to vector<8x512xf32>
    %202 = arith.mulf %201, %200 : vector<8x512xf32>
    %cst_84 = arith.constant -1.45315206 : f32
    %203 = vector.broadcast %cst_84 : f32 to vector<8x512xf32>
    %204 = arith.addf %202, %203 : vector<8x512xf32>
    %205 = arith.mulf %204, %200 : vector<8x512xf32>
    %cst_85 = arith.constant 1.42141378 : f32
    %206 = vector.broadcast %cst_85 : f32 to vector<8x512xf32>
    %207 = arith.addf %205, %206 : vector<8x512xf32>
    %208 = arith.mulf %207, %200 : vector<8x512xf32>
    %cst_86 = arith.constant -0.284496725 : f32
    %209 = vector.broadcast %cst_86 : f32 to vector<8x512xf32>
    %210 = arith.addf %208, %209 : vector<8x512xf32>
    %211 = arith.mulf %210, %200 : vector<8x512xf32>
    %cst_87 = arith.constant 0.254829586 : f32
    %212 = vector.broadcast %cst_87 : f32 to vector<8x512xf32>
    %213 = arith.addf %211, %212 : vector<8x512xf32>
    %214 = arith.mulf %213, %200 : vector<8x512xf32>
    %cst_88 = arith.constant 0.000000e+00 : f32
    %215 = vector.broadcast %cst_88 : f32 to vector<8x512xf32>
    %216 = arith.subf %215, %195 : vector<8x512xf32>
    %217 = arith.mulf %216, %195 : vector<8x512xf32>
    %218 = math.exp %217 : vector<8x512xf32>
    %219 = arith.mulf %214, %218 : vector<8x512xf32>
    %cst_89 = arith.constant 1.000000e+00 : f32
    %220 = vector.broadcast %cst_89 : f32 to vector<8x512xf32>
    %221 = arith.subf %220, %219 : vector<8x512xf32>
    %222 = arith.mulf %194, %221 : vector<8x512xf32>
    %cst_90 = arith.constant 1.000000e+00 : f32
    %223 = vector.broadcast %cst_90 : f32 to vector<8x512xf32>
    %224 = arith.addf %223, %222 : vector<8x512xf32>
    %225 = arith.mulf %187, %224 : vector<8x512xf32>
    %226 = arith.addf %225, %8 : vector<8x512xf32>
    %c6_91 = arith.constant 6 : index
    %c0_92 = arith.constant 0 : index
    %227 = vector.load %arg2[%c6_91, %c0_92] : memref<25x512xf32, #tpu.memory_space<vmem>>, vector<1x512xf32>
    %c17_i32_93 = arith.constant 17 : i32
    %228 = tpu.dynamic_rotate %226 by %c17_i32_93 dim 1 : vector<8x512xf32>, i32 -> vector<8x512xf32>
    %229 = vector.broadcast %227 : vector<1x512xf32> to vector<8x512xf32>
    %230 = arith.mulf %228, %229 : vector<8x512xf32>
    %231 = arith.truncf %230 : vector<8x512xf32> to vector<8x512xbf16>
    %c0_94 = arith.constant 0 : index
    %c0_95 = arith.constant 0 : index
    %232 = vector.load %arg18[%c0_94, %c0_95] : memref<72x512xbf16, #tpu.memory_space<vmem>>, vector<8x512xbf16>
    tpu.vector_store %arg18[%c0_94, %c0_95], %231 {strides = array<i32>} : memref<72x512xbf16, #tpu.memory_space<vmem>>, vector<8x512xbf16>,
    %c7_96 = arith.constant 7 : index
    %c0_97 = arith.constant 0 : index
    %233 = vector.load %arg2[%c7_96, %c0_97] : memref<25x512xf32, #tpu.memory_space<vmem>>, vector<1x512xf32>
    %c16_i32_98 = arith.constant 16 : i32
    %234 = tpu.dynamic_rotate %226 by %c16_i32_98 dim 1 : vector<8x512xf32>, i32 -> vector<8x512xf32>
    %235 = vector.broadcast %233 : vector<1x512xf32> to vector<8x512xf32>
    %236 = arith.mulf %234, %235 : vector<8x512xf32>
    %237 = arith.truncf %236 : vector<8x512xf32> to vector<8x512xbf16>
    %c8_99 = arith.constant 8 : index
    %c0_100 = arith.constant 0 : index
    %238 = vector.load %arg18[%c8_99, %c0_100] : memref<72x512xbf16, #tpu.memory_space<vmem>>, vector<8x512xbf16>
    tpu.vector_store %arg18[%c8_99, %c0_100], %237 {strides = array<i32>} : memref<72x512xbf16, #tpu.memory_space<vmem>>, vector<8x512xbf16>,
    %c8_101 = arith.constant 8 : index
    %c0_102 = arith.constant 0 : index
    %239 = vector.load %arg2[%c8_101, %c0_102] : memref<25x512xf32, #tpu.memory_space<vmem>>, vector<1x512xf32>
    %c15_i32_103 = arith.constant 15 : i32
    %240 = tpu.dynamic_rotate %226 by %c15_i32_103 dim 1 : vector<8x512xf32>, i32 -> vector<8x512xf32>
    %241 = vector.broadcast %239 : vector<1x512xf32> to vector<8x512xf32>
    %242 = arith.mulf %240, %241 : vector<8x512xf32>
    %243 = arith.truncf %242 : vector<8x512xf32> to vector<8x512xbf16>
    %c16_104 = arith.constant 16 : index
    %c0_105 = arith.constant 0 : index
    %244 = vector.load %arg18[%c16_104, %c0_105] : memref<72x512xbf16, #tpu.memory_space<vmem>>, vector<8x512xbf16>
    tpu.vector_store %arg18[%c16_104, %c0_105], %243 {strides = array<i32>} : memref<72x512xbf16, #tpu.memory_space<vmem>>, vector<8x512xbf16>,
    %c11_106 = arith.constant 11 : index
    %c0_107 = arith.constant 0 : index
    %245 = vector.load %arg2[%c11_106, %c0_107] : memref<25x512xf32, #tpu.memory_space<vmem>>, vector<1x512xf32>
    %c1_i32_108 = arith.constant 1 : i32
    %246 = tpu.dynamic_rotate %226 by %c1_i32_108 dim 1 : vector<8x512xf32>, i32 -> vector<8x512xf32>
    %247 = vector.broadcast %245 : vector<1x512xf32> to vector<8x512xf32>
    %248 = arith.mulf %246, %247 : vector<8x512xf32>
    %249 = arith.truncf %248 : vector<8x512xf32> to vector<8x512xbf16>
    %c24_109 = arith.constant 24 : index
    %c0_110 = arith.constant 0 : index
    %250 = vector.load %arg18[%c24_109, %c0_110] : memref<72x512xbf16, #tpu.memory_space<vmem>>, vector<8x512xbf16>
    tpu.vector_store %arg18[%c24_109, %c0_110], %249 {strides = array<i32>} : memref<72x512xbf16, #tpu.memory_space<vmem>>, vector<8x512xbf16>,
    %251 = arith.truncf %226 : vector<8x512xf32> to vector<8x512xbf16>
    %c32_111 = arith.constant 32 : index
    %c0_112 = arith.constant 0 : index
    %252 = vector.load %arg18[%c32_111, %c0_112] : memref<72x512xbf16, #tpu.memory_space<vmem>>, vector<8x512xbf16>
    tpu.vector_store %arg18[%c32_111, %c0_112], %251 {strides = array<i32>} : memref<72x512xbf16, #tpu.memory_space<vmem>>, vector<8x512xbf16>,
    %c13_113 = arith.constant 13 : index
    %c0_114 = arith.constant 0 : index
    %253 = vector.load %arg2[%c13_113, %c0_114] : memref<25x512xf32, #tpu.memory_space<vmem>>, vector<1x512xf32>
    %c511_i32_115 = arith.constant 511 : i32
    %254 = tpu.dynamic_rotate %226 by %c511_i32_115 dim 1 : vector<8x512xf32>, i32 -> vector<8x512xf32>
    %255 = vector.broadcast %253 : vector<1x512xf32> to vector<8x512xf32>
    %256 = arith.mulf %254, %255 : vector<8x512xf32>
    %257 = arith.truncf %256 : vector<8x512xf32> to vector<8x512xbf16>
    %c40_116 = arith.constant 40 : index
    %c0_117 = arith.constant 0 : index
    %258 = vector.load %arg18[%c40_116, %c0_117] : memref<72x512xbf16, #tpu.memory_space<vmem>>, vector<8x512xbf16>
    tpu.vector_store %arg18[%c40_116, %c0_117], %257 {strides = array<i32>} : memref<72x512xbf16, #tpu.memory_space<vmem>>, vector<8x512xbf16>,
    %c16_118 = arith.constant 16 : index
    %c0_119 = arith.constant 0 : index
    %259 = vector.load %arg2[%c16_118, %c0_119] : memref<25x512xf32, #tpu.memory_space<vmem>>, vector<1x512xf32>
    %c497_i32_120 = arith.constant 497 : i32
    %260 = tpu.dynamic_rotate %226 by %c497_i32_120 dim 1 : vector<8x512xf32>, i32 -> vector<8x512xf32>
    %261 = vector.broadcast %259 : vector<1x512xf32> to vector<8x512xf32>
    %262 = arith.mulf %260, %261 : vector<8x512xf32>
    %263 = arith.truncf %262 : vector<8x512xf32> to vector<8x512xbf16>
    %c48_121 = arith.constant 48 : index
    %c0_122 = arith.constant 0 : index
    %264 = vector.load %arg18[%c48_121, %c0_122] : memref<72x512xbf16, #tpu.memory_space<vmem>>, vector<8x512xbf16>
    tpu.vector_store %arg18[%c48_121, %c0_122], %263 {strides = array<i32>} : memref<72x512xbf16, #tpu.memory_space<vmem>>, vector<8x512xbf16>,
    %c17_123 = arith.constant 17 : index
    %c0_124 = arith.constant 0 : index
    %265 = vector.load %arg2[%c17_123, %c0_124] : memref<25x512xf32, #tpu.memory_space<vmem>>, vector<1x512xf32>
    %c496_i32_125 = arith.constant 496 : i32
    %266 = tpu.dynamic_rotate %226 by %c496_i32_125 dim 1 : vector<8x512xf32>, i32 -> vector<8x512xf32>
    %267 = vector.broadcast %265 : vector<1x512xf32> to vector<8x512xf32>
    %268 = arith.mulf %266, %267 : vector<8x512xf32>
    %269 = arith.truncf %268 : vector<8x512xf32> to vector<8x512xbf16>
    %c56_126 = arith.constant 56 : index
    %c0_127 = arith.constant 0 : index
    %270 = vector.load %arg18[%c56_126, %c0_127] : memref<72x512xbf16, #tpu.memory_space<vmem>>, vector<8x512xbf16>
    tpu.vector_store %arg18[%c56_126, %c0_127], %269 {strides = array<i32>} : memref<72x512xbf16, #tpu.memory_space<vmem>>, vector<8x512xbf16>,
    %c18_128 = arith.constant 18 : index
    %c0_129 = arith.constant 0 : index
    %271 = vector.load %arg2[%c18_128, %c0_129] : memref<25x512xf32, #tpu.memory_space<vmem>>, vector<1x512xf32>
    %c495_i32_130 = arith.constant 495 : i32
    %272 = tpu.dynamic_rotate %226 by %c495_i32_130 dim 1 : vector<8x512xf32>, i32 -> vector<8x512xf32>
    %273 = vector.broadcast %271 : vector<1x512xf32> to vector<8x512xf32>
    %274 = arith.mulf %272, %273 : vector<8x512xf32>
    %275 = arith.truncf %274 : vector<8x512xf32> to vector<8x512xbf16>
    %c64_131 = arith.constant 64 : index
    %c0_132 = arith.constant 0 : index
    %276 = vector.load %arg18[%c64_131, %c0_132] : memref<72x512xbf16, #tpu.memory_space<vmem>>, vector<8x512xbf16>
    tpu.vector_store %arg18[%c64_131, %c0_132], %275 {strides = array<i32>} : memref<72x512xbf16, #tpu.memory_space<vmem>>, vector<8x512xbf16>,
    %c0_133 = arith.constant 0 : index
    %c0_134 = arith.constant 0 : index
    %277 = vector.load %arg5[%c0_133, %c0_134] : memref<8x72xbf16, #tpu.memory_space<vmem>>, vector<8x72xbf16>
    %c0_135 = arith.constant 0 : index
    %c0_136 = arith.constant 0 : index
    %278 = vector.load %arg18[%c0_135, %c0_136] : memref<72x512xbf16, #tpu.memory_space<vmem>>, vector<72x512xbf16>
    %cst_137 = arith.constant dense<0.000000e+00> : vector<8x512xf32>
    %279 = tpu.matmul %277, %278, %cst_137 {dimension_numbers = #tpu.dot_dimension_numbers<[1], [0], [0], [1], [0, 0, 1, 1], [], []>} : vector<8x72xbf16>, vector<72x512xbf16>, vector<8x512xf32> -> vector<8x512xf32>
    %c0_138 = arith.constant 0 : index
    %c0_139 = arith.constant 0 : index
    %280 = vector.load %arg6[%c0_138, %c0_139] : memref<8x1xf32, #tpu.memory_space<vmem>>, vector<8x1xf32>
    %281 = vector.broadcast %280 : vector<8x1xf32> to vector<8x512xf32>
    %282 = arith.addf %279, %281 : vector<8x512xf32>
    %cst_140 = arith.constant 5.000000e-01 : f32
    %283 = vector.broadcast %cst_140 : f32 to vector<8x512xf32>
    %284 = arith.mulf %283, %282 : vector<8x512xf32>
    %cst_141 = arith.constant 0.707106769 : f32
    %285 = vector.broadcast %cst_141 : f32 to vector<8x512xf32>
    %286 = arith.mulf %282, %285 : vector<8x512xf32>
    %cst_142 = arith.constant 0.000000e+00 : f32
    %287 = vector.broadcast %cst_142 : f32 to vector<8x512xf32>
    %288 = arith.cmpf oge, %286, %287 : vector<8x512xf32>
    %cst_143 = arith.constant 1.000000e+00 : f32
    %cst_144 = arith.constant -1.000000e+00 : f32
    %289 = vector.broadcast %cst_143 : f32 to vector<8x512xf32>
    %290 = vector.broadcast %cst_144 : f32 to vector<8x512xf32>
    %291 = arith.select %288, %289, %290 : vector<8x512xi1>, vector<8x512xf32>
    %292 = math.absf %286 : vector<8x512xf32>
    %cst_145 = arith.constant 0.327591091 : f32
    %293 = vector.broadcast %cst_145 : f32 to vector<8x512xf32>
    %294 = arith.mulf %293, %292 : vector<8x512xf32>
    %cst_146 = arith.constant 1.000000e+00 : f32
    %295 = vector.broadcast %cst_146 : f32 to vector<8x512xf32>
    %296 = arith.addf %295, %294 : vector<8x512xf32>
    %297 = tpu.reciprocal %296 {approx = true} : vector<8x512xf32> -> vector<8x512xf32>
    %cst_147 = arith.constant 1.06140542 : f32
    %298 = vector.broadcast %cst_147 : f32 to vector<8x512xf32>
    %299 = arith.mulf %298, %297 : vector<8x512xf32>
    %cst_148 = arith.constant -1.45315206 : f32
    %300 = vector.broadcast %cst_148 : f32 to vector<8x512xf32>
    %301 = arith.addf %299, %300 : vector<8x512xf32>
    %302 = arith.mulf %301, %297 : vector<8x512xf32>
    %cst_149 = arith.constant 1.42141378 : f32
    %303 = vector.broadcast %cst_149 : f32 to vector<8x512xf32>
    %304 = arith.addf %302, %303 : vector<8x512xf32>
    %305 = arith.mulf %304, %297 : vector<8x512xf32>
    %cst_150 = arith.constant -0.284496725 : f32
    %306 = vector.broadcast %cst_150 : f32 to vector<8x512xf32>
    %307 = arith.addf %305, %306 : vector<8x512xf32>
    %308 = arith.mulf %307, %297 : vector<8x512xf32>
    %cst_151 = arith.constant 0.254829586 : f32
    %309 = vector.broadcast %cst_151 : f32 to vector<8x512xf32>
    %310 = arith.addf %308, %309 : vector<8x512xf32>
    %311 = arith.mulf %310, %297 : vector<8x512xf32>
    %cst_152 = arith.constant 0.000000e+00 : f32
    %312 = vector.broadcast %cst_152 : f32 to vector<8x512xf32>
    %313 = arith.subf %312, %292 : vector<8x512xf32>
    %314 = arith.mulf %313, %292 : vector<8x512xf32>
    %315 = math.exp %314 : vector<8x512xf32>
    %316 = arith.mulf %311, %315 : vector<8x512xf32>
    %cst_153 = arith.constant 1.000000e+00 : f32
    %317 = vector.broadcast %cst_153 : f32 to vector<8x512xf32>
    %318 = arith.subf %317, %316 : vector<8x512xf32>
    %319 = arith.mulf %291, %318 : vector<8x512xf32>
    %cst_154 = arith.constant 1.000000e+00 : f32
    %320 = vector.broadcast %cst_154 : f32 to vector<8x512xf32>
    %321 = arith.addf %320, %319 : vector<8x512xf32>
    %322 = arith.mulf %284, %321 : vector<8x512xf32>
    %c6_155 = arith.constant 6 : index
    %c0_156 = arith.constant 0 : index
    %323 = vector.load %arg2[%c6_155, %c0_156] : memref<25x512xf32, #tpu.memory_space<vmem>>, vector<1x512xf32>
    %c17_i32_157 = arith.constant 17 : i32
    %324 = tpu.dynamic_rotate %322 by %c17_i32_157 dim 1 : vector<8x512xf32>, i32 -> vector<8x512xf32>
    %325 = vector.broadcast %323 : vector<1x512xf32> to vector<8x512xf32>
    %326 = arith.mulf %324, %325 : vector<8x512xf32>
    %327 = vector.extract_strided_slice %326 {offsets = [0, 0], sizes = [4, 512], strides = [1, 1]} : vector<8x512xf32> to vector<4x512xf32>
    %328 = arith.truncf %327 : vector<4x512xf32> to vector<4x512xbf16>
    %c0_158 = arith.constant 0 : index
    %c0_159 = arith.constant 0 : index
    %329 = vector.load %arg19[%c0_158, %c0_159] : memref<144x512xbf16, #tpu.memory_space<vmem>>, vector<4x512xbf16>
    tpu.vector_store %arg19[%c0_158, %c0_159], %328 {strides = array<i32>} : memref<144x512xbf16, #tpu.memory_space<vmem>>, vector<4x512xbf16>,
    %c7_160 = arith.constant 7 : index
    %c0_161 = arith.constant 0 : index
    %330 = vector.load %arg2[%c7_160, %c0_161] : memref<25x512xf32, #tpu.memory_space<vmem>>, vector<1x512xf32>
    %c16_i32_162 = arith.constant 16 : i32
    %331 = tpu.dynamic_rotate %322 by %c16_i32_162 dim 1 : vector<8x512xf32>, i32 -> vector<8x512xf32>
    %332 = vector.broadcast %330 : vector<1x512xf32> to vector<8x512xf32>
    %333 = arith.mulf %331, %332 : vector<8x512xf32>
    %334 = vector.extract_strided_slice %333 {offsets = [0, 0], sizes = [4, 512], strides = [1, 1]} : vector<8x512xf32> to vector<4x512xf32>
    %335 = arith.truncf %334 : vector<4x512xf32> to vector<4x512xbf16>
    %c4_163 = arith.constant 4 : index
    %c0_164 = arith.constant 0 : index
    %336 = vector.load %arg19[%c4_163, %c0_164] : memref<144x512xbf16, #tpu.memory_space<vmem>>, vector<4x512xbf16>
    tpu.vector_store %arg19[%c4_163, %c0_164], %335 {strides = array<i32>} : memref<144x512xbf16, #tpu.memory_space<vmem>>, vector<4x512xbf16>,
    %c8_165 = arith.constant 8 : index
    %c0_166 = arith.constant 0 : index
    %337 = vector.load %arg2[%c8_165, %c0_166] : memref<25x512xf32, #tpu.memory_space<vmem>>, vector<1x512xf32>
    %c15_i32_167 = arith.constant 15 : i32
    %338 = tpu.dynamic_rotate %322 by %c15_i32_167 dim 1 : vector<8x512xf32>, i32 -> vector<8x512xf32>
    %339 = vector.broadcast %337 : vector<1x512xf32> to vector<8x512xf32>
    %340 = arith.mulf %338, %339 : vector<8x512xf32>
    %341 = vector.extract_strided_slice %340 {offsets = [0, 0], sizes = [4, 512], strides = [1, 1]} : vector<8x512xf32> to vector<4x512xf32>
    %342 = arith.truncf %341 : vector<4x512xf32> to vector<4x512xbf16>
    %c8_168 = arith.constant 8 : index
    %c0_169 = arith.constant 0 : index
    %343 = vector.load %arg19[%c8_168, %c0_169] : memref<144x512xbf16, #tpu.memory_space<vmem>>, vector<4x512xbf16>
    tpu.vector_store %arg19[%c8_168, %c0_169], %342 {strides = array<i32>} : memref<144x512xbf16, #tpu.memory_space<vmem>>, vector<4x512xbf16>,
    %c11_170 = arith.constant 11 : index
    %c0_171 = arith.constant 0 : index
    %344 = vector.load %arg2[%c11_170, %c0_171] : memref<25x512xf32, #tpu.memory_space<vmem>>, vector<1x512xf32>
    %c1_i32_172 = arith.constant 1 : i32
    %345 = tpu.dynamic_rotate %322 by %c1_i32_172 dim 1 : vector<8x512xf32>, i32 -> vector<8x512xf32>
    %346 = vector.broadcast %344 : vector<1x512xf32> to vector<8x512xf32>
    %347 = arith.mulf %345, %346 : vector<8x512xf32>
    %348 = vector.extract_strided_slice %347 {offsets = [0, 0], sizes = [4, 512], strides = [1, 1]} : vector<8x512xf32> to vector<4x512xf32>
    %349 = arith.truncf %348 : vector<4x512xf32> to vector<4x512xbf16>
    %c12_173 = arith.constant 12 : index
    %c0_174 = arith.constant 0 : index
    %350 = vector.load %arg19[%c12_173, %c0_174] : memref<144x512xbf16, #tpu.memory_space<vmem>>, vector<4x512xbf16>
    tpu.vector_store %arg19[%c12_173, %c0_174], %349 {strides = array<i32>} : memref<144x512xbf16, #tpu.memory_space<vmem>>, vector<4x512xbf16>,
    %351 = vector.extract_strided_slice %322 {offsets = [0, 0], sizes = [4, 512], strides = [1, 1]} : vector<8x512xf32> to vector<4x512xf32>
    %352 = arith.truncf %351 : vector<4x512xf32> to vector<4x512xbf16>
    %c16_175 = arith.constant 16 : index
    %c0_176 = arith.constant 0 : index
    %353 = vector.load %arg19[%c16_175, %c0_176] : memref<144x512xbf16, #tpu.memory_space<vmem>>, vector<4x512xbf16>
    tpu.vector_store %arg19[%c16_175, %c0_176], %352 {strides = array<i32>} : memref<144x512xbf16, #tpu.memory_space<vmem>>, vector<4x512xbf16>,
    %c13_177 = arith.constant 13 : index
    %c0_178 = arith.constant 0 : index
    %354 = vector.load %arg2[%c13_177, %c0_178] : memref<25x512xf32, #tpu.memory_space<vmem>>, vector<1x512xf32>
    %c511_i32_179 = arith.constant 511 : i32
    %355 = tpu.dynamic_rotate %322 by %c511_i32_179 dim 1 : vector<8x512xf32>, i32 -> vector<8x512xf32>
    %356 = vector.broadcast %354 : vector<1x512xf32> to vector<8x512xf32>
    %357 = arith.mulf %355, %356 : vector<8x512xf32>
    %358 = vector.extract_strided_slice %357 {offsets = [0, 0], sizes = [4, 512], strides = [1, 1]} : vector<8x512xf32> to vector<4x512xf32>
    %359 = arith.truncf %358 : vector<4x512xf32> to vector<4x512xbf16>
    %c20_180 = arith.constant 20 : index
    %c0_181 = arith.constant 0 : index
    %360 = vector.load %arg19[%c20_180, %c0_181] : memref<144x512xbf16, #tpu.memory_space<vmem>>, vector<4x512xbf16>
    tpu.vector_store %arg19[%c20_180, %c0_181], %359 {strides = array<i32>} : memref<144x512xbf16, #tpu.memory_space<vmem>>, vector<4x512xbf16>,
    %c16_182 = arith.constant 16 : index
    %c0_183 = arith.constant 0 : index
    %361 = vector.load %arg2[%c16_182, %c0_183] : memref<25x512xf32, #tpu.memory_space<vmem>>, vector<1x512xf32>
    %c497_i32_184 = arith.constant 497 : i32
    %362 = tpu.dynamic_rotate %322 by %c497_i32_184 dim 1 : vector<8x512xf32>, i32 -> vector<8x512xf32>
    %363 = vector.broadcast %361 : vector<1x512xf32> to vector<8x512xf32>
    %364 = arith.mulf %362, %363 : vector<8x512xf32>
    %365 = vector.extract_strided_slice %364 {offsets = [0, 0], sizes = [4, 512], strides = [1, 1]} : vector<8x512xf32> to vector<4x512xf32>
    %366 = arith.truncf %365 : vector<4x512xf32> to vector<4x512xbf16>
    %c24_185 = arith.constant 24 : index
    %c0_186 = arith.constant 0 : index
    %367 = vector.load %arg19[%c24_185, %c0_186] : memref<144x512xbf16, #tpu.memory_space<vmem>>, vector<4x512xbf16>
    tpu.vector_store %arg19[%c24_185, %c0_186], %366 {strides = array<i32>} : memref<144x512xbf16, #tpu.memory_space<vmem>>, vector<4x512xbf16>,
    %c17_187 = arith.constant 17 : index
    %c0_188 = arith.constant 0 : index
    %368 = vector.load %arg2[%c17_187, %c0_188] : memref<25x512xf32, #tpu.memory_space<vmem>>, vector<1x512xf32>
    %c496_i32_189 = arith.constant 496 : i32
    %369 = tpu.dynamic_rotate %322 by %c496_i32_189 dim 1 : vector<8x512xf32>, i32 -> vector<8x512xf32>
    %370 = vector.broadcast %368 : vector<1x512xf32> to vector<8x512xf32>
    %371 = arith.mulf %369, %370 : vector<8x512xf32>
    %372 = vector.extract_strided_slice %371 {offsets = [0, 0], sizes = [4, 512], strides = [1, 1]} : vector<8x512xf32> to vector<4x512xf32>
    %373 = arith.truncf %372 : vector<4x512xf32> to vector<4x512xbf16>
    %c28_190 = arith.constant 28 : index
    %c0_191 = arith.constant 0 : index
    %374 = vector.load %arg19[%c28_190, %c0_191] : memref<144x512xbf16, #tpu.memory_space<vmem>>, vector<4x512xbf16>
    tpu.vector_store %arg19[%c28_190, %c0_191], %373 {strides = array<i32>} : memref<144x512xbf16, #tpu.memory_space<vmem>>, vector<4x512xbf16>,
    %c18_192 = arith.constant 18 : index
    %c0_193 = arith.constant 0 : index
    %375 = vector.load %arg2[%c18_192, %c0_193] : memref<25x512xf32, #tpu.memory_space<vmem>>, vector<1x512xf32>
    %c495_i32_194 = arith.constant 495 : i32
    %376 = tpu.dynamic_rotate %322 by %c495_i32_194 dim 1 : vector<8x512xf32>, i32 -> vector<8x512xf32>
    %377 = vector.broadcast %375 : vector<1x512xf32> to vector<8x512xf32>
    %378 = arith.mulf %376, %377 : vector<8x512xf32>
    %379 = vector.extract_strided_slice %378 {offsets = [0, 0], sizes = [4, 512], strides = [1, 1]} : vector<8x512xf32> to vector<4x512xf32>
    %380 = arith.truncf %379 : vector<4x512xf32> to vector<4x512xbf16>
    %c32_195 = arith.constant 32 : index
    %c0_196 = arith.constant 0 : index
    %381 = vector.load %arg19[%c32_195, %c0_196] : memref<144x512xbf16, #tpu.memory_space<vmem>>, vector<4x512xbf16>
    tpu.vector_store %arg19[%c32_195, %c0_196], %380 {strides = array<i32>} : memref<144x512xbf16, #tpu.memory_space<vmem>>, vector<4x512xbf16>,
    %c0_197 = arith.constant 0 : index
    %c0_198 = arith.constant 0 : index
    %382 = vector.load %arg7[%c0_197, %c0_198] : memref<8x36xbf16, #tpu.memory_space<vmem>>, vector<8x36xbf16>
    %c0_199 = arith.constant 0 : index
    %c0_200 = arith.constant 0 : index
    %383 = vector.load %arg19[%c0_199, %c0_200] : memref<144x512xbf16, #tpu.memory_space<vmem>>, vector<36x512xbf16>
    %cst_201 = arith.constant dense<0.000000e+00> : vector<8x512xf32>
    %384 = tpu.matmul %382, %383, %cst_201 {dimension_numbers = #tpu.dot_dimension_numbers<[1], [0], [0], [1], [0, 0, 1, 1], [], []>} : vector<8x36xbf16>, vector<36x512xbf16>, vector<8x512xf32> -> vector<8x512xf32>
    %c0_202 = arith.constant 0 : index
    %c0_203 = arith.constant 0 : index
    %385 = vector.load %arg10[%c0_202, %c0_203] : memref<8x1xf32, #tpu.memory_space<vmem>>, vector<8x1xf32>
    %386 = vector.broadcast %385 : vector<8x1xf32> to vector<8x512xf32>
    %387 = arith.addf %384, %386 : vector<8x512xf32>
    %cst_204 = arith.constant 5.000000e-01 : f32
    %388 = vector.broadcast %cst_204 : f32 to vector<8x512xf32>
    %389 = arith.mulf %388, %387 : vector<8x512xf32>
    %cst_205 = arith.constant 0.707106769 : f32
    %390 = vector.broadcast %cst_205 : f32 to vector<8x512xf32>
    %391 = arith.mulf %387, %390 : vector<8x512xf32>
    %cst_206 = arith.constant 0.000000e+00 : f32
    %392 = vector.broadcast %cst_206 : f32 to vector<8x512xf32>
    %393 = arith.cmpf oge, %391, %392 : vector<8x512xf32>
    %cst_207 = arith.constant 1.000000e+00 : f32
    %cst_208 = arith.constant -1.000000e+00 : f32
    %394 = vector.broadcast %cst_207 : f32 to vector<8x512xf32>
    %395 = vector.broadcast %cst_208 : f32 to vector<8x512xf32>
    %396 = arith.select %393, %394, %395 : vector<8x512xi1>, vector<8x512xf32>
    %397 = math.absf %391 : vector<8x512xf32>
    %cst_209 = arith.constant 0.327591091 : f32
    %398 = vector.broadcast %cst_209 : f32 to vector<8x512xf32>
    %399 = arith.mulf %398, %397 : vector<8x512xf32>
    %cst_210 = arith.constant 1.000000e+00 : f32
    %400 = vector.broadcast %cst_210 : f32 to vector<8x512xf32>
    %401 = arith.addf %400, %399 : vector<8x512xf32>
    %402 = tpu.reciprocal %401 {approx = true} : vector<8x512xf32> -> vector<8x512xf32>
    %cst_211 = arith.constant 1.06140542 : f32
    %403 = vector.broadcast %cst_211 : f32 to vector<8x512xf32>
    %404 = arith.mulf %403, %402 : vector<8x512xf32>
    %cst_212 = arith.constant -1.45315206 : f32
    %405 = vector.broadcast %cst_212 : f32 to vector<8x512xf32>
    %406 = arith.addf %404, %405 : vector<8x512xf32>
    %407 = arith.mulf %406, %402 : vector<8x512xf32>
    %cst_213 = arith.constant 1.42141378 : f32
    %408 = vector.broadcast %cst_213 : f32 to vector<8x512xf32>
    %409 = arith.addf %407, %408 : vector<8x512xf32>
    %410 = arith.mulf %409, %402 : vector<8x512xf32>
    %cst_214 = arith.constant -0.284496725 : f32
    %411 = vector.broadcast %cst_214 : f32 to vector<8x512xf32>
    %412 = arith.addf %410, %411 : vector<8x512xf32>
    %413 = arith.mulf %412, %402 : vector<8x512xf32>
    %cst_215 = arith.constant 0.254829586 : f32
    %414 = vector.broadcast %cst_215 : f32 to vector<8x512xf32>
    %415 = arith.addf %413, %414 : vector<8x512xf32>
    %416 = arith.mulf %415, %402 : vector<8x512xf32>
    %cst_216 = arith.constant 0.000000e+00 : f32
    %417 = vector.broadcast %cst_216 : f32 to vector<8x512xf32>
    %418 = arith.subf %417, %397 : vector<8x512xf32>
    %419 = arith.mulf %418, %397 : vector<8x512xf32>
    %420 = math.exp %419 : vector<8x512xf32>
    %421 = arith.mulf %416, %420 : vector<8x512xf32>
    %cst_217 = arith.constant 1.000000e+00 : f32
    %422 = vector.broadcast %cst_217 : f32 to vector<8x512xf32>
    %423 = arith.subf %422, %421 : vector<8x512xf32>
    %424 = arith.mulf %396, %423 : vector<8x512xf32>
    %cst_218 = arith.constant 1.000000e+00 : f32
    %425 = vector.broadcast %cst_218 : f32 to vector<8x512xf32>
    %426 = arith.addf %425, %424 : vector<8x512xf32>
    %427 = arith.mulf %389, %426 : vector<8x512xf32>
    %c6_219 = arith.constant 6 : index
    %c0_220 = arith.constant 0 : index
    %428 = vector.load %arg2[%c6_219, %c0_220] : memref<25x512xf32, #tpu.memory_space<vmem>>, vector<1x512xf32>
    %c17_i32_221 = arith.constant 17 : i32
    %429 = tpu.dynamic_rotate %427 by %c17_i32_221 dim 1 : vector<8x512xf32>, i32 -> vector<8x512xf32>
    %430 = vector.broadcast %428 : vector<1x512xf32> to vector<8x512xf32>
    %431 = arith.mulf %429, %430 : vector<8x512xf32>
    %432 = vector.extract_strided_slice %431 {offsets = [0, 0], sizes = [4, 512], strides = [1, 1]} : vector<8x512xf32> to vector<4x512xf32>
    %433 = arith.truncf %432 : vector<4x512xf32> to vector<4x512xbf16>
    %c36_222 = arith.constant 36 : index
    %c0_223 = arith.constant 0 : index
    %434 = vector.load %arg19[%c36_222, %c0_223] : memref<144x512xbf16, #tpu.memory_space<vmem>>, vector<4x512xbf16>
    tpu.vector_store %arg19[%c36_222, %c0_223], %433 {strides = array<i32>} : memref<144x512xbf16, #tpu.memory_space<vmem>>, vector<4x512xbf16>,
    %c7_224 = arith.constant 7 : index
    %c0_225 = arith.constant 0 : index
    %435 = vector.load %arg2[%c7_224, %c0_225] : memref<25x512xf32, #tpu.memory_space<vmem>>, vector<1x512xf32>
    %c16_i32_226 = arith.constant 16 : i32
    %436 = tpu.dynamic_rotate %427 by %c16_i32_226 dim 1 : vector<8x512xf32>, i32 -> vector<8x512xf32>
    %437 = vector.broadcast %435 : vector<1x512xf32> to vector<8x512xf32>
    %438 = arith.mulf %436, %437 : vector<8x512xf32>
    %439 = vector.extract_strided_slice %438 {offsets = [0, 0], sizes = [4, 512], strides = [1, 1]} : vector<8x512xf32> to vector<4x512xf32>
    %440 = arith.truncf %439 : vector<4x512xf32> to vector<4x512xbf16>
    %c40_227 = arith.constant 40 : index
    %c0_228 = arith.constant 0 : index
    %441 = vector.load %arg19[%c40_227, %c0_228] : memref<144x512xbf16, #tpu.memory_space<vmem>>, vector<4x512xbf16>
    tpu.vector_store %arg19[%c40_227, %c0_228], %440 {strides = array<i32>} : memref<144x512xbf16, #tpu.memory_space<vmem>>, vector<4x512xbf16>,
    %c8_229 = arith.constant 8 : index
    %c0_230 = arith.constant 0 : index
    %442 = vector.load %arg2[%c8_229, %c0_230] : memref<25x512xf32, #tpu.memory_space<vmem>>, vector<1x512xf32>
    %c15_i32_231 = arith.constant 15 : i32
    %443 = tpu.dynamic_rotate %427 by %c15_i32_231 dim 1 : vector<8x512xf32>, i32 -> vector<8x512xf32>
    %444 = vector.broadcast %442 : vector<1x512xf32> to vector<8x512xf32>
    %445 = arith.mulf %443, %444 : vector<8x512xf32>
    %446 = vector.extract_strided_slice %445 {offsets = [0, 0], sizes = [4, 512], strides = [1, 1]} : vector<8x512xf32> to vector<4x512xf32>
    %447 = arith.truncf %446 : vector<4x512xf32> to vector<4x512xbf16>
    %c44_232 = arith.constant 44 : index
    %c0_233 = arith.constant 0 : index
    %448 = vector.load %arg19[%c44_232, %c0_233] : memref<144x512xbf16, #tpu.memory_space<vmem>>, vector<4x512xbf16>
    tpu.vector_store %arg19[%c44_232, %c0_233], %447 {strides = array<i32>} : memref<144x512xbf16, #tpu.memory_space<vmem>>, vector<4x512xbf16>,
    %c11_234 = arith.constant 11 : index
    %c0_235 = arith.constant 0 : index
    %449 = vector.load %arg2[%c11_234, %c0_235] : memref<25x512xf32, #tpu.memory_space<vmem>>, vector<1x512xf32>
    %c1_i32_236 = arith.constant 1 : i32
    %450 = tpu.dynamic_rotate %427 by %c1_i32_236 dim 1 : vector<8x512xf32>, i32 -> vector<8x512xf32>
    %451 = vector.broadcast %449 : vector<1x512xf32> to vector<8x512xf32>
    %452 = arith.mulf %450, %451 : vector<8x512xf32>
    %453 = vector.extract_strided_slice %452 {offsets = [0, 0], sizes = [4, 512], strides = [1, 1]} : vector<8x512xf32> to vector<4x512xf32>
    %454 = arith.truncf %453 : vector<4x512xf32> to vector<4x512xbf16>
    %c48_237 = arith.constant 48 : index
    %c0_238 = arith.constant 0 : index
    %455 = vector.load %arg19[%c48_237, %c0_238] : memref<144x512xbf16, #tpu.memory_space<vmem>>, vector<4x512xbf16>
    tpu.vector_store %arg19[%c48_237, %c0_238], %454 {strides = array<i32>} : memref<144x512xbf16, #tpu.memory_space<vmem>>, vector<4x512xbf16>,
    %456 = vector.extract_strided_slice %427 {offsets = [0, 0], sizes = [4, 512], strides = [1, 1]} : vector<8x512xf32> to vector<4x512xf32>
    %457 = arith.truncf %456 : vector<4x512xf32> to vector<4x512xbf16>
    %c52_239 = arith.constant 52 : index
    %c0_240 = arith.constant 0 : index
    %458 = vector.load %arg19[%c52_239, %c0_240] : memref<144x512xbf16, #tpu.memory_space<vmem>>, vector<4x512xbf16>
    tpu.vector_store %arg19[%c52_239, %c0_240], %457 {strides = array<i32>} : memref<144x512xbf16, #tpu.memory_space<vmem>>, vector<4x512xbf16>,
    %c13_241 = arith.constant 13 : index
    %c0_242 = arith.constant 0 : index
    %459 = vector.load %arg2[%c13_241, %c0_242] : memref<25x512xf32, #tpu.memory_space<vmem>>, vector<1x512xf32>
    %c511_i32_243 = arith.constant 511 : i32
    %460 = tpu.dynamic_rotate %427 by %c511_i32_243 dim 1 : vector<8x512xf32>, i32 -> vector<8x512xf32>
    %461 = vector.broadcast %459 : vector<1x512xf32> to vector<8x512xf32>
    %462 = arith.mulf %460, %461 : vector<8x512xf32>
    %463 = vector.extract_strided_slice %462 {offsets = [0, 0], sizes = [4, 512], strides = [1, 1]} : vector<8x512xf32> to vector<4x512xf32>
    %464 = arith.truncf %463 : vector<4x512xf32> to vector<4x512xbf16>
    %c56_244 = arith.constant 56 : index
    %c0_245 = arith.constant 0 : index
    %465 = vector.load %arg19[%c56_244, %c0_245] : memref<144x512xbf16, #tpu.memory_space<vmem>>, vector<4x512xbf16>
    tpu.vector_store %arg19[%c56_244, %c0_245], %464 {strides = array<i32>} : memref<144x512xbf16, #tpu.memory_space<vmem>>, vector<4x512xbf16>,
    %c16_246 = arith.constant 16 : index
    %c0_247 = arith.constant 0 : index
    %466 = vector.load %arg2[%c16_246, %c0_247] : memref<25x512xf32, #tpu.memory_space<vmem>>, vector<1x512xf32>
    %c497_i32_248 = arith.constant 497 : i32
    %467 = tpu.dynamic_rotate %427 by %c497_i32_248 dim 1 : vector<8x512xf32>, i32 -> vector<8x512xf32>
    %468 = vector.broadcast %466 : vector<1x512xf32> to vector<8x512xf32>
    %469 = arith.mulf %467, %468 : vector<8x512xf32>
    %470 = vector.extract_strided_slice %469 {offsets = [0, 0], sizes = [4, 512], strides = [1, 1]} : vector<8x512xf32> to vector<4x512xf32>
    %471 = arith.truncf %470 : vector<4x512xf32> to vector<4x512xbf16>
    %c60_249 = arith.constant 60 : index
    %c0_250 = arith.constant 0 : index
    %472 = vector.load %arg19[%c60_249, %c0_250] : memref<144x512xbf16, #tpu.memory_space<vmem>>, vector<4x512xbf16>
    tpu.vector_store %arg19[%c60_249, %c0_250], %471 {strides = array<i32>} : memref<144x512xbf16, #tpu.memory_space<vmem>>, vector<4x512xbf16>,
    %c17_251 = arith.constant 17 : index
    %c0_252 = arith.constant 0 : index
    %473 = vector.load %arg2[%c17_251, %c0_252] : memref<25x512xf32, #tpu.memory_space<vmem>>, vector<1x512xf32>
    %c496_i32_253 = arith.constant 496 : i32
    %474 = tpu.dynamic_rotate %427 by %c496_i32_253 dim 1 : vector<8x512xf32>, i32 -> vector<8x512xf32>
    %475 = vector.broadcast %473 : vector<1x512xf32> to vector<8x512xf32>
    %476 = arith.mulf %474, %475 : vector<8x512xf32>
    %477 = vector.extract_strided_slice %476 {offsets = [0, 0], sizes = [4, 512], strides = [1, 1]} : vector<8x512xf32> to vector<4x512xf32>
    %478 = arith.truncf %477 : vector<4x512xf32> to vector<4x512xbf16>
    %c64_254 = arith.constant 64 : index
    %c0_255 = arith.constant 0 : index
    %479 = vector.load %arg19[%c64_254, %c0_255] : memref<144x512xbf16, #tpu.memory_space<vmem>>, vector<4x512xbf16>
    tpu.vector_store %arg19[%c64_254, %c0_255], %478 {strides = array<i32>} : memref<144x512xbf16, #tpu.memory_space<vmem>>, vector<4x512xbf16>,
    %c18_256 = arith.constant 18 : index
    %c0_257 = arith.constant 0 : index
    %480 = vector.load %arg2[%c18_256, %c0_257] : memref<25x512xf32, #tpu.memory_space<vmem>>, vector<1x512xf32>
    %c495_i32_258 = arith.constant 495 : i32
    %481 = tpu.dynamic_rotate %427 by %c495_i32_258 dim 1 : vector<8x512xf32>, i32 -> vector<8x512xf32>
    %482 = vector.broadcast %480 : vector<1x512xf32> to vector<8x512xf32>
    %483 = arith.mulf %481, %482 : vector<8x512xf32>
    %484 = vector.extract_strided_slice %483 {offsets = [0, 0], sizes = [4, 512], strides = [1, 1]} : vector<8x512xf32> to vector<4x512xf32>
    %485 = arith.truncf %484 : vector<4x512xf32> to vector<4x512xbf16>
    %c68_259 = arith.constant 68 : index
    %c0_260 = arith.constant 0 : index
    %486 = vector.load %arg19[%c68_259, %c0_260] : memref<144x512xbf16, #tpu.memory_space<vmem>>, vector<4x512xbf16>
    tpu.vector_store %arg19[%c68_259, %c0_260], %485 {strides = array<i32>} : memref<144x512xbf16, #tpu.memory_space<vmem>>, vector<4x512xbf16>,
    %c0_261 = arith.constant 0 : index
    %c0_262 = arith.constant 0 : index
    %487 = vector.load %arg8[%c0_261, %c0_262] : memref<8x72xbf16, #tpu.memory_space<vmem>>, vector<8x72xbf16>
    %c0_263 = arith.constant 0 : index
    %c0_264 = arith.constant 0 : index
    %488 = vector.load %arg19[%c0_263, %c0_264] : memref<144x512xbf16, #tpu.memory_space<vmem>>, vector<72x512xbf16>
    %cst_265 = arith.constant dense<0.000000e+00> : vector<8x512xf32>
    %489 = tpu.matmul %487, %488, %cst_265 {dimension_numbers = #tpu.dot_dimension_numbers<[1], [0], [0], [1], [0, 0, 1, 1], [], []>} : vector<8x72xbf16>, vector<72x512xbf16>, vector<8x512xf32> -> vector<8x512xf32>
    %c0_266 = arith.constant 0 : index
    %c0_267 = arith.constant 0 : index
    %490 = vector.load %arg11[%c0_266, %c0_267] : memref<8x1xf32, #tpu.memory_space<vmem>>, vector<8x1xf32>
    %491 = vector.broadcast %490 : vector<8x1xf32> to vector<8x512xf32>
    %492 = arith.addf %489, %491 : vector<8x512xf32>
    %cst_268 = arith.constant 5.000000e-01 : f32
    %493 = vector.broadcast %cst_268 : f32 to vector<8x512xf32>
    %494 = arith.mulf %493, %492 : vector<8x512xf32>
    %cst_269 = arith.constant 0.707106769 : f32
    %495 = vector.broadcast %cst_269 : f32 to vector<8x512xf32>
    %496 = arith.mulf %492, %495 : vector<8x512xf32>
    %cst_270 = arith.constant 0.000000e+00 : f32
    %497 = vector.broadcast %cst_270 : f32 to vector<8x512xf32>
    %498 = arith.cmpf oge, %496, %497 : vector<8x512xf32>
    %cst_271 = arith.constant 1.000000e+00 : f32
    %cst_272 = arith.constant -1.000000e+00 : f32
    %499 = vector.broadcast %cst_271 : f32 to vector<8x512xf32>
    %500 = vector.broadcast %cst_272 : f32 to vector<8x512xf32>
    %501 = arith.select %498, %499, %500 : vector<8x512xi1>, vector<8x512xf32>
    %502 = math.absf %496 : vector<8x512xf32>
    %cst_273 = arith.constant 0.327591091 : f32
    %503 = vector.broadcast %cst_273 : f32 to vector<8x512xf32>
    %504 = arith.mulf %503, %502 : vector<8x512xf32>
    %cst_274 = arith.constant 1.000000e+00 : f32
    %505 = vector.broadcast %cst_274 : f32 to vector<8x512xf32>
    %506 = arith.addf %505, %504 : vector<8x512xf32>
    %507 = tpu.reciprocal %506 {approx = true} : vector<8x512xf32> -> vector<8x512xf32>
    %cst_275 = arith.constant 1.06140542 : f32
    %508 = vector.broadcast %cst_275 : f32 to vector<8x512xf32>
    %509 = arith.mulf %508, %507 : vector<8x512xf32>
    %cst_276 = arith.constant -1.45315206 : f32
    %510 = vector.broadcast %cst_276 : f32 to vector<8x512xf32>
    %511 = arith.addf %509, %510 : vector<8x512xf32>
    %512 = arith.mulf %511, %507 : vector<8x512xf32>
    %cst_277 = arith.constant 1.42141378 : f32
    %513 = vector.broadcast %cst_277 : f32 to vector<8x512xf32>
    %514 = arith.addf %512, %513 : vector<8x512xf32>
    %515 = arith.mulf %514, %507 : vector<8x512xf32>
    %cst_278 = arith.constant -0.284496725 : f32
    %516 = vector.broadcast %cst_278 : f32 to vector<8x512xf32>
    %517 = arith.addf %515, %516 : vector<8x512xf32>
    %518 = arith.mulf %517, %507 : vector<8x512xf32>
    %cst_279 = arith.constant 0.254829586 : f32
    %519 = vector.broadcast %cst_279 : f32 to vector<8x512xf32>
    %520 = arith.addf %518, %519 : vector<8x512xf32>
    %521 = arith.mulf %520, %507 : vector<8x512xf32>
    %cst_280 = arith.constant 0.000000e+00 : f32
    %522 = vector.broadcast %cst_280 : f32 to vector<8x512xf32>
    %523 = arith.subf %522, %502 : vector<8x512xf32>
    %524 = arith.mulf %523, %502 : vector<8x512xf32>
    %525 = math.exp %524 : vector<8x512xf32>
    %526 = arith.mulf %521, %525 : vector<8x512xf32>
    %cst_281 = arith.constant 1.000000e+00 : f32
    %527 = vector.broadcast %cst_281 : f32 to vector<8x512xf32>
    %528 = arith.subf %527, %526 : vector<8x512xf32>
    %529 = arith.mulf %501, %528 : vector<8x512xf32>
    %cst_282 = arith.constant 1.000000e+00 : f32
    %530 = vector.broadcast %cst_282 : f32 to vector<8x512xf32>
    %531 = arith.addf %530, %529 : vector<8x512xf32>
    %532 = arith.mulf %494, %531 : vector<8x512xf32>
    %c6_283 = arith.constant 6 : index
    %c0_284 = arith.constant 0 : index
    %533 = vector.load %arg2[%c6_283, %c0_284] : memref<25x512xf32, #tpu.memory_space<vmem>>, vector<1x512xf32>
    %c17_i32_285 = arith.constant 17 : i32
    %534 = tpu.dynamic_rotate %532 by %c17_i32_285 dim 1 : vector<8x512xf32>, i32 -> vector<8x512xf32>
    %535 = vector.broadcast %533 : vector<1x512xf32> to vector<8x512xf32>
    %536 = arith.mulf %534, %535 : vector<8x512xf32>
    %537 = vector.extract_strided_slice %536 {offsets = [0, 0], sizes = [4, 512], strides = [1, 1]} : vector<8x512xf32> to vector<4x512xf32>
    %538 = arith.truncf %537 : vector<4x512xf32> to vector<4x512xbf16>
    %c72_286 = arith.constant 72 : index
    %c0_287 = arith.constant 0 : index
    %539 = vector.load %arg19[%c72_286, %c0_287] : memref<144x512xbf16, #tpu.memory_space<vmem>>, vector<4x512xbf16>
    tpu.vector_store %arg19[%c72_286, %c0_287], %538 {strides = array<i32>} : memref<144x512xbf16, #tpu.memory_space<vmem>>, vector<4x512xbf16>,
    %c7_288 = arith.constant 7 : index
    %c0_289 = arith.constant 0 : index
    %540 = vector.load %arg2[%c7_288, %c0_289] : memref<25x512xf32, #tpu.memory_space<vmem>>, vector<1x512xf32>
    %c16_i32_290 = arith.constant 16 : i32
    %541 = tpu.dynamic_rotate %532 by %c16_i32_290 dim 1 : vector<8x512xf32>, i32 -> vector<8x512xf32>
    %542 = vector.broadcast %540 : vector<1x512xf32> to vector<8x512xf32>
    %543 = arith.mulf %541, %542 : vector<8x512xf32>
    %544 = vector.extract_strided_slice %543 {offsets = [0, 0], sizes = [4, 512], strides = [1, 1]} : vector<8x512xf32> to vector<4x512xf32>
    %545 = arith.truncf %544 : vector<4x512xf32> to vector<4x512xbf16>
    %c76_291 = arith.constant 76 : index
    %c0_292 = arith.constant 0 : index
    %546 = vector.load %arg19[%c76_291, %c0_292] : memref<144x512xbf16, #tpu.memory_space<vmem>>, vector<4x512xbf16>
    tpu.vector_store %arg19[%c76_291, %c0_292], %545 {strides = array<i32>} : memref<144x512xbf16, #tpu.memory_space<vmem>>, vector<4x512xbf16>,
    %c8_293 = arith.constant 8 : index
    %c0_294 = arith.constant 0 : index
    %547 = vector.load %arg2[%c8_293, %c0_294] : memref<25x512xf32, #tpu.memory_space<vmem>>, vector<1x512xf32>
    %c15_i32_295 = arith.constant 15 : i32
    %548 = tpu.dynamic_rotate %532 by %c15_i32_295 dim 1 : vector<8x512xf32>, i32 -> vector<8x512xf32>
    %549 = vector.broadcast %547 : vector<1x512xf32> to vector<8x512xf32>
    %550 = arith.mulf %548, %549 : vector<8x512xf32>
    %551 = vector.extract_strided_slice %550 {offsets = [0, 0], sizes = [4, 512], strides = [1, 1]} : vector<8x512xf32> to vector<4x512xf32>
    %552 = arith.truncf %551 : vector<4x512xf32> to vector<4x512xbf16>
    %c80_296 = arith.constant 80 : index
    %c0_297 = arith.constant 0 : index
    %553 = vector.load %arg19[%c80_296, %c0_297] : memref<144x512xbf16, #tpu.memory_space<vmem>>, vector<4x512xbf16>
    tpu.vector_store %arg19[%c80_296, %c0_297], %552 {strides = array<i32>} : memref<144x512xbf16, #tpu.memory_space<vmem>>, vector<4x512xbf16>,
    %c11_298 = arith.constant 11 : index
    %c0_299 = arith.constant 0 : index
    %554 = vector.load %arg2[%c11_298, %c0_299] : memref<25x512xf32, #tpu.memory_space<vmem>>, vector<1x512xf32>
    %c1_i32_300 = arith.constant 1 : i32
    %555 = tpu.dynamic_rotate %532 by %c1_i32_300 dim 1 : vector<8x512xf32>, i32 -> vector<8x512xf32>
    %556 = vector.broadcast %554 : vector<1x512xf32> to vector<8x512xf32>
    %557 = arith.mulf %555, %556 : vector<8x512xf32>
    %558 = vector.extract_strided_slice %557 {offsets = [0, 0], sizes = [4, 512], strides = [1, 1]} : vector<8x512xf32> to vector<4x512xf32>
    %559 = arith.truncf %558 : vector<4x512xf32> to vector<4x512xbf16>
    %c84_301 = arith.constant 84 : index
    %c0_302 = arith.constant 0 : index
    %560 = vector.load %arg19[%c84_301, %c0_302] : memref<144x512xbf16, #tpu.memory_space<vmem>>, vector<4x512xbf16>
    tpu.vector_store %arg19[%c84_301, %c0_302], %559 {strides = array<i32>} : memref<144x512xbf16, #tpu.memory_space<vmem>>, vector<4x512xbf16>,
    %561 = vector.extract_strided_slice %532 {offsets = [0, 0], sizes = [4, 512], strides = [1, 1]} : vector<8x512xf32> to vector<4x512xf32>
    %562 = arith.truncf %561 : vector<4x512xf32> to vector<4x512xbf16>
    %c88_303 = arith.constant 88 : index
    %c0_304 = arith.constant 0 : index
    %563 = vector.load %arg19[%c88_303, %c0_304] : memref<144x512xbf16, #tpu.memory_space<vmem>>, vector<4x512xbf16>
    tpu.vector_store %arg19[%c88_303, %c0_304], %562 {strides = array<i32>} : memref<144x512xbf16, #tpu.memory_space<vmem>>, vector<4x512xbf16>,
    %c13_305 = arith.constant 13 : index
    %c0_306 = arith.constant 0 : index
    %564 = vector.load %arg2[%c13_305, %c0_306] : memref<25x512xf32, #tpu.memory_space<vmem>>, vector<1x512xf32>
    %c511_i32_307 = arith.constant 511 : i32
    %565 = tpu.dynamic_rotate %532 by %c511_i32_307 dim 1 : vector<8x512xf32>, i32 -> vector<8x512xf32>
    %566 = vector.broadcast %564 : vector<1x512xf32> to vector<8x512xf32>
    %567 = arith.mulf %565, %566 : vector<8x512xf32>
    %568 = vector.extract_strided_slice %567 {offsets = [0, 0], sizes = [4, 512], strides = [1, 1]} : vector<8x512xf32> to vector<4x512xf32>
    %569 = arith.truncf %568 : vector<4x512xf32> to vector<4x512xbf16>
    %c92_308 = arith.constant 92 : index
    %c0_309 = arith.constant 0 : index
    %570 = vector.load %arg19[%c92_308, %c0_309] : memref<144x512xbf16, #tpu.memory_space<vmem>>, vector<4x512xbf16>
    tpu.vector_store %arg19[%c92_308, %c0_309], %569 {strides = array<i32>} : memref<144x512xbf16, #tpu.memory_space<vmem>>, vector<4x512xbf16>,
    %c16_310 = arith.constant 16 : index
    %c0_311 = arith.constant 0 : index
    %571 = vector.load %arg2[%c16_310, %c0_311] : memref<25x512xf32, #tpu.memory_space<vmem>>, vector<1x512xf32>
    %c497_i32_312 = arith.constant 497 : i32
    %572 = tpu.dynamic_rotate %532 by %c497_i32_312 dim 1 : vector<8x512xf32>, i32 -> vector<8x512xf32>
    %573 = vector.broadcast %571 : vector<1x512xf32> to vector<8x512xf32>
    %574 = arith.mulf %572, %573 : vector<8x512xf32>
    %575 = vector.extract_strided_slice %574 {offsets = [0, 0], sizes = [4, 512], strides = [1, 1]} : vector<8x512xf32> to vector<4x512xf32>
    %576 = arith.truncf %575 : vector<4x512xf32> to vector<4x512xbf16>
    %c96_313 = arith.constant 96 : index
    %c0_314 = arith.constant 0 : index
    %577 = vector.load %arg19[%c96_313, %c0_314] : memref<144x512xbf16, #tpu.memory_space<vmem>>, vector<4x512xbf16>
    tpu.vector_store %arg19[%c96_313, %c0_314], %576 {strides = array<i32>} : memref<144x512xbf16, #tpu.memory_space<vmem>>, vector<4x512xbf16>,
    %c17_315 = arith.constant 17 : index
    %c0_316 = arith.constant 0 : index
    %578 = vector.load %arg2[%c17_315, %c0_316] : memref<25x512xf32, #tpu.memory_space<vmem>>, vector<1x512xf32>
    %c496_i32_317 = arith.constant 496 : i32
    %579 = tpu.dynamic_rotate %532 by %c496_i32_317 dim 1 : vector<8x512xf32>, i32 -> vector<8x512xf32>
    %580 = vector.broadcast %578 : vector<1x512xf32> to vector<8x512xf32>
    %581 = arith.mulf %579, %580 : vector<8x512xf32>
    %582 = vector.extract_strided_slice %581 {offsets = [0, 0], sizes = [4, 512], strides = [1, 1]} : vector<8x512xf32> to vector<4x512xf32>
    %583 = arith.truncf %582 : vector<4x512xf32> to vector<4x512xbf16>
    %c100 = arith.constant 100 : index
    %c0_318 = arith.constant 0 : index
    %584 = vector.load %arg19[%c100, %c0_318] : memref<144x512xbf16, #tpu.memory_space<vmem>>, vector<4x512xbf16>
    tpu.vector_store %arg19[%c100, %c0_318], %583 {strides = array<i32>} : memref<144x512xbf16, #tpu.memory_space<vmem>>, vector<4x512xbf16>,
    %c18_319 = arith.constant 18 : index
    %c0_320 = arith.constant 0 : index
    %585 = vector.load %arg2[%c18_319, %c0_320] : memref<25x512xf32, #tpu.memory_space<vmem>>, vector<1x512xf32>
    %c495_i32_321 = arith.constant 495 : i32
    %586 = tpu.dynamic_rotate %532 by %c495_i32_321 dim 1 : vector<8x512xf32>, i32 -> vector<8x512xf32>
    %587 = vector.broadcast %585 : vector<1x512xf32> to vector<8x512xf32>
    %588 = arith.mulf %586, %587 : vector<8x512xf32>
    %589 = vector.extract_strided_slice %588 {offsets = [0, 0], sizes = [4, 512], strides = [1, 1]} : vector<8x512xf32> to vector<4x512xf32>
    %590 = arith.truncf %589 : vector<4x512xf32> to vector<4x512xbf16>
    %c104 = arith.constant 104 : index
    %c0_322 = arith.constant 0 : index
    %591 = vector.load %arg19[%c104, %c0_322] : memref<144x512xbf16, #tpu.memory_space<vmem>>, vector<4x512xbf16>
    tpu.vector_store %arg19[%c104, %c0_322], %590 {strides = array<i32>} : memref<144x512xbf16, #tpu.memory_space<vmem>>, vector<4x512xbf16>,
    %c0_323 = arith.constant 0 : index
    %c0_324 = arith.constant 0 : index
    %592 = vector.load %arg9[%c0_323, %c0_324] : memref<8x108xbf16, #tpu.memory_space<vmem>>, vector<8x108xbf16>
    %c0_325 = arith.constant 0 : index
    %c0_326 = arith.constant 0 : index
    %593 = vector.load %arg19[%c0_325, %c0_326] : memref<144x512xbf16, #tpu.memory_space<vmem>>, vector<108x512xbf16>
    %cst_327 = arith.constant dense<0.000000e+00> : vector<8x512xf32>
    %594 = tpu.matmul %592, %593, %cst_327 {dimension_numbers = #tpu.dot_dimension_numbers<[1], [0], [0], [1], [0, 0, 1, 1], [], []>} : vector<8x108xbf16>, vector<108x512xbf16>, vector<8x512xf32> -> vector<8x512xf32>
    %c0_328 = arith.constant 0 : index
    %c0_329 = arith.constant 0 : index
    %595 = vector.load %arg12[%c0_328, %c0_329] : memref<8x1xf32, #tpu.memory_space<vmem>>, vector<8x1xf32>
    %596 = vector.broadcast %595 : vector<8x1xf32> to vector<8x512xf32>
    %597 = arith.addf %594, %596 : vector<8x512xf32>
    %cst_330 = arith.constant 5.000000e-01 : f32
    %598 = vector.broadcast %cst_330 : f32 to vector<8x512xf32>
    %599 = arith.mulf %598, %597 : vector<8x512xf32>
    %cst_331 = arith.constant 0.707106769 : f32
    %600 = vector.broadcast %cst_331 : f32 to vector<8x512xf32>
    %601 = arith.mulf %597, %600 : vector<8x512xf32>
    %cst_332 = arith.constant 0.000000e+00 : f32
    %602 = vector.broadcast %cst_332 : f32 to vector<8x512xf32>
    %603 = arith.cmpf oge, %601, %602 : vector<8x512xf32>
    %cst_333 = arith.constant 1.000000e+00 : f32
    %cst_334 = arith.constant -1.000000e+00 : f32
    %604 = vector.broadcast %cst_333 : f32 to vector<8x512xf32>
    %605 = vector.broadcast %cst_334 : f32 to vector<8x512xf32>
    %606 = arith.select %603, %604, %605 : vector<8x512xi1>, vector<8x512xf32>
    %607 = math.absf %601 : vector<8x512xf32>
    %cst_335 = arith.constant 0.327591091 : f32
    %608 = vector.broadcast %cst_335 : f32 to vector<8x512xf32>
    %609 = arith.mulf %608, %607 : vector<8x512xf32>
    %cst_336 = arith.constant 1.000000e+00 : f32
    %610 = vector.broadcast %cst_336 : f32 to vector<8x512xf32>
    %611 = arith.addf %610, %609 : vector<8x512xf32>
    %612 = tpu.reciprocal %611 {approx = true} : vector<8x512xf32> -> vector<8x512xf32>
    %cst_337 = arith.constant 1.06140542 : f32
    %613 = vector.broadcast %cst_337 : f32 to vector<8x512xf32>
    %614 = arith.mulf %613, %612 : vector<8x512xf32>
    %cst_338 = arith.constant -1.45315206 : f32
    %615 = vector.broadcast %cst_338 : f32 to vector<8x512xf32>
    %616 = arith.addf %614, %615 : vector<8x512xf32>
    %617 = arith.mulf %616, %612 : vector<8x512xf32>
    %cst_339 = arith.constant 1.42141378 : f32
    %618 = vector.broadcast %cst_339 : f32 to vector<8x512xf32>
    %619 = arith.addf %617, %618 : vector<8x512xf32>
    %620 = arith.mulf %619, %612 : vector<8x512xf32>
    %cst_340 = arith.constant -0.284496725 : f32
    %621 = vector.broadcast %cst_340 : f32 to vector<8x512xf32>
    %622 = arith.addf %620, %621 : vector<8x512xf32>
    %623 = arith.mulf %622, %612 : vector<8x512xf32>
    %cst_341 = arith.constant 0.254829586 : f32
    %624 = vector.broadcast %cst_341 : f32 to vector<8x512xf32>
    %625 = arith.addf %623, %624 : vector<8x512xf32>
    %626 = arith.mulf %625, %612 : vector<8x512xf32>
    %cst_342 = arith.constant 0.000000e+00 : f32
    %627 = vector.broadcast %cst_342 : f32 to vector<8x512xf32>
    %628 = arith.subf %627, %607 : vector<8x512xf32>
    %629 = arith.mulf %628, %607 : vector<8x512xf32>
    %630 = math.exp %629 : vector<8x512xf32>
    %631 = arith.mulf %626, %630 : vector<8x512xf32>
    %cst_343 = arith.constant 1.000000e+00 : f32
    %632 = vector.broadcast %cst_343 : f32 to vector<8x512xf32>
    %633 = arith.subf %632, %631 : vector<8x512xf32>
    %634 = arith.mulf %606, %633 : vector<8x512xf32>
    %cst_344 = arith.constant 1.000000e+00 : f32
    %635 = vector.broadcast %cst_344 : f32 to vector<8x512xf32>
    %636 = arith.addf %635, %634 : vector<8x512xf32>
    %637 = arith.mulf %599, %636 : vector<8x512xf32>
    %c6_345 = arith.constant 6 : index
    %c0_346 = arith.constant 0 : index
    %638 = vector.load %arg2[%c6_345, %c0_346] : memref<25x512xf32, #tpu.memory_space<vmem>>, vector<1x512xf32>
    %c17_i32_347 = arith.constant 17 : i32
    %639 = tpu.dynamic_rotate %637 by %c17_i32_347 dim 1 : vector<8x512xf32>, i32 -> vector<8x512xf32>
    %640 = vector.broadcast %638 : vector<1x512xf32> to vector<8x512xf32>
    %641 = arith.mulf %639, %640 : vector<8x512xf32>
    %642 = vector.extract_strided_slice %641 {offsets = [0, 0], sizes = [4, 512], strides = [1, 1]} : vector<8x512xf32> to vector<4x512xf32>
    %643 = arith.truncf %642 : vector<4x512xf32> to vector<4x512xbf16>
    %c108 = arith.constant 108 : index
    %c0_348 = arith.constant 0 : index
    %644 = vector.load %arg19[%c108, %c0_348] : memref<144x512xbf16, #tpu.memory_space<vmem>>, vector<4x512xbf16>
    tpu.vector_store %arg19[%c108, %c0_348], %643 {strides = array<i32>} : memref<144x512xbf16, #tpu.memory_space<vmem>>, vector<4x512xbf16>,
    %c7_349 = arith.constant 7 : index
    %c0_350 = arith.constant 0 : index
    %645 = vector.load %arg2[%c7_349, %c0_350] : memref<25x512xf32, #tpu.memory_space<vmem>>, vector<1x512xf32>
    %c16_i32_351 = arith.constant 16 : i32
    %646 = tpu.dynamic_rotate %637 by %c16_i32_351 dim 1 : vector<8x512xf32>, i32 -> vector<8x512xf32>
    %647 = vector.broadcast %645 : vector<1x512xf32> to vector<8x512xf32>
    %648 = arith.mulf %646, %647 : vector<8x512xf32>
    %649 = vector.extract_strided_slice %648 {offsets = [0, 0], sizes = [4, 512], strides = [1, 1]} : vector<8x512xf32> to vector<4x512xf32>
    %650 = arith.truncf %649 : vector<4x512xf32> to vector<4x512xbf16>
    %c112 = arith.constant 112 : index
    %c0_352 = arith.constant 0 : index
    %651 = vector.load %arg19[%c112, %c0_352] : memref<144x512xbf16, #tpu.memory_space<vmem>>, vector<4x512xbf16>
    tpu.vector_store %arg19[%c112, %c0_352], %650 {strides = array<i32>} : memref<144x512xbf16, #tpu.memory_space<vmem>>, vector<4x512xbf16>,
    %c8_353 = arith.constant 8 : index
    %c0_354 = arith.constant 0 : index
    %652 = vector.load %arg2[%c8_353, %c0_354] : memref<25x512xf32, #tpu.memory_space<vmem>>, vector<1x512xf32>
    %c15_i32_355 = arith.constant 15 : i32
    %653 = tpu.dynamic_rotate %637 by %c15_i32_355 dim 1 : vector<8x512xf32>, i32 -> vector<8x512xf32>
    %654 = vector.broadcast %652 : vector<1x512xf32> to vector<8x512xf32>
    %655 = arith.mulf %653, %654 : vector<8x512xf32>
    %656 = vector.extract_strided_slice %655 {offsets = [0, 0], sizes = [4, 512], strides = [1, 1]} : vector<8x512xf32> to vector<4x512xf32>
    %657 = arith.truncf %656 : vector<4x512xf32> to vector<4x512xbf16>
    %c116 = arith.constant 116 : index
    %c0_356 = arith.constant 0 : index
    %658 = vector.load %arg19[%c116, %c0_356] : memref<144x512xbf16, #tpu.memory_space<vmem>>, vector<4x512xbf16>
    tpu.vector_store %arg19[%c116, %c0_356], %657 {strides = array<i32>} : memref<144x512xbf16, #tpu.memory_space<vmem>>, vector<4x512xbf16>,
    %c11_357 = arith.constant 11 : index
    %c0_358 = arith.constant 0 : index
    %659 = vector.load %arg2[%c11_357, %c0_358] : memref<25x512xf32, #tpu.memory_space<vmem>>, vector<1x512xf32>
    %c1_i32_359 = arith.constant 1 : i32
    %660 = tpu.dynamic_rotate %637 by %c1_i32_359 dim 1 : vector<8x512xf32>, i32 -> vector<8x512xf32>
    %661 = vector.broadcast %659 : vector<1x512xf32> to vector<8x512xf32>
    %662 = arith.mulf %660, %661 : vector<8x512xf32>
    %663 = vector.extract_strided_slice %662 {offsets = [0, 0], sizes = [4, 512], strides = [1, 1]} : vector<8x512xf32> to vector<4x512xf32>
    %664 = arith.truncf %663 : vector<4x512xf32> to vector<4x512xbf16>
    %c120 = arith.constant 120 : index
    %c0_360 = arith.constant 0 : index
    %665 = vector.load %arg19[%c120, %c0_360] : memref<144x512xbf16, #tpu.memory_space<vmem>>, vector<4x512xbf16>
    tpu.vector_store %arg19[%c120, %c0_360], %664 {strides = array<i32>} : memref<144x512xbf16, #tpu.memory_space<vmem>>, vector<4x512xbf16>,
    %666 = vector.extract_strided_slice %637 {offsets = [0, 0], sizes = [4, 512], strides = [1, 1]} : vector<8x512xf32> to vector<4x512xf32>
    %667 = arith.truncf %666 : vector<4x512xf32> to vector<4x512xbf16>
    %c124 = arith.constant 124 : index
    %c0_361 = arith.constant 0 : index
    %668 = vector.load %arg19[%c124, %c0_361] : memref<144x512xbf16, #tpu.memory_space<vmem>>, vector<4x512xbf16>
    tpu.vector_store %arg19[%c124, %c0_361], %667 {strides = array<i32>} : memref<144x512xbf16, #tpu.memory_space<vmem>>, vector<4x512xbf16>,
    %c13_362 = arith.constant 13 : index
    %c0_363 = arith.constant 0 : index
    %669 = vector.load %arg2[%c13_362, %c0_363] : memref<25x512xf32, #tpu.memory_space<vmem>>, vector<1x512xf32>
    %c511_i32_364 = arith.constant 511 : i32
    %670 = tpu.dynamic_rotate %637 by %c511_i32_364 dim 1 : vector<8x512xf32>, i32 -> vector<8x512xf32>
    %671 = vector.broadcast %669 : vector<1x512xf32> to vector<8x512xf32>
    %672 = arith.mulf %670, %671 : vector<8x512xf32>
    %673 = vector.extract_strided_slice %672 {offsets = [0, 0], sizes = [4, 512], strides = [1, 1]} : vector<8x512xf32> to vector<4x512xf32>
    %674 = arith.truncf %673 : vector<4x512xf32> to vector<4x512xbf16>
    %c128 = arith.constant 128 : index
    %c0_365 = arith.constant 0 : index
    %675 = vector.load %arg19[%c128, %c0_365] : memref<144x512xbf16, #tpu.memory_space<vmem>>, vector<4x512xbf16>
    tpu.vector_store %arg19[%c128, %c0_365], %674 {strides = array<i32>} : memref<144x512xbf16, #tpu.memory_space<vmem>>, vector<4x512xbf16>,
    %c16_366 = arith.constant 16 : index
    %c0_367 = arith.constant 0 : index
    %676 = vector.load %arg2[%c16_366, %c0_367] : memref<25x512xf32, #tpu.memory_space<vmem>>, vector<1x512xf32>
    %c497_i32_368 = arith.constant 497 : i32
    %677 = tpu.dynamic_rotate %637 by %c497_i32_368 dim 1 : vector<8x512xf32>, i32 -> vector<8x512xf32>
    %678 = vector.broadcast %676 : vector<1x512xf32> to vector<8x512xf32>
    %679 = arith.mulf %677, %678 : vector<8x512xf32>
    %680 = vector.extract_strided_slice %679 {offsets = [0, 0], sizes = [4, 512], strides = [1, 1]} : vector<8x512xf32> to vector<4x512xf32>
    %681 = arith.truncf %680 : vector<4x512xf32> to vector<4x512xbf16>
    %c132 = arith.constant 132 : index
    %c0_369 = arith.constant 0 : index
    %682 = vector.load %arg19[%c132, %c0_369] : memref<144x512xbf16, #tpu.memory_space<vmem>>, vector<4x512xbf16>
    tpu.vector_store %arg19[%c132, %c0_369], %681 {strides = array<i32>} : memref<144x512xbf16, #tpu.memory_space<vmem>>, vector<4x512xbf16>,
    %c17_370 = arith.constant 17 : index
    %c0_371 = arith.constant 0 : index
    %683 = vector.load %arg2[%c17_370, %c0_371] : memref<25x512xf32, #tpu.memory_space<vmem>>, vector<1x512xf32>
    %c496_i32_372 = arith.constant 496 : i32
    %684 = tpu.dynamic_rotate %637 by %c496_i32_372 dim 1 : vector<8x512xf32>, i32 -> vector<8x512xf32>
    %685 = vector.broadcast %683 : vector<1x512xf32> to vector<8x512xf32>
    %686 = arith.mulf %684, %685 : vector<8x512xf32>
    %687 = vector.extract_strided_slice %686 {offsets = [0, 0], sizes = [4, 512], strides = [1, 1]} : vector<8x512xf32> to vector<4x512xf32>
    %688 = arith.truncf %687 : vector<4x512xf32> to vector<4x512xbf16>
    %c136 = arith.constant 136 : index
    %c0_373 = arith.constant 0 : index
    %689 = vector.load %arg19[%c136, %c0_373] : memref<144x512xbf16, #tpu.memory_space<vmem>>, vector<4x512xbf16>
    tpu.vector_store %arg19[%c136, %c0_373], %688 {strides = array<i32>} : memref<144x512xbf16, #tpu.memory_space<vmem>>, vector<4x512xbf16>,
    %c18_374 = arith.constant 18 : index
    %c0_375 = arith.constant 0 : index
    %690 = vector.load %arg2[%c18_374, %c0_375] : memref<25x512xf32, #tpu.memory_space<vmem>>, vector<1x512xf32>
    %c495_i32_376 = arith.constant 495 : i32
    %691 = tpu.dynamic_rotate %637 by %c495_i32_376 dim 1 : vector<8x512xf32>, i32 -> vector<8x512xf32>
    %692 = vector.broadcast %690 : vector<1x512xf32> to vector<8x512xf32>
    %693 = arith.mulf %691, %692 : vector<8x512xf32>
    %694 = vector.extract_strided_slice %693 {offsets = [0, 0], sizes = [4, 512], strides = [1, 1]} : vector<8x512xf32> to vector<4x512xf32>
    %695 = arith.truncf %694 : vector<4x512xf32> to vector<4x512xbf16>
    %c140 = arith.constant 140 : index
    %c0_377 = arith.constant 0 : index
    %696 = vector.load %arg19[%c140, %c0_377] : memref<144x512xbf16, #tpu.memory_space<vmem>>, vector<4x512xbf16>
    tpu.vector_store %arg19[%c140, %c0_377], %695 {strides = array<i32>} : memref<144x512xbf16, #tpu.memory_space<vmem>>, vector<4x512xbf16>,
    %c0_378 = arith.constant 0 : index
    %c0_379 = arith.constant 0 : index
    %697 = vector.load %arg13[%c0_378, %c0_379] : memref<8x144xbf16, #tpu.memory_space<vmem>>, vector<8x144xbf16>
    %c0_380 = arith.constant 0 : index
    %c0_381 = arith.constant 0 : index
    %698 = vector.load %arg19[%c0_380, %c0_381] : memref<144x512xbf16, #tpu.memory_space<vmem>>, vector<144x512xbf16>
    %cst_382 = arith.constant dense<0.000000e+00> : vector<8x512xf32>
    %699 = tpu.matmul %697, %698, %cst_382 {dimension_numbers = #tpu.dot_dimension_numbers<[1], [0], [0], [1], [0, 0, 1, 1], [], []>} : vector<8x144xbf16>, vector<144x512xbf16>, vector<8x512xf32> -> vector<8x512xf32>
    %c0_383 = arith.constant 0 : index
    %c0_384 = arith.constant 0 : index
    %700 = vector.load %arg14[%c0_383, %c0_384] : memref<8x1xf32, #tpu.memory_space<vmem>>, vector<8x1xf32>
    %701 = vector.broadcast %700 : vector<8x1xf32> to vector<8x512xf32>
    %702 = arith.addf %699, %701 : vector<8x512xf32>
    %cst_385 = arith.constant 5.000000e-01 : f32
    %703 = vector.broadcast %cst_385 : f32 to vector<8x512xf32>
    %704 = arith.mulf %703, %702 : vector<8x512xf32>
    %cst_386 = arith.constant 0.707106769 : f32
    %705 = vector.broadcast %cst_386 : f32 to vector<8x512xf32>
    %706 = arith.mulf %702, %705 : vector<8x512xf32>
    %cst_387 = arith.constant 0.000000e+00 : f32
    %707 = vector.broadcast %cst_387 : f32 to vector<8x512xf32>
    %708 = arith.cmpf oge, %706, %707 : vector<8x512xf32>
    %cst_388 = arith.constant 1.000000e+00 : f32
    %cst_389 = arith.constant -1.000000e+00 : f32
    %709 = vector.broadcast %cst_388 : f32 to vector<8x512xf32>
    %710 = vector.broadcast %cst_389 : f32 to vector<8x512xf32>
    %711 = arith.select %708, %709, %710 : vector<8x512xi1>, vector<8x512xf32>
    %712 = math.absf %706 : vector<8x512xf32>
    %cst_390 = arith.constant 0.327591091 : f32
    %713 = vector.broadcast %cst_390 : f32 to vector<8x512xf32>
    %714 = arith.mulf %713, %712 : vector<8x512xf32>
    %cst_391 = arith.constant 1.000000e+00 : f32
    %715 = vector.broadcast %cst_391 : f32 to vector<8x512xf32>
    %716 = arith.addf %715, %714 : vector<8x512xf32>
    %717 = tpu.reciprocal %716 {approx = true} : vector<8x512xf32> -> vector<8x512xf32>
    %cst_392 = arith.constant 1.06140542 : f32
    %718 = vector.broadcast %cst_392 : f32 to vector<8x512xf32>
    %719 = arith.mulf %718, %717 : vector<8x512xf32>
    %cst_393 = arith.constant -1.45315206 : f32
    %720 = vector.broadcast %cst_393 : f32 to vector<8x512xf32>
    %721 = arith.addf %719, %720 : vector<8x512xf32>
    %722 = arith.mulf %721, %717 : vector<8x512xf32>
    %cst_394 = arith.constant 1.42141378 : f32
    %723 = vector.broadcast %cst_394 : f32 to vector<8x512xf32>
    %724 = arith.addf %722, %723 : vector<8x512xf32>
    %725 = arith.mulf %724, %717 : vector<8x512xf32>
    %cst_395 = arith.constant -0.284496725 : f32
    %726 = vector.broadcast %cst_395 : f32 to vector<8x512xf32>
    %727 = arith.addf %725, %726 : vector<8x512xf32>
    %728 = arith.mulf %727, %717 : vector<8x512xf32>
    %cst_396 = arith.constant 0.254829586 : f32
    %729 = vector.broadcast %cst_396 : f32 to vector<8x512xf32>
    %730 = arith.addf %728, %729 : vector<8x512xf32>
    %731 = arith.mulf %730, %717 : vector<8x512xf32>
    %cst_397 = arith.constant 0.000000e+00 : f32
    %732 = vector.broadcast %cst_397 : f32 to vector<8x512xf32>
    %733 = arith.subf %732, %712 : vector<8x512xf32>
    %734 = arith.mulf %733, %712 : vector<8x512xf32>
    %735 = math.exp %734 : vector<8x512xf32>
    %736 = arith.mulf %731, %735 : vector<8x512xf32>
    %cst_398 = arith.constant 1.000000e+00 : f32
    %737 = vector.broadcast %cst_398 : f32 to vector<8x512xf32>
    %738 = arith.subf %737, %736 : vector<8x512xf32>
    %739 = arith.mulf %711, %738 : vector<8x512xf32>
    %cst_399 = arith.constant 1.000000e+00 : f32
    %740 = vector.broadcast %cst_399 : f32 to vector<8x512xf32>
    %741 = arith.addf %740, %739 : vector<8x512xf32>
    %742 = arith.mulf %704, %741 : vector<8x512xf32>
    %743 = vector.extract_strided_slice %742 {offsets = [0, 0], sizes = [4, 512], strides = [1, 1]} : vector<8x512xf32> to vector<4x512xf32>
    %744 = vector.extract_strided_slice %8 {offsets = [0, 0], sizes = [4, 512], strides = [1, 1]} : vector<8x512xf32> to vector<4x512xf32>
    %745 = arith.addf %743, %744 : vector<4x512xf32>
    %746 = vector.extract_strided_slice %745 {offsets = [0, 0], sizes = [4, 256], strides = [1, 1]} : vector<4x512xf32> to vector<4x256xf32>
    %c0_400 = arith.constant 0 : index
    %c0_401 = arith.constant 0 : index
    %c0_402 = arith.constant 0 : index
    %747 = vector.load %arg15[%c0_400, %c0_401, %c0_402] : memref<2x4x256xf32, #tpu.memory_space<vmem>>, vector<1x4x256xf32>
    %748 = vector.shape_cast %747 : vector<1x4x256xf32> to vector<4x256xf32>
    %749 = vector.shape_cast %746 : vector<4x256xf32> to vector<1x4x256xf32>
    tpu.vector_store %arg15[%c0_400, %c0_401, %c0_402], %749 {strides = array<i32>} : memref<2x4x256xf32, #tpu.memory_space<vmem>>, vector<1x4x256xf32>,
    %750 = vector.extract_strided_slice %745 {offsets = [0, 256], sizes = [4, 256], strides = [1, 1]} : vector<4x512xf32> to vector<4x256xf32>
    %c1_403 = arith.constant 1 : index
    %c0_404 = arith.constant 0 : index
    %c0_405 = arith.constant 0 : index
    %751 = vector.load %arg15[%c1_403, %c0_404, %c0_405] : memref<2x4x256xf32, #tpu.memory_space<vmem>>, vector<1x4x256xf32>
    %752 = vector.shape_cast %751 : vector<1x4x256xf32> to vector<4x256xf32>
    %753 = vector.shape_cast %750 : vector<4x256xf32> to vector<1x4x256xf32>
    tpu.vector_store %arg15[%c1_403, %c0_404, %c0_405], %753 {strides = array<i32>} : memref<2x4x256xf32, #tpu.memory_space<vmem>>, vector<1x4x256xf32>,
    return
  }
  func.func @transform_0(%arg0: i32) -> (i32, i32, i32) {
    %c0_i32 = arith.constant 0 : i32
    %c0_i32_0 = arith.constant 0 : i32
    %c0_i32_1 = arith.constant 0 : i32
    return %arg0, %c0_i32, %c0_i32_0 : i32, i32, i32
  }
  func.func @transform_1(%arg0: i32) -> (i32, i32) {
    %c0_i32 = arith.constant 0 : i32
    %c0_i32_0 = arith.constant 0 : i32
    %c0_i32_1 = arith.constant 0 : i32
    return %c0_i32, %c0_i32_0 : i32, i32
  }
  func.func @transform_2(%arg0: i32) -> (i32, i32) {
    %c0_i32 = arith.constant 0 : i32
    %c0_i32_0 = arith.constant 0 : i32
    %c0_i32_1 = arith.constant 0 : i32
    return %c0_i32, %c0_i32_0 : i32, i32
  }
  func.func @transform_3(%arg0: i32) -> (i32, i32) {
    %c0_i32 = arith.constant 0 : i32
    %c0_i32_0 = arith.constant 0 : i32
    %c0_i32_1 = arith.constant 0 : i32
    return %c0_i32, %c0_i32_0 : i32, i32
  }
  func.func @transform_4(%arg0: i32) -> (i32, i32) {
    %c0_i32 = arith.constant 0 : i32
    %c0_i32_0 = arith.constant 0 : i32
    %c0_i32_1 = arith.constant 0 : i32
    return %c0_i32, %c0_i32_0 : i32, i32
  }
  func.func @transform_5(%arg0: i32) -> (i32, i32) {
    %c0_i32 = arith.constant 0 : i32
    %c0_i32_0 = arith.constant 0 : i32
    %c0_i32_1 = arith.constant 0 : i32
    return %c0_i32, %c0_i32_0 : i32, i32
  }
  func.func @transform_6(%arg0: i32) -> (i32, i32) {
    %c0_i32 = arith.constant 0 : i32
    %c0_i32_0 = arith.constant 0 : i32
    %c0_i32_1 = arith.constant 0 : i32
    return %c0_i32, %c0_i32_0 : i32, i32
  }
  func.func @transform_7(%arg0: i32) -> (i32, i32) {
    %c0_i32 = arith.constant 0 : i32
    %c0_i32_0 = arith.constant 0 : i32
    %c0_i32_1 = arith.constant 0 : i32
    return %c0_i32, %c0_i32_0 : i32, i32
  }
  func.func @transform_8(%arg0: i32) -> (i32, i32) {
    %c0_i32 = arith.constant 0 : i32
    %c0_i32_0 = arith.constant 0 : i32
    %c0_i32_1 = arith.constant 0 : i32
    return %c0_i32, %c0_i32_0 : i32, i32
  }
  func.func @transform_9(%arg0: i32) -> (i32, i32) {
    %c0_i32 = arith.constant 0 : i32
    %c0_i32_0 = arith.constant 0 : i32
    %c0_i32_1 = arith.constant 0 : i32
    return %c0_i32, %c0_i32_0 : i32, i32
  }
  func.func @transform_10(%arg0: i32) -> (i32, i32) {
    %c0_i32 = arith.constant 0 : i32
    %c0_i32_0 = arith.constant 0 : i32
    %c0_i32_1 = arith.constant 0 : i32
    return %c0_i32, %c0_i32_0 : i32, i32
  }
  func.func @transform_11(%arg0: i32) -> (i32, i32) {
    %c0_i32 = arith.constant 0 : i32
    %c0_i32_0 = arith.constant 0 : i32
    %c0_i32_1 = arith.constant 0 : i32
    return %c0_i32, %c0_i32_0 : i32, i32
  }
  func.func @transform_12(%arg0: i32) -> (i32, i32) {
    %c0_i32 = arith.constant 0 : i32
    %c0_i32_0 = arith.constant 0 : i32
    %c0_i32_1 = arith.constant 0 : i32
    return %c0_i32, %c0_i32_0 : i32, i32
  }
  func.func @transform_13(%arg0: i32) -> (i32, i32) {
    %c0_i32 = arith.constant 0 : i32
    %c0_i32_0 = arith.constant 0 : i32
    %c0_i32_1 = arith.constant 0 : i32
    return %c0_i32, %c0_i32_0 : i32, i32
  }
  func.func @transform_14(%arg0: i32) -> (i32, i32, i32) {
    %c0_i32 = arith.constant 0 : i32
    %c0_i32_0 = arith.constant 0 : i32
    %c0_i32_1 = arith.constant 0 : i32
    return %arg0, %c0_i32, %c0_i32_0 : i32, i32, i32
  }
}

</mosaic_0001>

<bundles_post_ra>
// kernel: msdb_forward.1
= control target key start
LH: loop header
LB: loop body
LE: loop exit
PB: predicated region body
PF: predicated region fallthrough
CT: control target
= control target key end

     0   :  { %s5080_s17 = smov 97   ;;  %s5081_s18 = smov 94   ;;  %v96_v14 = vlaneseq  ;;  %vm1099_vm5 = vcmask 1041408   ;;  %s7309_s0 = inlined_call_operand.vmem [shape: f32[2,4,256], index: 0, kind: input, shape index: {}]   ;;  %s7310_s1 = inlined_call_operand.vmem [shape: f32[25,512], index: 1, kind: input, shape index: {}]   ;;  %s7311_s3 = inlined_call_operand.vmem [shape: f32[8,1], index: 3, kind: input, shape index: {}]   ;;  %s7312_s2 = inlined_call_operand.vmem [shape: bf16[8,100], index: 2, kind: input, shape index: {}]   ;;  %s7313_s5 = inlined_call_operand.vmem [shape: f32[8,1], index: 5, kind: input, shape index: {}]   ;;  %s7314_s4 = inlined_call_operand.vmem [shape: bf16[8,72], index: 4, kind: input, shape index: {}]   ;;  %s7315_s9 = inlined_call_operand.vmem [shape: f32[8,1], index: 9, kind: input, shape index: {}]   ;;  %s7316_s6 = inlined_call_operand.vmem [shape: bf16[8,36], index: 6, kind: input, shape index: {}]   ;;  %s7317_s10 = inlined_call_operand.vmem [shape: f32[8,1], index: 10, kind: input, shape index: {}]   ;;  %s7318_s7 = inlined_call_operand.vmem [shape: bf16[8,72], index: 7, kind: input, shape index: {}]   ;;  %s7319_s11 = inlined_call_operand.vmem [shape: f32[8,1], index: 11, kind: input, shape index: {}]   ;;  %s7320_s8 = inlined_call_operand.vmem [shape: bf16[8,108], index: 8, kind: input, shape index: {}]   ;;  %s7321_s13 = inlined_call_operand.vmem [shape: f32[8,1], index: 13, kind: input, shape index: {}]   ;;  %s7322_s12 = inlined_call_operand.vmem [shape: bf16[8,144], index: 12, kind: input, shape index: {}]   ;;  %s7323_s14 = inlined_call_operand.vmem [shape: f32[2,4,256], index: 14, kind: output, shape index: {}]  }
   0x1   :  { %v48_v0 = vld [vmem:[%s7309_s0] sm:$0xff]  ;;  %v4219_v3 = vld [vmem:[%s7309_s0 + $0x8] sm:$0xff]  ;;  %s5082_s0 = smov 98   ;;  %s5083_s19 = smov 95  }
   0x2   :  { %50 = vst [vmem:[#allocation1] ss:$2 sm:$0xff] %v48_v0  ;;  %s5084_s20 = smov 96   ;;  %s5085_s21 = smov 112   ;;  %v5273_v16 = vand.u32 127, %v96_v14 }
   0x3   :  { %s5086_s22 = smov 110   ;;  %s5087_s23 = smov 113   ;;  %v5278_v17 = vld [vmem:[%s7310_s1 + $0x45] ss:$8 sm:$0xf] }
   0x4   :  { %s5088_s24 = smov 111   ;;  %s5089_s25 = smov 127   ;;  %vm802_vm0 = vcmp.lt.s32.totalorder %v5273_v16, 97  ;;  %v810_v18 = vperm.slane %v5278_v17, 2  ;;  %v811_v19 = vperm.slane %v5278_v17, 3  ;;  %vm910_vm1 = vcmp.lt.s32.totalorder %v5273_v16, 94 }
   0x5   :  { %s5090_s26 = smov 114   ;;  %s5091_s27 = smov 126   ;;  %v4242_v35 = vld [vmem:[%s7310_s1 + $0x60] ss:$8 sm:$0xf]  ;;  %vm770_vm2 = vcmp.lt.s32.totalorder %v5273_v16, 98 }
   0x6   :  { %s5092_s30 = smov 14   ;;  %s5093_s15 = smov 1   ;;  %v916_v36 = vperm.slane %v4242_v35, 0  ;;  %v917_v37 = vperm.slane %v4242_v35, 1  ;;  %v918_v47 = vperm.slane %v4242_v35, 2  ;;  %v919_v48 = vperm.slane %v4242_v35, 3 }
   0x7   :  { %v5340_v45 = vld [vmem:[%s7310_s1 + $0x44] ss:$8 sm:$0xf]  ;;  %v5364_v57 = vld [vmem:[%s7310_s1 + $0x47] ss:$8 sm:$0xf] }
   0x8   :  { %v778_v49 = vperm.slane %v5340_v45, 2  ;;  %v779_v50 = vperm.slane %v5340_v45, 3  ;;  %v5371_v63 = vld [vmem:[%s7310_s1 + $0x46] ss:$8 sm:$0xf]  ;;  %vm872_vm3 = vcmp.lt.s32.totalorder %v5273_v16, 95 }
   0x9   :  { %v51_v1 = vld.sshfl [vmem:[#allocation1] sm:$0xff pattern:$0x75316420]  ;;  %v52_v2 = vld.sshfl [vmem:[#allocation1 + $0x8] sm:$0xff pattern:$0x75316420] }
   0xa   :  { %55 = vst [vmem:[#allocation2 + $0x10] sm:$0xf] %v51_v1  ;;  %vm840_vm4 = vcmp.lt.s32.totalorder %v5273_v16, 96  ;;  %vm662_vm6 = vcmp.lt.s32.totalorder %v5273_v16, 112  ;;  %s5097_s28 = smov 16   ;;  %vm732_vm7 = vcmp.lt.s32.totalorder %v5273_v16, 110 }
   0xb   :  { %58 = vst [vmem:[#allocation1 + $0x1] ss:$2 sm:$0xff] %v48_v0  ;;  %vm630_vm8 = vcmp.lt.s32.totalorder %v5273_v16, 113  ;;  %vm700_vm9 = vcmp.lt.s32.totalorder %v5273_v16, 111  ;;  %vm522_vm10 = vcmp.lt.s32.totalorder %v5273_v16, 127  ;;  %vm592_vm11 = vcmp.lt.s32.totalorder %v5273_v16, 114 }
   0xc   :  { %56 = vst [vmem:[#allocation2] sm:$0xf] %v52_v2  ;;  %v881_v2 = vperm.slane %v5364_v57, 3  ;;  %vm560_vm12 = vcmp.lt.s32.totalorder %v5273_v16, 126  ;;  %vm410_vm13 = vcmp.lt.s32.totalorder %v5273_v16, 14  ;;  %vm480_vm14 = vcmp.lt.s32.totalorder %v5273_v16, 1 }
   0xd   :  { %vm378_vm15 = vcmp.lt.s32.totalorder %v5273_v16, 15 }
  0x12   :  { %v59_v4 = vld.sshfl [vmem:[#allocation1] sm:$0xff pattern:$0x75316420]  ;;  %v60_v5 = vld.sshfl [vmem:[#allocation1 + $0x8] sm:$0xff pattern:$0x75316420] }
  0x13   :  { %63 = vst [vmem:[#allocation2 + $0x10] sm:$0xf0] %v59_v4  ;;  %v848_v4 = vperm.slane %v5371_v63, 2 }
  0x14   :  { %68 = vst [vmem:[#allocation1] ss:$2 sm:$0xff] %v4219_v3 }
  0x15   :  { %64 = vst [vmem:[#allocation2] sm:$0xf0] %v60_v5 }
  0x1a   :  { %v5187_v6 = vld [vmem:[#allocation2 + $0x10] sm:$0xff] }
  0x1b   :  { %794 = vrot.lane.b32.xlu1 %v5187_v6, %s5080_s17  ;;  %902 = vrot.lane.b32.xlu0 %v5187_v6, %s5081_s18  ;;  %v69_v7 = vld.sshfl [vmem:[#allocation1] sm:$0xff pattern:$0x75316420]  ;;  %v70_v8 = vld.sshfl [vmem:[#allocation1 + $0x8] sm:$0xff pattern:$0x75316420] }
  0x1c   :  { %73 = vst [vmem:[#allocation2 + $0x18] sm:$0xf] %v69_v7  ;;  %v5196_v11 = vld [vmem:[#allocation2] sm:$0xff] }
  0x1d   :  { %76 = vst [vmem:[#allocation1 + $0x1] ss:$2 sm:$0xff] %v4219_v3  ;;  %v880_v3 = vperm.slane %v5364_v57, 2 }
  0x1e   :  { %74 = vst [vmem:[#allocation2 + $0x8] sm:$0xf] %v70_v8  ;;  %v849_v8 = vperm.slane %v5371_v63, 3 }
  0x23   :  { %762 = vrot.lane.b32.xlu1 %v5187_v6, %s5082_s0  ;;  %864 = vrot.lane.b32.xlu0 %v5187_v6, %s5083_s19 }
  0x24   :  { %v77_v9 = vld.sshfl [vmem:[#allocation1] sm:$0xff pattern:$0x75316420]  ;;  %v78_v10 = vld.sshfl [vmem:[#allocation1 + $0x8] sm:$0xff pattern:$0x75316420] }
  0x25   :  { %81 = vst [vmem:[#allocation2 + $0x18] sm:$0xf0] %v77_v9 }
  0x26   :  { %82 = vst [vmem:[#allocation2 + $0x8] sm:$0xf0] %v78_v10 }
  0x2b   :  { %832 = vrot.lane.b32.xlu1 %v5187_v6, %s5084_s20  ;;  %904 = vrot.lane.b32.xlu0 %v5196_v11, %s5081_s18 }
  0x2c   :  { %v5201_v12 = vld [vmem:[#allocation2 + $0x18] sm:$0xff] }
  0x2d   :  { %798 = vrot.lane.b32.xlu2 %v5201_v12, %s5080_s17  ;;  %v5205_v13 = vld [vmem:[#allocation2 + $0x8] sm:$0xff] }
  0x33   :  { %654 = vrot.lane.b32.xlu1 %v5187_v6, %s5085_s21  ;;  %906 = vrot.lane.b32.xlu0 %v5201_v12, %s5081_s18 }
  0x35   :  { %800 = vrot.lane.b32.xlu2 %v5205_v13, %s5080_s17 }
  0x3b   :  { %908 = vrot.lane.b32.xlu1 %v5205_v13, %s5081_s18  ;;  %768 = vrot.lane.b32.xlu0 %v5205_v13, %s5082_s0  ;;  %s5094_s18 = smov 15  }
  0x3d   :  { %870 = vrot.lane.b32.xlu2 %v5205_v13, %s5083_s19 }
  0x43   :  { %868 = vrot.lane.b32.xlu1 %v5201_v12, %s5083_s19  ;;  %838 = vrot.lane.b32.xlu0 %v5205_v13, %s5084_s20 }
  0x45   :  { %766 = vrot.lane.b32.xlu2 %v5201_v12, %s5082_s0 }
  0x4b   :  { %724 = vrot.lane.b32.xlu1 %v5187_v6, %s5086_s22  ;;  %660 = vrot.lane.b32.xlu0 %v5205_v13, %s5085_s21 }
  0x4d   :  { %836 = vrot.lane.b32.xlu2 %v5201_v12, %s5084_s20 }
  0x53   :  { %622 = vrot.lane.b32.xlu1 %v5187_v6, %s5087_s23  ;;  %730 = vrot.lane.b32.xlu0 %v5205_v13, %s5086_s22 }
  0x55   :  { %658 = vrot.lane.b32.xlu2 %v5201_v12, %s5085_s21 }
  0x5b   :  { %692 = vrot.lane.b32.xlu1 %v5187_v6, %s5088_s24  ;;  %628 = vrot.lane.b32.xlu0 %v5205_v13, %s5087_s23 }
  0x5d   :  { %728 = vrot.lane.b32.xlu2 %v5201_v12, %s5086_s22 }
  0x63   :  { %796 = vrot.lane.b32.xlu1 %v5196_v11, %s5080_s17  ;;  %698 = vrot.lane.b32.xlu0 %v5205_v13, %s5088_s24  ;;  %s5100_s17 = smov 33  }
  0x65   :  { %626 = vrot.lane.b32.xlu2 %v5201_v12, %s5087_s23 }
  0x6b   :  { %518 = vrot.lane.b32.xlu1 %v5201_v12, %s5089_s25  ;;  %514 = vrot.lane.b32.xlu0 %v5187_v6, %s5089_s25 }
  0x6d   :  { %696 = vrot.lane.b32.xlu2 %v5201_v12, %s5088_s24 }
  0x73   :  { %588 = vrot.lane.b32.xlu1 %v5201_v12, %s5090_s26  ;;  %584 = vrot.lane.b32.xlu0 %v5187_v6, %s5090_s26 }
  0x75   :  { %866 = vrot.lane.b32.xlu2 %v5196_v11, %s5083_s19  ;;  %s5101_s19 = smov 31  }
  0x7b   :  { %834 = vrot.lane.b32.xlu1 %v5196_v11, %s5084_s20  ;;  %764 = vrot.lane.b32.xlu0 %v5196_v11, %s5082_s0  ;;  %s5095_s20 = smov 2   ;;  %s5096_s0 = smov 18  }
  0x7d   :  { %520 = vrot.lane.b32.xlu2 %v5205_v13, %s5089_s25 }
  0x83   :  { %558 = vrot.lane.b32.xlu1 %v5205_v13, %s5091_s27  ;;  %556 = vrot.lane.b32.xlu0 %v5201_v12, %s5091_s27 }
  0x85   :  { %590 = vrot.lane.b32.xlu2 %v5205_v13, %s5090_s26 }
  0x87   :  { %v5271_v15 = vpop.permute.xlu2 %798 }
  0x8b   :  { %404 = vrot.lane.b32.xlu1 %v5196_v11, %s5092_s30  ;;  %726 = vrot.lane.b32.xlu0 %v5196_v11, %s5086_s22  ;;  %s5099_s22 = smov 17  }
  0x8d   :  { %552 = vrot.lane.b32.xlu2 %v5187_v6, %s5091_s27  ;;  %v5289_v20 = vpop.permute.xlu1 %794  ;;  %v903_v21 = vpop.permute.xlu0 %902 }
  0x8f   :  { %v801_v22 = vpop.permute.xlu2 %800 }
  0x90   :  { %v803_v23 = vsel %vm802_vm0, %v5271_v15, %v801_v22  ;;  %v806_v24 = vsel %vm802_vm0, %v801_v22, %v5289_v20 }
  0x91   :  { %v818_v25 = vmul.f32 %v810_v18, %v803_v23  ;;  %v819_v26 = vmul.f32 %v811_v19, %v806_v24 }
  0x93   :  { %v821_v27 = vpack.c.bf16 %v819_v26, %v818_v25  ;;  %474 = vrot.lane.b32.xlu1 %v5196_v11, %s5093_s15  ;;  %408 = vrot.lane.b32.xlu0 %v5205_v13, %s5092_s30 }
  0x95   :  { %v825_v28 = vrot.slane %v821_v27, 6  ;;  %656 = vrot.lane.b32.xlu2 %v5196_v11, %s5085_s21  ;;  %v5303_v29 = vpop.permute.xlu1 %762  ;;  %v5305_v30 = vpop.permute.xlu0 %864 }
  0x97   :  { %829 = vst [vmem:[#allocation3 + $0xa8] sm:$0xcc] %v825_v28  ;;  %v5307_v31 = vpop.permute.xlu2 %870 }
  0x98   :  { %v876_v7 = vsel %vm872_vm3, %v5307_v31, %v5305_v30 }
  0x99   :  { %v889_v22 = vmul.f32 %v881_v2, %v876_v7 }
  0x9b   :  { %624 = vrot.lane.b32.xlu1 %v5196_v11, %s5087_s23  ;;  %478 = vrot.lane.b32.xlu0 %v5205_v13, %s5093_s15 }
  0x9d   :  { %406 = vrot.lane.b32.xlu2 %v5201_v12, %s5092_s30  ;;  %v5315_v32 = vpop.permute.xlu1 %832  ;;  %v905_v33 = vpop.permute.xlu0 %904 }
  0x9e   :  { %v913_v38 = vsel %vm910_vm1, %v903_v21, %v905_v33 }
  0x9f   :  { %v5317_v34 = vpop.permute.xlu2 %766  ;;  %v924_v42 = vmul.f32 %v916_v36, %v913_v38  ;;  %v5407_v36 = vld [vmem:[%s7310_s1 + $0x41] ss:$8 sm:$0xf] }
  0xa3   :  { %374 = vrot.lane.b32.xlu1 %v5201_v12, %s5094_s18  ;;  %372 = vrot.lane.b32.xlu0 %v5196_v11, %s5094_s18 }
  0xa5   :  { %476 = vrot.lane.b32.xlu2 %v5201_v12, %s5093_s15  ;;  %v5331_v39 = vpop.permute.xlu1 %654  ;;  %v907_v40 = vpop.permute.xlu0 %906 }
  0xa6   :  { %v912_v41 = vsel %vm910_vm1, %v905_v33, %v907_v40 }
  0xa7   :  { %v5335_v43 = vpop.permute.xlu2 %836  ;;  %v925_v44 = vmul.f32 %v917_v37, %v912_v41 }
  0xa9   :  { %v928_v46 = vpack.c.bf16 %v925_v44, %v924_v42  ;;  %v671_v44 = vperm.slane %v5407_v36, 3 }
  0xab   :  { %930 = vst [vmem:[#allocation3 + $0xc0] sm:$0x33] %v928_v46  ;;  %444 = vrot.lane.b32.xlu1 %v5201_v12, %s5095_s20  ;;  %442 = vrot.lane.b32.xlu0 %v5196_v11, %s5095_s20 }
  0xad   :  { %694 = vrot.lane.b32.xlu2 %v5196_v11, %s5088_s24  ;;  %v909_v51 = vpop.permute.xlu1 %908  ;;  %v769_v52 = vpop.permute.xlu0 %768 }
  0xae   :  { %v911_v53 = vsel %vm910_vm1, %v907_v40, %v909_v51  ;;  %v914_v54 = vsel %vm910_vm1, %v909_v51, %v903_v21  ;;  %v771_v55 = vsel %vm770_vm2, %v5317_v34, %v769_v52  ;;  %v774_v56 = vsel %vm770_vm2, %v769_v52, %v5303_v29 }
  0xaf   :  { %v5366_v58 = vpop.permute.xlu2 %658  ;;  %v926_v59 = vmul.f32 %v918_v47, %v911_v53  ;;  %v927_v60 = vmul.f32 %v919_v48, %v914_v54  ;;  %v786_v61 = vmul.f32 %v778_v49, %v771_v55  ;;  %v787_v62 = vmul.f32 %v779_v50, %v774_v56 }
  0xb0   :  { %v670_v40 = vperm.slane %v5407_v36, 2  ;;  %vm270_vm1 = vcmp.lt.s32.totalorder %v5273_v16, 18 }
  0xb1   :  { %v929_v0 = vpack.c.bf16 %v927_v60, %v926_v59  ;;  %v789_v1 = vpack.c.bf16 %v787_v62, %v786_v61  ;;  %v5434_v61 = vld [vmem:[%s7310_s1 + $0x43] ss:$8 sm:$0xf] }
  0xb2   :  { %v957_v5 = vld [vmem:[#allocation3 + $0xc0] sm:$0x33]  ;;  %v741_v2 = vperm.slane %v5434_v61, 3 }
  0xb3   :  { %931 = vst [vmem:[#allocation3 + $0xc8] sm:$0x33] %v929_v0  ;;  %586 = vrot.lane.b32.xlu1 %v5196_v11, %s5090_s26  ;;  %516 = vrot.lane.b32.xlu0 %v5196_v11, %s5089_s25  ;;  %v1039_v9 = vunpack.c.l.b16 %v957_v5  ;;  %v1040_v10 = vunpack.c.h.b16 %v957_v5  ;;  %s5098_s26 = smov 30  }
  0xb4   :  { %791 = vst [vmem:[#allocation3 + $0xa8] sm:$0x33] %v789_v1  ;;  %v740_v1 = vperm.slane %v5434_v61, 2 }
  0xb5   :  { %376 = vrot.lane.b32.xlu2 %v5205_v13, %s5094_s18  ;;  %v5389_v14 = vpop.permute.xlu1 %868  ;;  %v839_v18 = vpop.permute.xlu0 %838  ;;  %v1067_v19 = vpack.c.b16 %v1039_v9, %v1039_v9  ;;  %v1068_v21 = vpack.c.b16 %v1040_v10, %v1040_v10 }
  0xb6   :  { %v873_v23 = vsel %vm872_vm3, %v5389_v14, %v5307_v31  ;;  %v841_v24 = vsel %vm840_vm4, %v5335_v43, %v839_v18  ;;  %v844_v25 = vsel %vm840_vm4, %v839_v18, %v5315_v32 }
  0xb7   :  { %v5401_v26 = vpop.permute.xlu2 %728  ;;  %v888_v27 = vmul.f32 %v880_v3, %v873_v23  ;;  %v856_v28 = vmul.f32 %v848_v4, %v841_v24  ;;  %v857_v33 = vmul.f32 %v849_v8, %v844_v25  ;;  %v1101_v35 = vsel %vm1099_vm5, %v1067_v19, 0 }
  0xb8   :  { %1113 = vmatpush.bf16.msra.mxu0 %v1101_v35  ;;  %v1104_v31 = vsel %vm1099_vm5, %v1068_v21, 0  ;;  %v509_v19 = vpack.c.bf16 %v5205_v13, %v5201_v12 }
  0xb9   :  { %v891_v37 = vpack.c.bf16 %v889_v22, %v888_v27  ;;  %v859_v38 = vpack.c.bf16 %v857_v33, %v856_v28  ;;  %1126 = vmatpush.bf16.msra.mxu1 %v1104_v31  ;;  %v5460_v27 = vld [vmem:[%s7310_s1 + $0x40] ss:$8 sm:$0xf] }
  0xba   :  { %v958_v41 = vld [vmem:[#allocation3 + $0xc8] sm:$0x33]  ;;  %511 = vst [vmem:[#allocation3 + $0x68] sm:$0x33] %v509_v19  ;;  %v638_v35 = vperm.slane %v5460_v27, 2  ;;  %v639_v31 = vperm.slane %v5460_v27, 3 }
  0xbb   :  { %v895_v42 = vrot.slane %v891_v37, 6  ;;  %861 = vst [vmem:[#allocation3 + $0xb8] sm:$0x33] %v859_v38  ;;  %268 = vrot.lane.b32.xlu1 %v5205_v13, %s5096_s0  ;;  %266 = vrot.lane.b32.xlu0 %v5201_v12, %s5096_s0  ;;  %v1041_v46 = vunpack.c.l.b16 %v958_v41  ;;  %v1042_v47 = vunpack.c.h.b16 %v958_v41  ;;  %v4333_v3 = vld [vmem:[#allocation3 + $0xa8] sm:$0xf]  ;;  %v878_v37 = vperm.slane %v5364_v57, 0 }
  0xbc   :  { %v4841_v5 = vld [vmem:[#allocation3 + $0xac] sm:$0xf]  ;;  %v879_v38 = vperm.slane %v5364_v57, 1 }
  0xbd   :  { %899 = vst [vmem:[#allocation3 + $0xb8] sm:$0xcc] %v895_v42  ;;  %446 = vrot.lane.b32.xlu2 %v5205_v13, %s5095_s20  ;;  %v5419_v48 = vpop.permute.xlu1 %724  ;;  %v661_v49 = vpop.permute.xlu0 %660  ;;  %v1069_v50 = vpack.c.b16 %v1041_v46, %v1041_v46  ;;  %v1070_v51 = vpack.c.b16 %v1042_v47, %v1042_v47 }
  0xbe   :  { %v663_v52 = vsel %vm662_vm6, %v5366_v58, %v661_v49  ;;  %v666_v53 = vsel %vm662_vm6, %v661_v49, %v5331_v39 }
  0xbf   :  { %v5427_v54 = vpop.permute.xlu2 %626  ;;  %v678_v55 = vmul.f32 %v670_v40, %v663_v52  ;;  %v679_v56 = vmul.f32 %v671_v44, %v666_v53  ;;  %v1107_v59 = vsel %vm1099_vm5, %v1069_v50, 0  ;;  %v1110_v60 = vsel %vm1099_vm5, %v1070_v51, 0  ;;  %v5490_v51 = vld [vmem:[%s7310_s1 + $0x42] ss:$8 sm:$0xf] }
  0xc0   :  { %1139 = vmatpush.bf16.msra.mxu2 %v1107_v59  ;;  %1152 = vmatpush.bf16.msra.mxu3 %v1110_v60  ;;  %v809_v59 = vperm.slane %v5278_v17, 1 }
  0xc1   :  { %v681_v62 = vpack.c.bf16 %v679_v56, %v678_v55  ;;  %v808_v56 = vperm.slane %v5278_v17, 0 }
  0xc3   :  { %v685_v0 = vrot.slane %v681_v62, 6  ;;  %338 = vrot.lane.b32.xlu1 %v5205_v13, %s5097_s28  ;;  %336 = vrot.lane.b32.xlu0 %v5201_v12, %s5097_s28 }
  0xc4   :  { %v4843_v4 = vld [vmem:[#allocation3 + $0xb4] sm:$0xf0]  ;;  %v4335_v7 = vld [vmem:[#allocation3 + $0xb8] sm:$0xf0] }
  0xc5   :  { %689 = vst [vmem:[#allocation3 + $0x88] sm:$0xcc] %v685_v0  ;;  %264 = vrot.lane.b32.xlu2 %v5196_v11, %s5096_s0  ;;  %v5445_v8 = vpop.permute.xlu1 %622  ;;  %v731_v9 = vpop.permute.xlu0 %730  ;;  %v4334_v10 = vor.u32 %v4843_v4, %v4333_v3  ;;  %v4338_v18 = vor.u32 %v4841_v5, %v4335_v7 }
  0xc6   :  { %v733_v21 = vsel %vm732_vm7, %v5401_v26, %v731_v9  ;;  %v736_v22 = vsel %vm732_vm7, %v731_v9, %v5419_v48 }
  0xc7   :  { %v5455_v23 = vpop.permute.xlu2 %696  ;;  %v748_v24 = vmul.f32 %v740_v1, %v733_v21  ;;  %v749_v25 = vmul.f32 %v741_v2, %v736_v22  ;;  %1140 = vmatpush.bf16.msra.mxu2 %v4334_v10  ;;  %1153 = vmatpush.bf16.msra.mxu3 %v4338_v18 }
  0xc9   :  { %v751_v28 = vpack.c.bf16 %v749_v25, %v748_v24 }
  0xcb   :  { %v755_v33 = vrot.slane %v751_v28, 6  ;;  %234 = vrot.lane.b32.xlu1 %v5201_v12, %s5098_s26  ;;  %232 = vrot.lane.b32.xlu0 %v5196_v11, %s5098_s26 }
  0xcd   :  { %759 = vst [vmem:[#allocation3 + $0x98] sm:$0xcc] %v755_v33  ;;  %334 = vrot.lane.b32.xlu2 %v5196_v11, %s5097_s28  ;;  %v5473_v40 = vpop.permute.xlu1 %692  ;;  %v629_v41 = vpop.permute.xlu0 %628 }
  0xce   :  { %v631_v42 = vsel %vm630_vm8, %v5427_v54, %v629_v41  ;;  %v634_v44 = vsel %vm630_vm8, %v629_v41, %v5445_v8 }
  0xcf   :  { %v867_v46 = vpop.permute.xlu2 %866  ;;  %v646_v47 = vmul.f32 %v638_v35, %v631_v42  ;;  %v647_v49 = vmul.f32 %v639_v31, %v634_v44  ;;  %v5542_v31 = vld [vmem:[%s7310_s1 + $0x27] ss:$8 sm:$0xf] }
  0xd0   :  { %v874_v50 = vsel %vm872_vm3, %v867_v46, %v5389_v14  ;;  %v875_v57 = vsel %vm872_vm3, %v5305_v30, %v867_v46  ;;  %v708_v30 = vperm.slane %v5490_v51, 2  ;;  %v709_v14 = vperm.slane %v5490_v51, 3 }
  0xd1   :  { %v886_v52 = vmul.f32 %v878_v37, %v875_v57  ;;  %v887_v53 = vmul.f32 %v879_v38, %v874_v50  ;;  %v649_v55 = vpack.c.bf16 %v647_v49, %v646_v47  ;;  %v600_v44 = vperm.slane %v5542_v31, 2 }
  0xd2   :  { %vm238_vm3 = vcmp.lt.s32.totalorder %v5273_v16, 30 }
  0xd3   :  { %v890_v60 = vpack.c.bf16 %v887_v53, %v886_v52  ;;  %651 = vst [vmem:[#allocation3 + $0x88] sm:$0x33] %v649_v55  ;;  %304 = vrot.lane.b32.xlu1 %v5201_v12, %s5099_s22  ;;  %302 = vrot.lane.b32.xlu0 %v5196_v11, %s5099_s22  ;;  %v601_v55 = vperm.slane %v5542_v31, 3 }
  0xd5   :  { %v894_v62 = vrot.slane %v890_v60, 6  ;;  %554 = vrot.lane.b32.xlu2 %v5196_v11, %s5091_s27  ;;  %v797_v17 = vpop.permute.xlu1 %796  ;;  %v699_v0 = vpop.permute.xlu0 %698 }
  0xd6   :  { %v804_v1 = vsel %vm802_vm0, %v797_v17, %v5271_v15  ;;  %v805_v2 = vsel %vm802_vm0, %v5289_v20, %v797_v17  ;;  %v701_v3 = vsel %vm700_vm9, %v5455_v23, %v699_v0  ;;  %v704_v4 = vsel %vm700_vm9, %v699_v0, %v5473_v40  ;;  %v5518_v15 = vld [vmem:[%s7310_s1 + $0x25] ss:$8 sm:$0xf] }
  0xd7   :  { %898 = vst [vmem:[#allocation3 + $0xb0] sm:$0xcc] %v894_v62  ;;  %v521_v5 = vpop.permute.xlu2 %520  ;;  %v816_v7 = vmul.f32 %v808_v56, %v805_v2  ;;  %v817_v9 = vmul.f32 %v809_v59, %v804_v1  ;;  %v716_v10 = vmul.f32 %v708_v30, %v701_v3  ;;  %v717_v18 = vmul.f32 %v709_v14, %v704_v4 }
  0xd8   :  { %v530_v22 = vperm.slane %v5518_v15, 2  ;;  %v531_v24 = vperm.slane %v5518_v15, 3  ;;  %v846_v1 = vperm.slane %v5371_v63, 0  ;;  %v847_v3 = vperm.slane %v5371_v63, 1 }
  0xd9   :  { %v820_v20 = vpack.c.bf16 %v817_v9, %v816_v7  ;;  %v719_v19 = vpack.c.bf16 %v717_v18, %v716_v10  ;;  %v776_v4 = vperm.slane %v5340_v45, 0  ;;  %v668_v7 = vperm.slane %v5407_v36, 0 }
  0xda   :  { %v4317_v46 = vld [vmem:[#allocation3 + $0x88] sm:$0xf]  ;;  %v4837_v49 = vld [vmem:[#allocation3 + $0x8c] sm:$0xf]  ;;  %v669_v9 = vperm.slane %v5407_v36, 1  ;;  %vm448_vm0 = vcmp.lt.s32.totalorder %v5273_v16, 2 }
  0xdb   :  { %v824_v21 = vrot.slane %v820_v20, 6  ;;  %721 = vst [vmem:[#allocation3 + $0x98] sm:$0x33] %v719_v19  ;;  %472 = vrot.lane.b32.xlu1 %v5187_v6, %s5093_s15  ;;  %402 = vrot.lane.b32.xlu0 %v5187_v6, %s5092_s30  ;;  %s5102_s30 = smov 34  }
  0xdd   :  { %828 = vst [vmem:[#allocation3 + $0xa0] sm:$0xcc] %v824_v21  ;;  %236 = vrot.lane.b32.xlu2 %v5205_v13, %s5098_s26  ;;  %v5529_v25 = vpop.permute.xlu1 %518  ;;  %v5531_v28 = vpop.permute.xlu0 %514 }
  0xde   :  { %v523_v33 = vsel %vm522_vm10, %v5529_v25, %v521_v5  ;;  %v526_v35 = vsel %vm522_vm10, %v521_v5, %v5531_v28  ;;  %v777_v5 = vperm.slane %v5340_v45, 1 }
  0xdf   :  { %v591_v37 = vpop.permute.xlu2 %590  ;;  %v538_v38 = vmul.f32 %v530_v22, %v523_v33  ;;  %v539_v41 = vmul.f32 %v531_v24, %v526_v35 }
  0xe1   :  { %v541_v42 = vpack.c.bf16 %v539_v41, %v538_v38 }
  0xe2   :  { %v4839_v47 = vld [vmem:[#allocation3 + $0x94] sm:$0xf0]  ;;  %v4319_v50 = vld [vmem:[#allocation3 + $0x98] sm:$0xf0] }
  0xe3   :  { %v545_v57 = vrot.slane %v541_v42, 6  ;;  %128 = vrot.lane.b32.xlu1 %v5205_v13, %s5100_s17  ;;  %126 = vrot.lane.b32.xlu0 %v5201_v12, %s5100_s17  ;;  %v4318_v52 = vor.u32 %v4839_v47, %v4317_v46  ;;  %v4322_v53 = vor.u32 %v4837_v49, %v4319_v50 }
  0xe5   :  { %549 = vst [vmem:[#allocation3 + $0x68] sm:$0xcc] %v545_v57  ;;  %306 = vrot.lane.b32.xlu2 %v5205_v13, %s5099_s22  ;;  %v5553_v56 = vpop.permute.xlu1 %588  ;;  %1141 = vmatpush.bf16.msra.mxu2 %v4318_v52  ;;  %v5555_v59 = vpop.permute.xlu0 %584 }
  0xe6   :  { %v593_v60 = vsel %vm592_vm11, %v5553_v56, %v591_v37  ;;  %1154 = vmatpush.bf16.msra.mxu3 %v4322_v53  ;;  %v596_v30 = vsel %vm592_vm11, %v591_v37, %v5555_v59 }
  0xe7   :  { %v5563_v14 = vpop.permute.xlu2 %552  ;;  %v608_v62 = vmul.f32 %v600_v44, %v593_v60  ;;  %v609_v17 = vmul.f32 %v601_v55, %v596_v30  ;;  %v738_v30 = vperm.slane %v5434_v61, 0 }
  0xe9   :  { %v611_v0 = vpack.c.bf16 %v609_v17, %v608_v62  ;;  %v739_v62 = vperm.slane %v5434_v61, 1  ;;  %v5630_v61 = vld [vmem:[%s7310_s1 + $0x21] ss:$8 sm:$0xf] }
  0xeb   :  { %v615_v2 = vrot.slane %v611_v0, 6  ;;  %198 = vrot.lane.b32.xlu1 %v5205_v13, %s5101_s19  ;;  %196 = vrot.lane.b32.xlu0 %v5201_v12, %s5101_s19 }
  0xed   :  { %619 = vst [vmem:[#allocation3 + $0x78] sm:$0xcc] %v615_v2  ;;  %124 = vrot.lane.b32.xlu2 %v5196_v11, %s5100_s17  ;;  %v835_v10 = vpop.permute.xlu1 %834  ;;  %v765_v18 = vpop.permute.xlu0 %764 }
  0xee   :  { %v842_v20 = vsel %vm840_vm4, %v835_v10, %v5335_v43  ;;  %v843_v63 = vsel %vm840_vm4, %v5315_v32, %v835_v10  ;;  %v772_v45 = vsel %vm770_vm2, %v765_v18, %v5317_v34  ;;  %v773_v19 = vsel %vm770_vm2, %v5303_v29, %v765_v18  ;;  %v5598_v34 = vld [vmem:[%s7310_s1 + $0x26] ss:$8 sm:$0xf] }
  0xef   :  { %v657_v21 = vpop.permute.xlu2 %656  ;;  %v854_v36 = vmul.f32 %v846_v1, %v843_v63  ;;  %v855_v22 = vmul.f32 %v847_v3, %v842_v20  ;;  %v784_v24 = vmul.f32 %v776_v4, %v773_v19  ;;  %v785_v33 = vmul.f32 %v777_v5, %v772_v45  ;;  %v4301_v45 = vld [vmem:[#allocation3 + $0x68] sm:$0xf] }
  0xf0   :  { %v664_v43 = vsel %vm662_vm6, %v657_v21, %v5366_v58  ;;  %v665_v32 = vsel %vm662_vm6, %v5331_v39, %v657_v21  ;;  %v569_v39 = vperm.slane %v5598_v34, 3  ;;  %v568_v58 = vperm.slane %v5598_v34, 2  ;;  %v4833_v21 = vld [vmem:[#allocation3 + $0x6c] sm:$0xf] }
  0xf1   :  { %v676_v35 = vmul.f32 %v668_v7, %v665_v32  ;;  %v677_v29 = vmul.f32 %v669_v9, %v664_v43  ;;  %v858_v37 = vpack.c.bf16 %v855_v22, %v854_v36  ;;  %v788_v38 = vpack.c.bf16 %v785_v33, %v784_v24 }
  0xf2   :  { %v418_v20 = vperm.slane %v5630_v61, 2  ;;  %v419_v24 = vperm.slane %v5630_v61, 3  ;;  %v706_v43 = vperm.slane %v5490_v51, 0  ;;  %v707_v32 = vperm.slane %v5490_v51, 1 }
  0xf3   :  { %v680_v41 = vpack.c.bf16 %v677_v29, %v676_v35  ;;  %860 = vst [vmem:[#allocation3 + $0xb0] sm:$0x33] %v858_v37  ;;  %90 = vrot.lane.b32.xlu1 %v5196_v11, %s5102_s30  ;;  %440 = vrot.lane.b32.xlu0 %v5187_v6, %s5095_s20  ;;  %s5103_s20 = smov 32   ;;  %vm340_vm2 = vcmp.lt.s32.totalorder %v5273_v16, 16  ;;  %vm308_vm4 = vcmp.lt.s32.totalorder %v5273_v16, 17 }
  0xf4   :  { %790 = vst [vmem:[#allocation3 + $0xa0] sm:$0x33] %v788_v38 }
  0xf5   :  { %v684_v42 = vrot.slane %v680_v41, 6  ;;  %194 = vrot.lane.b32.xlu2 %v5196_v11, %s5101_s19  ;;  %v559_v44 = vpop.permute.xlu1 %558  ;;  %v5609_v46 = vpop.permute.xlu0 %556  ;;  %v5662_v41 = vld [vmem:[%s7310_s1 + $0x23] ss:$8 sm:$0xf] }
  0xf6   :  { %v564_v47 = vsel %vm560_vm12, %v559_v44, %v5563_v14  ;;  %v561_v49 = vsel %vm560_vm12, %v5609_v46, %v559_v44 }
  0xf7   :  { %688 = vst [vmem:[#allocation3 + $0x80] sm:$0xcc] %v684_v42  ;;  %v407_v50 = vpop.permute.xlu2 %406  ;;  %v577_v57 = vmul.f32 %v569_v39, %v564_v47  ;;  %v576_v52 = vmul.f32 %v568_v58, %v561_v49  ;;  %v488_v49 = vperm.slane %v5662_v41, 2 }
  0xf9   :  { %v579_v53 = vpack.c.bf16 %v577_v57, %v576_v52 }
  0xfa   :  { %v4842_v55 = vld [vmem:[#allocation3 + $0xac] sm:$0xf0]  ;;  %v4327_v60 = vld [vmem:[#allocation3 + $0xb0] sm:$0xf0] }
  0xfb   :  { %581 = vst [vmem:[#allocation3 + $0x78] sm:$0x33] %v579_v53  ;;  %162 = vrot.lane.b32.xlu1 %v5196_v11, %s5103_s20  ;;  %94 = vrot.lane.b32.xlu0 %v5205_v13, %s5102_s30  ;;  %v4325_v17 = vld [vmem:[#allocation3 + $0xa0] sm:$0xf]  ;;  %v4840_v0 = vld [vmem:[#allocation3 + $0xa4] sm:$0xf] }
  0xfc   :  { %v4326_v1 = vor.u32 %v4842_v55, %v4325_v17  ;;  %v4330_v2 = vor.u32 %v4840_v0, %v4327_v60 }
  0xfd   :  { %370 = vrot.lane.b32.xlu2 %v5187_v6, %s5094_s18  ;;  %v5625_v3 = vpop.permute.xlu1 %404  ;;  %v727_v4 = vpop.permute.xlu0 %726 }
  0xfe   :  { %1114 = vmatpush.bf16.msra.mxu0 %v4326_v1  ;;  %1127 = vmatpush.bf16.msra.mxu1 %v4330_v2  ;;  %v734_v5 = vsel %vm732_vm7, %v727_v4, %v5401_v26  ;;  %v735_v7 = vsel %vm732_vm7, %v5419_v48, %v727_v4  ;;  %v412_v33 = vsel %vm410_vm13, %v5625_v3, %v407_v50  ;;  %vm130_vm7 = vcmp.lt.s32.totalorder %v5273_v16, 33 }
  0xff   :  { %v477_v9 = vpop.permute.xlu2 %476  ;;  %v746_v10 = vmul.f32 %v738_v30, %v735_v7  ;;  %v747_v18 = vmul.f32 %v739_v62, %v734_v5  ;;  %v426_v37 = vmul.f32 %v418_v20, %v412_v33  ;;  %v508_v30 = vpack.c.bf16 %v5196_v11, %v5187_v6  ;;  %v5702_v11 = vld [vmem:[%s7310_s1 + $0x20] ss:$8 sm:$0xf] }
 0x100   :  { %v387_v7 = vperm.slane %v5702_v11, 3 }
 0x101   :  { %v750_v63 = vpack.c.bf16 %v747_v18, %v746_v10  ;;  %510 = vst [vmem:[#allocation3 + $0x60] sm:$0x33] %v508_v30 }
 0x102   :  { %v4835_v19 = vld [vmem:[#allocation3 + $0x74] sm:$0xf0]  ;;  %v4303_v36 = vld [vmem:[#allocation3 + $0x78] sm:$0xf0] }
 0x103   :  { %v754_v22 = vrot.slane %v750_v63, 6  ;;  %262 = vrot.lane.b32.xlu1 %v5187_v6, %s5096_s0  ;;  %166 = vrot.lane.b32.xlu0 %v5205_v13, %s5103_s20  ;;  %v4302_v26 = vor.u32 %v4835_v19, %v4301_v45  ;;  %v4306_v48 = vor.u32 %v4833_v21, %v4303_v36  ;;  %v5726_v36 = vld [vmem:[%s7310_s1 + $0x22] ss:$8 sm:$0xf] }
 0x105   :  { %758 = vst [vmem:[#allocation3 + $0x90] sm:$0xcc] %v754_v22  ;;  %92 = vrot.lane.b32.xlu2 %v5201_v12, %s5102_s30  ;;  %v5652_v35 = vpop.permute.xlu1 %474  ;;  %1142 = vmatpush.bf16.msra.mxu2 %v4302_v26  ;;  %v5654_v13 = vpop.permute.xlu0 %408 }
 0x106   :  { %1155 = vmatpush.bf16.msra.mxu3 %v4306_v48  ;;  %v411_v29 = vsel %vm410_vm13, %v407_v50, %v5654_v13  ;;  %v636_v50 = vperm.slane %v5460_v27, 0  ;;  %v482_v53 = vsel %vm480_vm14, %v5652_v35, %v477_v9 }
 0x107   :  { %v695_v38 = vpop.permute.xlu2 %694  ;;  %v427_v39 = vmul.f32 %v419_v24, %v411_v29 }
 0x108   :  { %v702_v51 = vsel %vm700_vm9, %v695_v38, %v5455_v23  ;;  %v703_v58 = vsel %vm700_vm9, %v5473_v40, %v695_v38  ;;  %v637_v23 = vperm.slane %v5460_v27, 1  ;;  %v489_v40 = vperm.slane %v5662_v41, 3 }
 0x109   :  { %v714_v42 = vmul.f32 %v706_v43, %v703_v58  ;;  %v715_v44 = vmul.f32 %v707_v32, %v702_v51  ;;  %v429_v47 = vpack.c.bf16 %v427_v39, %v426_v37  ;;  %v457_v43 = vperm.slane %v5726_v36, 3 }
 0x10a   :  { %v456_v37 = vperm.slane %v5726_v36, 2 }
 0x10b   :  { %v718_v57 = vpack.c.bf16 %v715_v44, %v714_v42  ;;  %v433_v52 = vrot.slane %v429_v47, 6  ;;  %300 = vrot.lane.b32.xlu1 %v5187_v6, %s5099_s22  ;;  %230 = vrot.lane.b32.xlu0 %v5187_v6, %s5098_s26 }
 0x10d   :  { %720 = vst [vmem:[#allocation3 + $0x90] sm:$0x33] %v718_v57  ;;  %164 = vrot.lane.b32.xlu2 %v5201_v12, %s5103_s20  ;;  %v625_v55 = vpop.permute.xlu1 %624  ;;  %v5684_v60 = vpop.permute.xlu0 %478  ;;  %v496_v12 = vmul.f32 %v488_v49, %v482_v53  ;;  %v599_v57 = vperm.slane %v5542_v31, 1 }
 0x10e   :  { %437 = vst [vmem:[#allocation3 + $0x48] sm:$0xcc] %v433_v52  ;;  %v632_v27 = vsel %vm630_vm8, %v625_v55, %v5427_v54  ;;  %v633_v62 = vsel %vm630_vm8, %v5445_v8, %v625_v55  ;;  %v481_v17 = vsel %vm480_vm14, %v477_v9, %v5684_v60  ;;  %v386_v9 = vperm.slane %v5702_v11, 2 }
 0x10f   :  { %v5697_v0 = vpop.permute.xlu2 %376  ;;  %v644_v1 = vmul.f32 %v636_v50, %v633_v62  ;;  %v645_v2 = vmul.f32 %v637_v23, %v632_v27  ;;  %v497_v4 = vmul.f32 %v489_v40, %v481_v17  ;;  %v598_v50 = vperm.slane %v5542_v31, 0 }
 0x110   :  { %v528_v52 = vperm.slane %v5518_v15, 0  ;;  %v529_v23 = vperm.slane %v5518_v15, 1 }
 0x111   :  { %v648_v54 = vpack.c.bf16 %v645_v2, %v644_v1  ;;  %v499_v5 = vpack.c.bf16 %v497_v4, %v496_v12 }
 0x113   :  { %650 = vst [vmem:[#allocation3 + $0x80] sm:$0x33] %v648_v54  ;;  %v503_v8 = vrot.slane %v499_v5, 6  ;;  %88 = vrot.lane.b32.xlu1 %v5187_v6, %s5102_s30  ;;  %192 = vrot.lane.b32.xlu0 %v5187_v6, %s5101_s19 }
 0x114   :  { %v4838_v26 = vld [vmem:[#allocation3 + $0x8c] sm:$0xf0]  ;;  %v4311_v33 = vld [vmem:[#allocation3 + $0x90] sm:$0xf0] }
 0x115   :  { %507 = vst [vmem:[#allocation3 + $0x58] sm:$0xcc] %v503_v8  ;;  %332 = vrot.lane.b32.xlu2 %v5187_v6, %s5097_s28  ;;  %v375_v10 = vpop.permute.xlu1 %374  ;;  %v5713_v18 = vpop.permute.xlu0 %372 }
 0x116   :  { %v379_v20 = vsel %vm378_vm15, %v375_v10, %v5697_v0  ;;  %v380_v63 = vsel %vm378_vm15, %v5713_v18, %v375_v10 }
 0x117   :  { %v5721_v45 = vpop.permute.xlu2 %446  ;;  %v395_v19 = vmul.f32 %v387_v7, %v379_v20  ;;  %v394_v21 = vmul.f32 %v386_v9, %v380_v63  ;;  %v566_v20 = vperm.slane %v5598_v34, 0  ;;  %v567_v63 = vperm.slane %v5598_v34, 1 }
 0x119   :  { %v397_v22 = vpack.c.bf16 %v395_v19, %v394_v21 }
 0x11a   :  { %v4309_v48 = vld [vmem:[#allocation3 + $0x80] sm:$0xf]  ;;  %v4836_v24 = vld [vmem:[#allocation3 + $0x84] sm:$0xf] }
 0x11b   :  { %399 = vst [vmem:[#allocation3 + $0x48] sm:$0x33] %v397_v22  ;;  %v4310_v32 = vor.u32 %v4838_v26, %v4309_v48  ;;  %v4314_v29 = vor.u32 %v4836_v24, %v4311_v33 }
 0x11d   :  { %122 = vrot.lane.b32.xlu2 %v5187_v6, %s5100_s17  ;;  %v445_v38 = vpop.permute.xlu1 %444  ;;  %1115 = vmatpush.bf16.msra.mxu0 %v4310_v32  ;;  %v5733_v39 = vpop.permute.xlu0 %442  ;;  %v5790_v32 = vld [vmem:[%s7310_s1 + $0x7] ss:$8 sm:$0xf] }
 0x11e   :  { %v449_v51 = vsel %vm448_vm0, %v445_v38, %v5721_v45  ;;  %1128 = vmatpush.bf16.msra.mxu1 %v4314_v29  ;;  %v450_v58 = vsel %vm448_vm0, %v5733_v39, %v445_v38 }
 0x11f   :  { %v5741_v42 = vpop.permute.xlu2 %264  ;;  %v465_v44 = vmul.f32 %v457_v43, %v449_v51  ;;  %v464_v47 = vmul.f32 %v456_v37, %v450_v58 }
 0x121   :  { %v467_v49 = vpack.c.bf16 %v465_v44, %v464_v47  ;;  %v348_v44 = vperm.slane %v5790_v32, 2 }
 0x122   :  { %v4829_v54 = vld [vmem:[#allocation3 + $0x4c] sm:$0xf] }
 0x123   :  { %469 = vst [vmem:[#allocation3 + $0x58] sm:$0x33] %v467_v49 }
 0x125   :  { %160 = vrot.lane.b32.xlu2 %v5187_v6, %s5103_s20  ;;  %v587_v40 = vpop.permute.xlu1 %586  ;;  %v517_v53 = vpop.permute.xlu0 %516  ;;  %v5764_v6 = vld [vmem:[%s7310_s1 + $0x5] ss:$8 sm:$0xf] }
 0x126   :  { %v594_v55 = vsel %vm592_vm11, %v587_v40, %v5553_v56  ;;  %v595_v30 = vsel %vm592_vm11, %v5555_v59, %v587_v40  ;;  %v524_v31 = vsel %vm522_vm10, %v517_v53, %v5529_v25  ;;  %v525_v15 = vsel %vm522_vm10, %v5531_v28, %v517_v53  ;;  %v4285_v25 = vld [vmem:[#allocation3 + $0x48] sm:$0xf]  ;;  %v5808_v40 = vld [vmem:[%s7310_s1 + $0x4] ss:$8 sm:$0xf] }
 0x127   :  { %v5766_v27 = vpop.permute.xlu2 %334  ;;  %v606_v56 = vmul.f32 %v598_v50, %v595_v30  ;;  %v607_v62 = vmul.f32 %v599_v57, %v594_v55  ;;  %v536_v17 = vmul.f32 %v528_v52, %v525_v15  ;;  %v537_v12 = vmul.f32 %v529_v23, %v524_v31 }
 0x128   :  { %v278_v2 = vperm.slane %v5764_v6, 2  ;;  %v279_v28 = vperm.slane %v5764_v6, 3  ;;  %v247_v30 = vperm.slane %v5808_v40, 3  ;;  %v246_v31 = vperm.slane %v5808_v40, 2 }
 0x129   :  { %v610_v59 = vpack.c.bf16 %v607_v62, %v606_v56  ;;  %v540_v1 = vpack.c.bf16 %v537_v12, %v536_v17  ;;  %vm200_vm11 = vcmp.lt.s32.totalorder %v5273_v16, 31 }
 0x12a   :  { %v4831_v4 = vld [vmem:[#allocation3 + $0x54] sm:$0xf0]  ;;  %v4287_v5 = vld [vmem:[#allocation3 + $0x58] sm:$0xf0] }
 0x12b   :  { %v614_v8 = vrot.slane %v610_v59, 6  ;;  %v544_v7 = vrot.slane %v540_v1, 6  ;;  %v4286_v9 = vor.u32 %v4831_v4, %v4285_v25  ;;  %v4290_v10 = vor.u32 %v4829_v54, %v4287_v5 }
 0x12d   :  { %618 = vst [vmem:[#allocation3 + $0x70] sm:$0xcc] %v614_v8  ;;  %v5773_v19 = vpop.permute.xlu1 %268  ;;  %1143 = vmatpush.bf16.msra.mxu2 %v4286_v9  ;;  %1156 = vmatpush.bf16.msra.mxu3 %v4290_v10  ;;  %v267_v21 = vpop.permute.xlu0 %266  ;;  %v5826_v8 = vld [vmem:[%s7310_s1 + $0x6] ss:$8 sm:$0xf] }
 0x12e   :  { %548 = vst [vmem:[#allocation3 + $0x60] sm:$0xcc] %v544_v7  ;;  %v271_v22 = vsel %vm270_vm1, %v267_v21, %v5773_v19  ;;  %v272_v26 = vsel %vm270_vm1, %v5741_v42, %v267_v21  ;;  %v317_v9 = vperm.slane %v5826_v8, 3  ;;  %v316_v10 = vperm.slane %v5826_v8, 2 }
 0x12f   :  { %v555_v48 = vpop.permute.xlu2 %554  ;;  %v286_v24 = vmul.f32 %v278_v2, %v272_v26  ;;  %v287_v33 = vmul.f32 %v279_v28, %v271_v22 }
 0x130   :  { %v562_v34 = vsel %vm560_vm12, %v555_v48, %v5609_v46  ;;  %v563_v43 = vsel %vm560_vm12, %v5563_v14, %v555_v48  ;;  %v349_v46 = vperm.slane %v5790_v32, 3  ;;  %vm98_vm12 = vcmp.lt.s32.totalorder %v5273_v16, 34 }
 0x131   :  { %v574_v29 = vmul.f32 %v566_v20, %v563_v43  ;;  %v575_v37 = vmul.f32 %v567_v63, %v562_v34  ;;  %v289_v38 = vpack.c.bf16 %v287_v33, %v286_v24  ;;  %v486_v34 = vperm.slane %v5662_v41, 0 }
 0x132   :  { %v487_v43 = vperm.slane %v5662_v41, 1 }
 0x133   :  { %v578_v51 = vpack.c.bf16 %v575_v37, %v574_v29  ;;  %v293_v58 = vrot.slane %v289_v38, 6  ;;  %v416_v29 = vperm.slane %v5630_v61, 0  ;;  %v417_v37 = vperm.slane %v5630_v61, 1  ;;  %v5860_v61 = vld [vmem:[%s7310_s1 + $0x1] ss:$8 sm:$0xf] }
 0x135   :  { %580 = vst [vmem:[#allocation3 + $0x70] sm:$0x33] %v578_v51  ;;  %v5795_v47 = vpop.permute.xlu1 %338  ;;  %v337_v14 = vpop.permute.xlu0 %336  ;;  %v4293_v15 = vld [vmem:[#allocation3 + $0x60] sm:$0xf]  ;;  %v4832_v62 = vld [vmem:[#allocation3 + $0x64] sm:$0xf] }
 0x136   :  { %297 = vst [vmem:[#allocation3 + $0x28] sm:$0xcc] %v293_v58  ;;  %v341_v49 = vsel %vm340_vm2, %v337_v14, %v5795_v47  ;;  %v342_v50 = vsel %vm340_vm2, %v5766_v27, %v337_v14 }
 0x137   :  { %v5803_v57 = vpop.permute.xlu2 %236  ;;  %v356_v52 = vmul.f32 %v348_v44, %v342_v50  ;;  %v357_v23 = vmul.f32 %v349_v46, %v341_v49 }
 0x139   :  { %v359_v53 = vpack.c.bf16 %v357_v23, %v356_v52 }
 0x13b   :  { %v363_v55 = vrot.slane %v359_v53, 6  ;;  %v138_v53 = vperm.slane %v5860_v61, 2 }
 0x13c   :  { %v4834_v56 = vld [vmem:[#allocation3 + $0x6c] sm:$0xf0]  ;;  %v4295_v17 = vld [vmem:[#allocation3 + $0x70] sm:$0xf0] }
 0x13d   :  { %367 = vst [vmem:[#allocation3 + $0x38] sm:$0xcc] %v363_v55  ;;  %v235_v12 = vpop.permute.xlu1 %234  ;;  %v5813_v59 = vpop.permute.xlu0 %232  ;;  %v4294_v1 = vor.u32 %v4834_v56, %v4293_v15  ;;  %v4298_v25 = vor.u32 %v4832_v62, %v4295_v17 }
 0x13e   :  { %v239_v2 = vsel %vm238_vm3, %v235_v12, %v5803_v57  ;;  %v240_v28 = vsel %vm238_vm3, %v5813_v59, %v235_v12  ;;  %v384_v12 = vperm.slane %v5702_v11, 0 }
 0x13f   :  { %v5821_v4 = vpop.permute.xlu2 %306  ;;  %v255_v54 = vmul.f32 %v247_v30, %v239_v2  ;;  %v254_v5 = vmul.f32 %v246_v31, %v240_v28  ;;  %1116 = vmatpush.bf16.msra.mxu0 %v4294_v1  ;;  %1129 = vmatpush.bf16.msra.mxu1 %v4298_v25  ;;  %v385_v1 = vperm.slane %v5702_v11, 1 }
 0x141   :  { %v257_v7 = vpack.c.bf16 %v255_v54, %v254_v5 }
 0x143   :  { %259 = vst [vmem:[#allocation3 + $0x28] sm:$0x33] %v257_v7 }
 0x145   :  { %v305_v20 = vpop.permute.xlu1 %304  ;;  %v5831_v63 = vpop.permute.xlu0 %302 }
 0x146   :  { %v309_v21 = vsel %vm308_vm4, %v305_v20, %v5821_v4  ;;  %v310_v22 = vsel %vm308_vm4, %v5831_v63, %v305_v20  ;;  %v5886_v20 = vld [vmem:[%s7310_s1 + $0x3] ss:$8 sm:$0xf] }
 0x147   :  { %v5839_v26 = vpop.permute.xlu2 %124  ;;  %v325_v48 = vmul.f32 %v317_v9, %v309_v21  ;;  %v324_v24 = vmul.f32 %v316_v10, %v310_v22 }
 0x149   :  { %v327_v33 = vpack.c.bf16 %v325_v48, %v324_v24 }
 0x14a   :  { %v4825_v30 = vld [vmem:[#allocation3 + $0x2c] sm:$0xf] }
 0x14b   :  { %329 = vst [vmem:[#allocation3 + $0x38] sm:$0x33] %v327_v33 }
 0x14d   :  { %v473_v38 = vpop.permute.xlu1 %472  ;;  %v403_v51 = vpop.permute.xlu0 %402 }
 0x14e   :  { %v483_v58 = vsel %vm480_vm14, %v473_v38, %v5652_v35  ;;  %v484_v44 = vsel %vm480_vm14, %v5684_v60, %v473_v38  ;;  %v413_v46 = vsel %vm410_vm13, %v403_v51, %v5625_v3  ;;  %v414_v41 = vsel %vm410_vm13, %v5654_v13, %v403_v51  ;;  %v4269_v3 = vld [vmem:[#allocation3 + $0x28] sm:$0xf] }
 0x14f   :  { %v5862_v14 = vpop.permute.xlu2 %194  ;;  %v494_v35 = vmul.f32 %v486_v34, %v484_v44  ;;  %v495_v49 = vmul.f32 %v487_v43, %v483_v58  ;;  %v424_v50 = vmul.f32 %v416_v29, %v414_v41  ;;  %v425_v52 = vmul.f32 %v417_v37, %v413_v46 }
 0x150   :  { %v139_v13 = vperm.slane %v5860_v61, 3  ;;  %v208_v34 = vperm.slane %v5886_v20, 2  ;;  %v454_v41 = vperm.slane %v5726_v36, 0  ;;  %vm168_vm13 = vcmp.lt.s32.totalorder %v5273_v16, 32 }
 0x151   :  { %v498_v60 = vpack.c.bf16 %v495_v49, %v494_v35  ;;  %v428_v23 = vpack.c.bf16 %v425_v52, %v424_v50  ;;  %v455_v35 = vperm.slane %v5726_v36, 1 }
 0x152   :  { %v4827_v55 = vld [vmem:[#allocation3 + $0x34] sm:$0xf0]  ;;  %v4271_v31 = vld [vmem:[#allocation3 + $0x38] sm:$0xf0] }
 0x153   :  { %v502_v15 = vrot.slane %v498_v60, 6  ;;  %v432_v56 = vrot.slane %v428_v23, 6  ;;  %v4270_v62 = vor.u32 %v4827_v55, %v4269_v3  ;;  %v4274_v17 = vor.u32 %v4825_v30, %v4271_v31  ;;  %v5923_v30 = vld [vmem:[%s7310_s1 + $0x2] ss:$8 sm:$0xf] }
 0x154   :  { %v346_v31 = vperm.slane %v5790_v32, 0 }
 0x155   :  { %506 = vst [vmem:[#allocation3 + $0x50] sm:$0xcc] %v502_v15  ;;  %v5869_v25 = vpop.permute.xlu1 %128  ;;  %1144 = vmatpush.bf16.msra.mxu2 %v4270_v62  ;;  %1157 = vmatpush.bf16.msra.mxu3 %v4274_v17  ;;  %v127_v2 = vpop.permute.xlu0 %126  ;;  %v347_v15 = vperm.slane %v5790_v32, 1 }
 0x156   :  { %436 = vst [vmem:[#allocation3 + $0x40] sm:$0xcc] %v432_v56  ;;  %v131_v28 = vsel %vm130_vm7, %v127_v2, %v5869_v25  ;;  %v132_v54 = vsel %vm130_vm7, %v5839_v26, %v127_v2  ;;  %v176_v2 = vperm.slane %v5923_v30, 2 }
 0x157   :  { %v371_v5 = vpop.permute.xlu2 %370  ;;  %v146_v7 = vmul.f32 %v138_v53, %v132_v54  ;;  %v147_v9 = vmul.f32 %v139_v13, %v131_v28  ;;  %v5912_v13 = vld [vmem:[%s7310_s1] ss:$8 sm:$0xf] }
 0x158   :  { %v381_v11 = vsel %vm378_vm15, %v371_v5, %v5713_v18  ;;  %v382_v10 = vsel %vm378_vm15, %v5697_v0, %v371_v5  ;;  %v209_v18 = vperm.slane %v5886_v20, 3  ;;  %v106_v55 = vperm.slane %v5912_v13, 2 }
 0x159   :  { %v392_v21 = vmul.f32 %v384_v12, %v382_v10  ;;  %v393_v22 = vmul.f32 %v385_v1, %v381_v11  ;;  %v149_v48 = vpack.c.bf16 %v147_v9, %v146_v7  ;;  %v276_v5 = vperm.slane %v5764_v6, 0 }
 0x15a   :  { %v277_v7 = vperm.slane %v5764_v6, 1  ;;  %v136_v6 = vperm.slane %v5860_v61, 0 }
 0x15b   :  { %v396_v24 = vpack.c.bf16 %v393_v22, %v392_v21  ;;  %v153_v33 = vrot.slane %v149_v48, 6  ;;  %v177_v21 = vperm.slane %v5923_v30, 3 }
 0x15d   :  { %398 = vst [vmem:[#allocation3 + $0x40] sm:$0x33] %v396_v24  ;;  %v5891_v43 = vpop.permute.xlu1 %198  ;;  %v197_v0 = vpop.permute.xlu0 %196 }
 0x15e   :  { %157 = vst [vmem:[#allocation3 + $0x8] sm:$0xcc] %v153_v33  ;;  %v201_v29 = vsel %vm200_vm11, %v197_v0, %v5891_v43  ;;  %v202_v37 = vsel %vm200_vm11, %v5862_v14, %v197_v0 }
 0x15f   :  { %v93_v38 = vpop.permute.xlu2 %92  ;;  %v216_v51 = vmul.f32 %v208_v34, %v202_v37  ;;  %v217_v58 = vmul.f32 %v209_v18, %v201_v29  ;;  %v137_v29 = vperm.slane %v5860_v61, 1 }
 0x161   :  { %v219_v44 = vpack.c.bf16 %v217_v58, %v216_v51 }
 0x163   :  { %v223_v46 = vrot.slane %v219_v44, 6 }
 0x164   :  { %v4277_v22 = vld [vmem:[#allocation3 + $0x40] sm:$0xf]  ;;  %v4828_v24 = vld [vmem:[#allocation3 + $0x44] sm:$0xf] }
 0x165   :  { %227 = vst [vmem:[#allocation3 + $0x18] sm:$0xcc] %v223_v46  ;;  %v5901_v49 = vpop.permute.xlu1 %90  ;;  %v441_v50 = vpop.permute.xlu0 %440 }
 0x166   :  { %v451_v52 = vsel %vm448_vm0, %v441_v50, %v5733_v39  ;;  %v452_v60 = vsel %vm448_vm0, %v5721_v45, %v441_v50  ;;  %v107_v39 = vperm.slane %v5912_v13, 3  ;;  %v100_v45 = vsel %vm98_vm12, %v5901_v49, %v93_v38 }
 0x167   :  { %v165_v23 = vpop.permute.xlu2 %164  ;;  %v462_v3 = vmul.f32 %v454_v41, %v452_v60  ;;  %v463_v53 = vmul.f32 %v455_v35, %v451_v52  ;;  %v114_v12 = vmul.f32 %v106_v55, %v100_v45  ;;  %v959_v52 = vld [vmem:[%s7311_s3] sm:$0xff]  ;;  %v5104_v60 = vmov 0  }
 0x168   :  { %4974 = vset.pattern.permute.xlu0 %v5104_v60  ;;  %4975 = vset.pattern.permute.xlu1 %v5104_v60  ;;  %v314_v55 = vperm.slane %v5826_v8, 0  ;;  %vm1095_vm0 = vcmask 818176  }
 0x169   :  { %v466_v36 = vpack.c.bf16 %v463_v53, %v462_v3  ;;  %962 = vperm.xlu0 %4974, %v959_v52  }
 0x16b   :  { %468 = vst [vmem:[#allocation3 + $0x50] sm:$0x33] %v466_v36 }
 0x16d   :  { %v5927_v56 = vpop.permute.xlu1 %162  ;;  %v5929_v62 = vpop.permute.xlu0 %94 }
 0x16e   :  { %v99_v17 = vsel %vm98_vm12, %v93_v38, %v5929_v62 }
 0x16f   :  { %v333_v1 = vpop.permute.xlu2 %332  ;;  %v115_v28 = vmul.f32 %v107_v39, %v99_v17  ;;  %v315_v39 = vperm.slane %v5826_v8, 1  ;;  %v174_v17 = vperm.slane %v5923_v30, 0 }
 0x170   :  { %v343_v54 = vsel %vm340_vm2, %v333_v1, %v5766_v27  ;;  %v344_v32 = vsel %vm340_vm2, %v5795_v47, %v333_v1  ;;  %v170_v27 = vsel %vm168_vm13, %v5927_v56, %v165_v23 }
 0x171   :  { %v354_v9 = vmul.f32 %v346_v31, %v344_v32  ;;  %v355_v11 = vmul.f32 %v347_v15, %v343_v54  ;;  %v117_v10 = vpack.c.bf16 %v115_v28, %v114_v12  ;;  %v184_v51 = vmul.f32 %v176_v2, %v170_v27 }
 0x172   :  { %v4830_v48 = vld [vmem:[#allocation3 + $0x4c] sm:$0xf0]  ;;  %v4279_v33 = vld [vmem:[#allocation3 + $0x50] sm:$0xf0]  ;;  %v245_v15 = vperm.slane %v5808_v40, 1  ;;  %v175_v12 = vperm.slane %v5923_v30, 1 }
 0x173   :  { %v358_v34 = vpack.c.bf16 %v355_v11, %v354_v9  ;;  %119 = vst [vmem:[#allocation3 + $0x8] sm:$0x33] %v117_v10  ;;  %v4278_v47 = vor.u32 %v4830_v48, %v4277_v22  ;;  %v4282_v18 = vor.u32 %v4828_v24, %v4279_v33  ;;  %v104_v28 = vperm.slane %v5912_v13, 0 }
 0x174   :  { %v105_v10 = vperm.slane %v5912_v13, 1 }
 0x175   :  { %v362_v0 = vrot.slane %v358_v34, 6  ;;  %v263_v37 = vpop.permute.xlu1 %262  ;;  %v167_v38 = vpop.permute.xlu0 %166  ;;  %1117 = vmatpush.bf16.msra.mxu0 %v4278_v47  ;;  %1130 = vmatpush.bf16.msra.mxu1 %v4282_v18 }
 0x176   :  { %v273_v58 = vsel %vm270_vm1, %v263_v37, %v5741_v42  ;;  %v274_v44 = vsel %vm270_vm1, %v5773_v19, %v263_v37  ;;  %v169_v46 = vsel %vm168_vm13, %v165_v23, %v167_v38 }
 0x177   :  { %366 = vst [vmem:[#allocation3 + $0x30] sm:$0xcc] %v362_v0  ;;  %v123_v41 = vpop.permute.xlu2 %122  ;;  %v284_v35 = vmul.f32 %v276_v5, %v274_v44  ;;  %v285_v61 = vmul.f32 %v277_v7, %v273_v58  ;;  %v185_v50 = vmul.f32 %v177_v21, %v169_v46 }
 0x178   :  { %v133_v42 = vsel %vm130_vm7, %v123_v41, %v5839_v26  ;;  %v134_v19 = vsel %vm130_vm7, %v5869_v25, %v123_v41  ;;  %v244_v26 = vperm.slane %v5808_v40, 0 }
 0x179   :  { %v144_v23 = vmul.f32 %v136_v6, %v134_v19  ;;  %v145_v3 = vmul.f32 %v137_v29, %v133_v42  ;;  %v288_v53 = vpack.c.bf16 %v285_v61, %v284_v35  ;;  %v187_v36 = vpack.c.bf16 %v185_v50, %v184_v51  ;;  %v932_v29 = vld [vmem:[%s7312_s2] sm:$0xf] }
 0x17a   :  { %v4253_v24 = vld [vmem:[#allocation3 + $0x8] sm:$0xf]  ;;  %v4821_v34 = vld [vmem:[#allocation3 + $0xc] sm:$0xf] }
 0x17b   :  { %v148_v45 = vpack.c.bf16 %v145_v3, %v144_v23  ;;  %v292_v31 = vrot.slane %v288_v53, 6  ;;  %189 = vst [vmem:[#allocation3 + $0x18] sm:$0x33] %v187_v36 }
 0x17d   :  { %v152_v25 = vrot.slane %v148_v45, 6  ;;  %296 = vst [vmem:[#allocation3 + $0x20] sm:$0xcc] %v292_v31  ;;  %v301_v1 = vpop.permute.xlu1 %300  ;;  %v231_v2 = vpop.permute.xlu0 %230 }
 0x17e   :  { %v311_v8 = vsel %vm308_vm4, %v301_v1, %v5831_v63  ;;  %v312_v54 = vsel %vm308_vm4, %v5821_v4, %v301_v1  ;;  %v241_v40 = vsel %vm238_vm3, %v231_v2, %v5813_v59  ;;  %v242_v30 = vsel %vm238_vm3, %v5803_v57, %v231_v2 }
 0x17f   :  { %156 = vst [vmem:[#allocation3] sm:$0xcc] %v152_v25  ;;  %v161_v32 = vpop.permute.xlu2 %160  ;;  %v322_v5 = vmul.f32 %v314_v55, %v312_v54  ;;  %v323_v7 = vmul.f32 %v315_v39, %v311_v8  ;;  %v252_v9 = vmul.f32 %v244_v26, %v242_v30  ;;  %v253_v11 = vmul.f32 %v245_v15, %v241_v40 }
 0x180   :  { %v171_v63 = vsel %vm168_vm13, %v161_v32, %v5927_v56  ;;  %v172_v4 = vsel %vm168_vm13, %v167_v38, %v161_v32  ;;  %v206_v59 = vperm.slane %v5886_v20, 0  ;;  %v207_v56 = vperm.slane %v5886_v20, 1 }
 0x181   :  { %v182_v21 = vmul.f32 %v174_v17, %v172_v4  ;;  %v183_v22 = vmul.f32 %v175_v12, %v171_v63  ;;  %v326_v57 = vpack.c.bf16 %v323_v7, %v322_v5  ;;  %v256_v48 = vpack.c.bf16 %v253_v11, %v252_v9 }
 0x182   :  { %v4823_v33 = vld [vmem:[#allocation3 + $0x14] sm:$0xf0]  ;;  %v4255_v27 = vld [vmem:[#allocation3 + $0x18] sm:$0xf0]  ;;  %vm1631_vm13 = vcmask 588800  }
 0x183   :  { %v186_v47 = vpack.c.bf16 %v183_v22, %v182_v21  ;;  %328 = vst [vmem:[#allocation3 + $0x30] sm:$0x33] %v326_v57  ;;  %v4254_v18 = vor.u32 %v4823_v33, %v4253_v24  ;;  %v4258_v0 = vor.u32 %v4821_v34, %v4255_v27 }
 0x184   :  { %258 = vst [vmem:[#allocation3 + $0x20] sm:$0x33] %v256_v48 }
 0x185   :  { %188 = vst [vmem:[#allocation3 + $0x10] sm:$0x33] %v186_v47  ;;  %v89_v6 = vpop.permute.xlu1 %88  ;;  %1145 = vmatpush.bf16.msra.mxu2 %v4254_v18  ;;  %1158 = vmatpush.bf16.msra.mxu3 %v4258_v0  ;;  %v193_v13 = vpop.permute.xlu0 %192 }
 0x186   :  { %v101_v37 = vsel %vm98_vm12, %v89_v6, %v5901_v49  ;;  %v102_v38 = vsel %vm98_vm12, %v5929_v62, %v89_v6  ;;  %v203_v20 = vsel %vm200_vm11, %v193_v13, %v5862_v14  ;;  %v204_v51 = vsel %vm200_vm11, %v5891_v43, %v193_v13 }
 0x187   :  { %v112_v58 = vmul.f32 %v104_v28, %v102_v38  ;;  %v113_v44 = vmul.f32 %v105_v10, %v101_v37  ;;  %v214_v46 = vmul.f32 %v206_v59, %v204_v51  ;;  %v215_v41 = vmul.f32 %v207_v56, %v203_v20 }
 0x188   :  { %4341 = vmatmul.msk.bf16.vlgmr.msra.gmra.mxu2 %vm1095_vm0, %v932_v29  ;;  %4342 = vmatmul.msk.bf16.vlgmr.msra.gmra.mxu3 %vm1095_vm0, %v932_v29  ;;  %vm1635_vm12 = vcmask 1043456  }
 0x189   :  { %v116_v49 = vpack.c.bf16 %v113_v44, %v112_v58  ;;  %v218_v35 = vpack.c.bf16 %v215_v41, %v214_v46 }
 0x18a   :  { %v4826_v61 = vld [vmem:[#allocation3 + $0x2c] sm:$0xf0]  ;;  %v4263_v62 = vld [vmem:[#allocation3 + $0x30] sm:$0xf0] }
 0x18b   :  { %118 = vst [vmem:[#allocation3] sm:$0x33] %v116_v49  ;;  %v222_v50 = vrot.slane %v218_v35, 6  ;;  %v4261_v52 = vld [vmem:[#allocation3 + $0x20] sm:$0xf] }
 0x18c   :  { %v4262_v14 = vor.u32 %v4826_v61, %v4261_v52  ;;  %v4824_v42 = vld [vmem:[#allocation3 + $0x24] sm:$0xf] }
 0x18d   :  { %226 = vst [vmem:[#allocation3 + $0x10] sm:$0xcc] %v222_v50  ;;  %v4266_v19 = vor.u32 %v4824_v42, %v4263_v62 }
 0x18e   :  { %1118 = vmatpush.bf16.msra.mxu0 %v4262_v14 }
 0x18f   :  { %1131 = vmatpush.bf16.msra.mxu1 %v4266_v19 }
 0x192   :  { %v4245_v43 = vld [vmem:[#allocation3] sm:$0xf]  ;;  %v4820_v23 = vld [vmem:[#allocation3 + $0x4] sm:$0xf] }
 0x194   :  { %v4822_v60 = vld [vmem:[#allocation3 + $0xc] sm:$0xf0]  ;;  %v4247_v3 = vld [vmem:[#allocation3 + $0x10] sm:$0xf0] }
 0x195   :  { %v4246_v53 = vor.u32 %v4822_v60, %v4245_v43  ;;  %v4250_v36 = vor.u32 %v4820_v23, %v4247_v3 }
 0x197   :  { %1119 = vmatpush.bf16.msra.mxu0 %v4246_v53  ;;  %1132 = vmatpush.bf16.msra.mxu1 %v4250_v36 }
 0x19a   :  { %4339 = vmatmul.msk.bf16.vlgmr.msra.gmra.mxu0 %vm1095_vm0, %v932_v29  ;;  %4340 = vmatmul.msk.bf16.vlgmr.msra.gmra.mxu1 %vm1095_vm0, %v932_v29 }
 0x1db   :  { %v963_v55 = vpop.permute.xlu0 %962 }
 0x20b   :  { %v1147_v39 = vpop.f32.mrf.mxu2  ;;  %v1160_v45 = vpop.f32.mrf.mxu3 }
 0x20c   :  { %v6013_v31 = vadd.f32 %v1147_v39, %v963_v55  ;;  %v6015_v26 = vadd.f32 %v1160_v45, %v963_v55 }
 0x20e   :  { %v6018_v15 = vmul.f32 0.70710677, %v6013_v31  ;;  %v6021_v25 = vmul.f32 0.70710677, %v6015_v26 }
 0x210   :  { %v1182_v17 = vand.u32 2147483647, %v6018_v15  ;;  %v1183_v12 = vand.u32 2147483647, %v6021_v25  ;;  %vm1174_vm1 = vcmp.ge.f32.partialorder %v6018_v15, 0.0  ;;  %vm1175_vm3 = vcmp.ge.f32.partialorder %v6021_v25, 0.0 }
 0x211   :  { %v1166_v25 = vmul.f32 0.5, %v6013_v31 }
 0x212   :  { %v1186_v1 = vmul.f32 0.3275911, %v1182_v17  ;;  %v1187_v2 = vmul.f32 0.3275911, %v1183_v12  ;;  %v1234_v4 = vsub.f32 0.0, %v1182_v17  ;;  %v1235_v57 = vsub.f32 0.0, %v1183_v12 }
 0x213   :  { %v1162_v28 = vpop.f32.mrf.mxu3  ;;  %v1149_v8 = vpop.f32.mrf.mxu2 }
 0x214   :  { %v1190_v54 = vadd.f32 1.0, %v1186_v1  ;;  %v1191_v40 = vadd.f32 1.0, %v1187_v2  ;;  %v1238_v0 = vmul.f32 %v1234_v4, %v1182_v17  ;;  %v1239_v13 = vmul.f32 %v1235_v57, %v1183_v12 }
 0x216   :  { %4976 = vrcp.f32 %v1190_v54  ;;  %v1244_v51 = vmul.f32 1.442695, %v1238_v0  ;;  %v1246_v44 = vmul.f32 1.442695, %v1239_v13 }
 0x217   :  { %4978 = vrcp.f32 %v1191_v40  ;;  %v1121_v30 = vpop.f32.mrf.mxu0  ;;  %v1134_v32 = vpop.f32.mrf.mxu1 }
 0x218   :  { %v6025_v5 = vadd.f32 %v1121_v30, %v963_v55  ;;  %v6027_v7 = vadd.f32 %v1134_v32, %v963_v55 }
 0x21a   :  { %v6030_v9 = vmul.f32 0.70710677, %v6025_v5  ;;  %v6033_v11 = vmul.f32 0.70710677, %v6027_v7 }
 0x21c   :  { %v4977_v63 = vpop.eup %4976  ;;  %v1180_v10 = vand.u32 2147483647, %v6030_v9  ;;  %v1181_v59 = vand.u32 2147483647, %v6033_v11  ;;  %vm1172_vm7 = vcmp.ge.f32.partialorder %v6030_v9, 0.0  ;;  %vm1173_vm11 = vcmp.ge.f32.partialorder %v6033_v11, 0.0 }
 0x21d   :  { %v4979_v21 = vpop.eup %4978  ;;  %v1198_v22 = vmul.f32 1.0614054, %v4977_v63  ;;  %v5074_v11 = vld [vmem:[#allocation2 + $0x10] sm:$0xff] }
 0x21e   :  { %v1199_v48 = vmul.f32 1.0614054, %v4979_v21  ;;  %v1184_v24 = vmul.f32 0.3275911, %v1180_v10  ;;  %v1185_v34 = vmul.f32 0.3275911, %v1181_v59 }
 0x21f   :  { %v1202_v33 = vadd.f32 -1.4531521, %v1198_v22  ;;  %v1123_v27 = vpop.f32.mrf.mxu0  ;;  %v1136_v47 = vpop.f32.mrf.mxu1  ;;  %v1232_v61 = vsub.f32 0.0, %v1180_v10  ;;  %v1233_v14 = vsub.f32 0.0, %v1181_v59 }
 0x220   :  { %v1203_v18 = vadd.f32 -1.4531521, %v1199_v48  ;;  %v1188_v56 = vadd.f32 1.0, %v1184_v24  ;;  %v1189_v29 = vadd.f32 1.0, %v1185_v34  ;;  %v1167_v27 = vmul.f32 0.5, %v6015_v26 }
 0x221   :  { %v1206_v6 = vmul.f32 %v4977_v63, %v1202_v33  ;;  %v1236_v3 = vmul.f32 %v1232_v61, %v1180_v10  ;;  %v1237_v39 = vmul.f32 %v1233_v14, %v1181_v59  ;;  %v5105_v10 = vmov -1.0  }
 0x222   :  { %v1207_v37 = vmul.f32 %v4979_v21, %v1203_v18  ;;  %4980 = vrcp.f32 %v1188_v56  ;;  %v1176_v61 = vsel %vm1172_vm7, 1.0, %v5105_v10 }
 0x223   :  { %v1210_v38 = vadd.f32 1.4214138, %v1206_v6  ;;  %4982 = vrcp.f32 %v1189_v29  ;;  %v1240_v54 = vmul.f32 1.442695, %v1236_v3  ;;  %v1242_v4 = vmul.f32 1.442695, %v1237_v39 }
 0x224   :  { %v1211_v20 = vadd.f32 1.4214138, %v1207_v37  ;;  %4984 = vpow2.f32 %v1244_v51  ;;  %v5072_v29 = vld [vmem:[#allocation2 + $0x18] sm:$0xff]  ;;  %v5073_v51 = vld [vmem:[#allocation2 + $0x8] sm:$0xff]  ;;  %v5075_v3 = vld [vmem:[#allocation2] sm:$0xff] }
 0x225   :  { %v1214_v58 = vmul.f32 %v4977_v63, %v1210_v38  ;;  %4986 = vpow2.f32 %v1246_v44 }
 0x226   :  { %v1215_v46 = vmul.f32 %v4979_v21, %v1211_v20  ;;  %4988 = vpow2.f32 %v1240_v54 }
 0x227   :  { %v1218_v41 = vadd.f32 -0.28449672, %v1214_v58  ;;  %4990 = vpow2.f32 %v1242_v4 }
 0x228   :  { %v4981_v49 = vpop.eup %4980  ;;  %v1219_v35 = vadd.f32 -0.28449672, %v1215_v46 }
 0x229   :  { %v4983_v62 = vpop.eup %4982  ;;  %v1222_v50 = vmul.f32 %v4977_v63, %v1218_v41  ;;  %v1196_v52 = vmul.f32 1.0614054, %v4981_v49 }
 0x22a   :  { %v1223_v42 = vmul.f32 %v4979_v21, %v1219_v35  ;;  %v1197_v19 = vmul.f32 1.0614054, %v4983_v62  ;;  %v4985_v45 = vpop.eup %4984 }
 0x22b   :  { %v1226_v43 = vadd.f32 0.2548296, %v1222_v50  ;;  %v1200_v60 = vadd.f32 -1.4531521, %v1196_v52  ;;  %v4987_v1 = vpop.eup %4986 }
 0x22c   :  { %v1227_v23 = vadd.f32 0.2548296, %v1223_v42  ;;  %v1201_v53 = vadd.f32 -1.4531521, %v1197_v19  ;;  %v4989_v20 = vpop.eup %4988  ;;  %v1164_v42 = vmul.f32 0.5, %v6025_v5  ;;  %v1165_v19 = vmul.f32 0.5, %v6027_v7 }
 0x22d   :  { %v1230_v36 = vmul.f32 %v4977_v63, %v1226_v43  ;;  %v1204_v55 = vmul.f32 %v4981_v49, %v1200_v60  ;;  %v1178_v63 = vsel %vm1174_vm1, 1.0, %v5105_v10  ;;  %v4991_v46 = vpop.eup %4990 }
 0x22e   :  { %v1231_v17 = vmul.f32 %v4979_v21, %v1227_v23  ;;  %v1205_v12 = vmul.f32 %v4983_v62, %v1201_v53  ;;  %v1179_v21 = vsel %vm1175_vm3, 1.0, %v5105_v10 }
 0x22f   :  { %v1250_v2 = vmul.f32 %v4985_v45, %v1230_v36  ;;  %v1208_v28 = vadd.f32 1.4214138, %v1204_v55 }
 0x230   :  { %v1251_v8 = vmul.f32 %v4987_v1, %v1231_v17  ;;  %v1209_v40 = vadd.f32 1.4214138, %v1205_v12  ;;  %v4350_v12 = vld [vmem:[%s7310_s1 + $0x42] ss:$8 sm:$0xf] }
 0x231   :  { %v1254_v30 = vsub.f32 1.0, %v1250_v2  ;;  %v1212_v32 = vmul.f32 %v4981_v49, %v1208_v28  ;;  %v1500_v1 = vperm.slane %v4350_v12, 0  ;;  %v1501_v2 = vperm.slane %v4350_v12, 1 }
 0x232   :  { %v1255_v59 = vsub.f32 1.0, %v1251_v8  ;;  %v1213_v22 = vmul.f32 %v4983_v62, %v1209_v40 }
 0x233   :  { %v1258_v57 = vmul.f32 %v1254_v30, %v1178_v63  ;;  %v1216_v48 = vadd.f32 -0.28449672, %v1212_v32 }
 0x234   :  { %v1259_v15 = vmul.f32 %v1255_v59, %v1179_v21  ;;  %v1217_v24 = vadd.f32 -0.28449672, %v1213_v22  ;;  %v1502_v59 = vperm.slane %v4350_v12, 2  ;;  %v1503_v22 = vperm.slane %v4350_v12, 3 }
 0x235   :  { %v1262_v33 = vadd.f32 1.0, %v1258_v57  ;;  %v1220_v34 = vmul.f32 %v4981_v49, %v1216_v48 }
 0x236   :  { %v1263_v47 = vadd.f32 1.0, %v1259_v15  ;;  %v1221_v18 = vmul.f32 %v4983_v62, %v1217_v24 }
 0x237   :  { %v1266_v0 = vmul.f32 %v1262_v33, %v1166_v25  ;;  %v1224_v56 = vadd.f32 0.2548296, %v1220_v34 }
 0x238   :  { %v1267_v6 = vmul.f32 %v1263_v47, %v1167_v27  ;;  %v1225_v13 = vadd.f32 0.2548296, %v1221_v18  ;;  %v4348_v18 = vld [vmem:[%s7310_s1 + $0x40] ss:$8 sm:$0xf] }
 0x239   :  { %v1270_v37 = vadd.f32 %v5072_v29, %v1266_v0  ;;  %v1228_v38 = vmul.f32 %v4981_v49, %v1224_v56  ;;  %v1177_v49 = vsel %vm1173_vm11, 1.0, %v5105_v10  ;;  %v1442_v29 = vperm.slane %v4348_v18, 2 }
 0x23a   :  { %v1271_v58 = vadd.f32 %v5073_v51, %v1267_v6  ;;  %v1229_v44 = vmul.f32 %v4983_v62, %v1225_v13  ;;  %v1443_v13 = vperm.slane %v4348_v18, 3  ;;  %vm2139_vm11 = vcmask 293888  }
 0x23b   :  { %v1248_v31 = vmul.f32 %v4989_v20, %v1228_v38  ;;  %v1440_v38 = vperm.slane %v4348_v18, 0  ;;  %v1441_v20 = vperm.slane %v4348_v18, 1 }
 0x23c   :  { %v1249_v26 = vmul.f32 %v4991_v46, %v1229_v44  ;;  %v1393_v41 = vpack.c.bf16 %v1271_v58, %v1270_v37 }
 0x23d   :  { %v1252_v35 = vsub.f32 1.0, %v1248_v31 }
 0x23e   :  { %v1253_v50 = vsub.f32 1.0, %v1249_v26  ;;  %1395 = vst [vmem:[#allocation4 + $0x48] sm:$0xff] %v1393_v41 }
 0x23f   :  { %v1256_v52 = vmul.f32 %v1252_v35, %v1176_v61 }
 0x240   :  { %v1257_v14 = vmul.f32 %v1253_v50, %v1177_v49 }
 0x241   :  { %v1260_v62 = vadd.f32 1.0, %v1256_v52 }
 0x242   :  { %v1261_v9 = vadd.f32 1.0, %v1257_v14 }
 0x243   :  { %v1264_v43 = vmul.f32 %v1260_v62, %v1164_v42 }
 0x244   :  { %v1265_v60 = vmul.f32 %v1261_v9, %v1165_v19  ;;  %v4349_v19 = vld [vmem:[%s7310_s1 + $0x41] ss:$8 sm:$0xf] }
 0x245   :  { %v1268_v23 = vadd.f32 %v5074_v11, %v1264_v43 }
 0x246   :  { %v1269_v53 = vadd.f32 %v5075_v3, %v1265_v60  ;;  %v1473_v3 = vperm.slane %v4349_v19, 3 }
 0x247   :  { %1427 = vrot.lane.b32.xlu0 %v1268_v23, %s5087_s23  ;;  %1487 = vrot.lane.b32.xlu1 %v1268_v23, %s5088_s24 }
 0x248   :  { %1489 = vrot.lane.b32.xlu2 %v1269_v53, %s5088_s24  ;;  %v1392_v36 = vpack.c.bf16 %v1269_v53, %v1268_v23 }
 0x24a   :  { %1394 = vst [vmem:[#allocation4 + $0x40] sm:$0xff] %v1392_v36  ;;  %v1472_v36 = vperm.slane %v4349_v19, 2 }
 0x24f   :  { %1457 = vrot.lane.b32.xlu0 %v1268_v23, %s5085_s21  ;;  %1459 = vrot.lane.b32.xlu1 %v1269_v53, %s5085_s21 }
 0x250   :  { %1335 = vrot.lane.b32.xlu2 %v1269_v53, %s5094_s18 }
 0x257   :  { %1397 = vrot.lane.b32.xlu0 %v1268_v23, %s5089_s25  ;;  %1493 = vrot.lane.b32.xlu1 %v1271_v58, %s5088_s24 }
 0x258   :  { %1365 = vrot.lane.b32.xlu2 %v1269_v53, %s5093_s15 }
 0x25f   :  { %1431 = vrot.lane.b32.xlu1 %v1270_v37, %s5087_s23  ;;  %1429 = vrot.lane.b32.xlu0 %v1269_v53, %s5087_s23 }
 0x260   :  { %1399 = vrot.lane.b32.xlu2 %v1269_v53, %s5089_s25 }
 0x267   :  { %1461 = vrot.lane.b32.xlu1 %v1270_v37, %s5085_s21  ;;  %1275 = vrot.lane.b32.xlu0 %v1269_v53, %s5099_s22 }
 0x268   :  { %1491 = vrot.lane.b32.xlu2 %v1270_v37, %s5088_s24 }
 0x26f   :  { %1401 = vrot.lane.b32.xlu1 %v1270_v37, %s5089_s25  ;;  %1305 = vrot.lane.b32.xlu0 %v1269_v53, %s5097_s28  ;;  %v1471_v53 = vperm.slane %v4349_v19, 1 }
 0x270   :  { %1433 = vrot.lane.b32.xlu2 %v1271_v58, %s5087_s23 }
 0x277   :  { %1339 = vrot.lane.b32.xlu1 %v1271_v58, %s5094_s18  ;;  %1337 = vrot.lane.b32.xlu0 %v1270_v37, %s5094_s18 }
 0x278   :  { %1463 = vrot.lane.b32.xlu2 %v1271_v58, %s5085_s21 }
 0x27f   :  { %1369 = vrot.lane.b32.xlu1 %v1271_v58, %s5093_s15  ;;  %1367 = vrot.lane.b32.xlu0 %v1270_v37, %s5093_s15 }
 0x280   :  { %1403 = vrot.lane.b32.xlu2 %v1271_v58, %s5089_s25 }
 0x287   :  { %1277 = vrot.lane.b32.xlu1 %v1270_v37, %s5099_s22  ;;  %1333 = vrot.lane.b32.xlu0 %v1268_v23, %s5094_s18 }
 0x288   :  { %1279 = vrot.lane.b32.xlu2 %v1271_v58, %s5099_s22 }
 0x28f   :  { %1307 = vrot.lane.b32.xlu1 %v1270_v37, %s5097_s28  ;;  %1303 = vrot.lane.b32.xlu0 %v1268_v23, %s5097_s28 }
 0x290   :  { %1309 = vrot.lane.b32.xlu2 %v1271_v58, %s5097_s28 }
 0x297   :  { %1363 = vrot.lane.b32.xlu1 %v1268_v23, %s5093_s15 }
 0x298   :  { %1273 = vrot.lane.b32.xlu2 %v1268_v23, %s5099_s22  ;;  %v1470_v23 = vperm.slane %v4349_v19, 0 }
 0x2a2   :  { %v1490_v5 = vpop.permute.xlu2 %1489 }
 0x2aa   :  { %v6081_v7 = vpop.permute.xlu2 %1335 }
 0x2b2   :  { %v6083_v55 = vpop.permute.xlu2 %1365 }
 0x2b9   :  { %v1428_v39 = vpop.permute.xlu0 %1427  ;;  %v1488_v45 = vpop.permute.xlu1 %1487 }
 0x2ba   :  { %v6085_v17 = vpop.permute.xlu2 %1399  ;;  %v1497_v28 = vsel %vm700_vm9, %v1488_v45, %v1490_v5 }
 0x2bb   :  { %v1508_v32 = vmul.f32 %v1500_v1, %v1497_v28 }
 0x2c1   :  { %v1458_v8 = vpop.permute.xlu0 %1457  ;;  %v6092_v54 = vpop.permute.xlu1 %1459 }
 0x2c2   :  { %v1492_v40 = vpop.permute.xlu2 %1491 }
 0x2c3   :  { %v1496_v30 = vsel %vm700_vm9, %v1490_v5, %v1492_v40  ;;  %v1467_v5 = vsel %vm662_vm6, %v1458_v8, %v6092_v54 }
 0x2c4   :  { %v1509_v4 = vmul.f32 %v1501_v2, %v1496_v30 }
 0x2c6   :  { %v1512_v63 = vpack.c.bf16 %v1509_v4, %v1508_v32 }
 0x2c8   :  { %v1591_v21 = vunpack.c.l.b16 %v1512_v63  ;;  %v1592_v57 = vunpack.c.h.b16 %v1512_v63  ;;  %v4347_v63 = vld [vmem:[%s7310_s1 + $0x25] ss:$8 sm:$0xf] }
 0x2c9   :  { %v6096_v48 = vpop.permute.xlu0 %1397  ;;  %v1494_v15 = vpop.permute.xlu1 %1493 }
 0x2ca   :  { %v1495_v24 = vsel %vm700_vm9, %v1492_v40, %v1494_v15  ;;  %v1498_v25 = vsel %vm700_vm9, %v1494_v15, %v1488_v45  ;;  %v1434_v33 = vpop.permute.xlu2 %1433  ;;  %v1611_v34 = vpack.c.b16 %v1591_v21, %v1591_v21  ;;  %v1612_v56 = vpack.c.b16 %v1592_v57, %v1592_v57 }
 0x2cb   :  { %v1510_v27 = vmul.f32 %v1502_v59, %v1495_v24  ;;  %v1511_v47 = vmul.f32 %v1503_v22, %v1498_v25  ;;  %v1438_v44 = vsel %vm630_vm8, %v1434_v33, %v1428_v39  ;;  %v1478_v40 = vmul.f32 %v1470_v23, %v1467_v5  ;;  %v4393_v23 = vld [vmem:[#allocation4 + $0x48] sm:$0xf] }
 0x2cc   :  { %v1637_v0 = vsel %vm1635_vm12, %v1611_v34, 0  ;;  %v1640_v37 = vsel %vm1635_vm12, %v1612_v56, 0  ;;  %v1451_v49 = vmul.f32 %v1443_v13, %v1438_v44  ;;  %v1410_v22 = vperm.slane %v4347_v63, 0  ;;  %v6147_v34 = vld [vmem:[%s7310_s1 + $0x20] ss:$8 sm:$0xf] }
 0x2cd   :  { %v1513_v6 = vpack.c.bf16 %v1511_v47, %v1510_v27  ;;  %1651 = vmatpush.bf16.msrb.mxu0 %v1637_v0  ;;  %1664 = vmatpush.bf16.msrb.mxu1 %v1640_v37  ;;  %v1413_v21 = vperm.slane %v4347_v63, 3  ;;  %v1411_v57 = vperm.slane %v4347_v63, 1  ;;  %v1412_v15 = vperm.slane %v4347_v63, 2 }
 0x2ce   :  { %v1348_v13 = vperm.slane %v6147_v34, 2 }
 0x2cf   :  { %v1593_v51 = vunpack.c.l.b16 %v1513_v6  ;;  %v1594_v58 = vunpack.c.h.b16 %v1513_v6 }
 0x2d1   :  { %v1432_v46 = vpop.permute.xlu1 %1431  ;;  %v1430_v31 = vpop.permute.xlu0 %1429  ;;  %v1613_v26 = vpack.c.b16 %v1593_v51, %v1593_v51  ;;  %v1614_v41 = vpack.c.b16 %v1594_v58, %v1594_v58 }
 0x2d2   :  { %v1435_v35 = vsel %vm630_vm8, %v1432_v46, %v1434_v33  ;;  %v1436_v61 = vsel %vm630_vm8, %v1430_v31, %v1432_v46  ;;  %v1437_v50 = vsel %vm630_vm8, %v1428_v39, %v1430_v31  ;;  %v1464_v52 = vpop.permute.xlu2 %1463  ;;  %v1349_v31 = vperm.slane %v6147_v34, 3 }
 0x2d3   :  { %v1450_v14 = vmul.f32 %v1442_v29, %v1435_v35  ;;  %v1448_v42 = vmul.f32 %v1440_v38, %v1437_v50  ;;  %v1449_v62 = vmul.f32 %v1441_v20, %v1436_v61  ;;  %v1643_v9 = vsel %vm1635_vm12, %v1613_v26, 0 }
 0x2d4   :  { %v1646_v43 = vsel %vm1635_vm12, %v1614_v41, 0  ;;  %1677 = vmatpush.bf16.msrb.mxu2 %v1643_v9  ;;  %v1468_v39 = vsel %vm662_vm6, %v1464_v52, %v1458_v8 }
 0x2d5   :  { %v1453_v60 = vpack.c.bf16 %v1451_v49, %v1450_v14  ;;  %v1452_v11 = vpack.c.bf16 %v1449_v62, %v1448_v42  ;;  %1690 = vmatpush.bf16.msrb.mxu3 %v1646_v43  ;;  %v1481_v30 = vmul.f32 %v1473_v3, %v1468_v39  ;;  %v6168_v43 = vld [vmem:[%s7310_s1 + $0x23] ss:$8 sm:$0xf]  ;;  %v4853_v3 = vld [vmem:[#allocation4 + $0x4c] sm:$0xf] }
 0x2d6   :  { %v1378_v5 = vperm.slane %v6168_v43, 2 }
 0x2d7   :  { %1455 = vst [vmem:[#allocation4 + $0x68] sm:$0xff] %v1453_v60  ;;  %v4385_v60 = vld [vmem:[#allocation4 + $0x40] sm:$0xf] }
 0x2d8   :  { %1454 = vst [vmem:[#allocation4 + $0x60] sm:$0xff] %v1452_v11 }
 0x2d9   :  { %v1462_v45 = vpop.permute.xlu1 %1461  ;;  %v6125_v12 = vpop.permute.xlu0 %1275 }
 0x2da   :  { %v1465_v1 = vsel %vm662_vm6, %v1462_v45, %v1464_v52  ;;  %v1466_v2 = vsel %vm662_vm6, %v6092_v54, %v1462_v45  ;;  %v1404_v28 = vpop.permute.xlu2 %1403  ;;  %v1407_v54 = vsel %vm522_vm10, %v6096_v48, %v6085_v17 }
 0x2db   :  { %v1479_v32 = vmul.f32 %v1471_v53, %v1466_v2  ;;  %v1480_v4 = vmul.f32 %v1472_v36, %v1465_v1  ;;  %v1408_v24 = vsel %vm522_vm10, %v1404_v28, %v6096_v48  ;;  %v1418_v0 = vmul.f32 %v1410_v22, %v1407_v54  ;;  %v4343_v53 = vld [vmem:[%s7310_s1 + $0x6] ss:$8 sm:$0xf] }
 0x2dc   :  { %v1421_v56 = vmul.f32 %v1413_v21, %v1408_v24  ;;  %v4852_v36 = vld [vmem:[#allocation4 + $0x44] sm:$0xf]  ;;  %v1379_v1 = vperm.slane %v6168_v43, 3  ;;  %v1286_v63 = vperm.slane %v4343_v53, 0 }
 0x2dd   :  { %v1482_v8 = vpack.c.bf16 %v1479_v32, %v1478_v40  ;;  %v1483_v59 = vpack.c.bf16 %v1481_v30, %v1480_v4 }
 0x2de   :  { %v4409_v20 = vld [vmem:[#allocation4 + $0x68] sm:$0xf]  ;;  %v4857_v51 = vld [vmem:[#allocation4 + $0x6c] sm:$0xf] }
 0x2df   :  { %1484 = vst [vmem:[#allocation4 + $0x70] sm:$0xff] %v1482_v8  ;;  %v4401_v38 = vld [vmem:[#allocation4 + $0x60] sm:$0xf]  ;;  %v4856_v44 = vld [vmem:[#allocation4 + $0x64] sm:$0xf]  ;;  %v1287_v8 = vperm.slane %v4343_v53, 1 }
 0x2e0   :  { %1485 = vst [vmem:[#allocation4 + $0x78] sm:$0xff] %v1483_v59 }
 0x2e1   :  { %v1402_v25 = vpop.permute.xlu1 %1401  ;;  %v6142_v33 = vpop.permute.xlu0 %1305 }
 0x2e2   :  { %v1405_v27 = vsel %vm522_vm10, %v1402_v25, %v1404_v28  ;;  %v1406_v47 = vsel %vm522_vm10, %v6085_v17, %v1402_v25  ;;  %v6154_v18 = vpop.permute.xlu2 %1279 }
 0x2e3   :  { %v1419_v48 = vmul.f32 %v1411_v57, %v1406_v47  ;;  %v1420_v6 = vmul.f32 %v1412_v15, %v1405_v27 }
 0x2e5   :  { %v1422_v29 = vpack.c.bf16 %v1419_v48, %v1418_v0  ;;  %v1423_v37 = vpack.c.bf16 %v1421_v56, %v1420_v6  ;;  %v1288_v6 = vperm.slane %v4343_v53, 2 }
 0x2e6   :  { %v4858_v58 = vld [vmem:[#allocation4 + $0x6c] sm:$0xf0]  ;;  %v4403_v46 = vld [vmem:[#allocation4 + $0x70] sm:$0xf0] }
 0x2e7   :  { %1424 = vst [vmem:[#allocation4 + $0x50] sm:$0xff] %v1422_v29  ;;  %v4402_v17 = vor.u32 %v4858_v58, %v4401_v38  ;;  %v4406_v26 = vor.u32 %v4856_v44, %v4403_v46  ;;  %v4859_v41 = vld [vmem:[#allocation4 + $0x74] sm:$0xf0]  ;;  %v4411_v35 = vld [vmem:[#allocation4 + $0x78] sm:$0xf0]  ;;  %v1346_v29 = vperm.slane %v6147_v34, 0 }
 0x2e8   :  { %1425 = vst [vmem:[#allocation4 + $0x58] sm:$0xff] %v1423_v37  ;;  %v4410_v61 = vor.u32 %v4859_v41, %v4409_v20  ;;  %v4414_v50 = vor.u32 %v4857_v51, %v4411_v35  ;;  %v1347_v37 = vperm.slane %v6147_v34, 1  ;;  %v4344_v34 = vld [vmem:[%s7310_s1 + $0x7] ss:$8 sm:$0xf] }
 0x2e9   :  { %v1340_v52 = vpop.permute.xlu1 %1339  ;;  %v1338_v49 = vpop.permute.xlu0 %1337  ;;  %1652 = vmatpush.bf16.msrb.mxu0 %v4402_v17  ;;  %1665 = vmatpush.bf16.msrb.mxu1 %v4406_v26 }
 0x2ea   :  { %v1341_v14 = vsel %vm378_vm15, %v1338_v49, %v1340_v52  ;;  %v1342_v42 = vsel %vm378_vm15, %v6081_v7, %v1338_v49  ;;  %1678 = vmatpush.bf16.msrb.mxu2 %v4410_v61  ;;  %1691 = vmatpush.bf16.msrb.mxu3 %v4414_v50  ;;  %v6163_v62 = vpop.permute.xlu2 %1309  ;;  %v1318_v61 = vperm.slane %v4344_v34, 2  ;;  %v1319_v50 = vperm.slane %v4344_v34, 3 }
 0x2eb   :  { %v1356_v19 = vmul.f32 %v1348_v13, %v1342_v42  ;;  %v1357_v9 = vmul.f32 %v1349_v31, %v1341_v14  ;;  %v1289_v13 = vperm.slane %v4343_v53, 3 }
 0x2ed   :  { %v1359_v11 = vpack.c.bf16 %v1357_v9, %v1356_v19  ;;  %v1317_v19 = vperm.slane %v4344_v34, 1 }
 0x2ee   :  { %v4854_v39 = vld [vmem:[#allocation4 + $0x4c] sm:$0xf0]  ;;  %v4387_v45 = vld [vmem:[#allocation4 + $0x50] sm:$0xf0] }
 0x2ef   :  { %1361 = vst [vmem:[#allocation4 + $0x28] sm:$0xff] %v1359_v11  ;;  %v4855_v2 = vld [vmem:[#allocation4 + $0x54] sm:$0xf0]  ;;  %v4395_v28 = vld [vmem:[#allocation4 + $0x58] sm:$0xf0]  ;;  %v4386_v40 = vor.u32 %v4854_v39, %v4385_v60  ;;  %v4390_v30 = vor.u32 %v4852_v36, %v4387_v45  ;;  %v1535_v60 = vld [vmem:[%s7313_s5] sm:$0xff] }
 0x2f0   :  { %v4394_v32 = vor.u32 %v4855_v2, %v4393_v23  ;;  %v4398_v4 = vor.u32 %v4853_v3, %v4395_v28  ;;  %1538 = vperm.xlu1 %4975, %v1535_v60  }
 0x2f1   :  { %v6175_v59 = vpop.permute.xlu1 %1369  ;;  %v1368_v22 = vpop.permute.xlu0 %1367  ;;  %1653 = vmatpush.bf16.msrb.mxu0 %v4386_v40  ;;  %1666 = vmatpush.bf16.msrb.mxu1 %v4390_v30  ;;  %v1376_v30 = vperm.slane %v6168_v43, 0 }
 0x2f2   :  { %v1371_v21 = vsel %vm480_vm14, %v1368_v22, %v6175_v59  ;;  %v1372_v57 = vsel %vm480_vm14, %v6083_v55, %v1368_v22  ;;  %1679 = vmatpush.bf16.msrb.mxu2 %v4394_v32  ;;  %1692 = vmatpush.bf16.msrb.mxu3 %v4398_v4  ;;  %v1274_v15 = vpop.permute.xlu2 %1273  ;;  %v1377_v32 = vperm.slane %v6168_v43, 1 }
 0x2f3   :  { %v1386_v54 = vmul.f32 %v1378_v5, %v1372_v57  ;;  %v1387_v24 = vmul.f32 %v1379_v1, %v1371_v21  ;;  %v1283_v25 = vsel %vm308_vm4, %v1274_v15, %v6125_v12  ;;  %v1284_v27 = vsel %vm308_vm4, %v6154_v18, %v1274_v15 }
 0x2f4   :  { %v1294_v47 = vmul.f32 %v1286_v63, %v1284_v27  ;;  %v1295_v0 = vmul.f32 %v1287_v8, %v1283_v25 }
 0x2f5   :  { %v1389_v56 = vpack.c.bf16 %v1387_v24, %v1386_v54 }
 0x2f6   :  { %v1298_v48 = vpack.c.bf16 %v1295_v0, %v1294_v47  ;;  %v4849_v14 = vld [vmem:[#allocation4 + $0x2c] sm:$0xf] }
 0x2f7   :  { %1391 = vst [vmem:[#allocation4 + $0x38] sm:$0xff] %v1389_v56 }
 0x2f8   :  { %1300 = vst [vmem:[#allocation4] sm:$0xff] %v1298_v48 }
 0x2f9   :  { %v1278_v38 = vpop.permute.xlu1 %1277  ;;  %v1334_v20 = vpop.permute.xlu0 %1333 }
 0x2fa   :  { %v1281_v51 = vsel %vm308_vm4, %v1278_v38, %v6154_v18  ;;  %v1282_v58 = vsel %vm308_vm4, %v6125_v12, %v1278_v38  ;;  %v1343_v44 = vsel %vm378_vm15, %v1334_v20, %v6081_v7  ;;  %v1344_v46 = vsel %vm378_vm15, %v1340_v52, %v1334_v20  ;;  %v4377_v12 = vld [vmem:[#allocation4 + $0x28] sm:$0xf] }
 0x2fb   :  { %v1296_v31 = vmul.f32 %v1288_v6, %v1282_v58  ;;  %v1297_v17 = vmul.f32 %v1289_v13, %v1281_v51  ;;  %v1354_v26 = vmul.f32 %v1346_v29, %v1344_v46  ;;  %v1355_v41 = vmul.f32 %v1347_v37, %v1343_v44 }
 0x2fc   :  { %v1316_v7 = vperm.slane %v4344_v34, 0 }
 0x2fd   :  { %v1299_v18 = vpack.c.bf16 %v1297_v17, %v1296_v31  ;;  %v1358_v35 = vpack.c.bf16 %v1355_v41, %v1354_v26 }
 0x2fe   :  { %v4851_v49 = vld [vmem:[#allocation4 + $0x34] sm:$0xf0]  ;;  %v4379_v42 = vld [vmem:[#allocation4 + $0x38] sm:$0xf0] }
 0x2ff   :  { %1301 = vst [vmem:[#allocation4 + $0x8] sm:$0xff] %v1299_v18  ;;  %v4378_v52 = vor.u32 %v4851_v49, %v4377_v12  ;;  %v4382_v9 = vor.u32 %v4849_v14, %v4379_v42  ;;  %v4353_v13 = vld [vmem:[#allocation4] sm:$0xf]  ;;  %v4844_v29 = vld [vmem:[#allocation4 + $0x4] sm:$0xf] }
 0x300   :  { %1360 = vst [vmem:[#allocation4 + $0x20] sm:$0xff] %v1358_v35 }
 0x301   :  { %v1308_v11 = vpop.permute.xlu1 %1307  ;;  %v1304_v23 = vpop.permute.xlu0 %1303  ;;  %1680 = vmatpush.bf16.msrb.mxu2 %v4378_v52  ;;  %1693 = vmatpush.bf16.msrb.mxu3 %v4382_v9 }
 0x302   :  { %v1311_v3 = vsel %vm340_vm2, %v1308_v11, %v6163_v62  ;;  %v1312_v53 = vsel %vm340_vm2, %v6142_v33, %v1308_v11  ;;  %v1313_v36 = vsel %vm340_vm2, %v1304_v23, %v6142_v33  ;;  %v1314_v5 = vsel %vm340_vm2, %v6163_v62, %v1304_v23 }
 0x303   :  { %v1326_v39 = vmul.f32 %v1318_v61, %v1312_v53  ;;  %v1327_v45 = vmul.f32 %v1319_v50, %v1311_v3  ;;  %v1324_v1 = vmul.f32 %v1316_v7, %v1314_v5  ;;  %v1325_v2 = vmul.f32 %v1317_v19, %v1313_v36 }
 0x305   :  { %v1329_v28 = vpack.c.bf16 %v1327_v45, %v1326_v39  ;;  %v1328_v40 = vpack.c.bf16 %v1325_v2, %v1324_v1 }
 0x306   :  { %v4361_v21 = vld [vmem:[#allocation4 + $0x8] sm:$0xf]  ;;  %v4845_v15 = vld [vmem:[#allocation4 + $0xc] sm:$0xf] }
 0x307   :  { %1331 = vst [vmem:[#allocation4 + $0x18] sm:$0xff] %v1329_v28  ;;  %v4848_v27 = vld [vmem:[#allocation4 + $0x24] sm:$0xf] }
 0x308   :  { %1330 = vst [vmem:[#allocation4 + $0x10] sm:$0xff] %v1328_v40 }
 0x309   :  { %v1364_v4 = vpop.permute.xlu1 %1363 }
 0x30a   :  { %v1373_v33 = vsel %vm480_vm14, %v1364_v4, %v6083_v55  ;;  %v1374_v62 = vsel %vm480_vm14, %v6175_v59, %v1364_v4  ;;  %v1516_v55 = vld [vmem:[%s7314_s4] sm:$0xf]  ;;  %v4369_v59 = vld [vmem:[#allocation4 + $0x20] sm:$0xf] }
 0x30b   :  { %v1384_v63 = vmul.f32 %v1376_v30, %v1374_v62  ;;  %v1385_v8 = vmul.f32 %v1377_v32, %v1373_v33 }
 0x30d   :  { %v1388_v22 = vpack.c.bf16 %v1385_v8, %v1384_v63 }
 0x30e   :  { %v4847_v57 = vld [vmem:[#allocation4 + $0x14] sm:$0xf0]  ;;  %v4363_v54 = vld [vmem:[#allocation4 + $0x18] sm:$0xf0] }
 0x30f   :  { %1390 = vst [vmem:[#allocation4 + $0x30] sm:$0xff] %v1388_v22  ;;  %v4362_v24 = vor.u32 %v4847_v57, %v4361_v21  ;;  %v4366_v43 = vor.u32 %v4845_v15, %v4363_v54  ;;  %v4846_v48 = vld [vmem:[#allocation4 + $0xc] sm:$0xf0]  ;;  %v4355_v6 = vld [vmem:[#allocation4 + $0x10] sm:$0xf0] }
 0x310   :  { %v4354_v37 = vor.u32 %v4846_v48, %v4353_v13  ;;  %v4358_v38 = vor.u32 %v4844_v29, %v4355_v6 }
 0x311   :  { %1681 = vmatpush.bf16.msrb.mxu2 %v4362_v24  ;;  %1694 = vmatpush.bf16.msrb.mxu3 %v4366_v43 }
 0x314   :  { %4417 = vmatmul.msk.bf16.vlgmr.msrb.gmra.mxu2 %vm1631_vm13, %v1516_v55  ;;  %4418 = vmatmul.msk.bf16.vlgmr.msrb.gmra.mxu3 %vm1631_vm13, %v1516_v55 }
 0x316   :  { %v4850_v25 = vld [vmem:[#allocation4 + $0x2c] sm:$0xf0]  ;;  %v4371_v47 = vld [vmem:[#allocation4 + $0x30] sm:$0xf0] }
 0x317   :  { %v4370_v0 = vor.u32 %v4850_v25, %v4369_v59  ;;  %v4374_v56 = vor.u32 %v4848_v27, %v4371_v47 }
 0x319   :  { %1654 = vmatpush.bf16.msrb.mxu0 %v4370_v0  ;;  %1667 = vmatpush.bf16.msrb.mxu1 %v4374_v56 }
 0x31d   :  { %1655 = vmatpush.bf16.msrb.mxu0 %v4354_v37  ;;  %1668 = vmatpush.bf16.msrb.mxu1 %v4358_v38 }
 0x320   :  { %4415 = vmatmul.msk.bf16.vlgmr.msrb.gmra.mxu0 %vm1631_vm13, %v1516_v55  ;;  %4416 = vmatmul.msk.bf16.vlgmr.msrb.gmra.mxu1 %vm1631_vm13, %v1516_v55 }
 0x362   :  { %v1539_v20 = vpop.permute.xlu1 %1538 }
 0x397   :  { %v1683_v51 = vpop.f32.mrf.mxu2  ;;  %v1696_v58 = vpop.f32.mrf.mxu3 }
 0x398   :  { %v6235_v44 = vadd.f32 %v1683_v51, %v1539_v20  ;;  %v6237_v46 = vadd.f32 %v1696_v58, %v1539_v20 }
 0x39a   :  { %v6240_v34 = vmul.f32 0.70710677, %v6235_v44  ;;  %v6243_v31 = vmul.f32 0.70710677, %v6237_v46 }
 0x39c   :  { %v1718_v17 = vand.u32 2147483647, %v6240_v34  ;;  %v1719_v26 = vand.u32 2147483647, %v6243_v31  ;;  %vm1710_vm0 = vcmp.ge.f32.partialorder %v6240_v34, 0.0  ;;  %vm1711_vm1 = vcmp.ge.f32.partialorder %v6243_v31, 0.0 }
 0x39d   :  { %v1657_v41 = vpop.f32.mrf.mxu0  ;;  %v1670_v18 = vpop.f32.mrf.mxu1 }
 0x39e   :  { %v1722_v35 = vmul.f32 0.3275911, %v1718_v17  ;;  %v1723_v61 = vmul.f32 0.3275911, %v1719_v26  ;;  %v6247_v50 = vadd.f32 %v1657_v41, %v1539_v20  ;;  %v6249_v12 = vadd.f32 %v1670_v18, %v1539_v20 }
 0x39f   :  { %v1685_v49 = vpop.f32.mrf.mxu2  ;;  %v1698_v14 = vpop.f32.mrf.mxu3  ;;  %v1770_v36 = vsub.f32 0.0, %v1718_v17  ;;  %v1771_v28 = vsub.f32 0.0, %v1719_v26 }
 0x3a0   :  { %v1726_v42 = vadd.f32 1.0, %v1722_v35  ;;  %v1727_v7 = vadd.f32 1.0, %v1723_v61  ;;  %v6252_v19 = vmul.f32 0.70710677, %v6247_v50  ;;  %v6255_v52 = vmul.f32 0.70710677, %v6249_v12 }
 0x3a1   :  { %v1774_v32 = vmul.f32 %v1770_v36, %v1718_v17  ;;  %v1775_v62 = vmul.f32 %v1771_v28, %v1719_v26 }
 0x3a2   :  { %4992 = vrcp.f32 %v1726_v42  ;;  %v1716_v9 = vand.u32 2147483647, %v6252_v19  ;;  %v1717_v60 = vand.u32 2147483647, %v6255_v52  ;;  %vm1708_vm3 = vcmp.ge.f32.partialorder %v6252_v19, 0.0 }
 0x3a3   :  { %4994 = vrcp.f32 %v1727_v7  ;;  %v1780_v21 = vmul.f32 1.442695, %v1774_v32  ;;  %v1782_v59 = vmul.f32 1.442695, %v1775_v62  ;;  %v1702_v32 = vmul.f32 0.5, %v6235_v44 }
 0x3a4   :  { %v1720_v11 = vmul.f32 0.3275911, %v1716_v9  ;;  %v1721_v53 = vmul.f32 0.3275911, %v1717_v60  ;;  %v1768_v57 = vsub.f32 0.0, %v1716_v9  ;;  %v1769_v43 = vsub.f32 0.0, %v1717_v60 }
 0x3a5   :  { %v1672_v23 = vpop.f32.mrf.mxu1  ;;  %v1659_v3 = vpop.f32.mrf.mxu0  ;;  %v1703_v62 = vmul.f32 0.5, %v6237_v46  ;;  %vm1709_vm7 = vcmp.ge.f32.partialorder %v6255_v52, 0.0 }
 0x3a6   :  { %v1724_v5 = vadd.f32 1.0, %v1720_v11  ;;  %v1725_v45 = vadd.f32 1.0, %v1721_v53  ;;  %v1772_v56 = vmul.f32 %v1768_v57, %v1716_v9  ;;  %v1773_v29 = vmul.f32 %v1769_v43, %v1717_v60 }
 0x3a8   :  { %v4993_v39 = vpop.eup %4992  ;;  %4996 = vrcp.f32 %v1724_v5  ;;  %v1776_v17 = vmul.f32 1.442695, %v1772_v56  ;;  %v1778_v35 = vmul.f32 1.442695, %v1773_v29  ;;  %v1714_v5 = vsel %vm1710_vm0, 1.0, %v5105_v10 }
 0x3a9   :  { %v4995_v1 = vpop.eup %4994  ;;  %v1734_v2 = vmul.f32 1.0614054, %v4993_v39  ;;  %4998 = vrcp.f32 %v1725_v45 }
 0x3aa   :  { %v1735_v40 = vmul.f32 1.0614054, %v4995_v1  ;;  %5000 = vpow2.f32 %v1780_v21 }
 0x3ab   :  { %v1738_v30 = vadd.f32 -1.4531521, %v1734_v2  ;;  %5002 = vpow2.f32 %v1782_v59  ;;  %v1700_v59 = vmul.f32 0.5, %v6247_v50  ;;  %v2083_v50 = vld [vmem:[%s7315_s9] sm:$0xff] }
 0x3ac   :  { %v1739_v4 = vadd.f32 -1.4531521, %v1735_v40  ;;  %5004 = vpow2.f32 %v1776_v17 }
 0x3ad   :  { %v1742_v33 = vmul.f32 %v4993_v39, %v1738_v30  ;;  %5006 = vpow2.f32 %v1778_v35 }
 0x3ae   :  { %v1743_v63 = vmul.f32 %v4995_v1, %v1739_v4  ;;  %v4997_v8 = vpop.eup %4996 }
 0x3af   :  { %v1746_v22 = vadd.f32 1.4214138, %v1742_v33  ;;  %v4999_v15 = vpop.eup %4998  ;;  %v1732_v24 = vmul.f32 1.0614054, %v4997_v8 }
 0x3b0   :  { %v1747_v54 = vadd.f32 1.4214138, %v1743_v63  ;;  %v1733_v25 = vmul.f32 1.0614054, %v4999_v15  ;;  %v5001_v14 = vpop.eup %5000 }
 0x3b1   :  { %v1750_v55 = vmul.f32 %v4993_v39, %v1746_v22  ;;  %v1736_v47 = vadd.f32 -1.4531521, %v1732_v24  ;;  %v5003_v9 = vpop.eup %5002 }
 0x3b2   :  { %v1751_v27 = vmul.f32 %v4995_v1, %v1747_v54  ;;  %v1737_v48 = vadd.f32 -1.4531521, %v1733_v25  ;;  %v5005_v30 = vpop.eup %5004  ;;  %v1701_v25 = vmul.f32 0.5, %v6249_v12 }
 0x3b3   :  { %v1754_v0 = vadd.f32 -0.28449672, %v1750_v55  ;;  %v1740_v13 = vmul.f32 %v4997_v8, %v1736_v47  ;;  %v5007_v33 = vpop.eup %5006 }
 0x3b4   :  { %v1755_v6 = vadd.f32 -0.28449672, %v1751_v27  ;;  %v1741_v38 = vmul.f32 %v4999_v15, %v1737_v48 }
 0x3b5   :  { %v1758_v37 = vmul.f32 %v4993_v39, %v1754_v0  ;;  %v1744_v51 = vadd.f32 1.4214138, %v1740_v13  ;;  %v6317_v13 = vld [vmem:[%s7310_s1 + $0x42] ss:$8 sm:$0xf] }
 0x3b6   :  { %v1759_v20 = vmul.f32 %v4995_v1, %v1755_v6  ;;  %v1745_v26 = vadd.f32 1.4214138, %v1741_v38  ;;  %v2056_v29 = vperm.slane %v6317_v13, 0 }
 0x3b7   :  { %v1762_v58 = vadd.f32 0.2548296, %v1758_v37  ;;  %v1748_v18 = vmul.f32 %v4997_v8, %v1744_v51  ;;  %v2057_v37 = vperm.slane %v6317_v13, 1 }
 0x3b8   :  { %v1763_v41 = vadd.f32 0.2548296, %v1759_v20  ;;  %v1749_v49 = vmul.f32 %v4999_v15, %v1745_v26 }
 0x3b9   :  { %v1766_v61 = vmul.f32 %v4993_v39, %v1762_v58  ;;  %v1752_v7 = vadd.f32 -0.28449672, %v1748_v18  ;;  %v6334_v18 = vld [vmem:[%s7310_s1 + $0x25] ss:$8 sm:$0xf] }
 0x3ba   :  { %v1767_v42 = vmul.f32 %v4995_v1, %v1763_v41  ;;  %v1753_v11 = vadd.f32 -0.28449672, %v1749_v49  ;;  %v1715_v1 = vsel %vm1711_vm1, 1.0, %v5105_v10  ;;  %v1955_v49 = vperm.slane %v6334_v18, 1 }
 0x3bb   :  { %v1786_v60 = vmul.f32 %v5001_v14, %v1766_v61  ;;  %v1756_v3 = vmul.f32 %v4997_v8, %v1752_v7  ;;  %v1954_v61 = vperm.slane %v6334_v18, 0 }
 0x3bc   :  { %v1787_v23 = vmul.f32 %v5003_v9, %v1767_v42  ;;  %v1757_v36 = vmul.f32 %v4999_v15, %v1753_v11 }
 0x3bd   :  { %v1790_v53 = vsub.f32 1.0, %v1786_v60  ;;  %v1760_v45 = vadd.f32 0.2548296, %v1756_v3  ;;  %v6349_v3 = vld [vmem:[%s7310_s1 + $0x41] ss:$8 sm:$0xf] }
 0x3be   :  { %v1791_v39 = vsub.f32 1.0, %v1787_v23  ;;  %v1761_v28 = vadd.f32 0.2548296, %v1757_v36  ;;  %v2020_v36 = vperm.slane %v6349_v3, 0 }
 0x3bf   :  { %v1794_v2 = vmul.f32 %v1790_v53, %v1714_v5  ;;  %v1764_v34 = vmul.f32 %v4997_v8, %v1760_v45  ;;  %v1712_v8 = vsel %vm1708_vm3, 1.0, %v5105_v10  ;;  %v2021_v45 = vperm.slane %v6349_v3, 1 }
 0x3c0   :  { %v1795_v40 = vmul.f32 %v1791_v39, %v1715_v1  ;;  %v1765_v31 = vmul.f32 %v4999_v15, %v1761_v28  ;;  %v1713_v15 = vsel %vm1709_vm7, 1.0, %v5105_v10 }
 0x3c1   :  { %v1798_v4 = vadd.f32 1.0, %v1794_v2  ;;  %v1784_v22 = vmul.f32 %v5005_v30, %v1764_v34 }
 0x3c2   :  { %v1799_v63 = vadd.f32 1.0, %v1795_v40  ;;  %v1785_v57 = vmul.f32 %v5007_v33, %v1765_v31 }
 0x3c3   :  { %v1802_v21 = vmul.f32 %v1798_v4, %v1702_v32  ;;  %v1788_v24 = vsub.f32 1.0, %v1784_v22 }
 0x3c4   :  { %v1803_v54 = vmul.f32 %v1799_v63, %v1703_v62  ;;  %v1789_v43 = vsub.f32 1.0, %v1785_v57 }
 0x3c5   :  { %2047 = vrot.lane.b32.xlu1 %v1802_v21, %s5088_s24  ;;  %v1792_v44 = vmul.f32 %v1788_v24, %v1712_v8 }
 0x3c6   :  { %v1937_v55 = vpack.c.bf16 %v1803_v54, %v1802_v21  ;;  %v1793_v46 = vmul.f32 %v1789_v43, %v1713_v15 }
 0x3c7   :  { %v1796_v19 = vadd.f32 1.0, %v1792_v44 }
 0x3c8   :  { %1939 = vst [vmem:[#allocation5 + $0x28] sm:$0x33] %v1937_v55  ;;  %v1797_v52 = vadd.f32 1.0, %v1793_v46 }
 0x3c9   :  { %v1800_v27 = vmul.f32 %v1796_v19, %v1700_v59 }
 0x3ca   :  { %v1801_v47 = vmul.f32 %v1797_v52, %v1701_v25  ;;  %v6385_v25 = vld [vmem:[%s7310_s1 + $0x7] ss:$8 sm:$0xf] }
 0x3cb   :  { %2043 = vrot.lane.b32.xlu2 %v1800_v27, %s5088_s24 }
 0x3cc   :  { %2045 = vrot.lane.b32.xlu0 %v1801_v47, %s5088_s24  ;;  %v1936_v0 = vpack.c.bf16 %v1801_v47, %v1800_v27 }
 0x3cd   :  { %1945 = vrot.lane.b32.xlu1 %v1802_v21, %s5089_s25 }
 0x3ce   :  { %1938 = vst [vmem:[#allocation5 + $0x20] sm:$0x33] %v1936_v0 }
 0x3d3   :  { %1941 = vrot.lane.b32.xlu2 %v1800_v27, %s5089_s25 }
 0x3d4   :  { %1943 = vrot.lane.b32.xlu0 %v1801_v47, %s5089_s25 }
 0x3d5   :  { %2011 = vrot.lane.b32.xlu1 %v1802_v21, %s5085_s21 }
 0x3db   :  { %2007 = vrot.lane.b32.xlu2 %v1800_v27, %s5085_s21 }
 0x3dc   :  { %2009 = vrot.lane.b32.xlu0 %v1801_v47, %s5085_s21 }
 0x3dd   :  { %1981 = vrot.lane.b32.xlu1 %v1802_v21, %s5087_s23 }
 0x3e3   :  { %1977 = vrot.lane.b32.xlu2 %v1800_v27, %s5087_s23 }
 0x3e4   :  { %1979 = vrot.lane.b32.xlu0 %v1801_v47, %s5087_s23 }
 0x3e5   :  { %1841 = vrot.lane.b32.xlu1 %v1803_v54, %s5097_s28 }
 0x3eb   :  { %1835 = vrot.lane.b32.xlu2 %v1800_v27, %s5097_s28 }
 0x3ec   :  { %1837 = vrot.lane.b32.xlu0 %v1801_v47, %s5097_s28 }
 0x3ed   :  { %1907 = vrot.lane.b32.xlu1 %v1803_v54, %s5093_s15 }
 0x3f3   :  { %1901 = vrot.lane.b32.xlu2 %v1800_v27, %s5093_s15 }
 0x3f4   :  { %1903 = vrot.lane.b32.xlu0 %v1801_v47, %s5093_s15 }
 0x3f5   :  { %1811 = vrot.lane.b32.xlu1 %v1803_v54, %s5099_s22 }
 0x3fb   :  { %1805 = vrot.lane.b32.xlu2 %v1800_v27, %s5099_s22 }
 0x3fc   :  { %1807 = vrot.lane.b32.xlu0 %v1801_v47, %s5099_s22 }
 0x3fd   :  { %1877 = vrot.lane.b32.xlu1 %v1803_v54, %s5094_s18 }
 0x403   :  { %1871 = vrot.lane.b32.xlu2 %v1800_v27, %s5094_s18  ;;  %v1848_v27 = vperm.slane %v6385_v25, 0 }
 0x404   :  { %1873 = vrot.lane.b32.xlu0 %v1801_v47, %s5094_s18  ;;  %v1849_v47 = vperm.slane %v6385_v25, 1 }
 0x405   :  { %2013 = vrot.lane.b32.xlu1 %v1803_v54, %s5085_s21 }
 0x40b   :  { %2049 = vrot.lane.b32.xlu2 %v1803_v54, %s5088_s24 }
 0x40c   :  { %1947 = vrot.lane.b32.xlu0 %v1803_v54, %s5089_s25 }
 0x40d   :  { %1905 = vrot.lane.b32.xlu1 %v1802_v21, %s5093_s15 }
 0x413   :  { %1983 = vrot.lane.b32.xlu2 %v1803_v54, %s5087_s23 }
 0x414   :  { %1839 = vrot.lane.b32.xlu0 %v1802_v21, %s5097_s28 }
 0x415   :  { %2086 = vperm.xlu1 %4975, %v2083_v50  }
 0x41b   :  { %1809 = vrot.lane.b32.xlu2 %v1802_v21, %s5099_s22 }
 0x41c   :  { %1875 = vrot.lane.b32.xlu0 %v1802_v21, %s5094_s18  ;;  %v6368_v21 = vld [vmem:[%s7310_s1 + $0x40] ss:$8 sm:$0xf] }
 0x41d   :  { %v1990_v24 = vperm.slane %v6368_v21, 0  ;;  %v1991_v8 = vperm.slane %v6368_v21, 1 }
 0x425   :  { %v6306_v12 = vpop.permute.xlu2 %2043 }
 0x42d   :  { %v6308_v56 = vpop.permute.xlu2 %1941 }
 0x435   :  { %v6310_v48 = vpop.permute.xlu2 %2007 }
 0x437   :  { %v6312_v6 = vpop.permute.xlu1 %2047 }
 0x43d   :  { %v6321_v38 = vpop.permute.xlu2 %1977 }
 0x43e   :  { %v2046_v20 = vpop.permute.xlu0 %2045 }
 0x43f   :  { %v6323_v51 = vpop.permute.xlu1 %1945  ;;  %v2052_v58 = vsel %vm700_vm9, %v2046_v20, %v6312_v6  ;;  %v2053_v17 = vsel %vm700_vm9, %v6306_v12, %v2046_v20 }
 0x440   :  { %v2064_v26 = vmul.f32 %v2056_v29, %v2053_v17  ;;  %v2065_v41 = vmul.f32 %v2057_v37, %v2052_v58  ;;  %v6404_v58 = vld [vmem:[%s7310_s1 + $0x23] ss:$8 sm:$0xf] }
 0x442   :  { %v2068_v35 = vpack.c.bf16 %v2065_v41, %v2064_v26 }
 0x444   :  { %2070 = vst [vmem:[#allocation5 + $0x40] sm:$0x33] %v2068_v35  ;;  %v1914_v35 = vperm.slane %v6404_v58, 0 }
 0x445   :  { %v1836_v14 = vpop.permute.xlu2 %1835 }
 0x446   :  { %v1944_v42 = vpop.permute.xlu0 %1943 }
 0x447   :  { %v6338_v7 = vpop.permute.xlu1 %2011  ;;  %v1950_v9 = vsel %vm522_vm10, %v1944_v42, %v6323_v51  ;;  %v1951_v60 = vsel %vm522_vm10, %v6308_v56, %v1944_v42 }
 0x448   :  { %v1962_v11 = vmul.f32 %v1954_v61, %v1951_v60  ;;  %v1963_v23 = vmul.f32 %v1955_v49, %v1950_v9  ;;  %v2058_v61 = vperm.slane %v6317_v13, 2  ;;  %v2059_v49 = vperm.slane %v6317_v13, 3 }
 0x44a   :  { %v1966_v53 = vpack.c.bf16 %v1963_v23, %v1962_v11 }
 0x44b   :  { %v2081_v5 = vld [vmem:[#allocation5 + $0x40] sm:$0x33] }
 0x44c   :  { %v1970_v39 = vrot.slane %v1966_v53, 6  ;;  %v2115_v2 = vunpack.c.l.b16 %v2081_v5  ;;  %v2116_v1 = vunpack.c.h.b16 %v2081_v5 }
 0x44d   :  { %v6353_v28 = vpop.permute.xlu2 %1901 }
 0x44e   :  { %1974 = vst [vmem:[#allocation5 + $0x20] sm:$0xcc] %v1970_v39  ;;  %v2010_v40 = vpop.permute.xlu0 %2009  ;;  %v2127_v30 = vpack.c.b16 %v2115_v2, %v2115_v2  ;;  %v2128_v32 = vpack.c.b16 %v2116_v1, %v2116_v1 }
 0x44f   :  { %v6355_v34 = vpop.permute.xlu1 %1981  ;;  %v2016_v4 = vsel %vm662_vm6, %v2010_v40, %v6338_v7  ;;  %v2017_v31 = vsel %vm662_vm6, %v6310_v48, %v2010_v40 }
 0x450   :  { %v2028_v33 = vmul.f32 %v2020_v36, %v2017_v31  ;;  %v2029_v62 = vmul.f32 %v2021_v45, %v2016_v4  ;;  %v2144_v63 = vsel %vm1099_vm5, %v2127_v30, 0  ;;  %v2147_v22 = vsel %vm1099_vm5, %v2128_v32, 0 }
 0x451   :  { %2160 = vmatpush.bf16.msra.mxu3 %v2144_v63  ;;  %2173 = vmatpush.bf16.msra.mxu1 %v2147_v22  ;;  %v1993_v63 = vperm.slane %v6368_v21, 3 }
 0x452   :  { %v2032_v57 = vpack.c.bf16 %v2029_v62, %v2028_v33  ;;  %v1992_v62 = vperm.slane %v6368_v21, 2 }
 0x454   :  { %v2036_v54 = vrot.slane %v2032_v57, 6 }
 0x455   :  { %v6372_v43 = vpop.permute.xlu2 %1805  ;;  %v4445_v42 = vld [vmem:[#allocation5 + $0x20] sm:$0xf]  ;;  %v4864_v60 = vld [vmem:[#allocation5 + $0x24] sm:$0xf] }
 0x456   :  { %2040 = vst [vmem:[#allocation5 + $0x30] sm:$0xcc] %v2036_v54  ;;  %v1980_v44 = vpop.permute.xlu0 %1979 }
 0x457   :  { %v6374_v15 = vpop.permute.xlu1 %1841  ;;  %v1986_v55 = vsel %vm630_vm8, %v1980_v44, %v6355_v34  ;;  %v1987_v46 = vsel %vm630_vm8, %v6321_v38, %v1980_v44 }
 0x458   :  { %v1998_v59 = vmul.f32 %v1990_v24, %v1987_v46  ;;  %v1999_v19 = vmul.f32 %v1991_v8, %v1986_v55  ;;  %v1846_v0 = vsel %vm340_vm2, %v6374_v15, %v1836_v14 }
 0x459   :  { %v1856_v17 = vmul.f32 %v1848_v27, %v1846_v0 }
 0x45a   :  { %v2002_v52 = vpack.c.bf16 %v1999_v19, %v1998_v59 }
 0x45c   :  { %2004 = vst [vmem:[#allocation5 + $0x30] sm:$0x33] %v2002_v52  ;;  %v6448_v52 = vld [vmem:[%s7310_s1 + $0x20] ss:$8 sm:$0xf] }
 0x45d   :  { %v6392_v50 = vpop.permute.xlu2 %1871 }
 0x45e   :  { %v6394_v29 = vpop.permute.xlu0 %1837 }
 0x45f   :  { %v6396_v37 = vpop.permute.xlu1 %1907  ;;  %v1845_v20 = vsel %vm340_vm2, %v1836_v14, %v6394_v29  ;;  %v1915_v14 = vperm.slane %v6404_v58, 1 }
 0x460   :  { %v1857_v26 = vmul.f32 %v1849_v47, %v1845_v20  ;;  %v1912_v5 = vsel %vm480_vm14, %v6396_v37, %v6353_v28 }
 0x461   :  { %v1922_v4 = vmul.f32 %v1914_v35, %v1912_v5  ;;  %v1885_v35 = vperm.slane %v6448_v52, 1 }
 0x462   :  { %v1860_v41 = vpack.c.bf16 %v1857_v26, %v1856_v17 }
 0x463   :  { %v4866_v9 = vld [vmem:[#allocation5 + $0x2c] sm:$0xf0]  ;;  %v4447_v11 = vld [vmem:[#allocation5 + $0x30] sm:$0xf0] }
 0x464   :  { %v1864_v23 = vrot.slane %v1860_v41, 6  ;;  %v4446_v53 = vor.u32 %v4866_v9, %v4445_v42  ;;  %v4450_v36 = vor.u32 %v4864_v60, %v4447_v11  ;;  %v2023_v42 = vperm.slane %v6349_v3, 3 }
 0x465   :  { %v2050_v39 = vpop.permute.xlu2 %2049 }
 0x466   :  { %1868 = vst [vmem:[#allocation5] sm:$0xcc] %v1864_v23  ;;  %v2051_v13 = vsel %vm700_vm9, %v6312_v6, %v2050_v39  ;;  %v2054_v45 = vsel %vm700_vm9, %v2050_v39, %v6306_v12  ;;  %v6420_v2 = vpop.permute.xlu0 %1903  ;;  %2161 = vmatpush.bf16.msra.mxu3 %v4446_v53  ;;  %2174 = vmatpush.bf16.msra.mxu1 %v4450_v36  ;;  %v4419_v6 = vld [vmem:[%s7310_s1 + $0x6] ss:$8 sm:$0xf] }
 0x467   :  { %v1812_v1 = vpop.permute.xlu1 %1811  ;;  %v2066_v40 = vmul.f32 %v2058_v61, %v2051_v13  ;;  %v2067_v30 = vmul.f32 %v2059_v49, %v2054_v45  ;;  %v1911_v32 = vsel %vm480_vm14, %v6353_v28, %v6420_v2  ;;  %v1818_v57 = vperm.slane %v4419_v6, 0 }
 0x468   :  { %v1923_v31 = vmul.f32 %v1915_v14, %v1911_v32  ;;  %v1819_v54 = vperm.slane %v4419_v6, 1  ;;  %v1816_v28 = vsel %vm308_vm4, %v1812_v1, %v6372_v43  ;;  %v1820_v26 = vperm.slane %v4419_v6, 2 }
 0x469   :  { %v2069_v33 = vpack.c.bf16 %v2067_v30, %v2066_v40  ;;  %v1826_v27 = vmul.f32 %v1818_v57, %v1816_v28  ;;  %v2022_v61 = vperm.slane %v6349_v3, 2 }
 0x46a   :  { %v1926_v12 = vpack.c.bf16 %v1923_v31, %v1922_v4 }
 0x46b   :  { %2071 = vst [vmem:[#allocation5 + $0x48] sm:$0x33] %v2069_v33  ;;  %v1957_v33 = vperm.slane %v6334_v18, 3 }
 0x46c   :  { %v1930_v22 = vrot.slane %v1926_v12, 6 }
 0x46d   :  { %v1984_v24 = vpop.permute.xlu2 %1983 }
 0x46e   :  { %1934 = vst [vmem:[#allocation5 + $0x10] sm:$0xcc] %v1930_v22  ;;  %v1985_v8 = vsel %vm630_vm8, %v6355_v34, %v1984_v24  ;;  %v1988_v44 = vsel %vm630_vm8, %v1984_v24, %v6321_v38  ;;  %v1808_v55 = vpop.permute.xlu0 %1807  ;;  %v1884_v38 = vperm.slane %v6448_v52, 0 }
 0x46f   :  { %v6440_v46 = vpop.permute.xlu1 %1877  ;;  %v2000_v21 = vmul.f32 %v1992_v62, %v1985_v8  ;;  %v2001_v59 = vmul.f32 %v1993_v63, %v1988_v44  ;;  %v1815_v19 = vsel %vm308_vm4, %v6372_v43, %v1808_v55  ;;  %v1821_v43 = vperm.slane %v4419_v6, 3 }
 0x470   :  { %v1827_v34 = vmul.f32 %v1819_v54, %v1815_v19  ;;  %v1882_v17 = vsel %vm378_vm15, %v6440_v46, %v6392_v50  ;;  %v1917_v6 = vperm.slane %v6404_v58, 3  ;;  %v1850_v44 = vperm.slane %v6385_v25, 2 }
 0x471   :  { %v2003_v47 = vpack.c.bf16 %v2001_v59, %v2000_v21  ;;  %v1892_v60 = vmul.f32 %v1884_v38, %v1882_v17  ;;  %v1851_v21 = vperm.slane %v6385_v25, 3  ;;  %v2072_v17 = vld [vmem:[%s7316_s6] sm:$0xf] }
 0x472   :  { %v1830_v0 = vpack.c.bf16 %v1827_v34, %v1826_v27  ;;  %v2082_v20 = vld [vmem:[#allocation5 + $0x48] sm:$0x33] }
 0x473   :  { %2005 = vst [vmem:[#allocation5 + $0x38] sm:$0x33] %v2003_v47  ;;  %v2117_v41 = vunpack.c.l.b16 %v2082_v20  ;;  %v2118_v63 = vunpack.c.h.b16 %v2082_v20 }
 0x474   :  { %1832 = vst [vmem:[#allocation5] sm:$0x33] %v1830_v0 }
 0x475   :  { %v1810_v49 = vpop.permute.xlu2 %1809  ;;  %v2129_v9 = vpack.c.b16 %v2117_v41, %v2117_v41 }
 0x476   :  { %v1813_v11 = vsel %vm308_vm4, %v1810_v49, %v1812_v1  ;;  %v1814_v23 = vsel %vm308_vm4, %v1808_v55, %v1810_v49  ;;  %v6462_v14 = vpop.permute.xlu0 %1873  ;;  %v1886_v49 = vperm.slane %v6448_v52, 2 }
 0x477   :  { %v2014_v53 = vpop.permute.xlu1 %2013  ;;  %v1828_v36 = vmul.f32 %v1820_v26, %v1814_v23  ;;  %v1829_v5 = vmul.f32 %v1821_v43, %v1813_v11  ;;  %v1881_v39 = vsel %vm378_vm15, %v6392_v50, %v6462_v14  ;;  %v2150_v40 = vsel %vm1099_vm5, %v2129_v9, 0 }
 0x478   :  { %v2015_v3 = vsel %vm662_vm6, %v6338_v7, %v2014_v53  ;;  %v1893_v13 = vmul.f32 %v1885_v35, %v1881_v39  ;;  %v2018_v45 = vsel %vm662_vm6, %v2014_v53, %v6310_v48  ;;  %2186 = vmatpush.bf16.msra.mxu2 %v2150_v40  ;;  %v1956_v50 = vperm.slane %v6334_v18, 2 }
 0x479   :  { %v2030_v1 = vmul.f32 %v2022_v61, %v2015_v3  ;;  %v1831_v30 = vpack.c.bf16 %v1829_v5, %v1828_v36  ;;  %v2031_v32 = vmul.f32 %v2023_v42, %v2018_v45  ;;  %v1916_v7 = vperm.slane %v6404_v58, 2 }
 0x47a   :  { %v1896_v4 = vpack.c.bf16 %v1893_v13, %v1892_v60  ;;  %v1887_v42 = vperm.slane %v6448_v52, 3 }
 0x47b   :  { %1833 = vst [vmem:[#allocation5 + $0x8] sm:$0x33] %v1831_v30  ;;  %v2033_v31 = vpack.c.bf16 %v2031_v32, %v2030_v1  ;;  %v4429_v59 = vld [vmem:[#allocation5] sm:$0xf]  ;;  %v4860_v27 = vld [vmem:[#allocation5 + $0x4] sm:$0xf] }
 0x47c   :  { %1898 = vst [vmem:[#allocation5 + $0x10] sm:$0x33] %v1896_v4 }
 0x47d   :  { %v2037_v12 = vrot.slane %v2033_v31, 6 }
 0x47e   :  { %v1948_v48 = vpop.permute.xlu0 %1947 }
 0x47f   :  { %v1906_v62 = vpop.permute.xlu1 %1905  ;;  %2041 = vst [vmem:[#allocation5 + $0x38] sm:$0xcc] %v2037_v12  ;;  %v1949_v22 = vsel %vm522_vm10, %v6323_v51, %v1948_v48  ;;  %v1952_v57 = vsel %vm522_vm10, %v1948_v48, %v6308_v56  ;;  %v2130_v56 = vpack.c.b16 %v2118_v63, %v2118_v63 }
 0x480   :  { %v1909_v18 = vsel %vm480_vm14, %v1906_v62, %v6396_v37  ;;  %v1910_v58 = vsel %vm480_vm14, %v6420_v2, %v1906_v62  ;;  %v1964_v54 = vmul.f32 %v1956_v50, %v1949_v22  ;;  %v1965_v28 = vmul.f32 %v1957_v33, %v1952_v57 }
 0x481   :  { %v1924_v24 = vmul.f32 %v1916_v7, %v1910_v58  ;;  %v1925_v8 = vmul.f32 %v1917_v6, %v1909_v18  ;;  %v2153_v20 = vsel %vm1099_vm5, %v2130_v56, 0 }
 0x482   :  { %v1967_v55 = vpack.c.bf16 %v1965_v28, %v1964_v54 }
 0x483   :  { %v1927_v51 = vpack.c.bf16 %v1925_v8, %v1924_v24  ;;  %v4862_v19 = vld [vmem:[#allocation5 + $0xc] sm:$0xf0]  ;;  %v4431_v34 = vld [vmem:[#allocation5 + $0x10] sm:$0xf0] }
 0x484   :  { %v1971_v37 = vrot.slane %v1967_v55, 6  ;;  %v4430_v0 = vor.u32 %v4862_v19, %v4429_v59  ;;  %v4434_v38 = vor.u32 %v4860_v27, %v4431_v34 }
 0x485   :  { %v1931_v47 = vrot.slane %v1927_v51, 6 }
 0x486   :  { %1975 = vst [vmem:[#allocation5 + $0x28] sm:$0xcc] %v1971_v37  ;;  %v1840_v2 = vpop.permute.xlu0 %1839  ;;  %2162 = vmatpush.bf16.msra.mxu3 %v4430_v0  ;;  %2175 = vmatpush.bf16.msra.mxu1 %v4434_v38  ;;  %v4867_v9 = vld [vmem:[#allocation5 + $0x34] sm:$0xf0]  ;;  %v4455_v11 = vld [vmem:[#allocation5 + $0x38] sm:$0xf0] }
 0x487   :  { %1935 = vst [vmem:[#allocation5 + $0x18] sm:$0xcc] %v1931_v47  ;;  %v1843_v25 = vsel %vm340_vm2, %v1840_v2, %v6374_v15  ;;  %v1844_v26 = vsel %vm340_vm2, %v6394_v29, %v1840_v2 }
 0x488   :  { %v1858_v43 = vmul.f32 %v1850_v44, %v1844_v26  ;;  %v1859_v41 = vmul.f32 %v1851_v21, %v1843_v25 }
 0x489   :  { %4459 = vmatmul.msk.bf16.vlgmr.msra.gmra.mxu3 %vm2139_vm11, %v2072_v17  ;;  %4460 = vmatmul.msk.bf16.vlgmr.msra.gmra.mxu1 %vm2139_vm11, %v2072_v17 }
 0x48a   :  { %2199 = vmatpush.bf16.msrb.mxu3 %v2153_v20  ;;  %v1861_v35 = vpack.c.bf16 %v1859_v41, %v1858_v43 }
 0x48c   :  { %v1865_v61 = vrot.slane %v1861_v35, 6 }
 0x48d   :  { %v4453_v60 = vld [vmem:[#allocation5 + $0x28] sm:$0xf]  ;;  %v4865_v15 = vld [vmem:[#allocation5 + $0x2c] sm:$0xf] }
 0x48e   :  { %1869 = vst [vmem:[#allocation5 + $0x8] sm:$0xcc] %v1865_v61  ;;  %v1876_v23 = vpop.permute.xlu0 %1875  ;;  %v4454_v29 = vor.u32 %v4867_v9, %v4453_v60  ;;  %v4458_v53 = vor.u32 %v4865_v15, %v4455_v11 }
 0x48f   :  { %v1879_v36 = vsel %vm378_vm15, %v1876_v23, %v6440_v46  ;;  %v1880_v5 = vsel %vm378_vm15, %v6462_v14, %v1876_v23  ;;  %v2087_v46 = vpop.permute.xlu1 %2086 }
 0x490   :  { %v1894_v39 = vmul.f32 %v1886_v49, %v1880_v5  ;;  %v1895_v3 = vmul.f32 %v1887_v42, %v1879_v36  ;;  %2187 = vmatpush.bf16.msra.mxu2 %v4454_v29  ;;  %2200 = vmatpush.bf16.msrb.mxu3 %v4458_v53 }
 0x492   :  { %v1897_v52 = vpack.c.bf16 %v1895_v3, %v1894_v39 }
 0x494   :  { %1899 = vst [vmem:[#allocation5 + $0x18] sm:$0x33] %v1897_v52 }
 0x495   :  { %v4437_v13 = vld [vmem:[#allocation5 + $0x8] sm:$0xf]  ;;  %v4861_v1 = vld [vmem:[#allocation5 + $0xc] sm:$0xf] }
 0x49b   :  { %v4863_v45 = vld [vmem:[#allocation5 + $0x14] sm:$0xf0]  ;;  %v4439_v40 = vld [vmem:[#allocation5 + $0x18] sm:$0xf0] }
 0x49c   :  { %v4438_v30 = vor.u32 %v4863_v45, %v4437_v13  ;;  %v4442_v32 = vor.u32 %v4861_v1, %v4439_v40 }
 0x49e   :  { %2188 = vmatpush.bf16.msra.mxu2 %v4438_v30  ;;  %2201 = vmatpush.bf16.msrb.mxu3 %v4442_v32 }
 0x4a1   :  { %4461 = vmatmul.msk.bf16.vlgmr.msra.gmra.mxu2 %vm2139_vm11, %v2072_v17  ;;  %4462 = vmatmul.msk.bf16.vlgmr.msrb.gmra.mxu3 %vm2139_vm11, %v2072_v17 }
 0x506   :  { %v2177_v14 = vpop.f32.mrf.mxu1 }
 0x507   :  { %v6515_v4 = vadd.f32 %v2177_v14, %v2087_v46 }
 0x509   :  { %v2212_v31 = vmul.f32 0.70710677, %v6515_v4  ;;  %v2208_v32 = vmul.f32 0.5, %v6515_v4 }
 0x50b   :  { %v2224_v50 = vand.u32 2147483647, %v2212_v31  ;;  %vm2216_vm5 = vcmp.ge.f32.partialorder %v2212_v31, 0.0 }
 0x50c   :  { %v2164_v33 = vpop.f32.mrf.mxu3  ;;  %v2220_v52 = vsel %vm2216_vm5, 1.0, %v5105_v10 }
 0x50d   :  { %v2228_v7 = vmul.f32 0.3275911, %v2224_v50  ;;  %v6518_v6 = vadd.f32 %v2164_v33, %v2087_v46  ;;  %v2276_v54 = vsub.f32 0.0, %v2224_v50 }
 0x50e   :  { %v2179_v12 = vpop.f32.mrf.mxu1 }
 0x50f   :  { %v2232_v48 = vadd.f32 1.0, %v2228_v7  ;;  %v6521_v62 = vmul.f32 0.70710677, %v6518_v6  ;;  %v2280_v8 = vmul.f32 %v2276_v54, %v2224_v50 }
 0x511   :  { %5008 = vrcp.f32 %v2232_v48  ;;  %v2223_v63 = vand.u32 2147483647, %v6521_v62  ;;  %v2285_v56 = vmul.f32 1.442695, %v2280_v8  ;;  %vm2215_vm0 = vcmp.ge.f32.partialorder %v6521_v62, 0.0 }
 0x512   :  { %v2219_v33 = vsel %vm2215_vm0, 1.0, %v5105_v10  ;;  %v2207_v62 = vmul.f32 0.5, %v6518_v6  ;;  %vm3314_vm0 = vcmask 1045504  }
 0x513   :  { %v2227_v22 = vmul.f32 0.3275911, %v2223_v63  ;;  %v2275_v51 = vsub.f32 0.0, %v2223_v63 }
 0x514   :  { %v2166_v57 = vpop.f32.mrf.mxu3 }
 0x515   :  { %v2231_v18 = vadd.f32 1.0, %v2227_v22  ;;  %v2279_v34 = vmul.f32 %v2275_v51, %v2223_v63 }
 0x517   :  { %v5009_v58 = vpop.eup %5008  ;;  %5010 = vrcp.f32 %v2231_v18  ;;  %v2283_v17 = vmul.f32 1.442695, %v2279_v34 }
 0x518   :  { %v2240_v28 = vmul.f32 1.0614054, %v5009_v58  ;;  %5012 = vpow2.f32 %v2285_v56 }
 0x519   :  { %5014 = vpow2.f32 %v2283_v17 }
 0x51a   :  { %v2244_v24 = vadd.f32 -1.4531521, %v2240_v28 }
 0x51c   :  { %v2248_v44 = vmul.f32 %v5009_v58, %v2244_v24 }
 0x51d   :  { %v5011_v55 = vpop.eup %5010 }
 0x51e   :  { %v2252_v21 = vadd.f32 1.4214138, %v2248_v44  ;;  %v2239_v59 = vmul.f32 1.0614054, %v5011_v55  ;;  %v5013_v9 = vpop.eup %5012 }
 0x51f   :  { %v5015_v30 = vpop.eup %5014 }
 0x520   :  { %v2256_v19 = vmul.f32 %v5009_v58, %v2252_v21  ;;  %v2243_v27 = vadd.f32 -1.4531521, %v2239_v59 }
 0x522   :  { %v2260_v37 = vadd.f32 -0.28449672, %v2256_v19  ;;  %v2247_v47 = vmul.f32 %v5011_v55, %v2243_v27 }
 0x524   :  { %v2264_v0 = vmul.f32 %v5009_v58, %v2260_v37  ;;  %v2251_v38 = vadd.f32 1.4214138, %v2247_v47  ;;  %v2190_v2 = vpop.f32.mrf.mxu2  ;;  %v2203_v20 = vpop.f32.mrf.mxu3 }
 0x525   :  { %v6524_v25 = vadd.f32 %v2190_v2, %v2087_v46  ;;  %v6526_v26 = vadd.f32 %v2203_v20, %v2087_v46 }
 0x526   :  { %v2268_v43 = vadd.f32 0.2548296, %v2264_v0  ;;  %v2255_v41 = vmul.f32 %v5011_v55, %v2251_v38 }
 0x527   :  { %v6529_v35 = vmul.f32 0.70710677, %v6524_v25  ;;  %v6532_v61 = vmul.f32 0.70710677, %v6526_v26 }
 0x528   :  { %v2272_v49 = vmul.f32 %v5009_v58, %v2268_v43  ;;  %v2259_v42 = vadd.f32 -0.28449672, %v2255_v41 }
 0x529   :  { %v2225_v60 = vand.u32 2147483647, %v6529_v35  ;;  %v2226_v15 = vand.u32 2147483647, %v6532_v61  ;;  %vm2217_vm1 = vcmp.ge.f32.partialorder %v6529_v35, 0.0  ;;  %vm2218_vm3 = vcmp.ge.f32.partialorder %v6532_v61, 0.0 }
 0x52a   :  { %v2292_v11 = vmul.f32 %v5013_v9, %v2272_v49  ;;  %v2263_v23 = vmul.f32 %v5011_v55, %v2259_v42  ;;  %v2210_v35 = vmul.f32 0.5, %v6526_v26 }
 0x52b   :  { %v2229_v29 = vmul.f32 0.3275911, %v2225_v60  ;;  %v2230_v53 = vmul.f32 0.3275911, %v2226_v15  ;;  %v2277_v4 = vsub.f32 0.0, %v2225_v60  ;;  %v2278_v57 = vsub.f32 0.0, %v2226_v15 }
 0x52c   :  { %v2296_v36 = vsub.f32 1.0, %v2292_v11  ;;  %v2267_v5 = vadd.f32 0.2548296, %v2263_v23  ;;  %v2192_v39 = vpop.f32.mrf.mxu2  ;;  %v2205_v3 = vpop.f32.mrf.mxu3 }
 0x52d   :  { %v2233_v13 = vadd.f32 1.0, %v2229_v29  ;;  %v2234_v45 = vadd.f32 1.0, %v2230_v53  ;;  %v2281_v28 = vmul.f32 %v2277_v4, %v2225_v60  ;;  %v2282_v44 = vmul.f32 %v2278_v57, %v2226_v15 }
 0x52e   :  { %v2300_v1 = vmul.f32 %v2296_v36, %v2220_v52  ;;  %v2271_v40 = vmul.f32 %v5011_v55, %v2267_v5  ;;  %v2221_v15 = vsel %vm2217_vm1, 1.0, %v5105_v10  ;;  %v2222_v29 = vsel %vm2218_vm3, 1.0, %v5105_v10 }
 0x52f   :  { %5016 = vrcp.f32 %v2233_v13  ;;  %v2287_v59 = vmul.f32 1.442695, %v2281_v28  ;;  %v2289_v27 = vmul.f32 1.442695, %v2282_v44  ;;  %v2209_v36 = vmul.f32 0.5, %v6524_v25  ;;  %v2604_v25 = vld [vmem:[%s7317_s10] sm:$0xff] }
 0x530   :  { %v2304_v46 = vadd.f32 1.0, %v2300_v1  ;;  %v2291_v14 = vmul.f32 %v5015_v30, %v2271_v40  ;;  %5018 = vrcp.f32 %v2234_v45  ;;  %vm3310_vm1 = vcmask 883712  }
 0x531   :  { %5020 = vpow2.f32 %v2287_v59 }
 0x532   :  { %v6539_v31 = vmul.f32 %v2304_v46, %v2208_v32  ;;  %v2295_v50 = vsub.f32 1.0, %v2291_v14  ;;  %5022 = vpow2.f32 %v2289_v27  ;;  %v6650_v27 = vld [vmem:[%s7310_s1 + $0x40] ss:$8 sm:$0xf] }
 0x534   :  { %v2299_v7 = vmul.f32 %v2295_v50, %v2219_v33  ;;  %2416 = vrot.lane.b32.xlu1 %v6539_v31, %s5093_s15  ;;  %2522 = vrot.lane.b32.xlu0 %v6539_v31, %s5085_s21 }
 0x535   :  { %v5017_v12 = vpop.eup %5016  ;;  %2552 = vrot.lane.b32.xlu2 %v6539_v31, %s5088_s24 }
 0x536   :  { %v5019_v48 = vpop.eup %5018  ;;  %v2303_v63 = vadd.f32 1.0, %v2299_v7  ;;  %v2241_v22 = vmul.f32 1.0614054, %v5017_v12  ;;  %v4470_v7 = vld [vmem:[%s7310_s1 + $0x42] ss:$8 sm:$0xf] }
 0x537   :  { %v2242_v18 = vmul.f32 1.0614054, %v5019_v48  ;;  %v5021_v43 = vpop.eup %5020  ;;  %v2564_v4 = vperm.slane %v4470_v7, 1 }
 0x538   :  { %v6549_v58 = vmul.f32 %v2303_v63, %v2207_v62  ;;  %v2245_v54 = vadd.f32 -1.4531521, %v2241_v22  ;;  %v5023_v49 = vpop.eup %5022 }
 0x539   :  { %v2246_v24 = vadd.f32 -1.4531521, %v2242_v18 }
 0x53a   :  { %v2249_v8 = vmul.f32 %v5017_v12, %v2245_v54  ;;  %v2443_v55 = vpack.c.bf16 %v6539_v31, %v6549_v58  ;;  %v6634_v54 = vld [vmem:[%s7310_s1 + $0x41] ss:$8 sm:$0xf] }
 0x53b   :  { %v2250_v51 = vmul.f32 %v5019_v48, %v2246_v24  ;;  %v2533_v24 = vperm.slane %v6634_v54, 0  ;;  %v2534_v44 = vperm.slane %v6634_v54, 1 }
 0x53c   :  { %v2253_v21 = vadd.f32 1.4214138, %v2249_v8  ;;  %2314 = vrot.lane.b32.xlu1 %v6539_v31, %s5099_s22  ;;  %v2447_v6 = vrot.slane %v2443_v55, 6 }
 0x53d   :  { %v2254_v56 = vadd.f32 1.4214138, %v2250_v51  ;;  %2550 = vrot.lane.b32.xlu2 %v6549_v58, %s5088_s24 }
 0x53e   :  { %v2257_v19 = vmul.f32 %v5017_v12, %v2253_v21  ;;  %2451 = vst [vmem:[#allocation5 + $0x60] sm:$0xcc] %v2447_v6 }
 0x53f   :  { %v2258_v34 = vmul.f32 %v5019_v48, %v2254_v56 }
 0x540   :  { %v2261_v37 = vadd.f32 -0.28449672, %v2257_v19 }
 0x541   :  { %v2262_v47 = vadd.f32 -0.28449672, %v2258_v34 }
 0x542   :  { %v2265_v0 = vmul.f32 %v5017_v12, %v2261_v37  ;;  %v2499_v37 = vperm.slane %v6650_v27, 2 }
 0x543   :  { %v2266_v38 = vmul.f32 %v5019_v48, %v2262_v47  ;;  %v2500_v47 = vperm.slane %v6650_v27, 3 }
 0x544   :  { %v2269_v2 = vadd.f32 0.2548296, %v2265_v0  ;;  %2380 = vrot.lane.b32.xlu1 %v6539_v31, %s5094_s18 }
 0x545   :  { %v2270_v20 = vadd.f32 0.2548296, %v2266_v38  ;;  %2520 = vrot.lane.b32.xlu2 %v6549_v58, %s5085_s21 }
 0x546   :  { %v2273_v17 = vmul.f32 %v5017_v12, %v2269_v2  ;;  %v2563_v12 = vperm.slane %v4470_v7, 0  ;;  %v2565_v2 = vperm.slane %v4470_v7, 2 }
 0x547   :  { %v2274_v41 = vmul.f32 %v5019_v48, %v2270_v20  ;;  %v2566_v20 = vperm.slane %v4470_v7, 3 }
 0x548   :  { %v2293_v42 = vmul.f32 %v5021_v43, %v2273_v17 }
 0x549   :  { %v2294_v9 = vmul.f32 %v5023_v49, %v2274_v41 }
 0x54a   :  { %v2297_v60 = vsub.f32 1.0, %v2293_v42 }
 0x54b   :  { %v2298_v11 = vsub.f32 1.0, %v2294_v9  ;;  %v6665_v9 = vld [vmem:[%s7310_s1 + $0x25] ss:$8 sm:$0xf] }
 0x54c   :  { %v2301_v23 = vmul.f32 %v2297_v60, %v2221_v15  ;;  %2350 = vrot.lane.b32.xlu1 %v6539_v31, %s5097_s28 }
 0x54d   :  { %v2302_v53 = vmul.f32 %v2298_v11, %v2222_v29 }
 0x54e   :  { %v2305_v5 = vadd.f32 1.0, %v2301_v23 }
 0x54f   :  { %v2306_v39 = vadd.f32 1.0, %v2302_v53  ;;  %v2467_v53 = vperm.slane %v6665_v9, 0 }
 0x550   :  { %v2309_v3 = vmul.f32 %v2305_v5, %v2209_v36  ;;  %v2468_v36 = vperm.slane %v6665_v9, 1 }
 0x551   :  { %v2310_v61 = vmul.f32 %v2306_v39, %v2210_v35 }
 0x552   :  { %2554 = vrot.lane.b32.xlu0 %v2309_v3, %s5088_s24  ;;  %2418 = vrot.lane.b32.xlu2 %v2309_v3, %s5093_s15 }
 0x553   :  { %v2444_v52 = vpack.c.bf16 %v2310_v61, %v2309_v3 }
 0x554   :  { %2488 = vrot.lane.b32.xlu1 %v2309_v3, %s5087_s23 }
 0x555   :  { %v2448_v13 = vrot.slane %v2444_v52, 6  ;;  %v2535_v52 = vperm.slane %v6634_v54, 2 }
 0x557   :  { %2452 = vst [vmem:[#allocation5 + $0x68] sm:$0xcc] %v2448_v13 }
 0x55a   :  { %2524 = vrot.lane.b32.xlu0 %v2309_v3, %s5085_s21  ;;  %2458 = vrot.lane.b32.xlu2 %v2309_v3, %s5089_s25 }
 0x55c   :  { %2454 = vrot.lane.b32.xlu1 %v6549_v58, %s5089_s25 }
 0x562   :  { %2484 = vrot.lane.b32.xlu0 %v6549_v58, %s5087_s23  ;;  %2316 = vrot.lane.b32.xlu2 %v2309_v3, %s5099_s22 }
 0x564   :  { %2556 = vrot.lane.b32.xlu1 %v2310_v61, %s5088_s24 }
 0x56a   :  { %2456 = vrot.lane.b32.xlu0 %v6539_v31, %s5089_s25  ;;  %2382 = vrot.lane.b32.xlu2 %v2309_v3, %s5094_s18 }
 0x56c   :  { %2526 = vrot.lane.b32.xlu1 %v2310_v61, %s5085_s21 }
 0x572   :  { %2420 = vrot.lane.b32.xlu0 %v2310_v61, %s5093_s15  ;;  %2352 = vrot.lane.b32.xlu2 %v2309_v3, %s5097_s28 }
 0x574   :  { %2486 = vrot.lane.b32.xlu1 %v6539_v31, %s5087_s23 }
 0x57a   :  { %2460 = vrot.lane.b32.xlu0 %v2310_v61, %s5089_s25  ;;  %2490 = vrot.lane.b32.xlu2 %v2310_v61, %s5087_s23 }
 0x57c   :  { %2312 = vrot.lane.b32.xlu1 %v6549_v58, %s5099_s22 }
 0x582   :  { %2318 = vrot.lane.b32.xlu0 %v2310_v61, %s5099_s22  ;;  %2414 = vrot.lane.b32.xlu2 %v6549_v58, %s5093_s15 }
 0x584   :  { %2607 = vperm.xlu1 %4975, %v2604_v25  }
 0x58a   :  { %2384 = vrot.lane.b32.xlu0 %v2310_v61, %s5094_s18  ;;  %2378 = vrot.lane.b32.xlu2 %v6549_v58, %s5094_s18 }
 0x58f   :  { %v2553_v26 = vpop.permute.xlu2 %2552 }
 0x592   :  { %2354 = vrot.lane.b32.xlu0 %v2310_v61, %s5097_s28 }
 0x597   :  { %v2551_v45 = vpop.permute.xlu2 %2550 }
 0x598   :  { %v2560_v48 = vsel %vm700_vm9, %v2551_v45, %v2553_v26 }
 0x599   :  { %v2571_v57 = vmul.f32 %v2563_v12, %v2560_v48 }
 0x59a   :  { %2348 = vrot.lane.b32.xlu0 %v6549_v58, %s5097_s28 }
 0x59f   :  { %v6604_v1 = vpop.permute.xlu2 %2520 }
 0x5a6   :  { %v6606_v40 = vpop.permute.xlu1 %2416  ;;  %v2523_v31 = vpop.permute.xlu0 %2522 }
 0x5a7   :  { %v2530_v55 = vsel %vm662_vm6, %v6604_v1, %v2523_v31 }
 0x5a8   :  { %v2541_v59 = vmul.f32 %v2533_v24, %v2530_v55 }
 0x5ac   :  { %v6608_v30 = vpop.permute.xlu2 %2418 }
 0x5ae   :  { %v6610_v32 = vpop.permute.xlu1 %2314 }
 0x5b4   :  { %v6612_v46 = vpop.permute.xlu2 %2458 }
 0x5b6   :  { %v6614_v14 = vpop.permute.xlu1 %2380 }
 0x5bc   :  { %v6616_v50 = vpop.permute.xlu2 %2316 }
 0x5be   :  { %v6618_v33 = vpop.permute.xlu1 %2350 }
 0x5c4   :  { %v2555_v62 = vpop.permute.xlu0 %2554  ;;  %v6625_v63 = vpop.permute.xlu2 %2382 }
 0x5c5   :  { %v2559_v22 = vsel %vm700_vm9, %v2553_v26, %v2555_v62  ;;  %v2536_v26 = vperm.slane %v6634_v54, 3 }
 0x5c6   :  { %v2572_v18 = vmul.f32 %v2564_v4, %v2559_v22  ;;  %v6629_v58 = vpop.permute.xlu1 %2488  ;;  %v4466_v4 = vld [vmem:[%s7310_s1 + $0x23] ss:$8 sm:$0xf] }
 0x5c8   :  { %v2575_v28 = vpack.c.bf16 %v2572_v18, %v2571_v57 }
 0x5ca   :  { %v2579_v8 = vrot.slane %v2575_v28, 6 }
 0x5cc   :  { %2583 = vst [vmem:[#allocation5 + $0x80] sm:$0xcc] %v2579_v8  ;;  %v2525_v51 = vpop.permute.xlu0 %2524  ;;  %v6641_v21 = vpop.permute.xlu2 %2352 }
 0x5cd   :  { %v2529_v6 = vsel %vm662_vm6, %v2523_v31, %v2525_v51 }
 0x5ce   :  { %v2542_v56 = vmul.f32 %v2534_v44, %v2529_v6  ;;  %v6645_v19 = vpop.permute.xlu1 %2454  ;;  %v2429_v6 = vperm.slane %v4466_v4, 2 }
 0x5d0   :  { %v2545_v34 = vpack.c.bf16 %v2542_v56, %v2541_v59  ;;  %v2428_v59 = vperm.slane %v4466_v4, 1 }
 0x5d2   :  { %2547 = vst [vmem:[#allocation5 + $0x80] sm:$0x33] %v2545_v34  ;;  %v2427_v34 = vperm.slane %v4466_v4, 0 }
 0x5d4   :  { %v6654_v0 = vpop.permute.xlu0 %2484  ;;  %v2491_v38 = vpop.permute.xlu2 %2490 }
 0x5d5   :  { %v2492_v17 = vsel %vm630_vm8, %v6629_v58, %v2491_v38  ;;  %v2495_v43 = vsel %vm630_vm8, %v2491_v38, %v6654_v0  ;;  %v2497_v38 = vperm.slane %v6650_v27, 0 }
 0x5d6   :  { %v2507_v41 = vmul.f32 %v2499_v37, %v2492_v17  ;;  %v2508_v49 = vmul.f32 %v2500_v47, %v2495_v43  ;;  %v2557_v42 = vpop.permute.xlu1 %2556  ;;  %v2430_v37 = vperm.slane %v4466_v4, 3 }
 0x5d7   :  { %v2558_v60 = vsel %vm700_vm9, %v2555_v62, %v2557_v42  ;;  %v2561_v15 = vsel %vm700_vm9, %v2557_v42, %v2551_v45 }
 0x5d8   :  { %v2510_v11 = vpack.c.bf16 %v2508_v49, %v2507_v41  ;;  %v2573_v23 = vmul.f32 %v2565_v2, %v2558_v60  ;;  %v2574_v29 = vmul.f32 %v2566_v20, %v2561_v15  ;;  %v2498_v2 = vperm.slane %v6650_v27, 1 }
 0x5d9   :  { %v2602_v5 = vld [vmem:[#allocation5 + $0x80] sm:$0xff] }
 0x5da   :  { %v2514_v35 = vrot.slane %v2510_v11, 6  ;;  %v2576_v39 = vpack.c.bf16 %v2574_v29, %v2573_v23  ;;  %v2660_v3 = vunpack.c.l.b16 %v2602_v5  ;;  %v2661_v61 = vunpack.c.h.b16 %v2602_v5 }
 0x5dc   :  { %2518 = vst [vmem:[#allocation5 + $0x78] sm:$0xcc] %v2514_v35  ;;  %v2580_v13 = vrot.slane %v2576_v39, 6  ;;  %v2457_v25 = vpop.permute.xlu0 %2456  ;;  %v2680_v45 = vpack.c.b16 %v2660_v3, %v2660_v3  ;;  %v2681_v31 = vpack.c.b16 %v2661_v61, %v2661_v61  ;;  %v2415_v8 = vpop.permute.xlu2 %2414 }
 0x5dd   :  { %v2463_v7 = vsel %vm522_vm10, %v2457_v25, %v6612_v46  ;;  %v2464_v12 = vsel %vm522_vm10, %v6645_v19, %v2457_v25 }
 0x5de   :  { %2584 = vst [vmem:[#allocation5 + $0x88] sm:$0xcc] %v2580_v13  ;;  %v2475_v48 = vmul.f32 %v2467_v53, %v2464_v12  ;;  %v2476_v62 = vmul.f32 %v2468_v36, %v2463_v7  ;;  %v2527_v22 = vpop.permute.xlu1 %2526  ;;  %v2704_v57 = vsel %vm1635_vm12, %v2680_v45, 0  ;;  %v2707_v28 = vsel %vm1635_vm12, %v2681_v31, 0 }
 0x5df   :  { %v2528_v18 = vsel %vm662_vm6, %v2525_v51, %v2527_v22  ;;  %v2531_v54 = vsel %vm662_vm6, %v2527_v22, %v6604_v1  ;;  %2718 = vmatpush.bf16.msra.mxu0 %v2704_v57  ;;  %2731 = vmatpush.bf16.msrb.mxu1 %v2707_v28  ;;  %v2423_v51 = vsel %vm480_vm14, %v6606_v40, %v6608_v30  ;;  %v2469_v53 = vperm.slane %v6665_v9, 2  ;;  %v4465_v57 = vld [vmem:[%s7310_s1 + $0x20] ss:$8 sm:$0xf] }
 0x5e0   :  { %v2479_v24 = vpack.c.bf16 %v2476_v62, %v2475_v48  ;;  %v2543_v44 = vmul.f32 %v2535_v52, %v2528_v18  ;;  %v2544_v55 = vmul.f32 %v2536_v26, %v2531_v54  ;;  %v2424_v1 = vsel %vm480_vm14, %v2415_v8, %v6606_v40  ;;  %v4463_v52 = vld [vmem:[%s7310_s1 + $0x6] ss:$8 sm:$0xf] }
 0x5e1   :  { %v2437_v43 = vmul.f32 %v2429_v6, %v2423_v51  ;;  %v2436_v41 = vmul.f32 %v2428_v59, %v2424_v1  ;;  %v2470_v36 = vperm.slane %v6665_v9, 3  ;;  %v2326_v4 = vperm.slane %v4463_v52, 1 }
 0x5e2   :  { %2481 = vst [vmem:[#allocation5 + $0x70] sm:$0x33] %v2479_v24  ;;  %v2546_v56 = vpack.c.bf16 %v2544_v55, %v2543_v44  ;;  %v2325_v62 = vperm.slane %v4463_v52, 0  ;;  %v2328_v22 = vperm.slane %v4463_v52, 3  ;;  %v2393_v51 = vperm.slane %v4465_v57, 2 }
 0x5e3   :  { %v2392_v1 = vperm.slane %v4465_v57, 1 }
 0x5e4   :  { %2548 = vst [vmem:[#allocation5 + $0x88] sm:$0x33] %v2546_v56  ;;  %v2421_v47 = vpop.permute.xlu0 %2420 }
 0x5e5   :  { %v2422_v20 = vsel %vm480_vm14, %v6608_v30, %v2421_v47  ;;  %v2425_v17 = vsel %vm480_vm14, %v2421_v47, %v2415_v8  ;;  %v2379_v47 = vpop.permute.xlu2 %2378 }
 0x5e6   :  { %v2435_v49 = vmul.f32 %v2427_v34, %v2425_v17  ;;  %v2438_v42 = vmul.f32 %v2430_v37, %v2422_v20  ;;  %v2487_v60 = vpop.permute.xlu1 %2486  ;;  %v2391_v20 = vperm.slane %v4465_v57, 0  ;;  %v2394_v17 = vperm.slane %v4465_v57, 3 }
 0x5e7   :  { %v2493_v40 = vsel %vm630_vm8, %v2487_v60, %v6629_v58  ;;  %v2494_v27 = vsel %vm630_vm8, %v6654_v0, %v2487_v60 }
 0x5e8   :  { %v2439_v15 = vpack.c.bf16 %v2436_v41, %v2435_v49  ;;  %v2440_v11 = vpack.c.bf16 %v2438_v42, %v2437_v43  ;;  %v2505_v23 = vmul.f32 %v2497_v38, %v2494_v27  ;;  %v2506_v30 = vmul.f32 %v2498_v2, %v2493_v40 }
 0x5ea   :  { %2441 = vst [vmem:[#allocation5 + $0x60] sm:$0x33] %v2439_v15  ;;  %v2509_v29 = vpack.c.bf16 %v2506_v30, %v2505_v23  ;;  %v2387_v15 = vsel %vm378_vm15, %v6614_v14, %v6625_v63 }
 0x5eb   :  { %2442 = vst [vmem:[#allocation5 + $0x68] sm:$0x33] %v2440_v11  ;;  %v2603_v5 = vld [vmem:[#allocation5 + $0x88] sm:$0xff]  ;;  %v2388_v11 = vsel %vm378_vm15, %v2379_v47, %v6614_v14 }
 0x5ec   :  { %v2513_v35 = vrot.slane %v2509_v29, 6  ;;  %v2461_v39 = vpop.permute.xlu0 %2460  ;;  %v2662_v3 = vunpack.c.l.b16 %v2603_v5  ;;  %v2663_v58 = vunpack.c.h.b16 %v2603_v5  ;;  %v4464_v14 = vld [vmem:[%s7310_s1 + $0x7] ss:$8 sm:$0xf] }
 0x5ed   :  { %v2462_v0 = vsel %vm522_vm10, %v6612_v46, %v2461_v39  ;;  %v2465_v61 = vsel %vm522_vm10, %v2461_v39, %v6645_v19  ;;  %v2327_v46 = vperm.slane %v4463_v52, 2  ;;  %v2321_v19 = vsel %vm308_vm4, %v6610_v32, %v6616_v50  ;;  %v4929_v16 = vld [vmem:[#allocation5 + $0x8c] sm:$0xf] }
 0x5ee   :  { %2517 = vst [vmem:[#allocation5 + $0x70] sm:$0xcc] %v2513_v35  ;;  %v2477_v9 = vmul.f32 %v2469_v53, %v2462_v0  ;;  %v2478_v13 = vmul.f32 %v2470_v36, %v2465_v61  ;;  %v2682_v25 = vpack.c.b16 %v2662_v3, %v2662_v3  ;;  %v2683_v26 = vpack.c.b16 %v2663_v58, %v2663_v58  ;;  %v2313_v45 = vpop.permute.xlu1 %2312 }
 0x5ef   :  { %v2322_v48 = vsel %vm308_vm4, %v2313_v45, %v6610_v32  ;;  %v2335_v28 = vmul.f32 %v2327_v46, %v2321_v19  ;;  %v2401_v53 = vmul.f32 %v2393_v51, %v2387_v15  ;;  %v2400_v36 = vmul.f32 %v2392_v1, %v2388_v11  ;;  %v4475_v15 = vld [vmem:[#allocation5 + $0x10] sm:$0xf0]  ;;  %v4473_v11 = vld [vmem:[#allocation5] sm:$0xf] }
 0x5f0   :  { %v2480_v31 = vpack.c.bf16 %v2478_v13, %v2477_v9  ;;  %v2710_v7 = vsel %vm1635_vm12, %v2682_v25, 0  ;;  %v2713_v12 = vsel %vm1635_vm12, %v2683_v26, 0  ;;  %v2334_v24 = vmul.f32 %v2326_v4, %v2322_v48 }
 0x5f1   :  { %2744 = vmatpush.bf16.msrb.mxu2 %v2710_v7  ;;  %2757 = vmatpush.bf16.msra.mxu3 %v2713_v12  ;;  %v4521_v54 = vld [vmem:[#allocation5 + $0x60] sm:$0xf]  ;;  %v4880_v6 = vld [vmem:[#allocation5 + $0x64] sm:$0xf]  ;;  %v2363_v58 = vperm.slane %v4464_v14, 2  ;;  %v2364_v52 = vperm.slane %v4464_v14, 3 }
 0x5f2   :  { %2482 = vst [vmem:[#allocation5 + $0x78] sm:$0x33] %v2480_v31  ;;  %v4881_v41 = vld [vmem:[#allocation5 + $0x6c] sm:$0xf]  ;;  %v2361_v31 = vperm.slane %v4464_v14, 0  ;;  %v2362_v7 = vperm.slane %v4464_v14, 1 }
 0x5f4   :  { %v2319_v18 = vpop.permute.xlu0 %2318 }
 0x5f5   :  { %v2320_v8 = vsel %vm308_vm4, %v6616_v50, %v2319_v18  ;;  %v2323_v44 = vsel %vm308_vm4, %v2319_v18, %v2313_v45  ;;  %v4882_v55 = vld [vmem:[#allocation5 + $0x6c] sm:$0xf0]  ;;  %v4523_v32 = vld [vmem:[#allocation5 + $0x70] sm:$0xf0]  ;;  %v4529_v50 = vld [vmem:[#allocation5 + $0x68] sm:$0xf] }
 0x5f6   :  { %v2333_v59 = vmul.f32 %v2325_v62, %v2323_v44  ;;  %v2336_v56 = vmul.f32 %v2328_v22, %v2320_v8  ;;  %v4522_v34 = vor.u32 %v4882_v55, %v4521_v54  ;;  %v4526_v37 = vor.u32 %v4880_v6, %v4523_v32  ;;  %v4873_v8 = vld [vmem:[#allocation5 + $0x2c] sm:$0xf]  ;;  %v4875_v44 = vld [vmem:[#allocation5 + $0x34] sm:$0xf0]  ;;  %v4499_v55 = vld [vmem:[#allocation5 + $0x38] sm:$0xf0] }
 0x5f7   :  { %v4502_v6 = vor.u32 %v4873_v8, %v4499_v55 }
 0x5f8   :  { %v2337_v38 = vpack.c.bf16 %v2334_v24, %v2333_v59  ;;  %v2338_v2 = vpack.c.bf16 %v2336_v56, %v2335_v28  ;;  %2719 = vmatpush.bf16.msra.mxu0 %v4522_v34  ;;  %2732 = vmatpush.bf16.msrb.mxu1 %v4526_v37  ;;  %v4497_v24 = vld [vmem:[#allocation5 + $0x28] sm:$0xf]  ;;  %v4871_v59 = vld [vmem:[#allocation5 + $0x14] sm:$0xf0]  ;;  %v4483_v56 = vld [vmem:[#allocation5 + $0x18] sm:$0xf0] }
 0x5f9   :  { %v4883_v43 = vld [vmem:[#allocation5 + $0x74] sm:$0xf0]  ;;  %v4531_v49 = vld [vmem:[#allocation5 + $0x78] sm:$0xf0] }
 0x5fa   :  { %v2341_v42 = vrot.slane %v2337_v38, 6  ;;  %v2342_v60 = vrot.slane %v2338_v2, 6  ;;  %v4530_v40 = vor.u32 %v4883_v43, %v4529_v50  ;;  %v4534_v27 = vor.u32 %v4881_v41, %v4531_v49  ;;  %v4481_v38 = vld [vmem:[#allocation5 + $0x8] sm:$0xf]  ;;  %v4869_v2 = vld [vmem:[#allocation5 + $0xc] sm:$0xf] }
 0x5fb   :  { %v4874_v50 = vld [vmem:[#allocation5 + $0x2c] sm:$0xf0]  ;;  %v4491_v43 = vld [vmem:[#allocation5 + $0x30] sm:$0xf0]  ;;  %v2585_v41 = vld [vmem:[%s7318_s7] sm:$0xf] }
 0x5fc   :  { %2345 = vst [vmem:[#allocation5 + $0x40] sm:$0xcc] %v2341_v42  ;;  %v2385_v23 = vpop.permute.xlu0 %2384  ;;  %2745 = vmatpush.bf16.msrb.mxu2 %v4530_v40  ;;  %2758 = vmatpush.bf16.msra.mxu3 %v4534_v27  ;;  %v4489_v49 = vld [vmem:[#allocation5 + $0x20] sm:$0xf]  ;;  %v4872_v42 = vld [vmem:[#allocation5 + $0x24] sm:$0xf] }
 0x5fd   :  { %2346 = vst [vmem:[#allocation5 + $0x48] sm:$0xcc] %v2342_v60  ;;  %v2386_v30 = vsel %vm378_vm15, %v6625_v63, %v2385_v23  ;;  %v2389_v29 = vsel %vm378_vm15, %v2385_v23, %v2379_v47  ;;  %v2357_v63 = vsel %vm340_vm2, %v6618_v33, %v6641_v21  ;;  %v4490_v60 = vor.u32 %v4874_v50, %v4489_v49  ;;  %v4870_v27 = vld [vmem:[#allocation5 + $0xc] sm:$0xf0]  ;;  %v4868_v23 = vld [vmem:[#allocation5 + $0x4] sm:$0xf] }
 0x5fe   :  { %v2399_v5 = vmul.f32 %v2391_v20, %v2389_v29  ;;  %v2402_v35 = vmul.f32 %v2394_v17, %v2386_v30  ;;  %v2371_v25 = vmul.f32 %v2363_v58, %v2357_v63  ;;  %v4482_v20 = vor.u32 %v4871_v59, %v4481_v38 }
 0x5ff   :  { %v4486_v17 = vor.u32 %v4869_v2, %v4483_v56  ;;  %v4494_v40 = vor.u32 %v4872_v42, %v4491_v43  ;;  %v4474_v30 = vor.u32 %v4870_v27, %v4473_v11  ;;  %v4478_v29 = vor.u32 %v4868_v23, %v4475_v15 }
 0x600   :  { %v2403_v39 = vpack.c.bf16 %v2400_v36, %v2399_v5  ;;  %v2404_v3 = vpack.c.bf16 %v2402_v35, %v2401_v53  ;;  %v2608_v53 = vpop.permute.xlu1 %2607 }
 0x602   :  { %v2407_v0 = vrot.slane %v2403_v39, 6  ;;  %v2408_v61 = vrot.slane %v2404_v3, 6 }
 0x603   :  { %v4505_v32 = vld [vmem:[#allocation5 + $0x40] sm:$0xf]  ;;  %v4876_v37 = vld [vmem:[#allocation5 + $0x44] sm:$0xf] }
 0x604   :  { %2411 = vst [vmem:[#allocation5 + $0x50] sm:$0xcc] %v2407_v0  ;;  %v2355_v9 = vpop.permute.xlu0 %2354  ;;  %v4513_v22 = vld [vmem:[#allocation5 + $0x48] sm:$0xf] }
 0x605   :  { %2412 = vst [vmem:[#allocation5 + $0x58] sm:$0xcc] %v2408_v61  ;;  %v2356_v13 = vsel %vm340_vm2, %v6641_v21, %v2355_v9  ;;  %v4877_v21 = vld [vmem:[#allocation5 + $0x4c] sm:$0xf] }
 0x606   :  { %v2372_v26 = vmul.f32 %v2364_v52, %v2356_v13 }
 0x608   :  { %v2374_v45 = vpack.c.bf16 %v2372_v26, %v2371_v25 }
 0x60a   :  { %2376 = vst [vmem:[#allocation5 + $0x58] sm:$0x33] %v2374_v45 }
 0x60c   :  { %v2349_v12 = vpop.permute.xlu0 %2348 }
 0x60d   :  { %v2358_v46 = vsel %vm340_vm2, %v2349_v12, %v6618_v33  ;;  %v2359_v4 = vsel %vm340_vm2, %v2355_v9, %v2349_v12  ;;  %v4498_v33 = vor.u32 %v4875_v44, %v4497_v24 }
 0x60e   :  { %v2369_v19 = vmul.f32 %v2361_v31, %v2359_v4  ;;  %v2370_v48 = vmul.f32 %v2362_v7, %v2358_v46 }
 0x610   :  { %v2373_v62 = vpack.c.bf16 %v2370_v48, %v2369_v19 }
 0x611   :  { %v4879_v57 = vld [vmem:[#allocation5 + $0x54] sm:$0xf0]  ;;  %v4515_v18 = vld [vmem:[#allocation5 + $0x58] sm:$0xf0] }
 0x612   :  { %2375 = vst [vmem:[#allocation5 + $0x50] sm:$0x33] %v2373_v62  ;;  %v4514_v54 = vor.u32 %v4879_v57, %v4513_v22  ;;  %v4518_v28 = vor.u32 %v4877_v21, %v4515_v18 }
 0x614   :  { %2746 = vmatpush.bf16.msrb.mxu2 %v4514_v54  ;;  %2759 = vmatpush.bf16.msra.mxu3 %v4518_v28 }
 0x618   :  { %2747 = vmatpush.bf16.msrb.mxu2 %v4498_v33  ;;  %2760 = vmatpush.bf16.msra.mxu3 %v4502_v6 }
 0x619   :  { %v4878_v34 = vld [vmem:[#allocation5 + $0x4c] sm:$0xf0]  ;;  %v4507_v51 = vld [vmem:[#allocation5 + $0x50] sm:$0xf0] }
 0x61a   :  { %v4506_v1 = vor.u32 %v4878_v34, %v4505_v32  ;;  %v4510_v47 = vor.u32 %v4876_v37, %v4507_v51 }
 0x61c   :  { %2720 = vmatpush.bf16.msra.mxu0 %v4506_v1  ;;  %2733 = vmatpush.bf16.msrb.mxu1 %v4510_v47 }
 0x61d   :  { %2748 = vmatpush.bf16.msrb.mxu2 %v4482_v20  ;;  %2761 = vmatpush.bf16.msra.mxu3 %v4486_v17 }
 0x620   :  { %4537 = vmatmul.msk.bf16.vlgmr.msrb.gmra.mxu2 %vm1631_vm13, %v2585_v41  ;;  %4538 = vmatmul.msk.bf16.vlgmr.msra.gmra.mxu3 %vm1631_vm13, %v2585_v41 }
 0x621   :  { %2721 = vmatpush.bf16.msra.mxu0 %v4490_v60  ;;  %2734 = vmatpush.bf16.msrb.mxu1 %v4494_v40 }
 0x625   :  { %2722 = vmatpush.bf16.msra.mxu0 %v4474_v30  ;;  %2735 = vmatpush.bf16.msrb.mxu1 %v4478_v29 }
 0x628   :  { %4535 = vmatmul.msk.bf16.vlgmr.msra.gmra.mxu0 %vm1631_vm13, %v2585_v41  ;;  %4536 = vmatmul.msk.bf16.vlgmr.msrb.gmra.mxu1 %vm1631_vm13, %v2585_v41 }
 0x6a3   :  { %v2750_v36 = vpop.f32.mrf.mxu2  ;;  %v2763_v5 = vpop.f32.mrf.mxu3 }
 0x6a4   :  { %v6773_v35 = vadd.f32 %v2750_v36, %v2608_v53  ;;  %v6775_v14 = vadd.f32 %v2763_v5, %v2608_v53 }
 0x6a5   :  { %v2724_v39 = vpop.f32.mrf.mxu0  ;;  %v2737_v3 = vpop.f32.mrf.mxu1 }
 0x6a6   :  { %v6778_v58 = vmul.f32 0.70710677, %v6773_v35  ;;  %v6781_v0 = vmul.f32 0.70710677, %v6775_v14  ;;  %v6783_v61 = vadd.f32 %v2724_v39, %v2608_v53  ;;  %v6785_v52 = vadd.f32 %v2737_v3, %v2608_v53 }
 0x6a8   :  { %v2785_v63 = vand.u32 2147483647, %v6778_v58  ;;  %v2786_v9 = vand.u32 2147483647, %v6781_v0  ;;  %v6790_v13 = vmul.f32 0.70710677, %v6783_v61 }
 0x6a9   :  { %v6794_v31 = vmul.f32 0.70710677, %v6785_v52  ;;  %vm2777_vm13 = vcmp.ge.f32.partialorder %v6778_v58, 0.0  ;;  %vm2778_vm7 = vcmp.ge.f32.partialorder %v6781_v0, 0.0  ;;  %v2769_v0 = vmul.f32 0.5, %v6773_v35 }
 0x6aa   :  { %v2789_v25 = vmul.f32 0.3275911, %v2785_v63  ;;  %v2790_v26 = vmul.f32 0.3275911, %v2786_v9  ;;  %v2783_v45 = vand.u32 2147483647, %v6790_v13 }
 0x6ab   :  { %v2765_v7 = vpop.f32.mrf.mxu3  ;;  %v2752_v12 = vpop.f32.mrf.mxu2  ;;  %v2784_v57 = vand.u32 2147483647, %v6794_v31  ;;  %v2837_v28 = vsub.f32 0.0, %v2785_v63  ;;  %v2838_v44 = vsub.f32 0.0, %v2786_v9  ;;  %vm2775_vm11 = vcmp.ge.f32.partialorder %v6790_v13, 0.0 }
 0x6ac   :  { %v2793_v46 = vadd.f32 1.0, %v2789_v25  ;;  %v2794_v4 = vadd.f32 1.0, %v2790_v26  ;;  %v2787_v19 = vmul.f32 0.3275911, %v2783_v45  ;;  %v2835_v56 = vsub.f32 0.0, %v2783_v45 }
 0x6ad   :  { %v2739_v48 = vpop.f32.mrf.mxu1  ;;  %v2726_v62 = vpop.f32.mrf.mxu0  ;;  %v2788_v21 = vmul.f32 0.3275911, %v2784_v57  ;;  %v2841_v32 = vmul.f32 %v2837_v28, %v2785_v63  ;;  %v2842_v37 = vmul.f32 %v2838_v44, %v2786_v9  ;;  %v2836_v20 = vsub.f32 0.0, %v2784_v57 }
 0x6ae   :  { %5024 = vrcp.f32 %v2793_v46  ;;  %v2791_v22 = vadd.f32 1.0, %v2787_v19  ;;  %v2839_v43 = vmul.f32 %v2835_v56, %v2783_v45  ;;  %v2781_v44 = vsel %vm2777_vm13, 1.0, %v5105_v10 }
 0x6af   :  { %5026 = vrcp.f32 %v2794_v4  ;;  %v2792_v18 = vadd.f32 1.0, %v2788_v21  ;;  %v2847_v17 = vmul.f32 1.442695, %v2841_v32  ;;  %v2849_v42 = vmul.f32 1.442695, %v2842_v37 }
 0x6b0   :  { %5028 = vrcp.f32 %v2791_v22  ;;  %v2840_v23 = vmul.f32 %v2836_v20, %v2784_v57  ;;  %v2843_v29 = vmul.f32 1.442695, %v2839_v43  ;;  %v2770_v37 = vmul.f32 0.5, %v6775_v14 }
 0x6b1   :  { %5030 = vrcp.f32 %v2792_v18  ;;  %vm2776_vm5 = vcmp.ge.f32.partialorder %v6794_v31, 0.0  ;;  %v2768_v14 = vmul.f32 0.5, %v6785_v52 }
 0x6b2   :  { %5032 = vpow2.f32 %v2847_v17  ;;  %v2845_v25 = vmul.f32 1.442695, %v2840_v23  ;;  %v2780_v43 = vsel %vm2776_vm5, 1.0, %v5105_v10 }
 0x6b3   :  { %5034 = vpow2.f32 %v2849_v42 }
 0x6b4   :  { %v5025_v54 = vpop.eup %5024  ;;  %5036 = vpow2.f32 %v2843_v29 }
 0x6b5   :  { %v5027_v24 = vpop.eup %5026  ;;  %v2801_v8 = vmul.f32 1.0614054, %v5025_v54  ;;  %5038 = vpow2.f32 %v2845_v25 }
 0x6b6   :  { %v2802_v55 = vmul.f32 1.0614054, %v5027_v24  ;;  %v5029_v6 = vpop.eup %5028 }
 0x6b7   :  { %v2805_v33 = vadd.f32 -1.4531521, %v2801_v8  ;;  %v2799_v51 = vmul.f32 1.0614054, %v5029_v6  ;;  %v5031_v47 = vpop.eup %5030 }
 0x6b8   :  { %v2806_v59 = vadd.f32 -1.4531521, %v2802_v55  ;;  %v2800_v41 = vmul.f32 1.0614054, %v5031_v47  ;;  %v5033_v46 = vpop.eup %5032 }
 0x6b9   :  { %v2809_v34 = vmul.f32 %v5025_v54, %v2805_v33  ;;  %v2803_v2 = vadd.f32 -1.4531521, %v2799_v51  ;;  %v5035_v48 = vpop.eup %5034 }
 0x6ba   :  { %v2810_v1 = vmul.f32 %v5027_v24, %v2806_v59  ;;  %v2804_v27 = vadd.f32 -1.4531521, %v2800_v41  ;;  %v5037_v8 = vpop.eup %5036 }
 0x6bb   :  { %v2813_v38 = vadd.f32 1.4214138, %v2809_v34  ;;  %v2807_v60 = vmul.f32 %v5029_v6, %v2803_v2  ;;  %v5039_v56 = vpop.eup %5038 }
 0x6bc   :  { %v2814_v50 = vadd.f32 1.4214138, %v2810_v1  ;;  %v2808_v53 = vmul.f32 %v5031_v47, %v2804_v27  ;;  %v2779_v1 = vsel %vm2775_vm11, 1.0, %v5105_v10 }
 0x6bd   :  { %v2817_v49 = vmul.f32 %v5025_v54, %v2813_v38  ;;  %v2811_v11 = vadd.f32 1.4214138, %v2807_v60 }
 0x6be   :  { %v2818_v40 = vmul.f32 %v5027_v24, %v2814_v50  ;;  %v2812_v3 = vadd.f32 1.4214138, %v2808_v53  ;;  %v2767_v50 = vmul.f32 0.5, %v6783_v61  ;;  %v3168_v61 = vld [vmem:[%s7319_s11] sm:$0xff] }
 0x6bf   :  { %v2821_v15 = vadd.f32 -0.28449672, %v2817_v49  ;;  %v2815_v5 = vmul.f32 %v5029_v6, %v2811_v11 }
 0x6c0   :  { %v2822_v30 = vadd.f32 -0.28449672, %v2818_v40  ;;  %v2816_v45 = vmul.f32 %v5031_v47, %v2812_v3  ;;  %v4545_v3 = vld [vmem:[%s7310_s1 + $0x41] ss:$8 sm:$0xf] }
 0x6c1   :  { %v2825_v36 = vmul.f32 %v5025_v54, %v2821_v15  ;;  %v2819_v9 = vadd.f32 -0.28449672, %v2815_v5  ;;  %v3087_v25 = vperm.slane %v4545_v3, 0 }
 0x6c2   :  { %v2826_v39 = vmul.f32 %v5027_v24, %v2822_v30  ;;  %v2820_v19 = vadd.f32 -0.28449672, %v2816_v45  ;;  %v3089_v45 = vperm.slane %v4545_v3, 2 }
 0x6c3   :  { %v2829_v63 = vadd.f32 0.2548296, %v2825_v36  ;;  %v2823_v12 = vmul.f32 %v5029_v6, %v2819_v9  ;;  %v3090_v9 = vperm.slane %v4545_v3, 3 }
 0x6c4   :  { %v2830_v26 = vadd.f32 0.2548296, %v2826_v39  ;;  %v2824_v21 = vmul.f32 %v5031_v47, %v2820_v19 }
 0x6c5   :  { %v2833_v7 = vmul.f32 %v5025_v54, %v2829_v63  ;;  %v2827_v22 = vadd.f32 0.2548296, %v2823_v12 }
 0x6c6   :  { %v2834_v4 = vmul.f32 %v5027_v24, %v2830_v26  ;;  %v2828_v55 = vadd.f32 0.2548296, %v2824_v21  ;;  %v2782_v24 = vsel %vm2778_vm7, 1.0, %v5105_v10  ;;  %v3088_v26 = vperm.slane %v4545_v3, 1 }
 0x6c7   :  { %v2853_v62 = vmul.f32 %v5033_v46, %v2833_v7  ;;  %v2831_v28 = vmul.f32 %v5029_v6, %v2827_v22  ;;  %v4544_v22 = vld [vmem:[%s7310_s1 + $0x40] ss:$8 sm:$0xf] }
 0x6c8   :  { %v2854_v57 = vmul.f32 %v5035_v48, %v2834_v4  ;;  %v2832_v59 = vmul.f32 %v5031_v47, %v2828_v55 }
 0x6c9   :  { %v2857_v18 = vsub.f32 1.0, %v2853_v62  ;;  %v2851_v58 = vmul.f32 %v5037_v8, %v2831_v28 }
 0x6ca   :  { %v2858_v54 = vsub.f32 1.0, %v2854_v57  ;;  %v2852_v38 = vmul.f32 %v5039_v56, %v2832_v59 }
 0x6cb   :  { %v2861_v33 = vmul.f32 %v2857_v18, %v2781_v44  ;;  %v2855_v6 = vsub.f32 1.0, %v2851_v58  ;;  %v3057_v44 = vperm.slane %v4544_v22, 0  ;;  %v3058_v58 = vperm.slane %v4544_v22, 1 }
 0x6cc   :  { %v2862_v32 = vmul.f32 %v2858_v54, %v2782_v24  ;;  %v2856_v13 = vsub.f32 1.0, %v2852_v38  ;;  %v3060_v54 = vperm.slane %v4544_v22, 3 }
 0x6cd   :  { %v2865_v34 = vadd.f32 1.0, %v2861_v33  ;;  %v2859_v20 = vmul.f32 %v2855_v6, %v2779_v1  ;;  %v4546_v1 = vld [vmem:[%s7310_s1 + $0x42] ss:$8 sm:$0xf] }
 0x6ce   :  { %v2866_v51 = vadd.f32 1.0, %v2862_v32  ;;  %v2860_v35 = vmul.f32 %v2856_v13, %v2780_v43  ;;  %v3059_v32 = vperm.slane %v4544_v22, 2 }
 0x6cf   :  { %v2869_v2 = vmul.f32 %v2865_v34, %v2769_v0  ;;  %v2863_v47 = vadd.f32 1.0, %v2859_v20 }
 0x6d0   :  { %v2870_v17 = vmul.f32 %v2866_v51, %v2770_v37  ;;  %v2864_v42 = vadd.f32 1.0, %v2860_v35  ;;  %v4542_v37 = vld [vmem:[%s7310_s1 + $0x23] ss:$8 sm:$0xf]  ;;  %v3123_v35 = vperm.slane %v4546_v1, 0 }
 0x6d1   :  { %v2867_v49 = vmul.f32 %v2863_v47, %v2767_v50  ;;  %v2981_v13 = vperm.slane %v4542_v37, 0  ;;  %v2982_v50 = vperm.slane %v4542_v37, 1  ;;  %v2984_v22 = vperm.slane %v4542_v37, 3 }
 0x6d2   :  { %v3004_v41 = vpack.c.bf16 %v2870_v17, %v2869_v2  ;;  %v2868_v31 = vmul.f32 %v2864_v42, %v2768_v14  ;;  %v3124_v14 = vperm.slane %v4546_v1, 1  ;;  %v3125_v42 = vperm.slane %v4546_v1, 2 }
 0x6d3   :  { %3074 = vrot.lane.b32.xlu2 %v2867_v49, %s5085_s21 }
 0x6d4   :  { %3006 = vst [vmem:[#allocation5 + $0xb8] sm:$0x33] %v3004_v41  ;;  %3112 = vrot.lane.b32.xlu1 %v2868_v31, %s5088_s24  ;;  %2940 = vrot.lane.b32.xlu0 %v2868_v31, %s5094_s18  ;;  %v3003_v60 = vpack.c.bf16 %v2868_v31, %v2867_v49  ;;  %v3126_v41 = vperm.slane %v4546_v1, 3 }
 0x6d6   :  { %3005 = vst [vmem:[#allocation5 + $0xb0] sm:$0x33] %v3003_v60 }
 0x6db   :  { %3044 = vrot.lane.b32.xlu2 %v2867_v49, %s5087_s23 }
 0x6dc   :  { %3080 = vrot.lane.b32.xlu1 %v2870_v17, %s5085_s21  ;;  %3046 = vrot.lane.b32.xlu0 %v2868_v31, %s5087_s23 }
 0x6e3   :  { %3110 = vrot.lane.b32.xlu2 %v2867_v49, %s5088_s24 }
 0x6e4   :  { %3050 = vrot.lane.b32.xlu1 %v2870_v17, %s5087_s23  ;;  %3010 = vrot.lane.b32.xlu0 %v2868_v31, %s5089_s25 }
 0x6eb   :  { %2970 = vrot.lane.b32.xlu2 %v2868_v31, %s5093_s15 }
 0x6ec   :  { %3116 = vrot.lane.b32.xlu1 %v2870_v17, %s5088_s24  ;;  %3078 = vrot.lane.b32.xlu0 %v2869_v2, %s5085_s21 }
 0x6f3   :  { %3008 = vrot.lane.b32.xlu2 %v2867_v49, %s5089_s25 }
 0x6f4   :  { %2974 = vrot.lane.b32.xlu1 %v2870_v17, %s5093_s15  ;;  %3048 = vrot.lane.b32.xlu0 %v2869_v2, %s5087_s23 }
 0x6fb   :  { %3076 = vrot.lane.b32.xlu2 %v2868_v31, %s5085_s21 }
 0x6fc   :  { %3014 = vrot.lane.b32.xlu1 %v2870_v17, %s5089_s25  ;;  %3114 = vrot.lane.b32.xlu0 %v2869_v2, %s5088_s24 }
 0x703   :  { %2904 = vrot.lane.b32.xlu2 %v2868_v31, %s5097_s28 }
 0x704   :  { %2942 = vrot.lane.b32.xlu1 %v2869_v2, %s5094_s18  ;;  %2972 = vrot.lane.b32.xlu0 %v2869_v2, %s5093_s15 }
 0x70b   :  { %2874 = vrot.lane.b32.xlu2 %v2868_v31, %s5099_s22 }
 0x70c   :  { %2908 = vrot.lane.b32.xlu1 %v2870_v17, %s5097_s28  ;;  %3012 = vrot.lane.b32.xlu0 %v2869_v2, %s5089_s25 }
 0x713   :  { %2968 = vrot.lane.b32.xlu2 %v2867_v49, %s5093_s15 }
 0x714   :  { %2878 = vrot.lane.b32.xlu1 %v2870_v17, %s5099_s22  ;;  %2906 = vrot.lane.b32.xlu0 %v2869_v2, %s5097_s28 }
 0x71b   :  { %2944 = vrot.lane.b32.xlu2 %v2870_v17, %s5094_s18 }
 0x71c   :  { %2938 = vrot.lane.b32.xlu1 %v2867_v49, %s5094_s18  ;;  %2876 = vrot.lane.b32.xlu0 %v2869_v2, %s5099_s22 }
 0x723   :  { %2902 = vrot.lane.b32.xlu2 %v2867_v49, %s5097_s28 }
 0x724   :  { %3171 = vperm.xlu1 %4975, %v3168_v61   ;;  %2872 = vrot.lane.b32.xlu0 %v2867_v49, %s5099_s22 }
 0x72d   :  { %v3075_v52 = vpop.permute.xlu2 %3074 }
 0x735   :  { %v3045_v40 = vpop.permute.xlu2 %3044 }
 0x73d   :  { %v6844_v27 = vpop.permute.xlu2 %3110 }
 0x745   :  { %v6846_v15 = vpop.permute.xlu2 %2970 }
 0x746   :  { %v6848_v11 = vpop.permute.xlu1 %3112  ;;  %v6850_v23 = vpop.permute.xlu0 %2940 }
 0x747   :  { %v3120_v61 = vsel %vm700_vm9, %v6844_v27, %v6848_v11 }
 0x74d   :  { %v6852_v30 = vpop.permute.xlu2 %3008 }
 0x74e   :  { %v3081_v29 = vpop.permute.xlu1 %3080  ;;  %v3047_v53 = vpop.permute.xlu0 %3046 }
 0x74f   :  { %v3085_v7 = vsel %vm662_vm6, %v3081_v29, %v3075_v52  ;;  %v3054_v59 = vsel %vm630_vm8, %v3045_v40, %v3047_v53 }
 0x750   :  { %v3098_v62 = vmul.f32 %v3090_v9, %v3085_v7  ;;  %v3065_v38 = vmul.f32 %v3057_v44, %v3054_v59 }
 0x755   :  { %v3077_v36 = vpop.permute.xlu2 %3076 }
 0x756   :  { %v3051_v5 = vpop.permute.xlu1 %3050  ;;  %v6854_v39 = vpop.permute.xlu0 %3010  ;;  %v3084_v12 = vsel %vm662_vm6, %v3075_v52, %v3077_v36 }
 0x757   :  { %v3095_v57 = vmul.f32 %v3087_v25, %v3084_v12  ;;  %v3055_v56 = vsel %vm630_vm8, %v3051_v5, %v3045_v40  ;;  %v3131_v25 = vmul.f32 %v3123_v35, %v3120_v61 }
 0x758   :  { %v3068_v2 = vmul.f32 %v3060_v54, %v3055_v56  ;;  %v6930_v54 = vld [vmem:[%s7310_s1 + $0x7] ss:$8 sm:$0xf] }
 0x759   :  { %v2915_v1 = vperm.slane %v6930_v54, 0 }
 0x75d   :  { %v6859_v63 = vpop.permute.xlu2 %2904 }
 0x75e   :  { %v3117_v46 = vpop.permute.xlu1 %3116  ;;  %v3079_v4 = vpop.permute.xlu0 %3078 }
 0x75f   :  { %v3082_v19 = vsel %vm662_vm6, %v3079_v4, %v3081_v29  ;;  %v3083_v48 = vsel %vm662_vm6, %v3077_v36, %v3079_v4  ;;  %v3121_v52 = vsel %vm700_vm9, %v3117_v46, %v6844_v27  ;;  %v6910_v27 = vld [vmem:[%s7310_s1 + $0x20] ss:$8 sm:$0xf] }
 0x760   :  { %v3096_v21 = vmul.f32 %v3088_v26, %v3083_v48  ;;  %v3097_v18 = vmul.f32 %v3089_v45, %v3082_v19  ;;  %v3134_v26 = vmul.f32 %v3126_v41, %v3121_v52  ;;  %v2953_v48 = vperm.slane %v6910_v27, 2 }
 0x762   :  { %v3099_v28 = vpack.c.bf16 %v3096_v21, %v3095_v57  ;;  %v3100_v8 = vpack.c.bf16 %v3098_v62, %v3097_v18  ;;  %v2983_v62 = vperm.slane %v4542_v37, 2  ;;  %v2954_v57 = vperm.slane %v6910_v27, 3 }
 0x763   :  { %v3018_v18 = vsel %vm522_vm10, %v6852_v30, %v6854_v39 }
 0x764   :  { %v3103_v33 = vrot.slane %v3099_v28, 6  ;;  %v3104_v24 = vrot.slane %v3100_v8, 6 }
 0x765   :  { %v6872_v55 = vpop.permute.xlu2 %2874 }
 0x766   :  { %3107 = vst [vmem:[#allocation5 + $0xc0] sm:$0xcc] %v3103_v33  ;;  %v2975_v0 = vpop.permute.xlu1 %2974  ;;  %v3049_v34 = vpop.permute.xlu0 %3048 }
 0x767   :  { %3108 = vst [vmem:[#allocation5 + $0xc8] sm:$0xcc] %v3104_v24  ;;  %v3052_v6 = vsel %vm630_vm8, %v3049_v34, %v3051_v5  ;;  %v3053_v51 = vsel %vm630_vm8, %v3047_v53, %v3049_v34 }
 0x768   :  { %v3066_v20 = vmul.f32 %v3058_v58, %v3053_v51  ;;  %v3067_v17 = vmul.f32 %v3059_v32, %v3052_v6 }
 0x76a   :  { %v3069_v47 = vpack.c.bf16 %v3066_v20, %v3065_v38  ;;  %v3070_v43 = vpack.c.bf16 %v3068_v2, %v3067_v17 }
 0x76c   :  { %3071 = vst [vmem:[#allocation5 + $0xc0] sm:$0x33] %v3069_v47 }
 0x76d   :  { %v2969_v49 = vpop.permute.xlu2 %2968  ;;  %3072 = vst [vmem:[#allocation5 + $0xc8] sm:$0x33] %v3070_v43 }
 0x76e   :  { %v2978_v31 = vsel %vm480_vm14, %v2969_v49, %v6846_v15  ;;  %v2979_v60 = vsel %vm480_vm14, %v2975_v0, %v2969_v49  ;;  %v6900_v53 = vpop.permute.xlu1 %3014  ;;  %v3115_v36 = vpop.permute.xlu0 %3114 }
 0x76f   :  { %v2989_v40 = vmul.f32 %v2981_v13, %v2979_v60  ;;  %v2990_v29 = vmul.f32 %v2982_v50, %v2978_v31  ;;  %v3118_v5 = vsel %vm700_vm9, %v3115_v36, %v3117_v46  ;;  %v3119_v3 = vsel %vm700_vm9, %v6848_v11, %v3115_v36  ;;  %v6915_v46 = vld [vmem:[%s7310_s1 + $0x25] ss:$8 sm:$0xf] }
 0x770   :  { %v3132_v45 = vmul.f32 %v3124_v14, %v3119_v3  ;;  %v3133_v7 = vmul.f32 %v3125_v42, %v3118_v5  ;;  %v3021_v21 = vperm.slane %v6915_v46, 0  ;;  %v3024_v28 = vperm.slane %v6915_v46, 3 }
 0x771   :  { %v2993_v9 = vpack.c.bf16 %v2990_v29, %v2989_v40  ;;  %v3022_v6 = vperm.slane %v6915_v46, 1  ;;  %v3023_v51 = vperm.slane %v6915_v46, 2 }
 0x772   :  { %v3135_v4 = vpack.c.bf16 %v3132_v45, %v3131_v25  ;;  %v3136_v19 = vpack.c.bf16 %v3134_v26, %v3133_v7  ;;  %v3029_v31 = vmul.f32 %v3021_v21, %v3018_v18  ;;  %v2918_v18 = vperm.slane %v6930_v54, 3 }
 0x773   :  { %v2997_v12 = vrot.slane %v2993_v9, 6  ;;  %v4645_v20 = vld [vmem:[#allocation5 + $0xc0] sm:$0xf]  ;;  %v4908_v17 = vld [vmem:[#allocation5 + $0xc4] sm:$0xf] }
 0x774   :  { %3137 = vst [vmem:[#allocation5 + $0xd0] sm:$0x33] %v3135_v4  ;;  %v4653_v43 = vld [vmem:[#allocation5 + $0xc8] sm:$0xf]  ;;  %v4909_v61 = vld [vmem:[#allocation5 + $0xcc] sm:$0xf] }
 0x775   :  { %3001 = vst [vmem:[#allocation5 + $0xa0] sm:$0xcc] %v2997_v12  ;;  %v6917_v11 = vpop.permute.xlu2 %2944 }
 0x776   :  { %3138 = vst [vmem:[#allocation5 + $0xd8] sm:$0x33] %v3136_v19  ;;  %v2943_v8 = vpop.permute.xlu1 %2942  ;;  %v2973_v44 = vpop.permute.xlu0 %2972 }
 0x777   :  { %v2947_v33 = vsel %vm378_vm15, %v6850_v23, %v2943_v8  ;;  %v2976_v24 = vsel %vm480_vm14, %v2973_v44, %v2975_v0  ;;  %v2977_v58 = vsel %vm480_vm14, %v6846_v15, %v2973_v44  ;;  %v2946_v32 = vsel %vm378_vm15, %v2943_v8, %v6917_v11 }
 0x778   :  { %v2961_v59 = vmul.f32 %v2953_v48, %v2947_v33  ;;  %v2991_v56 = vmul.f32 %v2983_v62, %v2977_v58  ;;  %v2992_v34 = vmul.f32 %v2984_v22, %v2976_v24  ;;  %v2962_v37 = vmul.f32 %v2954_v57, %v2946_v32  ;;  %v4539_v32 = vld [vmem:[%s7310_s1 + $0x6] ss:$8 sm:$0xf] }
 0x779   :  { %v2916_v0 = vperm.slane %v6930_v54, 1  ;;  %v3019_v15 = vsel %vm522_vm10, %v6900_v53, %v6852_v30  ;;  %v2917_v22 = vperm.slane %v6930_v54, 2  ;;  %v2951_v54 = vperm.slane %v6910_v27, 0 }
 0x77a   :  { %v2994_v38 = vpack.c.bf16 %v2992_v34, %v2991_v56  ;;  %v2964_v2 = vpack.c.bf16 %v2962_v37, %v2961_v59  ;;  %v3032_v30 = vmul.f32 %v3024_v28, %v3019_v15  ;;  %v2952_v34 = vperm.slane %v6910_v27, 1 }
 0x77b   :  { %v4910_v50 = vld [vmem:[#allocation5 + $0xcc] sm:$0x30]  ;;  %v4647_v47 = vld [vmem:[#allocation5 + $0xd0] sm:$0x30]  ;;  %v2887_v37 = vperm.slane %v4539_v32, 2 }
 0x77c   :  { %v2998_v35 = vrot.slane %v2994_v38, 6  ;;  %2966 = vst [vmem:[#allocation5 + $0xa8] sm:$0x33] %v2964_v2  ;;  %v4646_v49 = vor.u32 %v4910_v50, %v4645_v20  ;;  %v4650_v14 = vor.u32 %v4908_v17, %v4647_v47 }
 0x77d   :  { %v2903_v13 = vpop.permute.xlu2 %2902  ;;  %v4911_v42 = vld [vmem:[#allocation5 + $0xd4] sm:$0x30]  ;;  %v4655_v52 = vld [vmem:[#allocation5 + $0xd8] sm:$0x30] }
 0x77e   :  { %v2912_v41 = vsel %vm340_vm2, %v2903_v13, %v6859_v63  ;;  %v4654_v60 = vor.u32 %v4911_v42, %v4653_v43  ;;  %3002 = vst [vmem:[#allocation5 + $0xa8] sm:$0xcc] %v2998_v35  ;;  %v2909_v40 = vpop.permute.xlu1 %2908  ;;  %v3013_v29 = vpop.permute.xlu0 %3012  ;;  %v3316_v5 = vsel %vm3314_vm0, %v4646_v49, 0  ;;  %v3319_v3 = vsel %vm3314_vm0, %v4650_v14, 0 }
 0x77f   :  { %v2924_v36 = vmul.f32 %v2916_v0, %v2912_v41  ;;  %v4658_v9 = vor.u32 %v4909_v61, %v4655_v52  ;;  %v3016_v25 = vsel %vm522_vm10, %v3013_v29, %v6900_v53  ;;  %v3017_v26 = vsel %vm522_vm10, %v6854_v39, %v3013_v29  ;;  %3328 = vmatpush.bf16.msrb.mxu0 %v3316_v5  ;;  %v4621_v29 = vld [vmem:[#allocation5 + $0x88] sm:$0xf] }
 0x780   :  { %v2913_v45 = vsel %vm340_vm2, %v2909_v40, %v2903_v13  ;;  %3341 = vmatpush.bf16.msra.mxu1 %v3319_v3  ;;  %v3322_v7 = vsel %vm3314_vm0, %v4654_v60, 0  ;;  %v3030_v12 = vmul.f32 %v3022_v6, %v3017_v26  ;;  %v3031_v4 = vmul.f32 %v3023_v51, %v3016_v25 }
 0x781   :  { %v2923_v19 = vmul.f32 %v2915_v1, %v2913_v45  ;;  %3354 = vmatpush.bf16.msra.mxu2 %v3322_v7  ;;  %v3325_v46 = vsel %vm3314_vm0, %v4658_v9, 0  ;;  %v2888_v6 = vperm.slane %v4539_v32, 3  ;;  %v2886_v14 = vperm.slane %v4539_v32, 1 }
 0x782   :  { %3367 = vmatpush.bf16.msrb.mxu3 %v3325_v46  ;;  %v3033_v48 = vpack.c.bf16 %v3030_v12, %v3029_v31  ;;  %v3034_v53 = vpack.c.bf16 %v3032_v30, %v3031_v4  ;;  %v4605_v46 = vld [vmem:[#allocation5 + $0x68] sm:$0xf] }
 0x783   :  { %v2927_v62 = vpack.c.bf16 %v2924_v36, %v2923_v19  ;;  %v4901_v36 = vld [vmem:[#allocation5 + $0x8c] sm:$0xf]  ;;  %v4607_v19 = vld [vmem:[#allocation5 + $0x78] sm:$0xf0] }
 0x784   :  { %v3037_v39 = vrot.slane %v3033_v48, 6  ;;  %v3038_v57 = vrot.slane %v3034_v53, 6  ;;  %v4897_v48 = vld [vmem:[#allocation5 + $0x6c] sm:$0xf] }
 0x785   :  { %v2931_v21 = vrot.slane %v2927_v62, 6  ;;  %v4637_v47 = vld [vmem:[#allocation5 + $0xa8] sm:$0xf]  ;;  %v4905_v43 = vld [vmem:[#allocation5 + $0xac] sm:$0xf]  ;;  %v4610_v62 = vor.u32 %v4897_v48, %v4607_v19 }
 0x786   :  { %3041 = vst [vmem:[#allocation5 + $0xb0] sm:$0xcc] %v3037_v39  ;;  %v2879_v28 = vpop.permute.xlu1 %2878  ;;  %v2907_v8 = vpop.permute.xlu0 %2906  ;;  %v4895_v39 = vld [vmem:[#allocation5 + $0x54] sm:$0xf0] }
 0x787   :  { %3042 = vst [vmem:[#allocation5 + $0xb8] sm:$0xcc] %v3038_v57  ;;  %v2910_v44 = vsel %vm340_vm2, %v2907_v8, %v2909_v40  ;;  %v2911_v33 = vsel %vm340_vm2, %v6859_v63, %v2907_v8  ;;  %v4591_v57 = vld [vmem:[#allocation5 + $0x58] sm:$0xf0] }
 0x788   :  { %2935 = vst [vmem:[#allocation5 + $0x90] sm:$0xcc] %v2931_v21  ;;  %v2925_v24 = vmul.f32 %v2917_v22, %v2911_v33  ;;  %v2926_v58 = vmul.f32 %v2918_v18, %v2910_v44  ;;  %v4613_v22 = vld [vmem:[#allocation5 + $0x80] sm:$0xf]  ;;  %v4900_v18 = vld [vmem:[#allocation5 + $0x84] sm:$0xf] }
 0x789   :  { %v4589_v33 = vld [vmem:[#allocation5 + $0x48] sm:$0xf] }
 0x78a   :  { %v2928_v59 = vpack.c.bf16 %v2926_v58, %v2925_v24  ;;  %v4893_v24 = vld [vmem:[#allocation5 + $0x4c] sm:$0xf]  ;;  %v4590_v58 = vor.u32 %v4895_v39, %v4589_v33 }
 0x78c   :  { %v2932_v56 = vrot.slane %v2928_v59, 6  ;;  %v4898_v59 = vld [vmem:[#allocation5 + $0x6c] sm:$0xf0] }
 0x78d   :  { %v4906_v40 = vld [vmem:[#allocation5 + $0xac] sm:$0xf0]  ;;  %v4631_v9 = vld [vmem:[#allocation5 + $0xb0] sm:$0xf0] }
 0x78e   :  { %2936 = vst [vmem:[#allocation5 + $0x98] sm:$0xcc] %v2932_v56  ;;  %v2939_v51 = vpop.permute.xlu1 %2938  ;;  %v2877_v1 = vpop.permute.xlu0 %2876  ;;  %v4907_v0 = vld [vmem:[#allocation5 + $0xb4] sm:$0xf0]  ;;  %v4639_v63 = vld [vmem:[#allocation5 + $0xb8] sm:$0xf0] }
 0x78f   :  { %v2948_v15 = vsel %vm378_vm15, %v2939_v51, %v6850_v23  ;;  %v2949_v38 = vsel %vm378_vm15, %v6917_v11, %v2939_v51  ;;  %v2880_v2 = vsel %vm308_vm4, %v2877_v1, %v2879_v28  ;;  %v2881_v27 = vsel %vm308_vm4, %v6872_v55, %v2877_v1  ;;  %v4573_v56 = vld [vmem:[#allocation5 + $0x28] sm:$0xf] }
 0x790   :  { %v2959_v20 = vmul.f32 %v2951_v54, %v2949_v38  ;;  %v2960_v17 = vmul.f32 %v2952_v34, %v2948_v15  ;;  %v2895_v13 = vmul.f32 %v2887_v37, %v2881_v27  ;;  %v2896_v50 = vmul.f32 %v2888_v6, %v2880_v2  ;;  %v4599_v54 = vld [vmem:[#allocation5 + $0x70] sm:$0xf0]  ;;  %v4889_v34 = vld [vmem:[#allocation5 + $0x2c] sm:$0xf]  ;;  %v4597_v37 = vld [vmem:[#allocation5 + $0x60] sm:$0xf] }
 0x791   :  { %v4638_v35 = vor.u32 %v4907_v0, %v4637_v47  ;;  %v4642_v41 = vor.u32 %v4905_v43, %v4639_v63  ;;  %v2885_v11 = vperm.slane %v4539_v32, 0  ;;  %v4594_v32 = vor.u32 %v4893_v24, %v4591_v57  ;;  %v4896_v6 = vld [vmem:[#allocation5 + $0x64] sm:$0xf]  ;;  %v4891_v0 = vld [vmem:[#allocation5 + $0x34] sm:$0xf0] }
 0x792   :  { %v2963_v23 = vpack.c.bf16 %v2960_v17, %v2959_v20  ;;  %v2898_v49 = vpack.c.bf16 %v2896_v50, %v2895_v13  ;;  %v4598_v51 = vor.u32 %v4898_v59, %v4597_v37  ;;  %v4602_v1 = vor.u32 %v4896_v6, %v4599_v54  ;;  %v4575_v63 = vld [vmem:[#allocation5 + $0x38] sm:$0xf0]  ;;  %v4894_v2 = vld [vmem:[#allocation5 + $0x4c] sm:$0xf0]  ;;  %v4583_v27 = vld [vmem:[#allocation5 + $0x50] sm:$0xf0] }
 0x793   :  { %3355 = vmatpush.bf16.msra.mxu2 %v4638_v35  ;;  %3368 = vmatpush.bf16.msrb.mxu3 %v4642_v41  ;;  %v4574_v15 = vor.u32 %v4891_v0, %v4573_v56  ;;  %v4578_v38 = vor.u32 %v4889_v34, %v4575_v63  ;;  %v4887_v20 = vld [vmem:[#allocation5 + $0x14] sm:$0xf0]  ;;  %v4559_v17 = vld [vmem:[#allocation5 + $0x18] sm:$0xf0]  ;;  %v4581_v13 = vld [vmem:[#allocation5 + $0x40] sm:$0xf] }
 0x794   :  { %2965 = vst [vmem:[#allocation5 + $0xa0] sm:$0x33] %v2963_v23  ;;  %v4892_v50 = vld [vmem:[#allocation5 + $0x44] sm:$0xf]  ;;  %v4582_v47 = vor.u32 %v4894_v2, %v4581_v13  ;;  %v4557_v35 = vld [vmem:[#allocation5 + $0x8] sm:$0xf] }
 0x795   :  { %2900 = vst [vmem:[#allocation5 + $0x98] sm:$0x33] %v2898_v49  ;;  %v4586_v43 = vor.u32 %v4892_v50, %v4583_v27  ;;  %v4885_v41 = vld [vmem:[#allocation5 + $0xc] sm:$0xf]  ;;  %v4558_v23 = vor.u32 %v4887_v20, %v4557_v35 }
 0x796   :  { %v2873_v42 = vpop.permute.xlu0 %2872  ;;  %v4562_v49 = vor.u32 %v4885_v41, %v4559_v17 }
 0x797   :  { %v2882_v31 = vsel %vm308_vm4, %v2873_v42, %v6872_v55  ;;  %v2883_v30 = vsel %vm308_vm4, %v2879_v28, %v2873_v42  ;;  %v4899_v55 = vld [vmem:[#allocation5 + $0x74] sm:$0xf0] }
 0x798   :  { %v2893_v60 = vmul.f32 %v2885_v11, %v2883_v30  ;;  %v2894_v61 = vmul.f32 %v2886_v14, %v2882_v31  ;;  %v4606_v53 = vor.u32 %v4899_v55, %v4605_v46  ;;  %v4890_v11 = vld [vmem:[#allocation5 + $0x2c] sm:$0xf0]  ;;  %v4567_v14 = vld [vmem:[#allocation5 + $0x30] sm:$0xf0]  ;;  %v3139_v42 = vld [vmem:[%s7320_s8] sm:$0xf] }
 0x799   :  { %v4565_v31 = vld [vmem:[#allocation5 + $0x20] sm:$0xf]  ;;  %v4888_v30 = vld [vmem:[#allocation5 + $0x24] sm:$0xf] }
 0x79a   :  { %v2897_v52 = vpack.c.bf16 %v2894_v61, %v2893_v60  ;;  %v4566_v60 = vor.u32 %v4890_v11, %v4565_v31  ;;  %v4570_v61 = vor.u32 %v4888_v30, %v4567_v14 }
 0x79b   :  { %v4629_v5 = vld [vmem:[#allocation5 + $0xa0] sm:$0xf]  ;;  %v4904_v3 = vld [vmem:[#allocation5 + $0xa4] sm:$0xf] }
 0x79c   :  { %2899 = vst [vmem:[#allocation5 + $0x90] sm:$0x33] %v2897_v52  ;;  %v4630_v25 = vor.u32 %v4906_v40, %v4629_v5  ;;  %v4634_v26 = vor.u32 %v4904_v3, %v4631_v9  ;;  %v4903_v45 = vld [vmem:[#allocation5 + $0x94] sm:$0xf0]  ;;  %v4623_v7 = vld [vmem:[#allocation5 + $0x98] sm:$0xf0]  ;;  %v3172_v9 = vpop.permute.xlu1 %3171 }
 0x79d   :  { %v4622_v12 = vor.u32 %v4903_v45, %v4621_v29  ;;  %v4626_v4 = vor.u32 %v4901_v36, %v4623_v7  ;;  %v4886_v52 = vld [vmem:[#allocation5 + $0xc] sm:$0xf0]  ;;  %v4551_v40 = vld [vmem:[#allocation5 + $0x10] sm:$0xf0]  ;;  %v4549_v29 = vld [vmem:[#allocation5] sm:$0xf] }
 0x79e   :  { %3329 = vmatpush.bf16.msrb.mxu0 %v4630_v25  ;;  %3342 = vmatpush.bf16.msra.mxu1 %v4634_v26  ;;  %v4884_v36 = vld [vmem:[#allocation5 + $0x4] sm:$0xf]  ;;  %v4550_v5 = vor.u32 %v4886_v52, %v4549_v29 }
 0x79f   :  { %3356 = vmatpush.bf16.msra.mxu2 %v4622_v12  ;;  %3369 = vmatpush.bf16.msrb.mxu3 %v4626_v4  ;;  %v4554_v3 = vor.u32 %v4884_v36, %v4551_v40 }
 0x7a3   :  { %3357 = vmatpush.bf16.msra.mxu2 %v4606_v53  ;;  %3370 = vmatpush.bf16.msrb.mxu3 %v4610_v62  ;;  %v4902_v21 = vld [vmem:[#allocation5 + $0x8c] sm:$0xf0]  ;;  %v4615_v28 = vld [vmem:[#allocation5 + $0x90] sm:$0xf0] }
 0x7a4   :  { %v4614_v8 = vor.u32 %v4902_v21, %v4613_v22  ;;  %v4618_v44 = vor.u32 %v4900_v18, %v4615_v28 }
 0x7a6   :  { %3330 = vmatpush.bf16.msrb.mxu0 %v4614_v8  ;;  %3343 = vmatpush.bf16.msra.mxu1 %v4618_v44 }
 0x7a7   :  { %3358 = vmatpush.bf16.msra.mxu2 %v4590_v58  ;;  %3371 = vmatpush.bf16.msrb.mxu3 %v4594_v32 }
 0x7aa   :  { %3331 = vmatpush.bf16.msrb.mxu0 %v4598_v51  ;;  %3344 = vmatpush.bf16.msra.mxu1 %v4602_v1 }
 0x7ab   :  { %3359 = vmatpush.bf16.msra.mxu2 %v4574_v15  ;;  %3372 = vmatpush.bf16.msrb.mxu3 %v4578_v38 }
 0x7ae   :  { %3332 = vmatpush.bf16.msrb.mxu0 %v4582_v47  ;;  %3345 = vmatpush.bf16.msra.mxu1 %v4586_v43 }
 0x7af   :  { %3360 = vmatpush.bf16.msra.mxu2 %v4558_v23  ;;  %3373 = vmatpush.bf16.msrb.mxu3 %v4562_v49 }
 0x7b2   :  { %4661 = vmatmul.msk.bf16.vlgmr.msra.gmra.mxu2 %vm3310_vm1, %v3139_v42  ;;  %4662 = vmatmul.msk.bf16.vlgmr.msrb.gmra.mxu3 %vm3310_vm1, %v3139_v42 }
 0x7b3   :  { %3333 = vmatpush.bf16.msrb.mxu0 %v4566_v60  ;;  %3346 = vmatpush.bf16.msra.mxu1 %v4570_v61 }
 0x7b7   :  { %3334 = vmatpush.bf16.msrb.mxu0 %v4550_v5  ;;  %3347 = vmatpush.bf16.msra.mxu1 %v4554_v3 }
 0x7ba   :  { %4659 = vmatmul.msk.bf16.vlgmr.msrb.gmra.mxu0 %vm3310_vm1, %v3139_v42  ;;  %4660 = vmatmul.msk.bf16.vlgmr.msra.gmra.mxu1 %vm3310_vm1, %v3139_v42 }
 0x835   :  { %v3362_v25 = vpop.f32.mrf.mxu2  ;;  %v3375_v26 = vpop.f32.mrf.mxu3 }
 0x836   :  { %v7001_v45 = vadd.f32 %v3362_v25, %v3172_v9  ;;  %v7003_v7 = vadd.f32 %v3375_v26, %v3172_v9 }
 0x837   :  { %v3336_v12 = vpop.f32.mrf.mxu0  ;;  %v3349_v4 = vpop.f32.mrf.mxu1 }
 0x838   :  { %v7006_v55 = vmul.f32 0.70710677, %v7001_v45  ;;  %v7009_v19 = vmul.f32 0.70710677, %v7003_v7  ;;  %v7011_v46 = vadd.f32 %v3336_v12, %v3172_v9  ;;  %v7013_v48 = vadd.f32 %v3349_v4, %v3172_v9 }
 0x83a   :  { %v3397_v53 = vand.u32 2147483647, %v7006_v55  ;;  %v3398_v62 = vand.u32 2147483647, %v7009_v19  ;;  %v7018_v22 = vmul.f32 0.70710677, %v7011_v46 }
 0x83b   :  { %v7022_v18 = vmul.f32 0.70710677, %v7013_v48  ;;  %vm3389_vm3 = vcmp.ge.f32.partialorder %v7006_v55, 0.0  ;;  %vm3390_vm13 = vcmp.ge.f32.partialorder %v7009_v19, 0.0  ;;  %v3381_v19 = vmul.f32 0.5, %v7001_v45 }
 0x83c   :  { %v3401_v39 = vmul.f32 0.3275911, %v3397_v53  ;;  %v3402_v57 = vmul.f32 0.3275911, %v3398_v62  ;;  %v3395_v21 = vand.u32 2147483647, %v7018_v22 }
 0x83d   :  { %v3377_v28 = vpop.f32.mrf.mxu3  ;;  %v3364_v8 = vpop.f32.mrf.mxu2  ;;  %v3396_v54 = vand.u32 2147483647, %v7022_v18  ;;  %v3449_v6 = vsub.f32 0.0, %v3397_v53  ;;  %v3450_v0 = vsub.f32 0.0, %v3398_v62  ;;  %vm3387_vm7 = vcmp.ge.f32.partialorder %v7018_v22, 0.0 }
 0x83e   :  { %v3405_v44 = vadd.f32 1.0, %v3401_v39  ;;  %v3406_v33 = vadd.f32 1.0, %v3402_v57  ;;  %v3399_v24 = vmul.f32 0.3275911, %v3395_v21  ;;  %v3447_v20 = vsub.f32 0.0, %v3395_v21 }
 0x83f   :  { %v3351_v58 = vpop.f32.mrf.mxu1  ;;  %v3338_v32 = vpop.f32.mrf.mxu0  ;;  %v3400_v56 = vmul.f32 0.3275911, %v3396_v54  ;;  %v3453_v2 = vmul.f32 %v3449_v6, %v3397_v53  ;;  %v3454_v13 = vmul.f32 %v3450_v0, %v3398_v62  ;;  %v3448_v23 = vsub.f32 0.0, %v3396_v54 }
 0x840   :  { %5040 = vrcp.f32 %v3405_v44  ;;  %v3403_v59 = vadd.f32 1.0, %v3399_v24  ;;  %v3451_v14 = vmul.f32 %v3447_v20, %v3395_v21  ;;  %v3393_v0 = vsel %vm3389_vm3, 1.0, %v5105_v10 }
 0x841   :  { %5042 = vrcp.f32 %v3406_v33  ;;  %v3404_v34 = vadd.f32 1.0, %v3400_v56  ;;  %v3459_v49 = vmul.f32 1.442695, %v3453_v2  ;;  %v3461_v30 = vmul.f32 1.442695, %v3454_v13 }
 0x842   :  { %5044 = vrcp.f32 %v3403_v59  ;;  %v3452_v36 = vmul.f32 %v3448_v23, %v3396_v54  ;;  %v3455_v3 = vmul.f32 1.442695, %v3451_v14  ;;  %v3382_v13 = vmul.f32 0.5, %v7003_v7 }
 0x843   :  { %5046 = vrcp.f32 %v3404_v34  ;;  %vm3388_vm11 = vcmp.ge.f32.partialorder %v7022_v18, 0.0  ;;  %v3380_v7 = vmul.f32 0.5, %v7013_v48  ;;  %v3794_v48 = vld [vmem:[%s7321_s13] sm:$0xff] }
 0x844   :  { %5048 = vpow2.f32 %v3459_v49  ;;  %v3457_v39 = vmul.f32 1.442695, %v3452_v36  ;;  %v3392_v14 = vsel %vm3388_vm11, 1.0, %v5105_v10 }
 0x845   :  { %5050 = vpow2.f32 %v3461_v30 }
 0x846   :  { %v5041_v37 = vpop.eup %5040  ;;  %5052 = vpow2.f32 %v3455_v3 }
 0x847   :  { %v5043_v51 = vpop.eup %5042  ;;  %v3413_v1 = vmul.f32 1.0614054, %v5041_v37  ;;  %5054 = vpow2.f32 %v3457_v39 }
 0x848   :  { %v3414_v63 = vmul.f32 1.0614054, %v5043_v51  ;;  %v5045_v38 = vpop.eup %5044 }
 0x849   :  { %v3417_v15 = vadd.f32 -1.4531521, %v3413_v1  ;;  %v3411_v50 = vmul.f32 1.0614054, %v5045_v38  ;;  %v5047_v43 = vpop.eup %5046 }
 0x84a   :  { %v3418_v27 = vadd.f32 -1.4531521, %v3414_v63  ;;  %v3412_v42 = vmul.f32 1.0614054, %v5047_v43  ;;  %v5049_v44 = vpop.eup %5048 }
 0x84b   :  { %v3421_v17 = vmul.f32 %v5041_v37, %v3417_v15  ;;  %v3415_v41 = vadd.f32 -1.4531521, %v3411_v50  ;;  %v5051_v58 = vpop.eup %5050 }
 0x84c   :  { %v3422_v47 = vmul.f32 %v5043_v51, %v3418_v27  ;;  %v3416_v52 = vadd.f32 -1.4531521, %v3412_v42  ;;  %v5053_v1 = vpop.eup %5052 }
 0x84d   :  { %v3425_v35 = vadd.f32 1.4214138, %v3421_v17  ;;  %v3419_v60 = vmul.f32 %v5045_v38, %v3415_v41  ;;  %v5055_v20 = vpop.eup %5054 }
 0x84e   :  { %v3426_v11 = vadd.f32 1.4214138, %v3422_v47  ;;  %v3420_v9 = vmul.f32 %v5047_v43, %v3416_v52  ;;  %v3391_v47 = vsel %vm3387_vm7, 1.0, %v5105_v10 }
 0x84f   :  { %v3429_v31 = vmul.f32 %v5041_v37, %v3425_v35  ;;  %v3423_v29 = vadd.f32 1.4214138, %v3419_v60 }
 0x850   :  { %v3430_v61 = vmul.f32 %v5043_v51, %v3426_v11  ;;  %v3424_v4 = vadd.f32 1.4214138, %v3420_v9  ;;  %v3379_v11 = vmul.f32 0.5, %v7011_v46  ;;  %v4665_v9 = vld [vmem:[%s7310_s1 + $0x20] ss:$8 sm:$0xf] }
 0x851   :  { %v3433_v40 = vadd.f32 -0.28449672, %v3429_v31  ;;  %v3427_v26 = vmul.f32 %v5045_v38, %v3423_v29 }
 0x852   :  { %v3434_v5 = vadd.f32 -0.28449672, %v3430_v61  ;;  %v3428_v21 = vmul.f32 %v5047_v43, %v3424_v4 }
 0x853   :  { %v3437_v25 = vmul.f32 %v5041_v37, %v3433_v40  ;;  %v3431_v62 = vadd.f32 -0.28449672, %v3427_v26 }
 0x854   :  { %v3438_v12 = vmul.f32 %v5043_v51, %v3434_v5  ;;  %v3432_v24 = vadd.f32 -0.28449672, %v3428_v21 }
 0x855   :  { %v3441_v53 = vadd.f32 0.2548296, %v3437_v25  ;;  %v3435_v8 = vmul.f32 %v5045_v38, %v3431_v62  ;;  %v3565_v25 = vperm.slane %v4665_v9, 2  ;;  %v3566_v62 = vperm.slane %v4665_v9, 3 }
 0x856   :  { %v3442_v57 = vadd.f32 0.2548296, %v3438_v12  ;;  %v3436_v56 = vmul.f32 %v5047_v43, %v3432_v24  ;;  %v3564_v12 = vperm.slane %v4665_v9, 1 }
 0x857   :  { %v3445_v28 = vmul.f32 %v5041_v37, %v3441_v53  ;;  %v3439_v59 = vadd.f32 0.2548296, %v3435_v8  ;;  %v3563_v53 = vperm.slane %v4665_v9, 0 }
 0x858   :  { %v3446_v33 = vmul.f32 %v5043_v51, %v3442_v57  ;;  %v3440_v63 = vadd.f32 0.2548296, %v3436_v56  ;;  %v3394_v51 = vsel %vm3390_vm13, 1.0, %v5105_v10 }
 0x859   :  { %v3465_v32 = vmul.f32 %v5049_v44, %v3445_v28  ;;  %v3443_v6 = vmul.f32 %v5045_v38, %v3439_v59 }
 0x85a   :  { %v3466_v54 = vmul.f32 %v5051_v58, %v3446_v33  ;;  %v3444_v27 = vmul.f32 %v5047_v43, %v3440_v63 }
 0x85b   :  { %v3469_v34 = vsub.f32 1.0, %v3465_v32  ;;  %v3463_v55 = vmul.f32 %v5053_v1, %v3443_v6  ;;  %v7092_v32 = vld [vmem:[%s7310_s1 + $0x7] ss:$8 sm:$0xf] }
 0x85c   :  { %v3470_v37 = vsub.f32 1.0, %v3466_v54  ;;  %v3464_v35 = vmul.f32 %v5055_v20, %v3444_v27  ;;  %v3534_v1 = vperm.slane %v7092_v32, 1  ;;  %v7109_v27 = vld [vmem:[%s7310_s1 + $0x23] ss:$8 sm:$0xf] }
 0x85d   :  { %v3473_v15 = vmul.f32 %v3469_v34, %v3393_v0  ;;  %v3467_v38 = vsub.f32 1.0, %v3463_v55  ;;  %v3533_v0 = vperm.slane %v7092_v32, 0 }
 0x85e   :  { %v3474_v2 = vmul.f32 %v3470_v37, %v3394_v51  ;;  %v3468_v22 = vsub.f32 1.0, %v3464_v35  ;;  %v7123_v35 = vld [vmem:[%s7310_s1 + $0x40] ss:$8 sm:$0xf] }
 0x85f   :  { %v3477_v17 = vadd.f32 1.0, %v3473_v15  ;;  %v3471_v23 = vmul.f32 %v3467_v38, %v3391_v47 }
 0x860   :  { %v3478_v50 = vadd.f32 1.0, %v3474_v2  ;;  %v3472_v45 = vmul.f32 %v3468_v22, %v3392_v14  ;;  %v4663_v22 = vld [vmem:[%s7310_s1 + $0x6] ss:$8 sm:$0xf] }
 0x861   :  { %v3481_v41 = vmul.f32 %v3477_v17, %v3381_v19  ;;  %v3475_v43 = vadd.f32 1.0, %v3471_v23  ;;  %v3600_v17 = vperm.slane %v7109_v27, 1 }
 0x862   :  { %v3482_v49 = vmul.f32 %v3478_v50, %v3382_v13  ;;  %v3476_v30 = vadd.f32 1.0, %v3472_v45  ;;  %v3599_v13 = vperm.slane %v7109_v27, 0  ;;  %v3498_v45 = vperm.slane %v4663_v22, 1 }
 0x863   :  { %v3479_v31 = vmul.f32 %v3475_v43, %v3379_v11  ;;  %v3670_v11 = vperm.slane %v7123_v35, 1 }
 0x864   :  { %v3616_v42 = vpack.c.bf16 %v3482_v49, %v3481_v41  ;;  %v3480_v18 = vmul.f32 %v3476_v30, %v3380_v7  ;;  %v3497_v30 = vperm.slane %v4663_v22, 0 }
 0x865   :  { %3550 = vrot.lane.b32.xlu2 %v3479_v31, %s5094_s18 }
 0x866   :  { %v3620_v60 = vrot.slane %v3616_v42, 6  ;;  %3658 = vrot.lane.b32.xlu1 %v3480_v18, %s5087_s23  ;;  %3552 = vrot.lane.b32.xlu0 %v3480_v18, %s5094_s18  ;;  %v3615_v61 = vpack.c.bf16 %v3480_v18, %v3479_v31  ;;  %v3499_v42 = vperm.slane %v4663_v22, 2 }
 0x868   :  { %3624 = vst [vmem:[#allocation5 + $0xf8] sm:$0xcc] %v3620_v60  ;;  %v3619_v46 = vrot.slane %v3615_v61, 6  ;;  %v3500_v60 = vperm.slane %v4663_v22, 3 }
 0x86a   :  { %3623 = vst [vmem:[#allocation5 + $0xf0] sm:$0xcc] %v3619_v46 }
 0x86d   :  { %3520 = vrot.lane.b32.xlu2 %v3479_v31, %s5097_s28 }
 0x86e   :  { %3556 = vrot.lane.b32.xlu1 %v3482_v49, %s5094_s18  ;;  %3522 = vrot.lane.b32.xlu0 %v3480_v18, %s5097_s28 }
 0x875   :  { %3586 = vrot.lane.b32.xlu2 %v3479_v31, %s5093_s15 }
 0x876   :  { %3526 = vrot.lane.b32.xlu1 %v3482_v49, %s5097_s28  ;;  %3588 = vrot.lane.b32.xlu0 %v3480_v18, %s5093_s15 }
 0x87d   :  { %3484 = vrot.lane.b32.xlu2 %v3479_v31, %s5099_s22 }
 0x87e   :  { %3592 = vrot.lane.b32.xlu1 %v3482_v49, %s5093_s15  ;;  %3486 = vrot.lane.b32.xlu0 %v3480_v18, %s5099_s22 }
 0x885   :  { %3554 = vrot.lane.b32.xlu2 %v3481_v41, %s5094_s18 }
 0x886   :  { %3490 = vrot.lane.b32.xlu1 %v3482_v49, %s5099_s22  ;;  %3656 = vrot.lane.b32.xlu0 %v3479_v31, %s5087_s23 }
 0x88d   :  { %3488 = vrot.lane.b32.xlu2 %v3481_v41, %s5099_s22 }
 0x88e   :  { %3724 = vrot.lane.b32.xlu1 %v3480_v18, %s5088_s24  ;;  %3722 = vrot.lane.b32.xlu0 %v3479_v31, %s5088_s24 }
 0x895   :  { %3660 = vrot.lane.b32.xlu2 %v3481_v41, %s5087_s23 }
 0x896   :  { %3590 = vrot.lane.b32.xlu1 %v3481_v41, %s5093_s15  ;;  %3626 = vrot.lane.b32.xlu0 %v3479_v31, %s5089_s25 }
 0x89d   :  { %3726 = vrot.lane.b32.xlu2 %v3481_v41, %s5088_s24 }
 0x89e   :  { %3628 = vrot.lane.b32.xlu1 %v3480_v18, %s5089_s25  ;;  %3524 = vrot.lane.b32.xlu0 %v3481_v41, %s5097_s28 }
 0x8a5   :  { %3630 = vrot.lane.b32.xlu2 %v3481_v41, %s5089_s25 }
 0x8a6   :  { %3694 = vrot.lane.b32.xlu1 %v3480_v18, %s5085_s21  ;;  %3692 = vrot.lane.b32.xlu0 %v3479_v31, %s5085_s21  ;;  %v3669_v18 = vperm.slane %v7123_v35, 0 }
 0x8ad   :  { %3696 = vrot.lane.b32.xlu2 %v3481_v41, %s5085_s21 }
 0x8ae   :  { %3728 = vrot.lane.b32.xlu1 %v3482_v49, %s5088_s24  ;;  %3662 = vrot.lane.b32.xlu0 %v3482_v49, %s5087_s23 }
 0x8b5   :  { %3632 = vrot.lane.b32.xlu2 %v3482_v49, %s5089_s25 }
 0x8b6   :  { %3797 = vperm.xlu1 %4975, %v3794_v48   ;;  %3698 = vrot.lane.b32.xlu0 %v3482_v49, %s5085_s21 }
 0x8bf   :  { %v3551_v52 = vpop.permute.xlu2 %3550 }
 0x8c7   :  { %v3521_v40 = vpop.permute.xlu2 %3520 }
 0x8cf   :  { %v3587_v29 = vpop.permute.xlu2 %3586 }
 0x8d7   :  { %v7072_v36 = vpop.permute.xlu2 %3484 }
 0x8d8   :  { %v7074_v5 = vpop.permute.xlu1 %3658  ;;  %v3553_v3 = vpop.permute.xlu0 %3552 }
 0x8d9   :  { %v3560_v39 = vsel %vm378_vm15, %v3551_v52, %v3553_v3 }
 0x8da   :  { %v3572_v33 = vmul.f32 %v3564_v12, %v3560_v39 }
 0x8df   :  { %v3555_v26 = vpop.permute.xlu2 %3554 }
 0x8e0   :  { %v3559_v4 = vsel %vm378_vm15, %v3553_v3, %v3555_v26  ;;  %v3557_v21 = vpop.permute.xlu1 %3556  ;;  %v7083_v28 = vpop.permute.xlu0 %3522 }
 0x8e1   :  { %v3573_v57 = vmul.f32 %v3565_v25, %v3559_v4  ;;  %v3558_v8 = vsel %vm378_vm15, %v3555_v26, %v3557_v21  ;;  %v3561_v44 = vsel %vm378_vm15, %v3557_v21, %v3551_v52  ;;  %v3530_v37 = vsel %vm340_vm2, %v3521_v40, %v7083_v28 }
 0x8e2   :  { %v3571_v24 = vmul.f32 %v3563_v53, %v3561_v44  ;;  %v3574_v58 = vmul.f32 %v3566_v62, %v3558_v8  ;;  %v3542_v55 = vmul.f32 %v3534_v1, %v3530_v37 }
 0x8e4   :  { %v3575_v59 = vpack.c.bf16 %v3572_v33, %v3571_v24  ;;  %v3576_v54 = vpack.c.bf16 %v3574_v58, %v3573_v57 }
 0x8e6   :  { %v3579_v34 = vrot.slane %v3575_v59, 6  ;;  %v3580_v6 = vrot.slane %v3576_v54, 6 }
 0x8e7   :  { %v3489_v56 = vpop.permute.xlu2 %3488 }
 0x8e8   :  { %3583 = vst [vmem:[#allocation5 + $0xe0] sm:$0xcc] %v3579_v34  ;;  %v7099_v63 = vpop.permute.xlu1 %3526  ;;  %v7101_v15 = vpop.permute.xlu0 %3588 }
 0x8e9   :  { %3584 = vst [vmem:[#allocation5 + $0xe8] sm:$0xcc] %v3580_v6  ;;  %v3531_v51 = vsel %vm340_vm2, %v7099_v63, %v3521_v40  ;;  %v3596_v38 = vsel %vm480_vm14, %v3587_v29, %v7101_v15  ;;  %v7149_v40 = vld [vmem:[%s7310_s1 + $0x42] ss:$8 sm:$0xf] }
 0x8ea   :  { %v3541_v2 = vmul.f32 %v3533_v0, %v3531_v51  ;;  %v3608_v23 = vmul.f32 %v3600_v17, %v3596_v38  ;;  %v3736_v62 = vperm.slane %v7149_v40, 1  ;;  %v3735_v8 = vperm.slane %v7149_v40, 0 }
 0x8eb   :  { %v3602_v38 = vperm.slane %v7109_v27, 3 }
 0x8ec   :  { %v3545_v20 = vpack.c.bf16 %v3542_v55, %v3541_v2 }
 0x8ee   :  { %3547 = vst [vmem:[#allocation5 + $0xe0] sm:$0x33] %v3545_v20 }
 0x8ef   :  { %v7111_v19 = vpop.permute.xlu2 %3660 }
 0x8f0   :  { %v7118_v50 = vpop.permute.xlu1 %3592  ;;  %v3487_v47 = vpop.permute.xlu0 %3486  ;;  %v3665_v14 = vsel %vm630_vm8, %v7074_v5, %v7111_v19 }
 0x8f1   :  { %v3597_v41 = vsel %vm480_vm14, %v7118_v50, %v3587_v29  ;;  %v3494_v7 = vsel %vm308_vm4, %v7072_v36, %v3487_v47  ;;  %v3493_v61 = vsel %vm308_vm4, %v3487_v47, %v3489_v56  ;;  %v3678_v46 = vmul.f32 %v3670_v11, %v3665_v14  ;;  %v4769_v47 = vld [vmem:[#allocation5 + $0xc0] sm:$0xf] }
 0x8f2   :  { %v3607_v49 = vmul.f32 %v3599_v13, %v3597_v41  ;;  %v3506_v29 = vmul.f32 %v3498_v45, %v3494_v7  ;;  %v3507_v26 = vmul.f32 %v3499_v42, %v3493_v61  ;;  %v3601_v13 = vperm.slane %v7109_v27, 2  ;;  %v4667_v45 = vld [vmem:[%s7310_s1 + $0x25] ss:$8 sm:$0xf]  ;;  %v4753_v7 = vld [vmem:[#allocation5 + $0xa0] sm:$0xf] }
 0x8f3   :  { %v4934_v61 = vld [vmem:[#allocation5 + $0xac] sm:$0xf0] }
 0x8f4   :  { %v3611_v43 = vpack.c.bf16 %v3608_v23, %v3607_v49  ;;  %v4936_v23 = vld [vmem:[#allocation5 + $0xc4] sm:$0xf] }
 0x8f5   :  { %v4785_v33 = vld [vmem:[#allocation5 + $0xe0] sm:$0xf] }
 0x8f6   :  { %3613 = vst [vmem:[#allocation5 + $0xf0] sm:$0x33] %v3611_v43 }
 0x8f7   :  { %v7136_v31 = vpop.permute.xlu2 %3726 }
 0x8f8   :  { %v3491_v48 = vpop.permute.xlu1 %3490  ;;  %v7144_v52 = vpop.permute.xlu0 %3656 }
 0x8f9   :  { %v3492_v3 = vsel %vm308_vm4, %v3489_v56, %v3491_v48  ;;  %v3495_v9 = vsel %vm308_vm4, %v3491_v48, %v7072_v36  ;;  %v3666_v25 = vsel %vm630_vm8, %v7144_v52, %v7074_v5  ;;  %v4940_v56 = vld [vmem:[#allocation5 + $0xe4] sm:$0xf]  ;;  %v3641_v48 = vperm.slane %v4667_v45, 2 }
 0x8fa   :  { %v3505_v12 = vmul.f32 %v3497_v30, %v3495_v9  ;;  %v3508_v4 = vmul.f32 %v3500_v60, %v3492_v3  ;;  %v3677_v53 = vmul.f32 %v3669_v18, %v3666_v25  ;;  %v4932_v30 = vld [vmem:[#allocation5 + $0xa4] sm:$0xf]  ;;  %v4754_v9 = vor.u32 %v4934_v61, %v4753_v7  ;;  %v7221_v61 = vld [vmem:[%s7322_s12] sm:$0xff] }
 0x8fc   :  { %v3509_v39 = vpack.c.bf16 %v3506_v29, %v3505_v12  ;;  %v3510_v57 = vpack.c.bf16 %v3508_v4, %v3507_v26  ;;  %v3681_v21 = vpack.c.bf16 %v3678_v46, %v3677_v53  ;;  %v4755_v46 = vld [vmem:[#allocation5 + $0xb0] sm:$0xf0]  ;;  %v3642_v29 = vperm.slane %v4667_v45, 3 }
 0x8fd   :  { %v4942_v36 = vld [vmem:[#allocation5 + $0xec] sm:$0xf0]  ;;  %v4787_v24 = vld [vmem:[#allocation5 + $0xf0] sm:$0xf0]  ;;  %v4758_v25 = vor.u32 %v4932_v30, %v4755_v46  ;;  %v3639_v12 = vperm.slane %v4667_v45, 0 }
 0x8fe   :  { %v3513_v58 = vrot.slane %v3509_v39, 6  ;;  %v3514_v59 = vrot.slane %v3510_v57, 6  ;;  %v3685_v54 = vrot.slane %v3681_v21, 6  ;;  %v4786_v5 = vor.u32 %v4942_v36, %v4785_v33  ;;  %v4739_v4 = vld [vmem:[#allocation5 + $0x90] sm:$0xf0] }
 0x8ff   :  { %v7162_v44 = vpop.permute.xlu2 %3630  ;;  %v4790_v34 = vor.u32 %v4940_v56, %v4787_v24  ;;  %v3536_v39 = vperm.slane %v7092_v32, 3  ;;  %v4737_v33 = vld [vmem:[#allocation5 + $0x80] sm:$0xf]  ;;  %v4928_v36 = vld [vmem:[#allocation5 + $0x84] sm:$0xf] }
 0x900   :  { %3517 = vst [vmem:[#allocation5 + $0xd0] sm:$0xcc] %v3513_v58  ;;  %v3725_v6 = vpop.permute.xlu1 %3724  ;;  %v7164_v1 = vpop.permute.xlu0 %3722  ;;  %3990 = vmatpush.bf16.msra.mxu0 %v4786_v5 }
 0x901   :  { %3518 = vst [vmem:[#allocation5 + $0xd8] sm:$0xcc] %v3514_v59  ;;  %v3731_v0 = vsel %vm700_vm9, %v3725_v6, %v7136_v31  ;;  %v3732_v37 = vsel %vm700_vm9, %v7164_v1, %v3725_v6  ;;  %4016 = vmatpush.bf16.msrb.mxu2 %v4790_v34 }
 0x902   :  { %3689 = vst [vmem:[#allocation5 + $0x100] sm:$0xcc] %v3685_v54  ;;  %v3744_v51 = vmul.f32 %v3736_v62, %v3731_v0  ;;  %v3743_v55 = vmul.f32 %v3735_v8, %v3732_v37  ;;  %v3640_v62 = vperm.slane %v4667_v45, 1  ;;  %v3535_v8 = vperm.slane %v7092_v32, 2  ;;  %v4926_v0 = vld [vmem:[#allocation5 + $0x6c] sm:$0xf0] }
 0x903   :  { %v4742_v54 = vor.u32 %v4928_v36, %v4739_v4  ;;  %v3737_v4 = vperm.slane %v7149_v40, 2 }
 0x904   :  { %v3747_v2 = vpack.c.bf16 %v3744_v51, %v3743_v55 }
 0x906   :  { %v3751_v17 = vrot.slane %v3747_v2, 6  ;;  %v4721_v2 = vld [vmem:[#allocation5 + $0x60] sm:$0xf] }
 0x907   :  { %v7172_v20 = vpop.permute.xlu2 %3696  ;;  %v4938_v41 = vld [vmem:[#allocation5 + $0xcc] sm:$0xf0]  ;;  %v4771_v49 = vld [vmem:[#allocation5 + $0xd0] sm:$0xf0] }
 0x908   :  { %3755 = vst [vmem:[#allocation5 + $0x110] sm:$0xcc] %v3751_v17  ;;  %v3591_v22 = vpop.permute.xlu1 %3590  ;;  %v3627_v11 = vpop.permute.xlu0 %3626  ;;  %v4770_v43 = vor.u32 %v4938_v41, %v4769_v47  ;;  %v4774_v14 = vor.u32 %v4936_v23, %v4771_v49  ;;  %v4723_v17 = vld [vmem:[#allocation5 + $0x70] sm:$0xf0]  ;;  %v4924_v47 = vld [vmem:[#allocation5 + $0x64] sm:$0xf] }
 0x909   :  { %v3594_v42 = vsel %vm480_vm14, %v3591_v22, %v7118_v50  ;;  %v3595_v27 = vsel %vm480_vm14, %v7101_v15, %v3591_v22  ;;  %v4930_v50 = vld [vmem:[#allocation5 + $0x8c] sm:$0xf0]  ;;  %v4726_v23 = vor.u32 %v4924_v47, %v4723_v17 }
 0x90a   :  { %v3609_v60 = vmul.f32 %v3601_v13, %v3595_v27  ;;  %v3610_v18 = vmul.f32 %v3602_v38, %v3594_v42  ;;  %3991 = vmatpush.bf16.msra.mxu0 %v4770_v43  ;;  %4017 = vmatpush.bf16.msrb.mxu2 %v4774_v14  ;;  %v4738_v59 = vor.u32 %v4930_v50, %v4737_v33  ;;  %v7206_v13 = vld [vmem:[%s7310_s1 + $0x41] ss:$8 sm:$0xf]  ;;  %v4920_v27 = vld [vmem:[#allocation5 + $0x44] sm:$0xf] }
 0x90b   :  { %v4722_v38 = vor.u32 %v4926_v0, %v4721_v2  ;;  %v4922_v49 = vld [vmem:[#allocation5 + $0x4c] sm:$0xf0]  ;;  %v3705_v22 = vperm.slane %v7206_v13, 0  ;;  %v4705_v43 = vld [vmem:[#allocation5 + $0x40] sm:$0xf] }
 0x90c   :  { %v3612_v3 = vpack.c.bf16 %v3610_v18, %v3609_v60  ;;  %v4706_v42 = vor.u32 %v4922_v49, %v4705_v43  ;;  %v4918_v18 = vld [vmem:[#allocation5 + $0x2c] sm:$0xf0]  ;;  %v4912_v33 = vld [vmem:[#allocation5 + $0x4] sm:$0xf]  ;;  %v4937_v2 = vld [vmem:[#allocation5 + $0xcc] sm:$0xf] }
 0x90e   :  { %3614 = vst [vmem:[#allocation5 + $0xf8] sm:$0x33] %v3612_v3  ;;  %3992 = vmatpush.bf16.msra.mxu0 %v4754_v9  ;;  %4018 = vmatpush.bf16.msrb.mxu2 %v4758_v25  ;;  %v4689_v3 = vld [vmem:[#allocation5 + $0x20] sm:$0xf] }
 0x90f   :  { %v3633_v26 = vpop.permute.xlu2 %3632  ;;  %v4690_v25 = vor.u32 %v4918_v18, %v4689_v3  ;;  %v4933_v18 = vld [vmem:[#allocation5 + $0xac] sm:$0xf] }
 0x910   :  { %v3634_v15 = vsel %vm522_vm10, %v7162_v44, %v3633_v26  ;;  %v3637_v53 = vsel %vm522_vm10, %v3633_v26, %v3627_v11  ;;  %v3629_v24 = vpop.permute.xlu1 %3628  ;;  %v3525_v58 = vpop.permute.xlu0 %3524  ;;  %v4916_v26 = vld [vmem:[#allocation5 + $0x24] sm:$0xf] }
 0x911   :  { %v3649_v57 = vmul.f32 %v3641_v48, %v3634_v15  ;;  %v3650_v21 = vmul.f32 %v3642_v29, %v3637_v53  ;;  %v3635_v56 = vsel %vm522_vm10, %v3629_v24, %v7162_v44  ;;  %v3636_v34 = vsel %vm522_vm10, %v3627_v11, %v3629_v24  ;;  %v4707_v11 = vld [vmem:[#allocation5 + $0x50] sm:$0xf0]  ;;  %v4914_v53 = vld [vmem:[#allocation5 + $0xc] sm:$0xf0] }
 0x912   :  { %v3528_v6 = vsel %vm340_vm2, %v3525_v58, %v7099_v63  ;;  %v3647_v32 = vmul.f32 %v3639_v12, %v3636_v34  ;;  %v3648_v37 = vmul.f32 %v3640_v62, %v3635_v56  ;;  %v3529_v51 = vsel %vm340_vm2, %v7083_v28, %v3525_v58  ;;  %3993 = vmatpush.bf16.msra.mxu0 %v4738_v59  ;;  %v4691_v29 = vld [vmem:[#allocation5 + $0x30] sm:$0xf0] }
 0x913   :  { %v3652_v5 = vpack.c.bf16 %v3650_v21, %v3649_v57  ;;  %v3544_v55 = vmul.f32 %v3536_v39, %v3528_v6  ;;  %v3543_v44 = vmul.f32 %v3535_v8, %v3529_v51  ;;  %4019 = vmatpush.bf16.msrb.mxu2 %v4742_v54  ;;  %v3706_v28 = vperm.slane %v7206_v13, 1  ;;  %v4675_v62 = vld [vmem:[#allocation5 + $0x10] sm:$0xf0]  ;;  %v4673_v8 = vld [vmem:[#allocation5] sm:$0xf] }
 0x914   :  { %v3651_v63 = vpack.c.bf16 %v3648_v37, %v3647_v32  ;;  %v4710_v60 = vor.u32 %v4920_v27, %v4707_v11  ;;  %v3801_v12 = vunpack.c.l.b16 %v7221_v61  ;;  %v4694_v50 = vor.u32 %v4916_v26, %v4691_v29  ;;  %v4763_v27 = vld [vmem:[#allocation5 + $0xb8] sm:$0xf0]  ;;  %v4777_v29 = vld [vmem:[#allocation5 + $0xc8] sm:$0xf] }
 0x915   :  { %3654 = vst [vmem:[#allocation5 + $0x108] sm:$0x33] %v3652_v5  ;;  %v3546_v41 = vpack.c.bf16 %v3544_v55, %v3543_v44  ;;  %v3738_v15 = vperm.slane %v7149_v40, 3  ;;  %v3671_v39 = vperm.slane %v7123_v35, 2  ;;  %v3672_v57 = vperm.slane %v7123_v35, 3 }
 0x916   :  { %3653 = vst [vmem:[#allocation5 + $0x100] sm:$0x33] %v3651_v63  ;;  %3994 = vmatpush.bf16.msra.mxu0 %v4722_v38  ;;  %v4795_v36 = vld [vmem:[#allocation5 + $0xf8] sm:$0xf0]  ;;  %v4674_v59 = vor.u32 %v4914_v53, %v4673_v8  ;;  %v4678_v54 = vor.u32 %v4912_v33, %v4675_v62  ;;  %v7228_v56 = vpack.c.b16 %v3801_v12, %v3801_v12  ;;  %v3708_v63 = vperm.slane %v7206_v13, 3 }
 0x917   :  { %3548 = vst [vmem:[#allocation5 + $0xe8] sm:$0x33] %v3546_v41  ;;  %4020 = vmatpush.bf16.msrb.mxu2 %v4726_v23  ;;  %v4779_v55 = vld [vmem:[#allocation5 + $0xd8] sm:$0xf0]  ;;  %v4943_v43 = vld [vmem:[#allocation5 + $0xf4] sm:$0xf0] }
 0x918   :  { %v3695_v14 = vpop.permute.xlu1 %3694  ;;  %v7210_v45 = vpop.permute.xlu0 %3692  ;;  %v4761_v26 = vld [vmem:[#allocation5 + $0xa8] sm:$0xf]  ;;  %v4927_v33 = vld [vmem:[#allocation5 + $0x74] sm:$0xf0] }
 0x919   :  { %v3701_v7 = vsel %vm662_vm6, %v3695_v14, %v7172_v20  ;;  %v3702_v30 = vsel %vm662_vm6, %v7210_v45, %v3695_v14  ;;  %v4745_v62 = vld [vmem:[#allocation5 + $0x88] sm:$0xf] }
 0x91a   :  { %v3714_v46 = vmul.f32 %v3706_v28, %v3701_v7  ;;  %v3713_v48 = vmul.f32 %v3705_v22, %v3702_v30  ;;  %3995 = vmatpush.bf16.msra.mxu0 %v4706_v42  ;;  %v4939_v7 = vld [vmem:[#allocation5 + $0xd4] sm:$0xf0] }
 0x91b   :  { %4021 = vmatpush.bf16.msrb.mxu2 %v4710_v60  ;;  %v4778_v3 = vor.u32 %v4939_v7, %v4777_v29 }
 0x91c   :  { %v3717_v9 = vpack.c.bf16 %v3714_v46, %v3713_v48  ;;  %v4766_v48 = vor.u32 %v4933_v18, %v4763_v27 }
 0x91d   :  { %v4801_v44 = vld [vmem:[#allocation5 + $0x100] sm:$0xf]  ;;  %v4944_v41 = vld [vmem:[#allocation5 + $0x104] sm:$0xf] }
 0x91e   :  { %3719 = vst [vmem:[#allocation5 + $0x110] sm:$0x33] %v3717_v9  ;;  %3996 = vmatpush.bf16.msra.mxu0 %v4690_v25  ;;  %v4941_v21 = vld [vmem:[#allocation5 + $0xec] sm:$0xf]  ;;  %v4793_v38 = vld [vmem:[#allocation5 + $0xe8] sm:$0xf] }
 0x91f   :  { %4022 = vmatpush.bf16.msrb.mxu2 %v4694_v50  ;;  %v4798_v5 = vor.u32 %v4941_v21, %v4795_v36  ;;  %v4794_v42 = vor.u32 %v4943_v43, %v4793_v38  ;;  %v4747_v9 = vld [vmem:[#allocation5 + $0x98] sm:$0xf0]  ;;  %v4921_v21 = vld [vmem:[#allocation5 + $0x4c] sm:$0xf] }
 0x920   :  { %v3729_v24 = vpop.permute.xlu1 %3728  ;;  %v3663_v58 = vpop.permute.xlu0 %3662  ;;  %v4731_v50 = vld [vmem:[#allocation5 + $0x78] sm:$0xf0] }
 0x921   :  { %v3730_v40 = vsel %vm700_vm9, %v7136_v31, %v3729_v24  ;;  %v3733_v35 = vsel %vm700_vm9, %v3729_v24, %v7164_v1  ;;  %v3664_v34 = vsel %vm630_vm8, %v7111_v19, %v3663_v58  ;;  %v3667_v6 = vsel %vm630_vm8, %v3663_v58, %v7144_v52 }
 0x922   :  { %v3745_v0 = vmul.f32 %v3737_v4, %v3730_v40  ;;  %v3746_v32 = vmul.f32 %v3738_v15, %v3733_v35  ;;  %v3679_v37 = vmul.f32 %v3671_v39, %v3664_v34  ;;  %v3680_v51 = vmul.f32 %v3672_v57, %v3667_v6  ;;  %3997 = vmatpush.bf16.msra.mxu0 %v4674_v59  ;;  %v4931_v4 = vld [vmem:[#allocation5 + $0x94] sm:$0xf0]  ;;  %v4925_v15 = vld [vmem:[#allocation5 + $0x6c] sm:$0xf]  ;;  %v4715_v57 = vld [vmem:[#allocation5 + $0x58] sm:$0xf0] }
 0x923   :  { %4023 = vmatpush.bf16.msrb.mxu2 %v4678_v54  ;;  %v3802_v31 = vunpack.c.h.b16 %v7221_v61  ;;  %v3707_v19 = vperm.slane %v7206_v13, 2  ;;  %v4782_v52 = vor.u32 %v4937_v2, %v4779_v55  ;;  %vm3986_vm8 = vcmask 130048   ;;  %v4729_v40 = vld [vmem:[#allocation5 + $0x68] sm:$0xf]  ;;  %v4917_v34 = vld [vmem:[#allocation5 + $0x2c] sm:$0xf] }
 0x924   :  { %v3748_v1 = vpack.c.bf16 %v3746_v32, %v3745_v0  ;;  %v3682_v17 = vpack.c.bf16 %v3680_v51, %v3679_v37  ;;  %v4734_v53 = vor.u32 %v4925_v15, %v4731_v50  ;;  %v4746_v39 = vor.u32 %v4931_v4, %v4745_v62  ;;  %v4923_v6 = vld [vmem:[#allocation5 + $0x54] sm:$0xf0]  ;;  %v4699_v0 = vld [vmem:[#allocation5 + $0x38] sm:$0xf0]  ;;  %v4713_v37 = vld [vmem:[#allocation5 + $0x48] sm:$0xf] }
 0x925   :  { %3998 = vmatmul.bf16.vlgmr.msra.gmra.mxu0 %v7228_v56  ;;  %v4946_v47 = vld [vmem:[#allocation5 + $0x10c] sm:$0xf0]  ;;  %v4803_v23 = vld [vmem:[#allocation5 + $0x110] sm:$0xf0]  ;;  %v7247_v14 = vpack.c.b16 %v3802_v31, %v3802_v31  ;;  %v4718_v59 = vor.u32 %v4921_v21, %v4715_v57  ;;  %v4730_v35 = vor.u32 %v4927_v33, %v4729_v40  ;;  %v4702_v32 = vor.u32 %v4917_v34, %v4699_v0  ;;  %v4683_v55 = vld [vmem:[#allocation5 + $0x18] sm:$0xf0] }
 0x926   :  { %4068 = vmatpush.bf16.msrb.mxu0 %v4798_v5  ;;  %v3752_v49 = vrot.slane %v3748_v1, 6  ;;  %v3686_v28 = vrot.slane %v3682_v17, 6  ;;  %4024 = vmatmul.bf16.vlgmr.msrb.gmra.mxu2 %v7228_v56  ;;  %v4802_v22 = vor.u32 %v4946_v47, %v4801_v44  ;;  %v4806_v11 = vor.u32 %v4944_v41, %v4803_v23  ;;  %v4697_v31 = vld [vmem:[#allocation5 + $0x28] sm:$0xf]  ;;  %v4913_v2 = vld [vmem:[#allocation5 + $0xc] sm:$0xf] }
 0x927   :  { %v4714_v51 = vor.u32 %v4923_v6, %v4713_v37  ;;  %v4686_v1 = vor.u32 %v4913_v2, %v4683_v55  ;;  %v4919_v17 = vld [vmem:[#allocation5 + $0x34] sm:$0xf0] }
 0x928   :  { %3756 = vst [vmem:[#allocation5 + $0x118] sm:$0xcc] %v3752_v49  ;;  %4010 = vmatpush.bf16.msrb.mxu1 %v4802_v22  ;;  %4036 = vmatpush.bf16.msra.mxu3 %v4806_v11  ;;  %v3699_v13 = vpop.permute.xlu0 %3698  ;;  %v4698_v44 = vor.u32 %v4919_v17, %v4697_v31  ;;  %v3798_v47 = vpop.permute.xlu1 %3797 }
 0x929   :  { %3690 = vst [vmem:[#allocation5 + $0x108] sm:$0xcc] %v3686_v28  ;;  %v3700_v30 = vsel %vm662_vm6, %v7172_v20, %v3699_v13  ;;  %v3703_v60 = vsel %vm662_vm6, %v3699_v13, %v7210_v45  ;;  %v4935_v20 = vld [vmem:[#allocation5 + $0xb4] sm:$0xf0]  ;;  %v4750_v45 = vor.u32 %v4929_v16, %v4747_v9 }
 0x92a   :  { %4069 = vmatpush.bf16.msrb.mxu0 %v4782_v52  ;;  %v3715_v61 = vmul.f32 %v3707_v19, %v3700_v30  ;;  %v3716_v46 = vmul.f32 %v3708_v63, %v3703_v60  ;;  %v4762_v12 = vor.u32 %v4935_v20, %v4761_v26  ;;  %v4915_v19 = vld [vmem:[#allocation5 + $0x14] sm:$0xf0]  ;;  %v4681_v63 = vld [vmem:[#allocation5 + $0x8] sm:$0xf] }
 0x92b   :  { %4815 = vmatmul.msk.bf16.vlgmr.msrb.gmra.mxu1 %vm3986_vm8, %v7247_v14  ;;  %4816 = vmatmul.msk.bf16.vlgmr.msra.gmra.mxu3 %vm3986_vm8, %v7247_v14  ;;  %v4682_v38 = vor.u32 %v4915_v19, %v4681_v63 }
 0x92c   :  { %4042 = vmatpush.bf16.msra.mxu1 %v4794_v42  ;;  %v3718_v25 = vpack.c.bf16 %v3716_v46, %v3715_v61 }
 0x92e   :  { %4070 = vmatpush.bf16.msrb.mxu0 %v4766_v48  ;;  %3720 = vst [vmem:[#allocation5 + $0x118] sm:$0x33] %v3718_v25 }
 0x930   :  { %4043 = vmatpush.bf16.msra.mxu1 %v4778_v3  ;;  %v4809_v8 = vld [vmem:[#allocation5 + $0x108] sm:$0xf]  ;;  %v4945_v24 = vld [vmem:[#allocation5 + $0x10c] sm:$0xf] }
 0x932   :  { %4071 = vmatpush.bf16.msrb.mxu0 %v4750_v45 }
 0x934   :  { %4044 = vmatpush.bf16.msra.mxu1 %v4762_v12 }
 0x935   :  { %v4947_v36 = vld [vmem:[#allocation5 + $0x114] sm:$0xf0]  ;;  %v4811_v58 = vld [vmem:[#allocation5 + $0x118] sm:$0xf0] }
 0x936   :  { %4072 = vmatpush.bf16.msrb.mxu0 %v4734_v53  ;;  %v4810_v54 = vor.u32 %v4947_v36, %v4809_v8  ;;  %v4814_v5 = vor.u32 %v4945_v24, %v4811_v58 }
 0x938   :  { %4045 = vmatpush.bf16.msra.mxu1 %v4746_v39  ;;  %4062 = vmatpush.bf16.msrb.mxu3 %v4810_v54 }
 0x939   :  { %4088 = vmatpush.bf16.msra.mxu2 %v4814_v5 }
 0x93a   :  { %4073 = vmatpush.bf16.msrb.mxu0 %v4718_v59 }
 0x93b   :  { %4817 = vmatmul.msk.bf16.vlgmr.msrb.gmra.mxu3 %vm3986_vm8, %v7247_v14 }
 0x93c   :  { %4046 = vmatpush.bf16.msra.mxu1 %v4730_v35  ;;  %4818 = vmatmul.msk.bf16.vlgmr.msra.gmra.mxu2 %vm3986_vm8, %v7247_v14 }
 0x93e   :  { %4074 = vmatpush.bf16.msrb.mxu0 %v4702_v32 }
 0x940   :  { %4047 = vmatpush.bf16.msra.mxu1 %v4714_v51 }
 0x942   :  { %4075 = vmatpush.bf16.msrb.mxu0 %v4686_v1 }
 0x944   :  { %4048 = vmatpush.bf16.msra.mxu1 %v4698_v44 }
 0x945   :  { %4076 = vmatmul.bf16.vlgmr.msrb.gmra.mxu0 %v7228_v56 }
 0x948   :  { %4049 = vmatpush.bf16.msra.mxu1 %v4682_v38 }
 0x94b   :  { %4050 = vmatmul.bf16.vlgmr.msra.gmra.mxu1 %v7228_v56 }
 0x9a2   :  { %v3999_v52 = vpop.f32.mrf.mxu0 }
 0x9a3   :  { %v4000_v41 = vadd.f32 %v3999_v52, %v3798_v47 }
 0x9a8   :  { %v4012_v23 = vpop.f32.mrf.mxu1 }
 0x9a9   :  { %v7265_v49 = vadd.f32 %v4012_v23, %v4000_v41  ;;  %v4025_v28 = vpop.f32.mrf.mxu2 }
 0x9aa   :  { %v4001_v22 = vpop.f32.mrf.mxu0  ;;  %v4026_v14 = vadd.f32 %v4025_v28, %v3798_v47 }
 0x9ab   :  { %v7268_v11 = vmul.f32 0.70710677, %v7265_v49 }
 0x9ad   :  { %v4110_v43 = vand.u32 2147483647, %v7268_v11  ;;  %vm4102_vm6 = vcmp.ge.f32.partialorder %v7268_v11, 0.0 }
 0x9ae   :  { %v4038_v42 = vpop.f32.mrf.mxu3 }
 0x9af   :  { %v4114_v27 = vmul.f32 0.3275911, %v4110_v43  ;;  %v7271_v13 = vadd.f32 %v4038_v42, %v4026_v14  ;;  %v4162_v3 = vsub.f32 0.0, %v4110_v43  ;;  %v4106_v42 = vsel %vm4102_vm6, 1.0, %v5105_v10 }
 0x9b0   :  { %v4014_v7 = vpop.f32.mrf.mxu1 }
 0x9b1   :  { %v4118_v56 = vadd.f32 1.0, %v4114_v27  ;;  %v7274_v30 = vmul.f32 0.70710677, %v7271_v13  ;;  %v4027_v60 = vpop.f32.mrf.mxu2  ;;  %v4166_v20 = vmul.f32 %v4162_v3, %v4110_v43  ;;  %v4094_v3 = vmul.f32 0.5, %v7265_v49 }
 0x9b3   :  { %5056 = vrcp.f32 %v4118_v56  ;;  %v4111_v18 = vand.u32 2147483647, %v7274_v30  ;;  %v4170_v62 = vmul.f32 1.442695, %v4166_v20  ;;  %vm4103_vm9 = vcmp.ge.f32.partialorder %v7274_v30, 0.0 }
 0x9b4   :  { %v4095_v20 = vmul.f32 0.5, %v7271_v13 }
 0x9b5   :  { %v4115_v61 = vmul.f32 0.3275911, %v4111_v18  ;;  %v4163_v12 = vsub.f32 0.0, %v4111_v18 }
 0x9b6   :  { %v4040_v46 = vpop.f32.mrf.mxu3 }
 0x9b7   :  { %v4119_v48 = vadd.f32 1.0, %v4115_v61  ;;  %v4167_v8 = vmul.f32 %v4163_v12, %v4111_v18  ;;  %v4107_v46 = vsel %vm4103_vm9, 1.0, %v5105_v10 }
 0x9b9   :  { %v5057_v29 = vpop.eup %5056  ;;  %5058 = vrcp.f32 %v4119_v48  ;;  %v4172_v34 = vmul.f32 1.442695, %v4167_v8 }
 0x9ba   :  { %v4126_v9 = vmul.f32 1.0614054, %v5057_v29  ;;  %5060 = vpow2.f32 %v4170_v62  ;;  %v5076_v62 = vld [vmem:[#allocation2] sm:$0xff] }
 0x9bb   :  { %5062 = vpow2.f32 %v4172_v34 }
 0x9bc   :  { %v4130_v25 = vadd.f32 -1.4531521, %v4126_v9 }
 0x9be   :  { %v4134_v16 = vmul.f32 %v5057_v29, %v4130_v25  ;;  %v4064_v45 = vpop.f32.mrf.mxu3 }
 0x9bf   :  { %v5059_v26 = vpop.eup %5058  ;;  %v4090_v50 = vpop.f32.mrf.mxu2 }
 0x9c0   :  { %v4138_v4 = vadd.f32 1.4214138, %v4134_v16  ;;  %v4127_v15 = vmul.f32 1.0614054, %v5059_v26  ;;  %v5061_v44 = vpop.eup %5060 }
 0x9c1   :  { %v5063_v14 = vpop.eup %5062 }
 0x9c2   :  { %v4077_v53 = vpop.f32.mrf.mxu0  ;;  %v4142_v57 = vmul.f32 %v5057_v29, %v4138_v4  ;;  %v4131_v21 = vadd.f32 -1.4531521, %v4127_v15 }
 0x9c3   :  { %v4078_v39 = vadd.f32 %v4077_v53, %v3798_v47 }
 0x9c4   :  { %v4146_v36 = vadd.f32 -0.28449672, %v4142_v57  ;;  %v4135_v24 = vmul.f32 %v5059_v26, %v4131_v21 }
 0x9c5   :  { %v7277_v33 = vadd.f32 %v4090_v50, %v4078_v39 }
 0x9c6   :  { %v4150_v54 = vmul.f32 %v5057_v29, %v4146_v36  ;;  %v4139_v5 = vadd.f32 1.4214138, %v4135_v24  ;;  %v4066_v35 = vpop.f32.mrf.mxu3  ;;  %v5077_v36 = vld [vmem:[#allocation2 + $0x10] sm:$0xff] }
 0x9c7   :  { %v7280_v58 = vmul.f32 0.70710677, %v7277_v33  ;;  %v4092_v0 = vpop.f32.mrf.mxu2 }
 0x9c8   :  { %v4051_v59 = vpop.f32.mrf.mxu1  ;;  %v4154_v32 = vadd.f32 0.2548296, %v4150_v54  ;;  %v4143_v37 = vmul.f32 %v5059_v26, %v4139_v5 }
 0x9c9   :  { %v4052_v40 = vadd.f32 %v4051_v59, %v3798_v47  ;;  %v4113_v6 = vand.u32 2147483647, %v7280_v58  ;;  %vm4105_vm10 = vcmp.ge.f32.partialorder %v7280_v58, 0.0  ;;  %v5078_v58 = vld [vmem:[#allocation2 + $0x8] sm:$0xff] }
 0x9ca   :  { %v4079_v55 = vpop.f32.mrf.mxu0  ;;  %v4158_v2 = vmul.f32 %v5057_v29, %v4154_v32  ;;  %v4147_v1 = vadd.f32 -0.28449672, %v4143_v37 }
 0x9cb   :  { %v7283_v51 = vadd.f32 %v4064_v45, %v4052_v40  ;;  %v4117_v31 = vmul.f32 0.3275911, %v4113_v6  ;;  %v4165_v60 = vsub.f32 0.0, %v4113_v6 }
 0x9cc   :  { %v4178_v63 = vmul.f32 %v5061_v44, %v4158_v2  ;;  %v4151_v38 = vmul.f32 %v5059_v26, %v4147_v1  ;;  %v4109_v1 = vsel %vm4105_vm10, 1.0, %v5105_v10 }
 0x9cd   :  { %v7286_v17 = vmul.f32 0.70710677, %v7283_v51  ;;  %v4121_v19 = vadd.f32 1.0, %v4117_v31  ;;  %v4169_v9 = vmul.f32 %v4165_v60, %v4113_v6 }
 0x9ce   :  { %v4182_v41 = vsub.f32 1.0, %v4178_v63  ;;  %v4155_v23 = vadd.f32 0.2548296, %v4151_v38 }
 0x9cf   :  { %v4112_v52 = vand.u32 2147483647, %v7286_v17  ;;  %5064 = vrcp.f32 %v4121_v19  ;;  %v4176_v15 = vmul.f32 1.442695, %v4169_v9  ;;  %vm4104_vm14 = vcmp.ge.f32.partialorder %v7286_v17, 0.0 }
 0x9d0   :  { %v4053_v47 = vpop.f32.mrf.mxu1  ;;  %v4159_v22 = vmul.f32 %v5059_v26, %v4155_v23  ;;  %v4186_v27 = vmul.f32 %v4182_v41, %v4106_v42 }
 0x9d1   :  { %v4116_v28 = vmul.f32 0.3275911, %v4112_v52  ;;  %v4164_v30 = vsub.f32 0.0, %v4112_v52 }
 0x9d2   :  { %v4179_v7 = vmul.f32 %v5063_v14, %v4159_v22  ;;  %v4190_v11 = vadd.f32 1.0, %v4186_v27  ;;  %v4096_v14 = vmul.f32 0.5, %v7283_v51 }
 0x9d3   :  { %v4120_v43 = vadd.f32 1.0, %v4116_v28  ;;  %v4168_v21 = vmul.f32 %v4164_v30, %v4112_v52  ;;  %v4097_v52 = vmul.f32 0.5, %v7277_v33  ;;  %v4108_v28 = vsel %vm4104_vm14, 1.0, %v5105_v10 }
 0x9d4   :  { %v4183_v18 = vsub.f32 1.0, %v4179_v7  ;;  %v4194_v12 = vmul.f32 %v4190_v11, %v4094_v3 }
 0x9d5   :  { %5066 = vrcp.f32 %v4120_v43  ;;  %v5065_v56 = vpop.eup %5064  ;;  %v4174_v40 = vmul.f32 1.442695, %v4168_v21 }
 0x9d6   :  { %v4129_v61 = vmul.f32 1.0614054, %v5065_v56  ;;  %v4187_v48 = vmul.f32 %v4183_v18, %v4107_v46  ;;  %v4198_v49 = vadd.f32 %v5077_v36, %v4194_v12  ;;  %5068 = vpow2.f32 %v4176_v15 }
 0x9d7   :  { %5070 = vpow2.f32 %v4174_v40 }
 0x9d8   :  { %v4133_v29 = vadd.f32 -1.4531521, %v4129_v61  ;;  %v4191_v16 = vadd.f32 1.0, %v4187_v48 }
 0x9da   :  { %v4137_v45 = vmul.f32 %v5065_v56, %v4133_v29  ;;  %v4195_v50 = vmul.f32 %v4191_v16, %v4095_v20 }
 0x9db   :  { %v5067_v25 = vpop.eup %5066 }
 0x9dc   :  { %v4128_v26 = vmul.f32 1.0614054, %v5067_v25  ;;  %v4141_v4 = vadd.f32 1.4214138, %v4137_v45  ;;  %v4199_v39 = vadd.f32 %v5076_v62, %v4195_v50  ;;  %v5069_v32 = vpop.eup %5068 }
 0x9dd   :  { %v5071_v19 = vpop.eup %5070 }
 0x9de   :  { %v4132_v53 = vadd.f32 -1.4531521, %v4128_v26  ;;  %v4145_v57 = vmul.f32 %v5065_v56, %v4141_v4  ;;  %v4204_v24 = vrot.slane %v4199_v39, 4 }
 0x9e0   :  { %v4136_v8 = vmul.f32 %v5067_v25, %v4132_v53  ;;  %v4149_v59 = vadd.f32 -0.28449672, %v4145_v57  ;;  %v4205_v54 = vsel %vm1635_vm12, %v4198_v49, %v4204_v24 }
 0x9e1   :  { %4207 = vst [vmem:[%s7323_s14] sm:$0xff] %v4205_v54 }
 0x9e2   :  { %v4140_v13 = vadd.f32 1.4214138, %v4136_v8  ;;  %v4153_v5 = vmul.f32 %v5065_v56, %v4149_v59 }
 0x9e4   :  { %v4144_v35 = vmul.f32 %v5067_v25, %v4140_v13  ;;  %v4157_v34 = vadd.f32 0.2548296, %v4153_v5 }
 0x9e6   :  { %v4148_v6 = vadd.f32 -0.28449672, %v4144_v35  ;;  %v4161_v0 = vmul.f32 %v5065_v56, %v4157_v34  ;;  %v5079_v56 = vld [vmem:[#allocation2 + $0x18] sm:$0xff] }
 0x9e8   :  { %v4152_v37 = vmul.f32 %v5067_v25, %v4148_v6  ;;  %v4181_v55 = vmul.f32 %v5069_v32, %v4161_v0 }
 0x9ea   :  { %v4156_v31 = vadd.f32 0.2548296, %v4152_v37  ;;  %v4185_v2 = vsub.f32 1.0, %v4181_v55 }
 0x9ec   :  { %v4160_v44 = vmul.f32 %v5067_v25, %v4156_v31  ;;  %v4189_v63 = vmul.f32 %v4185_v2, %v4109_v1 }
 0x9ee   :  { %v4180_v38 = vmul.f32 %v5071_v19, %v4160_v44  ;;  %v4193_v47 = vadd.f32 1.0, %v4189_v63 }
 0x9f0   :  { %v4184_v41 = vsub.f32 1.0, %v4180_v38  ;;  %v4197_v23 = vmul.f32 %v4193_v47, %v4097_v52 }
 0x9f2   :  { %v4188_v22 = vmul.f32 %v4184_v41, %v4108_v28  ;;  %v4201_v43 = vadd.f32 %v5078_v58, %v4197_v23 }
 0x9f4   :  { %v4192_v42 = vadd.f32 1.0, %v4188_v22  ;;  %v4210_v7 = vrot.slane %v4201_v43, 4 }
 0x9f6   :  { %v4196_v27 = vmul.f32 %v4192_v42, %v4096_v14 }
 0x9f8   :  { %v4200_v60 = vadd.f32 %v5079_v56, %v4196_v27 }
 0x9fa   :  { %v4211_v17 = vsel %vm1635_vm12, %v4200_v60, %v4210_v7 }
 0x9fb   :  { %4819 = vst [vmem:[%s7323_s14 + $0x8] sm:$0xff] %v4211_v17 }

</bundles_post_ra>
